<compile_context>
chip_gen: v6e
topology: v6e:2x2x1
jax: 0.10.0
libtpu: 0.0.40
codegen_flags: <defaults>
</compile_context>

<pallas_src>
import jax
import jax.numpy as jnp
from jax import lax
from jax.experimental import pallas as pl
from jax.experimental.pallas import tpu as pltpu

K_FEAT = 4096   # in_features
N_FEAT = 4096   # out_features


def linear_add_kernel(x_ref, w_ref, y_ref, o_ref):
    # x_ref: (M, K)   full K, resident across the whole grid
    # w_ref: (tn, K)  native PyTorch (out, in) layout tile
    # y_ref: (M, tn)
    # o_ref: (M, tn)
    acc = lax.dot_general(
        x_ref[...],
        w_ref[...],
        dimension_numbers=(((1,), (1,)), ((), ())),   # contract K with K
        preferred_element_type=jnp.float32,
    )
    o_ref[...] = (acc + y_ref[...].astype(jnp.float32)).astype(o_ref.dtype)


def linear_add(x, weight, y, *, tn=512):
    """x: (M, K), weight: (N, K) [PyTorch nn.Linear layout], y: (M, N) -> (M, N)."""
    M, K = x.shape
    N = weight.shape[0]
    assert weight.shape == (N, K) and y.shape == (M, N)
    assert N % tn == 0

    grid = (N // tn,)

    cost = pl.CostEstimate(
        flops=2 * M * K * N,
        bytes_accessed=(K * N + M * K + 2 * M * N) * x.dtype.itemsize,
        transcendentals=0,
    )

    return pl.pallas_call(
        linear_add_kernel,
        out_shape=jax.ShapeDtypeStruct((M, N), x.dtype),
        grid_spec=pltpu.PrefetchScalarGridSpec(
            num_scalar_prefetch=0,
            grid=grid,
            in_specs=[
                pl.BlockSpec((M, K), lambda j: (0, 0)),    # x: full, resident
                pl.BlockSpec((tn, K), lambda j: (j, 0)),   # w: native (N, K)
                pl.BlockSpec((M, tn), lambda j: (0, j)),   # y
            ],
            out_specs=pl.BlockSpec((M, tn), lambda j: (0, j)),
        ),
        compiler_params=pltpu.CompilerParams(
            dimension_semantics=("parallel",),
            # 2 x 8 MiB weight buffers + small x/y/out buffers; raise above the
            # v5e 16 MiB / v6e 32 MiB default scoped limits, well under v7x's
            # 64 MiB physical VMEM.
            vmem_limit_bytes=40 * 1024 * 1024,
        ),
        cost_estimate=cost,
    )(x, weight, y)


if __name__ == "__main__":
    key = jax.random.PRNGKey(0)
    kx, ky, kw = jax.random.split(key, 3)

    M = 8  # small batch of rows (sublane-aligned for f32)
    x = jax.random.normal(kx, (M, K_FEAT), dtype=jnp.float32)
    y = jax.random.normal(ky, (M, N_FEAT), dtype=jnp.float32)
    # Deterministic synthetic weight in PyTorch nn.Linear layout (out, in),
    # scaled roughly like kaiming-uniform.
    bound = 1.0 / (K_FEAT ** 0.5)
    weight = jax.random.uniform(
        kw, (N_FEAT, K_FEAT), dtype=jnp.float32, minval=-bound, maxval=bound
    )

    out = linear_add(x, weight, y)
    out = jax.block_until_ready(out)

    # Correctness check against plain JAX reference.
    ref = x @ weight.T + y
    assert out.shape == (M, N_FEAT)
    assert jnp.allclose(out, ref, atol=1e-3, rtol=1e-3)

    print("KERNEL_OK")
</pallas_src>

<mosaic_0001>
module attributes {stable_mosaic.version = 11 : i64} {
  func.func @linear_add_kernel(%arg0: i32, %arg1: memref<8x4096xf32, #tpu.memory_space<vmem>>, %arg2: memref<512x4096xf32, #tpu.memory_space<vmem>>, %arg3: memref<8x512xf32, #tpu.memory_space<vmem>>, %arg4: memref<8x512xf32, #tpu.memory_space<vmem>>) attributes {dimension_semantics = [#tpu.dimension_semantics<parallel>], iteration_bounds = array<i64: 8>, scalar_prefetch = 0 : i64, scratch_operands = 0 : i64, tpu.core_type = #tpu.core_type<tc>, window_params = [{pipeline_mode = #tpu.pipeline_mode<synchronous>, transform_indices = @transform_0, window_bounds = array<i64: 8, 4096>}, {transform_indices = @transform_1, window_bounds = array<i64: 512, 4096>}, {transform_indices = @transform_2, window_bounds = array<i64: 8, 512>}, {transform_indices = @transform_3, window_bounds = array<i64: 8, 512>}]} {
    %c0 = arith.constant 0 : index
    %c0_0 = arith.constant 0 : index
    %0 = vector.load %arg1[%c0, %c0_0] : memref<8x4096xf32, #tpu.memory_space<vmem>>, vector<8x4096xf32>
    %c0_1 = arith.constant 0 : index
    %c0_2 = arith.constant 0 : index
    %1 = vector.load %arg2[%c0_1, %c0_2] : memref<512x4096xf32, #tpu.memory_space<vmem>>, vector<512x4096xf32>
    %cst = arith.constant dense<0.000000e+00> : vector<8x512xf32>
    %2 = tpu.matmul %0, %1, %cst {dimension_numbers = #tpu.dot_dimension_numbers<[1], [1], [0], [0], [0, 0, 1, 0], [], []>} : vector<8x4096xf32>, vector<512x4096xf32>, vector<8x512xf32> -> vector<8x512xf32>
    %c0_3 = arith.constant 0 : index
    %c0_4 = arith.constant 0 : index
    %3 = vector.load %arg3[%c0_3, %c0_4] : memref<8x512xf32, #tpu.memory_space<vmem>>, vector<8x512xf32>
    %4 = arith.addf %2, %3 : vector<8x512xf32>
    %c0_5 = arith.constant 0 : index
    %c0_6 = arith.constant 0 : index
    %5 = vector.load %arg4[%c0_5, %c0_6] : memref<8x512xf32, #tpu.memory_space<vmem>>, vector<8x512xf32>
    tpu.vector_store %arg4[%c0_5, %c0_6], %4 {strides = array<i32>} : memref<8x512xf32, #tpu.memory_space<vmem>>, vector<8x512xf32>,
    return
  }
  func.func @transform_0(%arg0: i32) -> (i32, i32) {
    %c0_i32 = arith.constant 0 : i32
    %c0_i32_0 = arith.constant 0 : i32
    %c0_i32_1 = arith.constant 0 : i32
    return %c0_i32, %c0_i32_0 : i32, i32
  }
  func.func @transform_1(%arg0: i32) -> (i32, i32) {
    %c0_i32 = arith.constant 0 : i32
    %c0_i32_0 = arith.constant 0 : i32
    return %arg0, %c0_i32 : i32, i32
  }
  func.func @transform_2(%arg0: i32) -> (i32, i32) {
    %c0_i32 = arith.constant 0 : i32
    %c0_i32_0 = arith.constant 0 : i32
    return %c0_i32, %arg0 : i32, i32
  }
  func.func @transform_3(%arg0: i32) -> (i32, i32) {
    %c0_i32 = arith.constant 0 : i32
    %c0_i32_0 = arith.constant 0 : i32
    return %c0_i32, %arg0 : i32, i32
  }
}

</mosaic_0001>

<bundles_post_ra>
// kernel: tpu_custom_call.1
= control target key start
LH: loop header
LB: loop body
LE: loop exit
PB: predicated region body
PF: predicated region fallthrough
CT: control target
= control target key end

     0   :  { %8 = vsyncpa [#allocation3], 0  ;;  %s7293_s0 = inlined_call_operand.hbm [shape: f32[8,4096], index: 0, kind: input, shape index: {}]   ;;  %s7294_s1 = inlined_call_operand.hbm [shape: f32[4096,4096], index: 1, kind: input, shape index: {}]   ;;  %s7295_s2 = inlined_call_operand.hbm [shape: f32[8,4096], index: 2, kind: input, shape index: {}]   ;;  %s7296_s3 = inlined_call_operand.hbm [shape: f32[8,4096], index: 3, kind: output, shape index: {}]  }
   0x1   :  { %9 = vsyncpa [#allocation6], 0 }
   0x2   :  { %11 = vsyncpa [#allocation6 + $0x1], 0 }
   0x3   :  { %12 = vsyncpa [#allocation4], 0 }
   0x4   :  { %14 = vsyncpa [#allocation4 + $0x1], 0  ;;  %s5017_s12 = smov 0   ;;  %s5019_s13 = smov 0  }
   0x5   :  { %s5021_s14 = smov 0   ;;  %s5023_s15 = smov 0  }
   0x6 LB: > { %s5038_s16 = sadd.s32 1, %s4989_s15   ;;  %s48_s17 = sadd.s32 1, %s4985_s14  ;;  %s4989_s15 = sphi %s5023_s15, %s7318_s15   ;;  %s4985_s14 = sphi %s5021_s14, %s7317_s14   ;;  %s4981_s13 = sphi %s5019_s13, %s7316_s13   ;;  %s4977_s12 = sphi %s5017_s12, %s7315_s12  }
   0x7   : > { %s45_s18 = ssub.s32 %s4989_s15, %s5038_s16  ;;  %p55_p0 = scmp.ne.s32.totalorder %s4985_s14, %s4981_s13 }
   0x8   : > { %p46_p1 = scmp.eq.s32.totalorder %s45_s18, 0  ;;  %p56_p2 = scmp.eq.s32.totalorder %s4989_s15, 0 }
   0x9   : > { %p4769_p3 = scmp.lt.s32.totalorder %s4989_s15, 8  ;;  %s148_s20 = sand.u32 1, %s4989_s15  }
   0xa   : > { %s5048_s19 = scalar_select %p46_p1, %s4985_s14, %s48_s17  }
   0xb   : > { %p57_p4 = por %p56_p2, %p55_p0  ;;  %s150_s21 = sand.u32 1, %s4985_s14  }
   0xc   : > { %s4722_s22 = sshll.u32 %s150_s21, 14  ;;  %s4740_s23 = sshll.u32 %s4989_s15, 18 }
   0xd   : > { %s5061_s26 = scalar_lea.hbm %s7294_s1, %s4740_s23  ;;  %s152_s27 = scalar_lea.vmem [#allocation5], %s4722_s22 }
   0xe   : > { %s160_s28 = sshll.u32 %s152_s27, 4  ;;  %p5063_p5 = pnand %p4769_p3, %p57_p4  ;;  %s5067_s28 = int_to_ptr.vmem [resolvable:$true] %s160_s28 }
   0xf   : > { %s5069_s30 = scalar_lea.sflag [#allocation6], %s148_s20  ;;  %s4839_s4 = scalar_lea.hbm %s5061_s26, 262144 }
  0x10   : > { %p4840_p6 = scmp.ne.s32.totalorder %s5061_s26, %s4839_s4  ;;  %p4841_p7 = pneg %p5063_p5 }
  0x11   : > { %s4844_s7 = scalar_lea.hbm %s7294_s1, 2097152  ;;  %p4845_p10 = scmp.lt.s32.totalorder %s5061_s26, %s7294_s1 }
  0x12   : > { %p4842_p8 = pnand %p4841_p7, %p4840_p6  ;;  %p4846_p11 = scmp.lt.s32.totalorder %s4844_s7, %s4839_s4 }
  0x14   : > { %p4843_p9 = pneg %p4842_p8  ;;  %p4847_p12 = por %p4846_p11, %p4845_p10 }
  0x16   : > { %p4848_p13 = pnand %p4847_p12, %p4843_p9 }
  0x18   : > { %4851 = shalt.err (!%p4848_p13)
}
  0x19   : > { %s4852_s10 = scalar_lea.vmem %s5067_s28, 262144  ;;  %s4991_s11 = smov [#allocation5]  }
  0x1a   : > { %p4853_p1 = scmp.ne.s32.totalorder %s5067_s28, %s4852_s10  ;;  %s4857_s17 = sshll.u32 %s4991_s11, 4  ;;  %s4858_s17 = int_to_ptr.vmem [resolvable:$false] %s4857_s17 }
  0x1b   : > { %s4859_s18 = scalar_lea.vmem %s4858_s17, 524288  ;;  %p4860_p4 = scmp.lt.s32.totalorder %s5067_s28, %s4858_s17 }
  0x1c   : > { %p4855_p2 = pnand %p4853_p1, %p4841_p7  ;;  %p4861_p6 = scmp.lt.s32.totalorder %s4859_s18, %s4852_s10 }
  0x1e   : > { %p4856_p3 = pneg %p4855_p2  ;;  %p4862_p8 = por %p4861_p6, %p4860_p4 }
  0x20   : > { %p4863_p10 = pnand %p4862_p8, %p4856_p3 }
  0x22   : > { %4866 = shalt.err (!%p4863_p10)
}
  0x23   : > { %s4992_s20 = smov 4096   ;;  %s4993_s22 = smov 256  }
  0x24   : > { %4760 = dma.hbm_to_vmem [thread:$0]  (!%p5063_p5), %s5061_s26, 262144, %s5067_s28, %s5069_s30, %s4992_s20, %s4992_s20, %s4993_s22  }
  0x25   : > { %s5097_s23 = sadd.s32 4294967295, %s4989_s15   ;;  %s4718_s24 = sadd.s32 4294967294, %s4989_s15  }
  0x26   : > { %p61_p9 = scmp.ne.s32.totalorder %s4981_s13, %s4977_s12  ;;  %p7297_p11 = scmp.eq.s32.totalorder %s5097_s23, 0 }
  0x27   : > { %p111_p12 = scmp.eq.s32.totalorder %s5097_s23, 7  ;;  %p117_p13 = scmp.eq.s32.totalorder %s4718_s24, 7 }
  0x28   : > { %p5106_p1 = por %p7297_p11, %p61_p9  ;;  %p4719_p2 = scmp.ge.s32.totalorder %s4989_s15, 1 }
  0x29   : > { %p5114_p3 = por %p111_p12, %p55_p0  ;;  %p5118_p4 = por %p117_p13, %p61_p9 }
  0x2a   : > { %s7303_s25 = scalar_select %p5106_p1, 1, 0 }
  0x2b   : > { %s7304_s26 = scalar_select %p5114_p3, 1, 0 }
  0x2c   : > { %s7305_s27 = scalar_select %p5118_p4, 1, 0 }
  0x2d   : > { %p124_p6 = scmp.lt.s32.totalorder %s4989_s15, 9  ;;  %s4726_s28 = sshll.u32 %s150_s21, 5 }
  0x2e   : > { %s4994_s5 = smov [#allocation2]   ;;  %s4741_s7 = sshll.u32 %s4989_s15, 9 }
  0x2f   : > { %p5125_p8 = pnand %p4719_p2, %p124_p6  ;;  %s137_s6 = sshll.u32 %s4994_s5, 4  ;;  %s5129_s6 = int_to_ptr.vmem [resolvable:$true] %s137_s6 }
  0x30   : > { %s5137_s10 = scalar_lea.hbm %s7295_s2, %s4741_s7  ;;  %s174_s21 = scalar_lea.vmem [#allocation7], %s4726_s28 }
  0x31   : > { %s7306_s4 = scalar_select %p5125_p8, 1, 0 }
  0x32   : > { %p4753_p0 = pneg %p5125_p8  ;;  %s182_s11 = sshll.u32 %s174_s21, 4  ;;  %s183_s11 = int_to_ptr.vmem [resolvable:$true] %s182_s11 }
  0x33   : > { %s4867_s18 = scalar_lea.hbm %s5137_s10, 512  ;;  %s4872_s24 = scalar_lea.hbm %s7295_s2, 4096 }
  0x34   : > { %p5141_p10 = pnand %p4753_p0, %p7297_p11  ;;  %p4868_p9 = scmp.ne.s32.totalorder %s5137_s10, %s4867_s18 }
  0x35   : > { %p4873_p2 = scmp.lt.s32.totalorder %s5137_s10, %s7295_s2  ;;  %p4874_p6 = scmp.lt.s32.totalorder %s4872_s24, %s4867_s18 }
  0x36   : > { %s7307_s17 = scalar_select %p5141_p10, 1, 0 }
  0x37   : > { %p4870_p12 = pnand %p4868_p9, %p4841_p7  ;;  %p4875_p0 = por %p4874_p6, %p4873_p2 }
  0x39   : > { %p4871_p13 = pneg %p4870_p12 }
  0x3b   : > { %p4876_p11 = pnand %p4875_p0, %p4871_p13 }
  0x3d   : > { %4879 = shalt.err (!%p4876_p11)
}
  0x3e   : > { %s4880_s28 = scalar_lea.vmem %s183_s11, 512  ;;  %s4995_s8 = smov [#allocation7]  }
  0x3f   : > { %p4881_p4 = scmp.ne.s32.totalorder %s183_s11, %s4880_s28  ;;  %s4885_s9 = sshll.u32 %s4995_s8, 4  ;;  %s4886_s9 = int_to_ptr.vmem [resolvable:$false] %s4885_s9 }
  0x40   : > { %s4887_s21 = scalar_lea.vmem %s4886_s9, 1024  ;;  %p4888_p12 = scmp.lt.s32.totalorder %s183_s11, %s4886_s9 }
  0x41   : > { %p4883_p3 = pnand %p4881_p4, %p4841_p7  ;;  %p4889_p1 = scmp.lt.s32.totalorder %s4887_s21, %s4880_s28 }
  0x43   : > { %p4884_p9 = pneg %p4883_p3  ;;  %p4890_p8 = por %p4889_p1, %p4888_p12 }
  0x45   : > { %p4891_p10 = pnand %p4890_p8, %p4884_p9 }
  0x47   : > { %4894 = shalt.err (!%p4891_p10)
}
  0x48   : > { %4763 = dma.hbm_to_vmem [thread:$0]  (!%p5063_p5), %s5137_s10, 512, %s183_s11, %s5069_s30  }
  0x49   : > { %p7308_p7 = scmp.ne.s32.totalorder %s7307_s17, 0  ;;  %s4906_s18 = scalar_lea.vmem %s5129_s6, 4096 }
  0x4a   : > { %p4907_p3 = scmp.ne.s32.totalorder %s5129_s6, %s4906_s18  ;;  %p4914_p2 = scmp.lt.s32.totalorder %s5129_s6, %s5129_s6 }
  0x4b   : > { %p4897_p11 = pneg %p7308_p7  ;;  %p4915_p1 = scmp.lt.s32.totalorder %s4906_s18, %s4906_s18 }
  0x4d   : > { %p4909_p4 = pnand %p4907_p3, %p4897_p11  ;;  %p4916_p8 = por %p4915_p1, %p4914_p2 }
  0x4f   : > { %p4910_p13 = pneg %p4909_p4 }
  0x51   : > { %p4917_p10 = pnand %p4916_p8, %p4910_p13 }
  0x53   : > { %4920 = shalt.err (!%p4917_p10)
}
  0x54   : > { %4756 = dma.hbm_to_vmem [thread:$0]  (!%p7308_p7), %s7293_s0, 4096, %s5129_s6, [#allocation3]  }
  0x55   : > { %p7309_p5 = scmp.ne.s32.totalorder %s7306_s4, 0 }
  0x56   : > { %p7310_p6 = scmp.eq.s32.totalorder (!%p7309_p5), %s5097_s23, 0 }
  0x57   : > { %191 = sbr.rel (%p7309_p5) target bundleno = 2359 (0x937), region = 32 }
  0x5c   : > { %4964 = dma.done.wait (%p7310_p6), [#allocation3], 4096   ;;  %p7311_p0 = pmov %p7310_p6 }
  0x5d   : > { %s197_s30 = sand.u32 1, %s5097_s23   ;;  %s5184_s10 = sand.u32 1, %s4981_s13  }
  0x5e   : > { %4966 = vsyncadd (%p7311_p0), [#allocation3], 4294963200  ;;  %s4731_s11 = sshll.u32 %s5184_s10, 14  ;;  %s198_s17 = scalar_lea.sflag [#allocation6], %s197_s30 }
  0x5f   : > { %s5187_s22 = scalar_lea.vmem [#allocation5], %s4731_s11  ;;  %p7312_p9 = scmp.ne.s32.totalorder %s7303_s25, 0 }
  0x61   : > { %4968 = dma.done.wait (%p7312_p9), %s198_s17, 262656  }
  0x62   : > { %4970 = vsyncadd (%p7312_p9), %s198_s17, 4294704640  ;;  %v754_v0 = vld [vmem:[%s5187_s22 + $0xf08] sm:$0xff]  ;;  %v756_v1 = vld [vmem:[%s5187_s22 + $0xf18] sm:$0xff]  ;;  %s4732_s25 = sshll.u32 %s5184_s10, 5  ;;  %s4742_s24 = sshll.u32 %s5097_s23, 9 }
  0x63   : > { %v753_v2 = vld [vmem:[%s5187_s22 + $0xf00] sm:$0xff]  ;;  %2325 = vmatprep.subr.mxu0 %v754_v0  ;;  %2396 = vmatprep.subr.mxu1 %v756_v1  ;;  %v755_v3 = vld [vmem:[%s5187_s22 + $0xf10] sm:$0xff]  ;;  %v722_v4 = vld [vmem:[%s5187_s22 + $0xe08] sm:$0xff]  ;;  %s6374_s4 = scalar_lea.vmem [#allocation7], %s4732_s25  ;;  %s6428_s6 = scalar_lea.vmem [#allocation8], %s4732_s25 }
  0x64   : > { %v724_v5 = vld [vmem:[%s5187_s22 + $0xe18] sm:$0xff]  ;;  %2326 = vmatpush1.xpose.msra.mxu0 %v753_v2  ;;  %2397 = vmatpush1.xpose.msra.mxu1 %v755_v3  ;;  %v721_v6 = vld [vmem:[%s5187_s22 + $0xe00] sm:$0xff]  ;;  %v723_v7 = vld [vmem:[%s5187_s22 + $0xe10] sm:$0xff]  ;;  %s4616_s5 = sshll.u32 %s6428_s6, 4  ;;  %s4614_s8 = scalar_lea.hbm %s7296_s3, %s4742_s24  ;;  %s4617_s5 = int_to_ptr.vmem [resolvable:$true] %s4616_s5 }
  0x65   : > { %2327 = vmatprep.subr.mxu0 %v722_v4  ;;  %2398 = vmatprep.subr.mxu1 %v724_v5  ;;  %v690_v8 = vld [vmem:[%s5187_s22 + $0xd08] sm:$0xff]  ;;  %v692_v9 = vld [vmem:[%s5187_s22 + $0xd18] sm:$0xff]  ;;  %v689_v10 = vld [vmem:[%s5187_s22 + $0xd00] sm:$0xff]  ;;  %s4602_s9 = scalar_lea.sflag [#allocation4], %s5184_s10  ;;  %s4921_s21 = scalar_lea.vmem %s4617_s5, 512 }
  0x66   : > { %v691_v11 = vld [vmem:[%s5187_s22 + $0xd10] sm:$0xff]  ;;  %v658_v12 = vld [vmem:[%s5187_s22 + $0xc08] sm:$0xff]  ;;  %v660_v13 = vld [vmem:[%s5187_s22 + $0xc18] sm:$0xff]  ;;  %p4922_p12 = scmp.ne.s32.totalorder %s4617_s5, %s4921_s21  ;;  %p7313_p7 = scmp.ne.s32.totalorder %s7304_s26, 0 }
  0x67   : > { %v657_v14 = vld [vmem:[%s5187_s22 + $0xc00] sm:$0xff]  ;;  %v659_v15 = vld [vmem:[%s5187_s22 + $0xc10] sm:$0xff]  ;;  %v626_v16 = vld [vmem:[%s5187_s22 + $0xb08] sm:$0xff]  ;;  %s4996_s18 = smov [#allocation8]  }
  0x68   : > { %2328 = vmatpush1.xpose.msra.mxu0 %v721_v6  ;;  %2399 = vmatpush1.xpose.msra.mxu1 %v723_v7  ;;  %v628_v17 = vld [vmem:[%s5187_s22 + $0xb18] sm:$0xff]  ;;  %v625_v18 = vld [vmem:[%s5187_s22 + $0xb00] sm:$0xff]  ;;  %v627_v19 = vld [vmem:[%s5187_s22 + $0xb10] sm:$0xff]  ;;  %p4923_p11 = pnand %p4922_p12, %p7313_p7  ;;  %s4925_s23 = sshll.u32 %s4996_s18, 4  ;;  %s4926_s23 = int_to_ptr.vmem [resolvable:$false] %s4925_s23 }
  0x69   : > { %2329 = vmatprep.subr.mxu0 %v690_v8  ;;  %2400 = vmatprep.subr.mxu1 %v692_v9  ;;  %v594_v20 = vld [vmem:[%s5187_s22 + $0xa08] sm:$0xff]  ;;  %v596_v21 = vld [vmem:[%s5187_s22 + $0xa18] sm:$0xff]  ;;  %v593_v22 = vld [vmem:[%s5187_s22 + $0xa00] sm:$0xff]  ;;  %s4927_s29 = scalar_lea.vmem %s4926_s23, 1024  ;;  %p4928_p4 = scmp.lt.s32.totalorder %s4617_s5, %s4926_s23 }
  0x6a   : > { %v595_v23 = vld [vmem:[%s5187_s22 + $0xa10] sm:$0xff]  ;;  %v562_v24 = vld [vmem:[%s5187_s22 + $0x908] sm:$0xff]  ;;  %v564_v25 = vld [vmem:[%s5187_s22 + $0x918] sm:$0xff]  ;;  %p4924_p3 = pneg %p4923_p11  ;;  %p4929_p13 = scmp.lt.s32.totalorder %s4927_s29, %s4921_s21 }
  0x6b   : > { %v561_v26 = vld [vmem:[%s5187_s22 + $0x900] sm:$0xff]  ;;  %v563_v27 = vld [vmem:[%s5187_s22 + $0x910] sm:$0xff]  ;;  %v530_v28 = vld [vmem:[%s5187_s22 + $0x808] sm:$0xff] }
  0x6c   : > { %2330 = vmatpush1.xpose.msra.mxu0 %v689_v10  ;;  %2401 = vmatpush1.xpose.msra.mxu1 %v691_v11  ;;  %v532_v29 = vld [vmem:[%s5187_s22 + $0x818] sm:$0xff]  ;;  %v529_v30 = vld [vmem:[%s5187_s22 + $0x800] sm:$0xff]  ;;  %v531_v31 = vld [vmem:[%s5187_s22 + $0x810] sm:$0xff]  ;;  %p4930_p2 = por %p4929_p13, %p4928_p4 }
  0x6d   : > { %2331 = vmatprep.subr.mxu0 %v658_v12  ;;  %2402 = vmatprep.subr.mxu1 %v660_v13  ;;  %v498_v32 = vld [vmem:[%s5187_s22 + $0x708] sm:$0xff]  ;;  %v500_v33 = vld [vmem:[%s5187_s22 + $0x718] sm:$0xff]  ;;  %v497_v34 = vld [vmem:[%s5187_s22 + $0x700] sm:$0xff] }
  0x6e   : > { %v499_v35 = vld [vmem:[%s5187_s22 + $0x710] sm:$0xff]  ;;  %v466_v36 = vld [vmem:[%s5187_s22 + $0x608] sm:$0xff]  ;;  %v468_v37 = vld [vmem:[%s5187_s22 + $0x618] sm:$0xff]  ;;  %p4931_p1 = pnand %p4930_p2, %p4924_p3 }
  0x6f   : > { %v465_v38 = vld [vmem:[%s5187_s22 + $0x600] sm:$0xff]  ;;  %v467_v39 = vld [vmem:[%s5187_s22 + $0x610] sm:$0xff]  ;;  %v434_v40 = vld [vmem:[%s5187_s22 + $0x508] sm:$0xff] }
  0x70   : > { %2332 = vmatpush1.xpose.msra.mxu0 %v657_v14  ;;  %2403 = vmatpush1.xpose.msra.mxu1 %v659_v15  ;;  %v436_v41 = vld [vmem:[%s5187_s22 + $0x518] sm:$0xff]  ;;  %v433_v42 = vld [vmem:[%s5187_s22 + $0x500] sm:$0xff]  ;;  %v435_v43 = vld [vmem:[%s5187_s22 + $0x510] sm:$0xff] }
  0x71   : > { %2333 = vmatprep.subr.mxu0 %v626_v16  ;;  %2404 = vmatprep.subr.mxu1 %v628_v17  ;;  %v402_v44 = vld [vmem:[%s5187_s22 + $0x408] sm:$0xff]  ;;  %v404_v45 = vld [vmem:[%s5187_s22 + $0x418] sm:$0xff]  ;;  %v401_v47 = vld [vmem:[%s5187_s22 + $0x400] sm:$0xff] }
  0x72   : > { %v242_v46 = vld [vmem:[#allocation2 + $0x8] sm:$0xff]  ;;  %v403_v48 = vld [vmem:[%s5187_s22 + $0x410] sm:$0xff]  ;;  %v244_v49 = vld [vmem:[#allocation2 + $0x18] sm:$0xff] }
  0x73   : > { %v370_v50 = vld [vmem:[%s5187_s22 + $0x308] sm:$0xff]  ;;  %v372_v51 = vld [vmem:[%s5187_s22 + $0x318] sm:$0xff]  ;;  %2389 = vmatprep.mubr.f32.mxu0 %v242_v46  ;;  %2460 = vmatprep.mubr.f32.mxu1 %v244_v49  ;;  %v369_v52 = vld [vmem:[%s5187_s22 + $0x300] sm:$0xff] }
  0x74   : > { %2334 = vmatpush1.xpose.msra.mxu0 %v625_v18  ;;  %2405 = vmatpush1.xpose.msra.mxu1 %v627_v19  ;;  %v371_v53 = vld [vmem:[%s5187_s22 + $0x310] sm:$0xff]  ;;  %v338_v54 = vld [vmem:[%s5187_s22 + $0x208] sm:$0xff]  ;;  %v340_v55 = vld [vmem:[%s5187_s22 + $0x218] sm:$0xff] }
  0x75   : > { %2335 = vmatprep.subr.mxu0 %v594_v20  ;;  %2406 = vmatprep.subr.mxu1 %v596_v21  ;;  %v337_v56 = vld [vmem:[%s5187_s22 + $0x200] sm:$0xff]  ;;  %v339_v57 = vld [vmem:[%s5187_s22 + $0x210] sm:$0xff]  ;;  %v306_v58 = vld [vmem:[%s5187_s22 + $0x108] sm:$0xff] }
  0x76   : > { %v308_v59 = vld [vmem:[%s5187_s22 + $0x118] sm:$0xff]  ;;  %v305_v60 = vld [vmem:[%s5187_s22 + $0x100] sm:$0xff]  ;;  %v307_v61 = vld [vmem:[%s5187_s22 + $0x110] sm:$0xff] }
  0x77   : > { %v274_v62 = vld [vmem:[%s5187_s22 + $0x8] sm:$0xff]  ;;  %v276_v63 = vld [vmem:[%s5187_s22 + $0x18] sm:$0xff]  ;;  %v273_v0 = vld [vmem:[%s5187_s22] sm:$0xff] }
  0x78   : > { %2336 = vmatpush1.xpose.msra.mxu0 %v593_v22  ;;  %2407 = vmatpush1.xpose.msra.mxu1 %v595_v23  ;;  %v275_v1 = vld [vmem:[%s5187_s22 + $0x10] sm:$0xff]  ;;  %v1266_v2 = vld [vmem:[%s5187_s22 + $0x1f08] sm:$0xff]  ;;  %v1268_v3 = vld [vmem:[%s5187_s22 + $0x1f18] sm:$0xff] }
  0x79   : > { %2337 = vmatprep.subr.mxu0 %v562_v24  ;;  %2408 = vmatprep.subr.mxu1 %v564_v25  ;;  %v1265_v4 = vld [vmem:[%s5187_s22 + $0x1f00] sm:$0xff]  ;;  %v1267_v5 = vld [vmem:[%s5187_s22 + $0x1f10] sm:$0xff]  ;;  %v1234_v6 = vld [vmem:[%s5187_s22 + $0x1e08] sm:$0xff] }
  0x7a   : > { %v1236_v7 = vld [vmem:[%s5187_s22 + $0x1e18] sm:$0xff]  ;;  %v1233_v8 = vld [vmem:[%s5187_s22 + $0x1e00] sm:$0xff]  ;;  %v1235_v9 = vld [vmem:[%s5187_s22 + $0x1e10] sm:$0xff] }
  0x7b   : > { %v1202_v10 = vld [vmem:[%s5187_s22 + $0x1d08] sm:$0xff]  ;;  %v1204_v11 = vld [vmem:[%s5187_s22 + $0x1d18] sm:$0xff]  ;;  %v1201_v12 = vld [vmem:[%s5187_s22 + $0x1d00] sm:$0xff] }
  0x7c   : > { %2338 = vmatpush1.xpose.msra.mxu0 %v561_v26  ;;  %2409 = vmatpush1.xpose.msra.mxu1 %v563_v27  ;;  %v1203_v13 = vld [vmem:[%s5187_s22 + $0x1d10] sm:$0xff]  ;;  %v1170_v14 = vld [vmem:[%s5187_s22 + $0x1c08] sm:$0xff]  ;;  %v1172_v15 = vld [vmem:[%s5187_s22 + $0x1c18] sm:$0xff] }
  0x7d   : > { %2339 = vmatprep.subr.mxu0 %v530_v28  ;;  %2410 = vmatprep.subr.mxu1 %v532_v29  ;;  %v1169_v16 = vld [vmem:[%s5187_s22 + $0x1c00] sm:$0xff]  ;;  %v1171_v17 = vld [vmem:[%s5187_s22 + $0x1c10] sm:$0xff]  ;;  %v1138_v18 = vld [vmem:[%s5187_s22 + $0x1b08] sm:$0xff] }
  0x7e   : > { %v1140_v19 = vld [vmem:[%s5187_s22 + $0x1b18] sm:$0xff]  ;;  %v1137_v20 = vld [vmem:[%s5187_s22 + $0x1b00] sm:$0xff]  ;;  %v1139_v21 = vld [vmem:[%s5187_s22 + $0x1b10] sm:$0xff] }
  0x7f   : > { %v1106_v22 = vld [vmem:[%s5187_s22 + $0x1a08] sm:$0xff]  ;;  %v1108_v23 = vld [vmem:[%s5187_s22 + $0x1a18] sm:$0xff]  ;;  %v1105_v24 = vld [vmem:[%s5187_s22 + $0x1a00] sm:$0xff] }
  0x80   : > { %2340 = vmatpush1.xpose.msra.mxu0 %v529_v30  ;;  %2411 = vmatpush1.xpose.msra.mxu1 %v531_v31  ;;  %v1107_v25 = vld [vmem:[%s5187_s22 + $0x1a10] sm:$0xff]  ;;  %v1074_v26 = vld [vmem:[%s5187_s22 + $0x1908] sm:$0xff]  ;;  %v1076_v27 = vld [vmem:[%s5187_s22 + $0x1918] sm:$0xff] }
  0x81   : > { %2341 = vmatprep.subr.mxu0 %v498_v32  ;;  %2412 = vmatprep.subr.mxu1 %v500_v33  ;;  %v1073_v28 = vld [vmem:[%s5187_s22 + $0x1900] sm:$0xff]  ;;  %v1075_v29 = vld [vmem:[%s5187_s22 + $0x1910] sm:$0xff]  ;;  %v1042_v30 = vld [vmem:[%s5187_s22 + $0x1808] sm:$0xff] }
  0x82   : > { %v1044_v31 = vld [vmem:[%s5187_s22 + $0x1818] sm:$0xff]  ;;  %v1041_v32 = vld [vmem:[%s5187_s22 + $0x1800] sm:$0xff]  ;;  %v1043_v33 = vld [vmem:[%s5187_s22 + $0x1810] sm:$0xff] }
  0x83   : > { %v914_v46 = vld [vmem:[%s5187_s22 + $0x1408] sm:$0xff]  ;;  %v915_v49 = vld [vmem:[%s5187_s22 + $0x1410] sm:$0xff] }
  0x84   : > { %2342 = vmatpush1.xpose.msra.mxu0 %v497_v34  ;;  %2413 = vmatpush1.xpose.msra.mxu1 %v499_v35  ;;  %v1010_v34 = vld [vmem:[%s5187_s22 + $0x1708] sm:$0xff]  ;;  %v1012_v35 = vld [vmem:[%s5187_s22 + $0x1718] sm:$0xff] }
  0x85   : > { %2343 = vmatprep.subr.mxu0 %v466_v36  ;;  %2414 = vmatprep.subr.mxu1 %v468_v37  ;;  %v1009_v36 = vld [vmem:[%s5187_s22 + $0x1700] sm:$0xff]  ;;  %v1011_v37 = vld [vmem:[%s5187_s22 + $0x1710] sm:$0xff] }
  0x88   : > { %2344 = vmatpush1.xpose.msra.mxu0 %v465_v38  ;;  %2415 = vmatpush1.xpose.msra.mxu1 %v467_v39  ;;  %v978_v38 = vld [vmem:[%s5187_s22 + $0x1608] sm:$0xff]  ;;  %v980_v39 = vld [vmem:[%s5187_s22 + $0x1618] sm:$0xff] }
  0x89   : > { %2345 = vmatprep.subr.mxu0 %v434_v40  ;;  %2416 = vmatprep.subr.mxu1 %v436_v41  ;;  %v977_v40 = vld [vmem:[%s5187_s22 + $0x1600] sm:$0xff]  ;;  %v979_v41 = vld [vmem:[%s5187_s22 + $0x1610] sm:$0xff] }
  0x8c   : > { %2346 = vmatpush1.xpose.msra.mxu0 %v433_v42  ;;  %2417 = vmatpush1.xpose.msra.mxu1 %v435_v43  ;;  %v946_v42 = vld [vmem:[%s5187_s22 + $0x1508] sm:$0xff]  ;;  %v948_v43 = vld [vmem:[%s5187_s22 + $0x1518] sm:$0xff] }
  0x8d   : > { %2347 = vmatprep.subr.mxu0 %v402_v44  ;;  %2418 = vmatprep.subr.mxu1 %v404_v45  ;;  %v945_v44 = vld [vmem:[%s5187_s22 + $0x1500] sm:$0xff]  ;;  %v947_v45 = vld [vmem:[%s5187_s22 + $0x1510] sm:$0xff] }
  0x90   : > { %2348 = vmatpush1.xpose.msra.mxu0 %v401_v47  ;;  %2419 = vmatpush1.xpose.msra.mxu1 %v403_v48  ;;  %v916_v47 = vld [vmem:[%s5187_s22 + $0x1418] sm:$0xff]  ;;  %v913_v48 = vld [vmem:[%s5187_s22 + $0x1400] sm:$0xff] }
  0x91   : > { %2349 = vmatprep.subr.mxu0 %v370_v50  ;;  %2420 = vmatprep.subr.mxu1 %v372_v51  ;;  %v882_v50 = vld [vmem:[%s5187_s22 + $0x1308] sm:$0xff]  ;;  %v884_v51 = vld [vmem:[%s5187_s22 + $0x1318] sm:$0xff] }
  0x94   : > { %2350 = vmatpush1.xpose.msra.mxu0 %v369_v52  ;;  %2421 = vmatpush1.xpose.msra.mxu1 %v371_v53  ;;  %v881_v52 = vld [vmem:[%s5187_s22 + $0x1300] sm:$0xff]  ;;  %v883_v53 = vld [vmem:[%s5187_s22 + $0x1310] sm:$0xff] }
  0x95   : > { %2351 = vmatprep.subr.mxu0 %v338_v54  ;;  %2422 = vmatprep.subr.mxu1 %v340_v55  ;;  %v850_v54 = vld [vmem:[%s5187_s22 + $0x1208] sm:$0xff]  ;;  %v852_v55 = vld [vmem:[%s5187_s22 + $0x1218] sm:$0xff] }
  0x98   : > { %2352 = vmatpush1.xpose.msra.mxu0 %v337_v56  ;;  %2423 = vmatpush1.xpose.msra.mxu1 %v339_v57  ;;  %v849_v56 = vld [vmem:[%s5187_s22 + $0x1200] sm:$0xff]  ;;  %v851_v57 = vld [vmem:[%s5187_s22 + $0x1210] sm:$0xff] }
  0x99   : > { %2353 = vmatprep.subr.mxu0 %v306_v58  ;;  %2424 = vmatprep.subr.mxu1 %v308_v59  ;;  %v818_v58 = vld [vmem:[%s5187_s22 + $0x1108] sm:$0xff]  ;;  %v820_v59 = vld [vmem:[%s5187_s22 + $0x1118] sm:$0xff] }
  0x9c   : > { %2354 = vmatpush1.xpose.msra.mxu0 %v305_v60  ;;  %2425 = vmatpush1.xpose.msra.mxu1 %v307_v61  ;;  %v817_v60 = vld [vmem:[%s5187_s22 + $0x1100] sm:$0xff]  ;;  %v819_v61 = vld [vmem:[%s5187_s22 + $0x1110] sm:$0xff] }
  0x9d   : > { %2355 = vmatprep.subr.mxu0 %v274_v62  ;;  %2426 = vmatprep.subr.mxu1 %v276_v63  ;;  %v786_v62 = vld [vmem:[%s5187_s22 + $0x1008] sm:$0xff]  ;;  %v788_v63 = vld [vmem:[%s5187_s22 + $0x1018] sm:$0xff] }
  0xa0   : > { %2356 = vmatpush1.xpose.msra.mxu0 %v273_v0  ;;  %2427 = vmatpush1.xpose.msra.mxu1 %v275_v1  ;;  %v785_v0 = vld [vmem:[%s5187_s22 + $0x1000] sm:$0xff]  ;;  %v787_v1 = vld [vmem:[%s5187_s22 + $0x1010] sm:$0xff] }
  0xa1   : > { %2357 = vmatprep.subr.mxu0 %v1266_v2  ;;  %2428 = vmatprep.subr.mxu1 %v1268_v3  ;;  %v758_v2 = vld [vmem:[%s5187_s22 + $0xf28] sm:$0xff]  ;;  %v760_v3 = vld [vmem:[%s5187_s22 + $0xf38] sm:$0xff] }
  0xa4   : > { %2358 = vmatpush2.xpose.msra.mxu0 %v1265_v4  ;;  %2429 = vmatpush2.xpose.msra.mxu1 %v1267_v5  ;;  %v241_v4 = vld [vmem:[#allocation2] sm:$0xff]  ;;  %v243_v5 = vld [vmem:[#allocation2 + $0x10] sm:$0xff] }
  0xa5   : > { %2359 = vmatprep.subr.mxu0 %v1234_v6  ;;  %2430 = vmatprep.subr.mxu1 %v1236_v7  ;;  %v757_v6 = vld [vmem:[%s5187_s22 + $0xf20] sm:$0xff]  ;;  %v759_v7 = vld [vmem:[%s5187_s22 + $0xf30] sm:$0xff] }
  0xa8   : > { %2360 = vmatpush2.xpose.msra.mxu0 %v1233_v8  ;;  %2431 = vmatpush2.xpose.msra.mxu1 %v1235_v9  ;;  %v726_v8 = vld [vmem:[%s5187_s22 + $0xe28] sm:$0xff]  ;;  %v728_v9 = vld [vmem:[%s5187_s22 + $0xe38] sm:$0xff] }
  0xa9   : > { %2361 = vmatprep.subr.mxu0 %v1202_v10  ;;  %2432 = vmatprep.subr.mxu1 %v1204_v11  ;;  %v246_v10 = vld [vmem:[#allocation2 + $0x28] sm:$0xff]  ;;  %v248_v11 = vld [vmem:[#allocation2 + $0x38] sm:$0xff] }
  0xac   : > { %2362 = vmatpush2.xpose.msra.mxu0 %v1201_v12  ;;  %2433 = vmatpush2.xpose.msra.mxu1 %v1203_v13  ;;  %v725_v12 = vld [vmem:[%s5187_s22 + $0xe20] sm:$0xff]  ;;  %v727_v13 = vld [vmem:[%s5187_s22 + $0xe30] sm:$0xff] }
  0xad   : > { %2363 = vmatprep.subr.mxu0 %v1170_v14  ;;  %2434 = vmatprep.subr.mxu1 %v1172_v15  ;;  %v694_v14 = vld [vmem:[%s5187_s22 + $0xd28] sm:$0xff]  ;;  %v696_v15 = vld [vmem:[%s5187_s22 + $0xd38] sm:$0xff] }
  0xb0   : > { %2364 = vmatpush2.xpose.msra.mxu0 %v1169_v16  ;;  %2435 = vmatpush2.xpose.msra.mxu1 %v1171_v17  ;;  %v693_v16 = vld [vmem:[%s5187_s22 + $0xd20] sm:$0xff]  ;;  %v695_v17 = vld [vmem:[%s5187_s22 + $0xd30] sm:$0xff] }
  0xb1   : > { %2365 = vmatprep.subr.mxu0 %v1138_v18  ;;  %2436 = vmatprep.subr.mxu1 %v1140_v19  ;;  %v662_v18 = vld [vmem:[%s5187_s22 + $0xc28] sm:$0xff]  ;;  %v664_v19 = vld [vmem:[%s5187_s22 + $0xc38] sm:$0xff] }
  0xb4   : > { %2366 = vmatpush2.xpose.msra.mxu0 %v1137_v20  ;;  %2437 = vmatpush2.xpose.msra.mxu1 %v1139_v21  ;;  %v661_v20 = vld [vmem:[%s5187_s22 + $0xc20] sm:$0xff]  ;;  %v663_v21 = vld [vmem:[%s5187_s22 + $0xc30] sm:$0xff] }
  0xb5   : > { %2367 = vmatprep.subr.mxu0 %v1106_v22  ;;  %2438 = vmatprep.subr.mxu1 %v1108_v23  ;;  %v630_v22 = vld [vmem:[%s5187_s22 + $0xb28] sm:$0xff]  ;;  %v632_v23 = vld [vmem:[%s5187_s22 + $0xb38] sm:$0xff] }
  0xb8   : > { %2368 = vmatpush2.xpose.msra.mxu0 %v1105_v24  ;;  %2439 = vmatpush2.xpose.msra.mxu1 %v1107_v25  ;;  %v629_v24 = vld [vmem:[%s5187_s22 + $0xb20] sm:$0xff]  ;;  %v631_v25 = vld [vmem:[%s5187_s22 + $0xb30] sm:$0xff] }
  0xb9   : > { %2369 = vmatprep.subr.mxu0 %v1074_v26  ;;  %2440 = vmatprep.subr.mxu1 %v1076_v27  ;;  %v598_v26 = vld [vmem:[%s5187_s22 + $0xa28] sm:$0xff]  ;;  %v600_v27 = vld [vmem:[%s5187_s22 + $0xa38] sm:$0xff] }
  0xbc   : > { %2370 = vmatpush2.xpose.msra.mxu0 %v1073_v28  ;;  %2441 = vmatpush2.xpose.msra.mxu1 %v1075_v29  ;;  %v597_v28 = vld [vmem:[%s5187_s22 + $0xa20] sm:$0xff]  ;;  %v599_v29 = vld [vmem:[%s5187_s22 + $0xa30] sm:$0xff] }
  0xbd   : > { %2371 = vmatprep.subr.mxu0 %v1042_v30  ;;  %2442 = vmatprep.subr.mxu1 %v1044_v31  ;;  %v566_v30 = vld [vmem:[%s5187_s22 + $0x928] sm:$0xff]  ;;  %v568_v31 = vld [vmem:[%s5187_s22 + $0x938] sm:$0xff] }
  0xc0   : > { %2372 = vmatpush2.xpose.msra.mxu0 %v1041_v32  ;;  %2443 = vmatpush2.xpose.msra.mxu1 %v1043_v33  ;;  %v565_v32 = vld [vmem:[%s5187_s22 + $0x920] sm:$0xff]  ;;  %v567_v33 = vld [vmem:[%s5187_s22 + $0x930] sm:$0xff] }
  0xc1   : > { %2373 = vmatprep.subr.mxu0 %v1010_v34  ;;  %2444 = vmatprep.subr.mxu1 %v1012_v35  ;;  %v534_v34 = vld [vmem:[%s5187_s22 + $0x828] sm:$0xff]  ;;  %v536_v35 = vld [vmem:[%s5187_s22 + $0x838] sm:$0xff] }
  0xc4   : > { %2374 = vmatpush2.xpose.msra.mxu0 %v1009_v36  ;;  %2445 = vmatpush2.xpose.msra.mxu1 %v1011_v37  ;;  %v533_v36 = vld [vmem:[%s5187_s22 + $0x820] sm:$0xff]  ;;  %v535_v37 = vld [vmem:[%s5187_s22 + $0x830] sm:$0xff] }
  0xc5   : > { %2375 = vmatprep.subr.mxu0 %v978_v38  ;;  %2446 = vmatprep.subr.mxu1 %v980_v39  ;;  %v502_v38 = vld [vmem:[%s5187_s22 + $0x728] sm:$0xff]  ;;  %v504_v39 = vld [vmem:[%s5187_s22 + $0x738] sm:$0xff] }
  0xc8   : > { %2376 = vmatpush2.xpose.msra.mxu0 %v977_v40  ;;  %2447 = vmatpush2.xpose.msra.mxu1 %v979_v41  ;;  %v501_v40 = vld [vmem:[%s5187_s22 + $0x720] sm:$0xff]  ;;  %v503_v41 = vld [vmem:[%s5187_s22 + $0x730] sm:$0xff] }
  0xc9   : > { %2377 = vmatprep.subr.mxu0 %v946_v42  ;;  %2448 = vmatprep.subr.mxu1 %v948_v43  ;;  %v470_v42 = vld [vmem:[%s5187_s22 + $0x628] sm:$0xff]  ;;  %v472_v43 = vld [vmem:[%s5187_s22 + $0x638] sm:$0xff] }
  0xcc   : > { %2378 = vmatpush2.xpose.msra.mxu0 %v945_v44  ;;  %2449 = vmatpush2.xpose.msra.mxu1 %v947_v45  ;;  %v469_v44 = vld [vmem:[%s5187_s22 + $0x620] sm:$0xff]  ;;  %v471_v45 = vld [vmem:[%s5187_s22 + $0x630] sm:$0xff] }
  0xcd   : > { %2379 = vmatprep.subr.mxu0 %v914_v46  ;;  %2450 = vmatprep.subr.mxu1 %v916_v47  ;;  %v438_v46 = vld [vmem:[%s5187_s22 + $0x528] sm:$0xff]  ;;  %v440_v47 = vld [vmem:[%s5187_s22 + $0x538] sm:$0xff] }
  0xd0   : > { %2380 = vmatpush2.xpose.msra.mxu0 %v913_v48  ;;  %2451 = vmatpush2.xpose.msra.mxu1 %v915_v49  ;;  %v437_v48 = vld [vmem:[%s5187_s22 + $0x520] sm:$0xff]  ;;  %v439_v49 = vld [vmem:[%s5187_s22 + $0x530] sm:$0xff] }
  0xd1   : > { %2381 = vmatprep.subr.mxu0 %v882_v50  ;;  %2452 = vmatprep.subr.mxu1 %v884_v51  ;;  %v406_v50 = vld [vmem:[%s5187_s22 + $0x428] sm:$0xff]  ;;  %v408_v51 = vld [vmem:[%s5187_s22 + $0x438] sm:$0xff] }
  0xd4   : > { %2382 = vmatpush2.xpose.msra.mxu0 %v881_v52  ;;  %2453 = vmatpush2.xpose.msra.mxu1 %v883_v53  ;;  %v405_v52 = vld [vmem:[%s5187_s22 + $0x420] sm:$0xff]  ;;  %v407_v53 = vld [vmem:[%s5187_s22 + $0x430] sm:$0xff] }
  0xd5   : > { %2383 = vmatprep.subr.mxu0 %v850_v54  ;;  %2454 = vmatprep.subr.mxu1 %v852_v55  ;;  %v374_v54 = vld [vmem:[%s5187_s22 + $0x328] sm:$0xff]  ;;  %v376_v55 = vld [vmem:[%s5187_s22 + $0x338] sm:$0xff] }
  0xd8   : > { %2384 = vmatpush2.xpose.msra.mxu0 %v849_v56  ;;  %2455 = vmatpush2.xpose.msra.mxu1 %v851_v57  ;;  %v373_v56 = vld [vmem:[%s5187_s22 + $0x320] sm:$0xff]  ;;  %v375_v57 = vld [vmem:[%s5187_s22 + $0x330] sm:$0xff] }
  0xd9   : > { %2385 = vmatprep.subr.mxu0 %v818_v58  ;;  %2456 = vmatprep.subr.mxu1 %v820_v59  ;;  %v342_v58 = vld [vmem:[%s5187_s22 + $0x228] sm:$0xff]  ;;  %v344_v59 = vld [vmem:[%s5187_s22 + $0x238] sm:$0xff] }
  0xdc   : > { %2386 = vmatpush2.xpose.msra.mxu0 %v817_v60  ;;  %2457 = vmatpush2.xpose.msra.mxu1 %v819_v61  ;;  %v341_v60 = vld [vmem:[%s5187_s22 + $0x220] sm:$0xff]  ;;  %v343_v61 = vld [vmem:[%s5187_s22 + $0x230] sm:$0xff] }
  0xdd   : > { %2387 = vmatprep.subr.mxu0 %v786_v62  ;;  %2458 = vmatprep.subr.mxu1 %v788_v63  ;;  %v310_v62 = vld [vmem:[%s5187_s22 + $0x128] sm:$0xff]  ;;  %v312_v63 = vld [vmem:[%s5187_s22 + $0x138] sm:$0xff] }
  0xe0   : > { %2388 = vmatpush2.xpose.msra.mxu0 %v785_v0  ;;  %2459 = vmatpush2.xpose.msra.mxu1 %v787_v1  ;;  %v309_v0 = vld [vmem:[%s5187_s22 + $0x120] sm:$0xff]  ;;  %v311_v1 = vld [vmem:[%s5187_s22 + $0x130] sm:$0xff] }
  0xe1   : > { %2467 = vmatprep.subr.mxu0 %v758_v2  ;;  %2538 = vmatprep.subr.mxu1 %v760_v3  ;;  %v278_v2 = vld [vmem:[%s5187_s22 + $0x28] sm:$0xff]  ;;  %v280_v3 = vld [vmem:[%s5187_s22 + $0x38] sm:$0xff] }
  0xe3   : > { %2390 = vmatmul.mubr.f32.vlgmr.msra.gmra.mxu0 %v241_v4  ;;  %2461 = vmatmul.mubr.f32.vlgmr.msra.gmra.mxu1 %v243_v5  ;;  %v277_v4 = vld [vmem:[%s5187_s22 + $0x20] sm:$0xff]  ;;  %v279_v5 = vld [vmem:[%s5187_s22 + $0x30] sm:$0xff] }
  0xe4   : > { %2468 = vmatpush1.xpose.msra.mxu0 %v757_v6  ;;  %2539 = vmatpush1.xpose.msra.mxu1 %v759_v7  ;;  %v1270_v6 = vld [vmem:[%s5187_s22 + $0x1f28] sm:$0xff]  ;;  %v1272_v7 = vld [vmem:[%s5187_s22 + $0x1f38] sm:$0xff] }
  0xe5   : > { %2469 = vmatprep.subr.mxu0 %v726_v8  ;;  %2540 = vmatprep.subr.mxu1 %v728_v9  ;;  %v1269_v8 = vld [vmem:[%s5187_s22 + $0x1f20] sm:$0xff]  ;;  %v1271_v9 = vld [vmem:[%s5187_s22 + $0x1f30] sm:$0xff] }
  0xe6   : > { %2531 = vmatprep.mubr.f32.mxu0 %v246_v10  ;;  %2602 = vmatprep.mubr.f32.mxu1 %v248_v11  ;;  %v1238_v10 = vld [vmem:[%s5187_s22 + $0x1e28] sm:$0xff]  ;;  %v1240_v11 = vld [vmem:[%s5187_s22 + $0x1e38] sm:$0xff] }
  0xe8   : > { %2470 = vmatpush1.xpose.msra.mxu0 %v725_v12  ;;  %2541 = vmatpush1.xpose.msra.mxu1 %v727_v13  ;;  %v1237_v12 = vld [vmem:[%s5187_s22 + $0x1e20] sm:$0xff]  ;;  %v1239_v13 = vld [vmem:[%s5187_s22 + $0x1e30] sm:$0xff] }
  0xe9   : > { %2471 = vmatprep.subr.mxu0 %v694_v14  ;;  %2542 = vmatprep.subr.mxu1 %v696_v15  ;;  %v1206_v14 = vld [vmem:[%s5187_s22 + $0x1d28] sm:$0xff]  ;;  %v1208_v15 = vld [vmem:[%s5187_s22 + $0x1d38] sm:$0xff] }
  0xec   : > { %2472 = vmatpush1.xpose.msra.mxu0 %v693_v16  ;;  %2543 = vmatpush1.xpose.msra.mxu1 %v695_v17  ;;  %v1205_v16 = vld [vmem:[%s5187_s22 + $0x1d20] sm:$0xff]  ;;  %v1207_v17 = vld [vmem:[%s5187_s22 + $0x1d30] sm:$0xff] }
  0xed   : > { %2473 = vmatprep.subr.mxu0 %v662_v18  ;;  %2544 = vmatprep.subr.mxu1 %v664_v19  ;;  %v1174_v18 = vld [vmem:[%s5187_s22 + $0x1c28] sm:$0xff]  ;;  %v1176_v19 = vld [vmem:[%s5187_s22 + $0x1c38] sm:$0xff] }
  0xf0   : > { %2474 = vmatpush1.xpose.msra.mxu0 %v661_v20  ;;  %2545 = vmatpush1.xpose.msra.mxu1 %v663_v21  ;;  %v1173_v20 = vld [vmem:[%s5187_s22 + $0x1c20] sm:$0xff]  ;;  %v1175_v21 = vld [vmem:[%s5187_s22 + $0x1c30] sm:$0xff] }
  0xf1   : > { %2475 = vmatprep.subr.mxu0 %v630_v22  ;;  %2546 = vmatprep.subr.mxu1 %v632_v23  ;;  %v1142_v22 = vld [vmem:[%s5187_s22 + $0x1b28] sm:$0xff]  ;;  %v1144_v23 = vld [vmem:[%s5187_s22 + $0x1b38] sm:$0xff] }
  0xf4   : > { %2476 = vmatpush1.xpose.msra.mxu0 %v629_v24  ;;  %2547 = vmatpush1.xpose.msra.mxu1 %v631_v25  ;;  %v1141_v24 = vld [vmem:[%s5187_s22 + $0x1b20] sm:$0xff]  ;;  %v1143_v25 = vld [vmem:[%s5187_s22 + $0x1b30] sm:$0xff] }
  0xf5   : > { %2477 = vmatprep.subr.mxu0 %v598_v26  ;;  %2548 = vmatprep.subr.mxu1 %v600_v27  ;;  %v1110_v26 = vld [vmem:[%s5187_s22 + $0x1a28] sm:$0xff]  ;;  %v1112_v27 = vld [vmem:[%s5187_s22 + $0x1a38] sm:$0xff] }
  0xf8   : > { %2478 = vmatpush1.xpose.msra.mxu0 %v597_v28  ;;  %2549 = vmatpush1.xpose.msra.mxu1 %v599_v29  ;;  %v1109_v28 = vld [vmem:[%s5187_s22 + $0x1a20] sm:$0xff]  ;;  %v1111_v29 = vld [vmem:[%s5187_s22 + $0x1a30] sm:$0xff] }
  0xf9   : > { %2479 = vmatprep.subr.mxu0 %v566_v30  ;;  %2550 = vmatprep.subr.mxu1 %v568_v31  ;;  %v1078_v30 = vld [vmem:[%s5187_s22 + $0x1928] sm:$0xff]  ;;  %v1080_v31 = vld [vmem:[%s5187_s22 + $0x1938] sm:$0xff] }
  0xfc   : > { %2480 = vmatpush1.xpose.msra.mxu0 %v565_v32  ;;  %2551 = vmatpush1.xpose.msra.mxu1 %v567_v33  ;;  %v1077_v32 = vld [vmem:[%s5187_s22 + $0x1920] sm:$0xff]  ;;  %v1079_v33 = vld [vmem:[%s5187_s22 + $0x1930] sm:$0xff] }
  0xfd   : > { %2481 = vmatprep.subr.mxu0 %v534_v34  ;;  %2552 = vmatprep.subr.mxu1 %v536_v35  ;;  %v1046_v34 = vld [vmem:[%s5187_s22 + $0x1828] sm:$0xff]  ;;  %v1048_v35 = vld [vmem:[%s5187_s22 + $0x1838] sm:$0xff] }
 0x100   : > { %2482 = vmatpush1.xpose.msra.mxu0 %v533_v36  ;;  %2553 = vmatpush1.xpose.msra.mxu1 %v535_v37  ;;  %v1045_v36 = vld [vmem:[%s5187_s22 + $0x1820] sm:$0xff]  ;;  %v1047_v37 = vld [vmem:[%s5187_s22 + $0x1830] sm:$0xff] }
 0x101   : > { %2483 = vmatprep.subr.mxu0 %v502_v38  ;;  %2554 = vmatprep.subr.mxu1 %v504_v39  ;;  %v1014_v38 = vld [vmem:[%s5187_s22 + $0x1728] sm:$0xff]  ;;  %v1016_v39 = vld [vmem:[%s5187_s22 + $0x1738] sm:$0xff] }
 0x104   : > { %2484 = vmatpush1.xpose.msra.mxu0 %v501_v40  ;;  %2555 = vmatpush1.xpose.msra.mxu1 %v503_v41  ;;  %v1013_v40 = vld [vmem:[%s5187_s22 + $0x1720] sm:$0xff]  ;;  %v1015_v41 = vld [vmem:[%s5187_s22 + $0x1730] sm:$0xff] }
 0x105   : > { %2485 = vmatprep.subr.mxu0 %v470_v42  ;;  %2556 = vmatprep.subr.mxu1 %v472_v43  ;;  %v982_v42 = vld [vmem:[%s5187_s22 + $0x1628] sm:$0xff]  ;;  %v984_v43 = vld [vmem:[%s5187_s22 + $0x1638] sm:$0xff] }
 0x108   : > { %2486 = vmatpush1.xpose.msra.mxu0 %v469_v44  ;;  %2557 = vmatpush1.xpose.msra.mxu1 %v471_v45  ;;  %v981_v44 = vld [vmem:[%s5187_s22 + $0x1620] sm:$0xff]  ;;  %v983_v45 = vld [vmem:[%s5187_s22 + $0x1630] sm:$0xff] }
 0x109   : > { %2487 = vmatprep.subr.mxu0 %v438_v46  ;;  %2558 = vmatprep.subr.mxu1 %v440_v47  ;;  %v950_v46 = vld [vmem:[%s5187_s22 + $0x1528] sm:$0xff]  ;;  %v952_v47 = vld [vmem:[%s5187_s22 + $0x1538] sm:$0xff] }
 0x10c   : > { %2488 = vmatpush1.xpose.msra.mxu0 %v437_v48  ;;  %2559 = vmatpush1.xpose.msra.mxu1 %v439_v49  ;;  %v949_v48 = vld [vmem:[%s5187_s22 + $0x1520] sm:$0xff]  ;;  %v951_v49 = vld [vmem:[%s5187_s22 + $0x1530] sm:$0xff] }
 0x10d   : > { %2489 = vmatprep.subr.mxu0 %v406_v50  ;;  %2560 = vmatprep.subr.mxu1 %v408_v51  ;;  %v918_v50 = vld [vmem:[%s5187_s22 + $0x1428] sm:$0xff]  ;;  %v920_v51 = vld [vmem:[%s5187_s22 + $0x1438] sm:$0xff] }
 0x110   : > { %2490 = vmatpush1.xpose.msra.mxu0 %v405_v52  ;;  %2561 = vmatpush1.xpose.msra.mxu1 %v407_v53  ;;  %v917_v52 = vld [vmem:[%s5187_s22 + $0x1420] sm:$0xff]  ;;  %v919_v53 = vld [vmem:[%s5187_s22 + $0x1430] sm:$0xff] }
 0x111   : > { %2491 = vmatprep.subr.mxu0 %v374_v54  ;;  %2562 = vmatprep.subr.mxu1 %v376_v55  ;;  %v886_v54 = vld [vmem:[%s5187_s22 + $0x1328] sm:$0xff]  ;;  %v888_v55 = vld [vmem:[%s5187_s22 + $0x1338] sm:$0xff] }
 0x114   : > { %2492 = vmatpush1.xpose.msra.mxu0 %v373_v56  ;;  %2563 = vmatpush1.xpose.msra.mxu1 %v375_v57  ;;  %v885_v56 = vld [vmem:[%s5187_s22 + $0x1320] sm:$0xff]  ;;  %v887_v57 = vld [vmem:[%s5187_s22 + $0x1330] sm:$0xff] }
 0x115   : > { %2493 = vmatprep.subr.mxu0 %v342_v58  ;;  %2564 = vmatprep.subr.mxu1 %v344_v59  ;;  %v854_v58 = vld [vmem:[%s5187_s22 + $0x1228] sm:$0xff]  ;;  %v856_v59 = vld [vmem:[%s5187_s22 + $0x1238] sm:$0xff] }
 0x118   : > { %2494 = vmatpush1.xpose.msra.mxu0 %v341_v60  ;;  %2565 = vmatpush1.xpose.msra.mxu1 %v343_v61  ;;  %v853_v60 = vld [vmem:[%s5187_s22 + $0x1220] sm:$0xff]  ;;  %v855_v61 = vld [vmem:[%s5187_s22 + $0x1230] sm:$0xff] }
 0x119   : > { %2495 = vmatprep.subr.mxu0 %v310_v62  ;;  %2566 = vmatprep.subr.mxu1 %v312_v63  ;;  %v822_v62 = vld [vmem:[%s5187_s22 + $0x1128] sm:$0xff]  ;;  %v824_v63 = vld [vmem:[%s5187_s22 + $0x1138] sm:$0xff] }
 0x11c   : > { %2496 = vmatpush1.xpose.msra.mxu0 %v309_v0  ;;  %2567 = vmatpush1.xpose.msra.mxu1 %v311_v1  ;;  %v821_v0 = vld [vmem:[%s5187_s22 + $0x1120] sm:$0xff]  ;;  %v823_v1 = vld [vmem:[%s5187_s22 + $0x1130] sm:$0xff] }
 0x11d   : > { %2497 = vmatprep.subr.mxu0 %v278_v2  ;;  %2568 = vmatprep.subr.mxu1 %v280_v3  ;;  %v790_v2 = vld [vmem:[%s5187_s22 + $0x1028] sm:$0xff]  ;;  %v792_v3 = vld [vmem:[%s5187_s22 + $0x1038] sm:$0xff] }
 0x120   : > { %2498 = vmatpush1.xpose.msra.mxu0 %v277_v4  ;;  %2569 = vmatpush1.xpose.msra.mxu1 %v279_v5  ;;  %v789_v4 = vld [vmem:[%s5187_s22 + $0x1020] sm:$0xff]  ;;  %v791_v5 = vld [vmem:[%s5187_s22 + $0x1030] sm:$0xff] }
 0x121   : > { %2499 = vmatprep.subr.mxu0 %v1270_v6  ;;  %2570 = vmatprep.subr.mxu1 %v1272_v7  ;;  %v762_v6 = vld [vmem:[%s5187_s22 + $0xf48] sm:$0xff]  ;;  %v764_v7 = vld [vmem:[%s5187_s22 + $0xf58] sm:$0xff] }
 0x124   : > { %2500 = vmatpush2.xpose.msra.mxu0 %v1269_v8  ;;  %2571 = vmatpush2.xpose.msra.mxu1 %v1271_v9  ;;  %v245_v8 = vld [vmem:[#allocation2 + $0x20] sm:$0xff]  ;;  %v247_v9 = vld [vmem:[#allocation2 + $0x30] sm:$0xff] }
 0x125   : > { %2501 = vmatprep.subr.mxu0 %v1238_v10  ;;  %2572 = vmatprep.subr.mxu1 %v1240_v11  ;;  %v761_v10 = vld [vmem:[%s5187_s22 + $0xf40] sm:$0xff]  ;;  %v763_v11 = vld [vmem:[%s5187_s22 + $0xf50] sm:$0xff] }
 0x128   : > { %2502 = vmatpush2.xpose.msra.mxu0 %v1237_v12  ;;  %2573 = vmatpush2.xpose.msra.mxu1 %v1239_v13  ;;  %v730_v12 = vld [vmem:[%s5187_s22 + $0xe48] sm:$0xff]  ;;  %v732_v13 = vld [vmem:[%s5187_s22 + $0xe58] sm:$0xff] }
 0x129   : > { %2503 = vmatprep.subr.mxu0 %v1206_v14  ;;  %2574 = vmatprep.subr.mxu1 %v1208_v15  ;;  %v250_v14 = vld [vmem:[#allocation2 + $0x48] sm:$0xff]  ;;  %v252_v15 = vld [vmem:[#allocation2 + $0x58] sm:$0xff] }
 0x12c   : > { %2504 = vmatpush2.xpose.msra.mxu0 %v1205_v16  ;;  %2575 = vmatpush2.xpose.msra.mxu1 %v1207_v17  ;;  %v729_v16 = vld [vmem:[%s5187_s22 + $0xe40] sm:$0xff]  ;;  %v731_v17 = vld [vmem:[%s5187_s22 + $0xe50] sm:$0xff] }
 0x12d   : > { %2505 = vmatprep.subr.mxu0 %v1174_v18  ;;  %2576 = vmatprep.subr.mxu1 %v1176_v19  ;;  %v698_v18 = vld [vmem:[%s5187_s22 + $0xd48] sm:$0xff]  ;;  %v700_v19 = vld [vmem:[%s5187_s22 + $0xd58] sm:$0xff] }
 0x130   : > { %2506 = vmatpush2.xpose.msra.mxu0 %v1173_v20  ;;  %2577 = vmatpush2.xpose.msra.mxu1 %v1175_v21  ;;  %v697_v20 = vld [vmem:[%s5187_s22 + $0xd40] sm:$0xff]  ;;  %v699_v21 = vld [vmem:[%s5187_s22 + $0xd50] sm:$0xff] }
 0x131   : > { %2507 = vmatprep.subr.mxu0 %v1142_v22  ;;  %2578 = vmatprep.subr.mxu1 %v1144_v23  ;;  %v666_v22 = vld [vmem:[%s5187_s22 + $0xc48] sm:$0xff]  ;;  %v668_v23 = vld [vmem:[%s5187_s22 + $0xc58] sm:$0xff] }
 0x134   : > { %2508 = vmatpush2.xpose.msra.mxu0 %v1141_v24  ;;  %2579 = vmatpush2.xpose.msra.mxu1 %v1143_v25  ;;  %v665_v24 = vld [vmem:[%s5187_s22 + $0xc40] sm:$0xff]  ;;  %v667_v25 = vld [vmem:[%s5187_s22 + $0xc50] sm:$0xff] }
 0x135   : > { %2509 = vmatprep.subr.mxu0 %v1110_v26  ;;  %2580 = vmatprep.subr.mxu1 %v1112_v27  ;;  %v634_v26 = vld [vmem:[%s5187_s22 + $0xb48] sm:$0xff]  ;;  %v636_v27 = vld [vmem:[%s5187_s22 + $0xb58] sm:$0xff] }
 0x138   : > { %2510 = vmatpush2.xpose.msra.mxu0 %v1109_v28  ;;  %2581 = vmatpush2.xpose.msra.mxu1 %v1111_v29  ;;  %v633_v28 = vld [vmem:[%s5187_s22 + $0xb40] sm:$0xff]  ;;  %v635_v29 = vld [vmem:[%s5187_s22 + $0xb50] sm:$0xff] }
 0x139   : > { %2511 = vmatprep.subr.mxu0 %v1078_v30  ;;  %2582 = vmatprep.subr.mxu1 %v1080_v31  ;;  %v602_v30 = vld [vmem:[%s5187_s22 + $0xa48] sm:$0xff]  ;;  %v604_v31 = vld [vmem:[%s5187_s22 + $0xa58] sm:$0xff] }
 0x13c   : > { %2512 = vmatpush2.xpose.msra.mxu0 %v1077_v32  ;;  %2583 = vmatpush2.xpose.msra.mxu1 %v1079_v33  ;;  %v601_v32 = vld [vmem:[%s5187_s22 + $0xa40] sm:$0xff]  ;;  %v603_v33 = vld [vmem:[%s5187_s22 + $0xa50] sm:$0xff] }
 0x13d   : > { %2513 = vmatprep.subr.mxu0 %v1046_v34  ;;  %2584 = vmatprep.subr.mxu1 %v1048_v35  ;;  %v570_v34 = vld [vmem:[%s5187_s22 + $0x948] sm:$0xff]  ;;  %v572_v35 = vld [vmem:[%s5187_s22 + $0x958] sm:$0xff] }
 0x140   : > { %2514 = vmatpush2.xpose.msra.mxu0 %v1045_v36  ;;  %2585 = vmatpush2.xpose.msra.mxu1 %v1047_v37  ;;  %v569_v36 = vld [vmem:[%s5187_s22 + $0x940] sm:$0xff]  ;;  %v571_v37 = vld [vmem:[%s5187_s22 + $0x950] sm:$0xff] }
 0x141   : > { %2515 = vmatprep.subr.mxu0 %v1014_v38  ;;  %2586 = vmatprep.subr.mxu1 %v1016_v39  ;;  %v538_v38 = vld [vmem:[%s5187_s22 + $0x848] sm:$0xff]  ;;  %v540_v39 = vld [vmem:[%s5187_s22 + $0x858] sm:$0xff] }
 0x144   : > { %2516 = vmatpush2.xpose.msra.mxu0 %v1013_v40  ;;  %2587 = vmatpush2.xpose.msra.mxu1 %v1015_v41  ;;  %v537_v40 = vld [vmem:[%s5187_s22 + $0x840] sm:$0xff]  ;;  %v539_v41 = vld [vmem:[%s5187_s22 + $0x850] sm:$0xff] }
 0x145   : > { %2517 = vmatprep.subr.mxu0 %v982_v42  ;;  %2588 = vmatprep.subr.mxu1 %v984_v43  ;;  %v506_v42 = vld [vmem:[%s5187_s22 + $0x748] sm:$0xff]  ;;  %v508_v43 = vld [vmem:[%s5187_s22 + $0x758] sm:$0xff] }
 0x148   : > { %2518 = vmatpush2.xpose.msra.mxu0 %v981_v44  ;;  %2589 = vmatpush2.xpose.msra.mxu1 %v983_v45  ;;  %v505_v44 = vld [vmem:[%s5187_s22 + $0x740] sm:$0xff]  ;;  %v507_v45 = vld [vmem:[%s5187_s22 + $0x750] sm:$0xff] }
 0x149   : > { %2519 = vmatprep.subr.mxu0 %v950_v46  ;;  %2590 = vmatprep.subr.mxu1 %v952_v47  ;;  %v474_v46 = vld [vmem:[%s5187_s22 + $0x648] sm:$0xff]  ;;  %v476_v47 = vld [vmem:[%s5187_s22 + $0x658] sm:$0xff] }
 0x14c   : > { %2520 = vmatpush2.xpose.msra.mxu0 %v949_v48  ;;  %2591 = vmatpush2.xpose.msra.mxu1 %v951_v49  ;;  %v473_v48 = vld [vmem:[%s5187_s22 + $0x640] sm:$0xff]  ;;  %v475_v49 = vld [vmem:[%s5187_s22 + $0x650] sm:$0xff] }
 0x14d   : > { %2521 = vmatprep.subr.mxu0 %v918_v50  ;;  %2592 = vmatprep.subr.mxu1 %v920_v51  ;;  %v442_v50 = vld [vmem:[%s5187_s22 + $0x548] sm:$0xff]  ;;  %v444_v51 = vld [vmem:[%s5187_s22 + $0x558] sm:$0xff] }
 0x150   : > { %2522 = vmatpush2.xpose.msra.mxu0 %v917_v52  ;;  %2593 = vmatpush2.xpose.msra.mxu1 %v919_v53  ;;  %v441_v52 = vld [vmem:[%s5187_s22 + $0x540] sm:$0xff]  ;;  %v443_v53 = vld [vmem:[%s5187_s22 + $0x550] sm:$0xff] }
 0x151   : > { %2523 = vmatprep.subr.mxu0 %v886_v54  ;;  %2594 = vmatprep.subr.mxu1 %v888_v55  ;;  %v410_v54 = vld [vmem:[%s5187_s22 + $0x448] sm:$0xff]  ;;  %v412_v55 = vld [vmem:[%s5187_s22 + $0x458] sm:$0xff] }
 0x154   : > { %2524 = vmatpush2.xpose.msra.mxu0 %v885_v56  ;;  %2595 = vmatpush2.xpose.msra.mxu1 %v887_v57  ;;  %v409_v56 = vld [vmem:[%s5187_s22 + $0x440] sm:$0xff]  ;;  %v411_v57 = vld [vmem:[%s5187_s22 + $0x450] sm:$0xff] }
 0x155   : > { %2525 = vmatprep.subr.mxu0 %v854_v58  ;;  %2596 = vmatprep.subr.mxu1 %v856_v59  ;;  %v378_v58 = vld [vmem:[%s5187_s22 + $0x348] sm:$0xff]  ;;  %v380_v59 = vld [vmem:[%s5187_s22 + $0x358] sm:$0xff] }
 0x158   : > { %2526 = vmatpush2.xpose.msra.mxu0 %v853_v60  ;;  %2597 = vmatpush2.xpose.msra.mxu1 %v855_v61  ;;  %v377_v60 = vld [vmem:[%s5187_s22 + $0x340] sm:$0xff]  ;;  %v379_v61 = vld [vmem:[%s5187_s22 + $0x350] sm:$0xff] }
 0x159   : > { %2527 = vmatprep.subr.mxu0 %v822_v62  ;;  %2598 = vmatprep.subr.mxu1 %v824_v63  ;;  %v346_v62 = vld [vmem:[%s5187_s22 + $0x248] sm:$0xff]  ;;  %v348_v63 = vld [vmem:[%s5187_s22 + $0x258] sm:$0xff] }
 0x15c   : > { %2528 = vmatpush2.xpose.msra.mxu0 %v821_v0  ;;  %2599 = vmatpush2.xpose.msra.mxu1 %v823_v1  ;;  %v345_v0 = vld [vmem:[%s5187_s22 + $0x240] sm:$0xff]  ;;  %v347_v1 = vld [vmem:[%s5187_s22 + $0x250] sm:$0xff] }
 0x15d   : > { %2529 = vmatprep.subr.mxu0 %v790_v2  ;;  %2600 = vmatprep.subr.mxu1 %v792_v3  ;;  %v314_v2 = vld [vmem:[%s5187_s22 + $0x148] sm:$0xff]  ;;  %v316_v3 = vld [vmem:[%s5187_s22 + $0x158] sm:$0xff] }
 0x160   : > { %2530 = vmatpush2.xpose.msra.mxu0 %v789_v4  ;;  %2601 = vmatpush2.xpose.msra.mxu1 %v791_v5  ;;  %v313_v4 = vld [vmem:[%s5187_s22 + $0x140] sm:$0xff]  ;;  %v315_v5 = vld [vmem:[%s5187_s22 + $0x150] sm:$0xff] }
 0x161   : > { %2609 = vmatprep.subr.mxu0 %v762_v6  ;;  %2680 = vmatprep.subr.mxu1 %v764_v7  ;;  %v282_v6 = vld [vmem:[%s5187_s22 + $0x48] sm:$0xff]  ;;  %v284_v7 = vld [vmem:[%s5187_s22 + $0x58] sm:$0xff] }
 0x163   : > { %2532 = vmatmul.mubr.f32.vlgmr.msra.gmra.mxu0 %v245_v8  ;;  %2603 = vmatmul.mubr.f32.vlgmr.msra.gmra.mxu1 %v247_v9  ;;  %v281_v8 = vld [vmem:[%s5187_s22 + $0x40] sm:$0xff]  ;;  %v283_v9 = vld [vmem:[%s5187_s22 + $0x50] sm:$0xff] }
 0x164   : > { %2610 = vmatpush1.xpose.msra.mxu0 %v761_v10  ;;  %2681 = vmatpush1.xpose.msra.mxu1 %v763_v11  ;;  %v1274_v10 = vld [vmem:[%s5187_s22 + $0x1f48] sm:$0xff]  ;;  %v1276_v11 = vld [vmem:[%s5187_s22 + $0x1f58] sm:$0xff] }
 0x165   : > { %2611 = vmatprep.subr.mxu0 %v730_v12  ;;  %2682 = vmatprep.subr.mxu1 %v732_v13  ;;  %v1273_v12 = vld [vmem:[%s5187_s22 + $0x1f40] sm:$0xff]  ;;  %v1275_v13 = vld [vmem:[%s5187_s22 + $0x1f50] sm:$0xff] }
 0x166   : > { %2673 = vmatprep.mubr.f32.mxu0 %v250_v14  ;;  %2744 = vmatprep.mubr.f32.mxu1 %v252_v15  ;;  %v1242_v14 = vld [vmem:[%s5187_s22 + $0x1e48] sm:$0xff]  ;;  %v1244_v15 = vld [vmem:[%s5187_s22 + $0x1e58] sm:$0xff] }
 0x168   : > { %2612 = vmatpush1.xpose.msra.mxu0 %v729_v16  ;;  %2683 = vmatpush1.xpose.msra.mxu1 %v731_v17  ;;  %v1241_v16 = vld [vmem:[%s5187_s22 + $0x1e40] sm:$0xff]  ;;  %v1243_v17 = vld [vmem:[%s5187_s22 + $0x1e50] sm:$0xff] }
 0x169   : > { %2613 = vmatprep.subr.mxu0 %v698_v18  ;;  %2684 = vmatprep.subr.mxu1 %v700_v19  ;;  %v1210_v18 = vld [vmem:[%s5187_s22 + $0x1d48] sm:$0xff]  ;;  %v1212_v19 = vld [vmem:[%s5187_s22 + $0x1d58] sm:$0xff] }
 0x16c   : > { %2614 = vmatpush1.xpose.msra.mxu0 %v697_v20  ;;  %2685 = vmatpush1.xpose.msra.mxu1 %v699_v21  ;;  %v1209_v20 = vld [vmem:[%s5187_s22 + $0x1d40] sm:$0xff]  ;;  %v1211_v21 = vld [vmem:[%s5187_s22 + $0x1d50] sm:$0xff] }
 0x16d   : > { %2615 = vmatprep.subr.mxu0 %v666_v22  ;;  %2686 = vmatprep.subr.mxu1 %v668_v23  ;;  %v1178_v22 = vld [vmem:[%s5187_s22 + $0x1c48] sm:$0xff]  ;;  %v1180_v23 = vld [vmem:[%s5187_s22 + $0x1c58] sm:$0xff] }
 0x170   : > { %2616 = vmatpush1.xpose.msra.mxu0 %v665_v24  ;;  %2687 = vmatpush1.xpose.msra.mxu1 %v667_v25  ;;  %v1177_v24 = vld [vmem:[%s5187_s22 + $0x1c40] sm:$0xff]  ;;  %v1179_v25 = vld [vmem:[%s5187_s22 + $0x1c50] sm:$0xff] }
 0x171   : > { %2617 = vmatprep.subr.mxu0 %v634_v26  ;;  %2688 = vmatprep.subr.mxu1 %v636_v27  ;;  %v1146_v26 = vld [vmem:[%s5187_s22 + $0x1b48] sm:$0xff]  ;;  %v1148_v27 = vld [vmem:[%s5187_s22 + $0x1b58] sm:$0xff] }
 0x174   : > { %2618 = vmatpush1.xpose.msra.mxu0 %v633_v28  ;;  %2689 = vmatpush1.xpose.msra.mxu1 %v635_v29  ;;  %v1145_v28 = vld [vmem:[%s5187_s22 + $0x1b40] sm:$0xff]  ;;  %v1147_v29 = vld [vmem:[%s5187_s22 + $0x1b50] sm:$0xff] }
 0x175   : > { %2619 = vmatprep.subr.mxu0 %v602_v30  ;;  %2690 = vmatprep.subr.mxu1 %v604_v31  ;;  %v1114_v30 = vld [vmem:[%s5187_s22 + $0x1a48] sm:$0xff]  ;;  %v1116_v31 = vld [vmem:[%s5187_s22 + $0x1a58] sm:$0xff] }
 0x178   : > { %2620 = vmatpush1.xpose.msra.mxu0 %v601_v32  ;;  %2691 = vmatpush1.xpose.msra.mxu1 %v603_v33  ;;  %v1113_v32 = vld [vmem:[%s5187_s22 + $0x1a40] sm:$0xff]  ;;  %v1115_v33 = vld [vmem:[%s5187_s22 + $0x1a50] sm:$0xff] }
 0x179   : > { %2621 = vmatprep.subr.mxu0 %v570_v34  ;;  %2692 = vmatprep.subr.mxu1 %v572_v35  ;;  %v1082_v34 = vld [vmem:[%s5187_s22 + $0x1948] sm:$0xff]  ;;  %v1084_v35 = vld [vmem:[%s5187_s22 + $0x1958] sm:$0xff] }
 0x17c   : > { %2622 = vmatpush1.xpose.msra.mxu0 %v569_v36  ;;  %2693 = vmatpush1.xpose.msra.mxu1 %v571_v37  ;;  %v1081_v36 = vld [vmem:[%s5187_s22 + $0x1940] sm:$0xff]  ;;  %v1083_v37 = vld [vmem:[%s5187_s22 + $0x1950] sm:$0xff] }
 0x17d   : > { %2623 = vmatprep.subr.mxu0 %v538_v38  ;;  %2694 = vmatprep.subr.mxu1 %v540_v39  ;;  %v1050_v38 = vld [vmem:[%s5187_s22 + $0x1848] sm:$0xff]  ;;  %v1052_v39 = vld [vmem:[%s5187_s22 + $0x1858] sm:$0xff] }
 0x180   : > { %2624 = vmatpush1.xpose.msra.mxu0 %v537_v40  ;;  %2695 = vmatpush1.xpose.msra.mxu1 %v539_v41  ;;  %v1049_v40 = vld [vmem:[%s5187_s22 + $0x1840] sm:$0xff]  ;;  %v1051_v41 = vld [vmem:[%s5187_s22 + $0x1850] sm:$0xff] }
 0x181   : > { %2625 = vmatprep.subr.mxu0 %v506_v42  ;;  %2696 = vmatprep.subr.mxu1 %v508_v43  ;;  %v1018_v42 = vld [vmem:[%s5187_s22 + $0x1748] sm:$0xff]  ;;  %v1020_v43 = vld [vmem:[%s5187_s22 + $0x1758] sm:$0xff] }
 0x184   : > { %2626 = vmatpush1.xpose.msra.mxu0 %v505_v44  ;;  %2697 = vmatpush1.xpose.msra.mxu1 %v507_v45  ;;  %v1017_v44 = vld [vmem:[%s5187_s22 + $0x1740] sm:$0xff]  ;;  %v1019_v45 = vld [vmem:[%s5187_s22 + $0x1750] sm:$0xff] }
 0x185   : > { %2627 = vmatprep.subr.mxu0 %v474_v46  ;;  %2698 = vmatprep.subr.mxu1 %v476_v47  ;;  %v986_v46 = vld [vmem:[%s5187_s22 + $0x1648] sm:$0xff]  ;;  %v988_v47 = vld [vmem:[%s5187_s22 + $0x1658] sm:$0xff] }
 0x188   : > { %2628 = vmatpush1.xpose.msra.mxu0 %v473_v48  ;;  %2699 = vmatpush1.xpose.msra.mxu1 %v475_v49  ;;  %v985_v48 = vld [vmem:[%s5187_s22 + $0x1640] sm:$0xff]  ;;  %v987_v49 = vld [vmem:[%s5187_s22 + $0x1650] sm:$0xff] }
 0x189   : > { %2629 = vmatprep.subr.mxu0 %v442_v50  ;;  %2700 = vmatprep.subr.mxu1 %v444_v51  ;;  %v954_v50 = vld [vmem:[%s5187_s22 + $0x1548] sm:$0xff]  ;;  %v956_v51 = vld [vmem:[%s5187_s22 + $0x1558] sm:$0xff] }
 0x18c   : > { %2630 = vmatpush1.xpose.msra.mxu0 %v441_v52  ;;  %2701 = vmatpush1.xpose.msra.mxu1 %v443_v53  ;;  %v953_v52 = vld [vmem:[%s5187_s22 + $0x1540] sm:$0xff]  ;;  %v955_v53 = vld [vmem:[%s5187_s22 + $0x1550] sm:$0xff] }
 0x18d   : > { %2631 = vmatprep.subr.mxu0 %v410_v54  ;;  %2702 = vmatprep.subr.mxu1 %v412_v55  ;;  %v922_v54 = vld [vmem:[%s5187_s22 + $0x1448] sm:$0xff]  ;;  %v924_v55 = vld [vmem:[%s5187_s22 + $0x1458] sm:$0xff] }
 0x190   : > { %2632 = vmatpush1.xpose.msra.mxu0 %v409_v56  ;;  %2703 = vmatpush1.xpose.msra.mxu1 %v411_v57  ;;  %v921_v56 = vld [vmem:[%s5187_s22 + $0x1440] sm:$0xff]  ;;  %v923_v57 = vld [vmem:[%s5187_s22 + $0x1450] sm:$0xff] }
 0x191   : > { %2633 = vmatprep.subr.mxu0 %v378_v58  ;;  %2704 = vmatprep.subr.mxu1 %v380_v59  ;;  %v890_v58 = vld [vmem:[%s5187_s22 + $0x1348] sm:$0xff]  ;;  %v892_v59 = vld [vmem:[%s5187_s22 + $0x1358] sm:$0xff] }
 0x194   : > { %2634 = vmatpush1.xpose.msra.mxu0 %v377_v60  ;;  %2705 = vmatpush1.xpose.msra.mxu1 %v379_v61  ;;  %v889_v60 = vld [vmem:[%s5187_s22 + $0x1340] sm:$0xff]  ;;  %v891_v61 = vld [vmem:[%s5187_s22 + $0x1350] sm:$0xff] }
 0x195   : > { %2635 = vmatprep.subr.mxu0 %v346_v62  ;;  %2706 = vmatprep.subr.mxu1 %v348_v63  ;;  %v858_v62 = vld [vmem:[%s5187_s22 + $0x1248] sm:$0xff]  ;;  %v860_v63 = vld [vmem:[%s5187_s22 + $0x1258] sm:$0xff] }
 0x198   : > { %2636 = vmatpush1.xpose.msra.mxu0 %v345_v0  ;;  %2707 = vmatpush1.xpose.msra.mxu1 %v347_v1  ;;  %v857_v0 = vld [vmem:[%s5187_s22 + $0x1240] sm:$0xff]  ;;  %v859_v1 = vld [vmem:[%s5187_s22 + $0x1250] sm:$0xff] }
 0x199   : > { %2637 = vmatprep.subr.mxu0 %v314_v2  ;;  %2708 = vmatprep.subr.mxu1 %v316_v3  ;;  %v826_v2 = vld [vmem:[%s5187_s22 + $0x1148] sm:$0xff]  ;;  %v828_v3 = vld [vmem:[%s5187_s22 + $0x1158] sm:$0xff] }
 0x19c   : > { %2638 = vmatpush1.xpose.msra.mxu0 %v313_v4  ;;  %2709 = vmatpush1.xpose.msra.mxu1 %v315_v5  ;;  %v825_v4 = vld [vmem:[%s5187_s22 + $0x1140] sm:$0xff]  ;;  %v827_v5 = vld [vmem:[%s5187_s22 + $0x1150] sm:$0xff] }
 0x19d   : > { %2639 = vmatprep.subr.mxu0 %v282_v6  ;;  %2710 = vmatprep.subr.mxu1 %v284_v7  ;;  %v794_v6 = vld [vmem:[%s5187_s22 + $0x1048] sm:$0xff]  ;;  %v796_v7 = vld [vmem:[%s5187_s22 + $0x1058] sm:$0xff] }
 0x1a0   : > { %2640 = vmatpush1.xpose.msra.mxu0 %v281_v8  ;;  %2711 = vmatpush1.xpose.msra.mxu1 %v283_v9  ;;  %v793_v8 = vld [vmem:[%s5187_s22 + $0x1040] sm:$0xff]  ;;  %v795_v9 = vld [vmem:[%s5187_s22 + $0x1050] sm:$0xff] }
 0x1a1   : > { %2641 = vmatprep.subr.mxu0 %v1274_v10  ;;  %2712 = vmatprep.subr.mxu1 %v1276_v11  ;;  %v766_v10 = vld [vmem:[%s5187_s22 + $0xf68] sm:$0xff]  ;;  %v768_v11 = vld [vmem:[%s5187_s22 + $0xf78] sm:$0xff] }
 0x1a4   : > { %2642 = vmatpush2.xpose.msra.mxu0 %v1273_v12  ;;  %2713 = vmatpush2.xpose.msra.mxu1 %v1275_v13  ;;  %v249_v12 = vld [vmem:[#allocation2 + $0x40] sm:$0xff]  ;;  %v251_v13 = vld [vmem:[#allocation2 + $0x50] sm:$0xff] }
 0x1a5   : > { %2643 = vmatprep.subr.mxu0 %v1242_v14  ;;  %2714 = vmatprep.subr.mxu1 %v1244_v15  ;;  %v765_v14 = vld [vmem:[%s5187_s22 + $0xf60] sm:$0xff]  ;;  %v767_v15 = vld [vmem:[%s5187_s22 + $0xf70] sm:$0xff] }
 0x1a8   : > { %2644 = vmatpush2.xpose.msra.mxu0 %v1241_v16  ;;  %2715 = vmatpush2.xpose.msra.mxu1 %v1243_v17  ;;  %v734_v16 = vld [vmem:[%s5187_s22 + $0xe68] sm:$0xff]  ;;  %v736_v17 = vld [vmem:[%s5187_s22 + $0xe78] sm:$0xff] }
 0x1a9   : > { %2645 = vmatprep.subr.mxu0 %v1210_v18  ;;  %2716 = vmatprep.subr.mxu1 %v1212_v19  ;;  %v254_v18 = vld [vmem:[#allocation2 + $0x68] sm:$0xff]  ;;  %v256_v19 = vld [vmem:[#allocation2 + $0x78] sm:$0xff] }
 0x1ac   : > { %2646 = vmatpush2.xpose.msra.mxu0 %v1209_v20  ;;  %2717 = vmatpush2.xpose.msra.mxu1 %v1211_v21  ;;  %v733_v20 = vld [vmem:[%s5187_s22 + $0xe60] sm:$0xff]  ;;  %v735_v21 = vld [vmem:[%s5187_s22 + $0xe70] sm:$0xff] }
 0x1ad   : > { %2647 = vmatprep.subr.mxu0 %v1178_v22  ;;  %2718 = vmatprep.subr.mxu1 %v1180_v23  ;;  %v702_v22 = vld [vmem:[%s5187_s22 + $0xd68] sm:$0xff]  ;;  %v704_v23 = vld [vmem:[%s5187_s22 + $0xd78] sm:$0xff] }
 0x1b0   : > { %2648 = vmatpush2.xpose.msra.mxu0 %v1177_v24  ;;  %2719 = vmatpush2.xpose.msra.mxu1 %v1179_v25  ;;  %v701_v24 = vld [vmem:[%s5187_s22 + $0xd60] sm:$0xff]  ;;  %v703_v25 = vld [vmem:[%s5187_s22 + $0xd70] sm:$0xff] }
 0x1b1   : > { %2649 = vmatprep.subr.mxu0 %v1146_v26  ;;  %2720 = vmatprep.subr.mxu1 %v1148_v27  ;;  %v670_v26 = vld [vmem:[%s5187_s22 + $0xc68] sm:$0xff]  ;;  %v672_v27 = vld [vmem:[%s5187_s22 + $0xc78] sm:$0xff] }
 0x1b4   : > { %2650 = vmatpush2.xpose.msra.mxu0 %v1145_v28  ;;  %2721 = vmatpush2.xpose.msra.mxu1 %v1147_v29  ;;  %v669_v28 = vld [vmem:[%s5187_s22 + $0xc60] sm:$0xff]  ;;  %v671_v29 = vld [vmem:[%s5187_s22 + $0xc70] sm:$0xff] }
 0x1b5   : > { %2651 = vmatprep.subr.mxu0 %v1114_v30  ;;  %2722 = vmatprep.subr.mxu1 %v1116_v31  ;;  %v638_v30 = vld [vmem:[%s5187_s22 + $0xb68] sm:$0xff]  ;;  %v640_v31 = vld [vmem:[%s5187_s22 + $0xb78] sm:$0xff] }
 0x1b8   : > { %2652 = vmatpush2.xpose.msra.mxu0 %v1113_v32  ;;  %2723 = vmatpush2.xpose.msra.mxu1 %v1115_v33  ;;  %v637_v32 = vld [vmem:[%s5187_s22 + $0xb60] sm:$0xff]  ;;  %v639_v33 = vld [vmem:[%s5187_s22 + $0xb70] sm:$0xff] }
 0x1b9   : > { %2653 = vmatprep.subr.mxu0 %v1082_v34  ;;  %2724 = vmatprep.subr.mxu1 %v1084_v35  ;;  %v606_v34 = vld [vmem:[%s5187_s22 + $0xa68] sm:$0xff]  ;;  %v608_v35 = vld [vmem:[%s5187_s22 + $0xa78] sm:$0xff] }
 0x1bc   : > { %2654 = vmatpush2.xpose.msra.mxu0 %v1081_v36  ;;  %2725 = vmatpush2.xpose.msra.mxu1 %v1083_v37  ;;  %v605_v36 = vld [vmem:[%s5187_s22 + $0xa60] sm:$0xff]  ;;  %v607_v37 = vld [vmem:[%s5187_s22 + $0xa70] sm:$0xff] }
 0x1bd   : > { %2655 = vmatprep.subr.mxu0 %v1050_v38  ;;  %2726 = vmatprep.subr.mxu1 %v1052_v39  ;;  %v574_v38 = vld [vmem:[%s5187_s22 + $0x968] sm:$0xff]  ;;  %v576_v39 = vld [vmem:[%s5187_s22 + $0x978] sm:$0xff] }
 0x1c0   : > { %2656 = vmatpush2.xpose.msra.mxu0 %v1049_v40  ;;  %2727 = vmatpush2.xpose.msra.mxu1 %v1051_v41  ;;  %v573_v40 = vld [vmem:[%s5187_s22 + $0x960] sm:$0xff]  ;;  %v575_v41 = vld [vmem:[%s5187_s22 + $0x970] sm:$0xff] }
 0x1c1   : > { %2657 = vmatprep.subr.mxu0 %v1018_v42  ;;  %2728 = vmatprep.subr.mxu1 %v1020_v43  ;;  %v542_v42 = vld [vmem:[%s5187_s22 + $0x868] sm:$0xff]  ;;  %v544_v43 = vld [vmem:[%s5187_s22 + $0x878] sm:$0xff] }
 0x1c4   : > { %2658 = vmatpush2.xpose.msra.mxu0 %v1017_v44  ;;  %2729 = vmatpush2.xpose.msra.mxu1 %v1019_v45  ;;  %v541_v44 = vld [vmem:[%s5187_s22 + $0x860] sm:$0xff]  ;;  %v543_v45 = vld [vmem:[%s5187_s22 + $0x870] sm:$0xff] }
 0x1c5   : > { %2659 = vmatprep.subr.mxu0 %v986_v46  ;;  %2730 = vmatprep.subr.mxu1 %v988_v47  ;;  %v510_v46 = vld [vmem:[%s5187_s22 + $0x768] sm:$0xff]  ;;  %v512_v47 = vld [vmem:[%s5187_s22 + $0x778] sm:$0xff] }
 0x1c8   : > { %2660 = vmatpush2.xpose.msra.mxu0 %v985_v48  ;;  %2731 = vmatpush2.xpose.msra.mxu1 %v987_v49  ;;  %v509_v48 = vld [vmem:[%s5187_s22 + $0x760] sm:$0xff]  ;;  %v511_v49 = vld [vmem:[%s5187_s22 + $0x770] sm:$0xff] }
 0x1c9   : > { %2661 = vmatprep.subr.mxu0 %v954_v50  ;;  %2732 = vmatprep.subr.mxu1 %v956_v51  ;;  %v478_v50 = vld [vmem:[%s5187_s22 + $0x668] sm:$0xff]  ;;  %v480_v51 = vld [vmem:[%s5187_s22 + $0x678] sm:$0xff] }
 0x1cc   : > { %2662 = vmatpush2.xpose.msra.mxu0 %v953_v52  ;;  %2733 = vmatpush2.xpose.msra.mxu1 %v955_v53  ;;  %v477_v52 = vld [vmem:[%s5187_s22 + $0x660] sm:$0xff]  ;;  %v479_v53 = vld [vmem:[%s5187_s22 + $0x670] sm:$0xff] }
 0x1cd   : > { %2663 = vmatprep.subr.mxu0 %v922_v54  ;;  %2734 = vmatprep.subr.mxu1 %v924_v55  ;;  %v446_v54 = vld [vmem:[%s5187_s22 + $0x568] sm:$0xff]  ;;  %v448_v55 = vld [vmem:[%s5187_s22 + $0x578] sm:$0xff] }
 0x1d0   : > { %2664 = vmatpush2.xpose.msra.mxu0 %v921_v56  ;;  %2735 = vmatpush2.xpose.msra.mxu1 %v923_v57  ;;  %v445_v56 = vld [vmem:[%s5187_s22 + $0x560] sm:$0xff]  ;;  %v447_v57 = vld [vmem:[%s5187_s22 + $0x570] sm:$0xff] }
 0x1d1   : > { %2665 = vmatprep.subr.mxu0 %v890_v58  ;;  %2736 = vmatprep.subr.mxu1 %v892_v59  ;;  %v414_v58 = vld [vmem:[%s5187_s22 + $0x468] sm:$0xff]  ;;  %v416_v59 = vld [vmem:[%s5187_s22 + $0x478] sm:$0xff] }
 0x1d4   : > { %2666 = vmatpush2.xpose.msra.mxu0 %v889_v60  ;;  %2737 = vmatpush2.xpose.msra.mxu1 %v891_v61  ;;  %v413_v60 = vld [vmem:[%s5187_s22 + $0x460] sm:$0xff]  ;;  %v415_v61 = vld [vmem:[%s5187_s22 + $0x470] sm:$0xff] }
 0x1d5   : > { %2667 = vmatprep.subr.mxu0 %v858_v62  ;;  %2738 = vmatprep.subr.mxu1 %v860_v63  ;;  %v382_v62 = vld [vmem:[%s5187_s22 + $0x368] sm:$0xff]  ;;  %v384_v63 = vld [vmem:[%s5187_s22 + $0x378] sm:$0xff] }
 0x1d8   : > { %2668 = vmatpush2.xpose.msra.mxu0 %v857_v0  ;;  %2739 = vmatpush2.xpose.msra.mxu1 %v859_v1  ;;  %v381_v0 = vld [vmem:[%s5187_s22 + $0x360] sm:$0xff]  ;;  %v383_v1 = vld [vmem:[%s5187_s22 + $0x370] sm:$0xff] }
 0x1d9   : > { %2669 = vmatprep.subr.mxu0 %v826_v2  ;;  %2740 = vmatprep.subr.mxu1 %v828_v3  ;;  %v350_v2 = vld [vmem:[%s5187_s22 + $0x268] sm:$0xff]  ;;  %v352_v3 = vld [vmem:[%s5187_s22 + $0x278] sm:$0xff] }
 0x1dc   : > { %2670 = vmatpush2.xpose.msra.mxu0 %v825_v4  ;;  %2741 = vmatpush2.xpose.msra.mxu1 %v827_v5  ;;  %v349_v4 = vld [vmem:[%s5187_s22 + $0x260] sm:$0xff]  ;;  %v351_v5 = vld [vmem:[%s5187_s22 + $0x270] sm:$0xff] }
 0x1dd   : > { %2671 = vmatprep.subr.mxu0 %v794_v6  ;;  %2742 = vmatprep.subr.mxu1 %v796_v7  ;;  %v318_v6 = vld [vmem:[%s5187_s22 + $0x168] sm:$0xff]  ;;  %v320_v7 = vld [vmem:[%s5187_s22 + $0x178] sm:$0xff] }
 0x1e0   : > { %2672 = vmatpush2.xpose.msra.mxu0 %v793_v8  ;;  %2743 = vmatpush2.xpose.msra.mxu1 %v795_v9  ;;  %v317_v8 = vld [vmem:[%s5187_s22 + $0x160] sm:$0xff]  ;;  %v319_v9 = vld [vmem:[%s5187_s22 + $0x170] sm:$0xff] }
 0x1e1   : > { %2751 = vmatprep.subr.mxu0 %v766_v10  ;;  %2822 = vmatprep.subr.mxu1 %v768_v11  ;;  %v286_v10 = vld [vmem:[%s5187_s22 + $0x68] sm:$0xff]  ;;  %v288_v11 = vld [vmem:[%s5187_s22 + $0x78] sm:$0xff] }
 0x1e3   : > { %2674 = vmatmul.mubr.f32.vlgmr.msra.gmra.mxu0 %v249_v12  ;;  %2745 = vmatmul.mubr.f32.vlgmr.msra.gmra.mxu1 %v251_v13  ;;  %v285_v12 = vld [vmem:[%s5187_s22 + $0x60] sm:$0xff]  ;;  %v287_v13 = vld [vmem:[%s5187_s22 + $0x70] sm:$0xff] }
 0x1e4   : > { %2752 = vmatpush1.xpose.msra.mxu0 %v765_v14  ;;  %2823 = vmatpush1.xpose.msra.mxu1 %v767_v15  ;;  %v1278_v14 = vld [vmem:[%s5187_s22 + $0x1f68] sm:$0xff]  ;;  %v1280_v15 = vld [vmem:[%s5187_s22 + $0x1f78] sm:$0xff] }
 0x1e5   : > { %2753 = vmatprep.subr.mxu0 %v734_v16  ;;  %2824 = vmatprep.subr.mxu1 %v736_v17  ;;  %v1277_v16 = vld [vmem:[%s5187_s22 + $0x1f60] sm:$0xff]  ;;  %v1279_v17 = vld [vmem:[%s5187_s22 + $0x1f70] sm:$0xff] }
 0x1e6   : > { %2815 = vmatprep.mubr.f32.mxu0 %v254_v18  ;;  %2886 = vmatprep.mubr.f32.mxu1 %v256_v19  ;;  %v1246_v18 = vld [vmem:[%s5187_s22 + $0x1e68] sm:$0xff]  ;;  %v1248_v19 = vld [vmem:[%s5187_s22 + $0x1e78] sm:$0xff] }
 0x1e8   : > { %2754 = vmatpush1.xpose.msra.mxu0 %v733_v20  ;;  %2825 = vmatpush1.xpose.msra.mxu1 %v735_v21  ;;  %v1245_v20 = vld [vmem:[%s5187_s22 + $0x1e60] sm:$0xff]  ;;  %v1247_v21 = vld [vmem:[%s5187_s22 + $0x1e70] sm:$0xff] }
 0x1e9   : > { %2755 = vmatprep.subr.mxu0 %v702_v22  ;;  %2826 = vmatprep.subr.mxu1 %v704_v23  ;;  %v1214_v22 = vld [vmem:[%s5187_s22 + $0x1d68] sm:$0xff]  ;;  %v1216_v23 = vld [vmem:[%s5187_s22 + $0x1d78] sm:$0xff] }
 0x1ec   : > { %2756 = vmatpush1.xpose.msra.mxu0 %v701_v24  ;;  %2827 = vmatpush1.xpose.msra.mxu1 %v703_v25  ;;  %v1213_v24 = vld [vmem:[%s5187_s22 + $0x1d60] sm:$0xff]  ;;  %v1215_v25 = vld [vmem:[%s5187_s22 + $0x1d70] sm:$0xff] }
 0x1ed   : > { %2757 = vmatprep.subr.mxu0 %v670_v26  ;;  %2828 = vmatprep.subr.mxu1 %v672_v27  ;;  %v1182_v26 = vld [vmem:[%s5187_s22 + $0x1c68] sm:$0xff]  ;;  %v1184_v27 = vld [vmem:[%s5187_s22 + $0x1c78] sm:$0xff] }
 0x1f0   : > { %2758 = vmatpush1.xpose.msra.mxu0 %v669_v28  ;;  %2829 = vmatpush1.xpose.msra.mxu1 %v671_v29  ;;  %v1181_v28 = vld [vmem:[%s5187_s22 + $0x1c60] sm:$0xff]  ;;  %v1183_v29 = vld [vmem:[%s5187_s22 + $0x1c70] sm:$0xff] }
 0x1f1   : > { %2759 = vmatprep.subr.mxu0 %v638_v30  ;;  %2830 = vmatprep.subr.mxu1 %v640_v31  ;;  %v1150_v30 = vld [vmem:[%s5187_s22 + $0x1b68] sm:$0xff]  ;;  %v1152_v31 = vld [vmem:[%s5187_s22 + $0x1b78] sm:$0xff] }
 0x1f4   : > { %2760 = vmatpush1.xpose.msra.mxu0 %v637_v32  ;;  %2831 = vmatpush1.xpose.msra.mxu1 %v639_v33  ;;  %v1149_v32 = vld [vmem:[%s5187_s22 + $0x1b60] sm:$0xff]  ;;  %v1151_v33 = vld [vmem:[%s5187_s22 + $0x1b70] sm:$0xff] }
 0x1f5   : > { %2761 = vmatprep.subr.mxu0 %v606_v34  ;;  %2832 = vmatprep.subr.mxu1 %v608_v35  ;;  %v1118_v34 = vld [vmem:[%s5187_s22 + $0x1a68] sm:$0xff]  ;;  %v1120_v35 = vld [vmem:[%s5187_s22 + $0x1a78] sm:$0xff] }
 0x1f8   : > { %2762 = vmatpush1.xpose.msra.mxu0 %v605_v36  ;;  %2833 = vmatpush1.xpose.msra.mxu1 %v607_v37  ;;  %v1117_v36 = vld [vmem:[%s5187_s22 + $0x1a60] sm:$0xff]  ;;  %v1119_v37 = vld [vmem:[%s5187_s22 + $0x1a70] sm:$0xff] }
 0x1f9   : > { %2763 = vmatprep.subr.mxu0 %v574_v38  ;;  %2834 = vmatprep.subr.mxu1 %v576_v39  ;;  %v1086_v38 = vld [vmem:[%s5187_s22 + $0x1968] sm:$0xff]  ;;  %v1088_v39 = vld [vmem:[%s5187_s22 + $0x1978] sm:$0xff] }
 0x1fc   : > { %2764 = vmatpush1.xpose.msra.mxu0 %v573_v40  ;;  %2835 = vmatpush1.xpose.msra.mxu1 %v575_v41  ;;  %v1085_v40 = vld [vmem:[%s5187_s22 + $0x1960] sm:$0xff]  ;;  %v1087_v41 = vld [vmem:[%s5187_s22 + $0x1970] sm:$0xff] }
 0x1fd   : > { %2765 = vmatprep.subr.mxu0 %v542_v42  ;;  %2836 = vmatprep.subr.mxu1 %v544_v43  ;;  %v1054_v42 = vld [vmem:[%s5187_s22 + $0x1868] sm:$0xff]  ;;  %v1056_v43 = vld [vmem:[%s5187_s22 + $0x1878] sm:$0xff] }
 0x200   : > { %2766 = vmatpush1.xpose.msra.mxu0 %v541_v44  ;;  %2837 = vmatpush1.xpose.msra.mxu1 %v543_v45  ;;  %v1053_v44 = vld [vmem:[%s5187_s22 + $0x1860] sm:$0xff]  ;;  %v1055_v45 = vld [vmem:[%s5187_s22 + $0x1870] sm:$0xff] }
 0x201   : > { %2767 = vmatprep.subr.mxu0 %v510_v46  ;;  %2838 = vmatprep.subr.mxu1 %v512_v47  ;;  %v1022_v46 = vld [vmem:[%s5187_s22 + $0x1768] sm:$0xff]  ;;  %v1024_v47 = vld [vmem:[%s5187_s22 + $0x1778] sm:$0xff] }
 0x204   : > { %2768 = vmatpush1.xpose.msra.mxu0 %v509_v48  ;;  %2839 = vmatpush1.xpose.msra.mxu1 %v511_v49  ;;  %v1021_v48 = vld [vmem:[%s5187_s22 + $0x1760] sm:$0xff]  ;;  %v1023_v49 = vld [vmem:[%s5187_s22 + $0x1770] sm:$0xff] }
 0x205   : > { %2769 = vmatprep.subr.mxu0 %v478_v50  ;;  %2840 = vmatprep.subr.mxu1 %v480_v51  ;;  %v990_v50 = vld [vmem:[%s5187_s22 + $0x1668] sm:$0xff]  ;;  %v992_v51 = vld [vmem:[%s5187_s22 + $0x1678] sm:$0xff] }
 0x208   : > { %2770 = vmatpush1.xpose.msra.mxu0 %v477_v52  ;;  %2841 = vmatpush1.xpose.msra.mxu1 %v479_v53  ;;  %v989_v52 = vld [vmem:[%s5187_s22 + $0x1660] sm:$0xff]  ;;  %v991_v53 = vld [vmem:[%s5187_s22 + $0x1670] sm:$0xff] }
 0x209   : > { %2771 = vmatprep.subr.mxu0 %v446_v54  ;;  %2842 = vmatprep.subr.mxu1 %v448_v55  ;;  %v958_v54 = vld [vmem:[%s5187_s22 + $0x1568] sm:$0xff]  ;;  %v960_v55 = vld [vmem:[%s5187_s22 + $0x1578] sm:$0xff] }
 0x20c   : > { %2772 = vmatpush1.xpose.msra.mxu0 %v445_v56  ;;  %2843 = vmatpush1.xpose.msra.mxu1 %v447_v57  ;;  %v957_v56 = vld [vmem:[%s5187_s22 + $0x1560] sm:$0xff]  ;;  %v959_v57 = vld [vmem:[%s5187_s22 + $0x1570] sm:$0xff] }
 0x20d   : > { %2773 = vmatprep.subr.mxu0 %v414_v58  ;;  %2844 = vmatprep.subr.mxu1 %v416_v59  ;;  %v926_v58 = vld [vmem:[%s5187_s22 + $0x1468] sm:$0xff]  ;;  %v928_v59 = vld [vmem:[%s5187_s22 + $0x1478] sm:$0xff] }
 0x210   : > { %2774 = vmatpush1.xpose.msra.mxu0 %v413_v60  ;;  %2845 = vmatpush1.xpose.msra.mxu1 %v415_v61  ;;  %v925_v60 = vld [vmem:[%s5187_s22 + $0x1460] sm:$0xff]  ;;  %v927_v61 = vld [vmem:[%s5187_s22 + $0x1470] sm:$0xff] }
 0x211   : > { %2775 = vmatprep.subr.mxu0 %v382_v62  ;;  %2846 = vmatprep.subr.mxu1 %v384_v63  ;;  %v894_v62 = vld [vmem:[%s5187_s22 + $0x1368] sm:$0xff]  ;;  %v896_v63 = vld [vmem:[%s5187_s22 + $0x1378] sm:$0xff] }
 0x214   : > { %2776 = vmatpush1.xpose.msra.mxu0 %v381_v0  ;;  %2847 = vmatpush1.xpose.msra.mxu1 %v383_v1  ;;  %v893_v0 = vld [vmem:[%s5187_s22 + $0x1360] sm:$0xff]  ;;  %v895_v1 = vld [vmem:[%s5187_s22 + $0x1370] sm:$0xff] }
 0x215   : > { %2777 = vmatprep.subr.mxu0 %v350_v2  ;;  %2848 = vmatprep.subr.mxu1 %v352_v3  ;;  %v862_v2 = vld [vmem:[%s5187_s22 + $0x1268] sm:$0xff]  ;;  %v864_v3 = vld [vmem:[%s5187_s22 + $0x1278] sm:$0xff] }
 0x218   : > { %2778 = vmatpush1.xpose.msra.mxu0 %v349_v4  ;;  %2849 = vmatpush1.xpose.msra.mxu1 %v351_v5  ;;  %v861_v4 = vld [vmem:[%s5187_s22 + $0x1260] sm:$0xff]  ;;  %v863_v5 = vld [vmem:[%s5187_s22 + $0x1270] sm:$0xff] }
 0x219   : > { %2779 = vmatprep.subr.mxu0 %v318_v6  ;;  %2850 = vmatprep.subr.mxu1 %v320_v7  ;;  %v830_v6 = vld [vmem:[%s5187_s22 + $0x1168] sm:$0xff]  ;;  %v832_v7 = vld [vmem:[%s5187_s22 + $0x1178] sm:$0xff] }
 0x21c   : > { %2780 = vmatpush1.xpose.msra.mxu0 %v317_v8  ;;  %2851 = vmatpush1.xpose.msra.mxu1 %v319_v9  ;;  %v829_v8 = vld [vmem:[%s5187_s22 + $0x1160] sm:$0xff]  ;;  %v831_v9 = vld [vmem:[%s5187_s22 + $0x1170] sm:$0xff] }
 0x21d   : > { %2781 = vmatprep.subr.mxu0 %v286_v10  ;;  %2852 = vmatprep.subr.mxu1 %v288_v11  ;;  %v798_v10 = vld [vmem:[%s5187_s22 + $0x1068] sm:$0xff]  ;;  %v800_v11 = vld [vmem:[%s5187_s22 + $0x1078] sm:$0xff] }
 0x220   : > { %2782 = vmatpush1.xpose.msra.mxu0 %v285_v12  ;;  %2853 = vmatpush1.xpose.msra.mxu1 %v287_v13  ;;  %v797_v12 = vld [vmem:[%s5187_s22 + $0x1060] sm:$0xff]  ;;  %v799_v13 = vld [vmem:[%s5187_s22 + $0x1070] sm:$0xff] }
 0x221   : > { %2783 = vmatprep.subr.mxu0 %v1278_v14  ;;  %2854 = vmatprep.subr.mxu1 %v1280_v15  ;;  %v770_v14 = vld [vmem:[%s5187_s22 + $0xf88] sm:$0xff]  ;;  %v772_v15 = vld [vmem:[%s5187_s22 + $0xf98] sm:$0xff] }
 0x224   : > { %2784 = vmatpush2.xpose.msra.mxu0 %v1277_v16  ;;  %2855 = vmatpush2.xpose.msra.mxu1 %v1279_v17  ;;  %v253_v16 = vld [vmem:[#allocation2 + $0x60] sm:$0xff]  ;;  %v255_v17 = vld [vmem:[#allocation2 + $0x70] sm:$0xff] }
 0x225   : > { %2785 = vmatprep.subr.mxu0 %v1246_v18  ;;  %2856 = vmatprep.subr.mxu1 %v1248_v19  ;;  %v769_v18 = vld [vmem:[%s5187_s22 + $0xf80] sm:$0xff]  ;;  %v771_v19 = vld [vmem:[%s5187_s22 + $0xf90] sm:$0xff] }
 0x228   : > { %2786 = vmatpush2.xpose.msra.mxu0 %v1245_v20  ;;  %2857 = vmatpush2.xpose.msra.mxu1 %v1247_v21  ;;  %v738_v20 = vld [vmem:[%s5187_s22 + $0xe88] sm:$0xff]  ;;  %v740_v21 = vld [vmem:[%s5187_s22 + $0xe98] sm:$0xff] }
 0x229   : > { %2787 = vmatprep.subr.mxu0 %v1214_v22  ;;  %2858 = vmatprep.subr.mxu1 %v1216_v23  ;;  %v258_v22 = vld [vmem:[#allocation2 + $0x88] sm:$0xff]  ;;  %v260_v23 = vld [vmem:[#allocation2 + $0x98] sm:$0xff] }
 0x22c   : > { %2788 = vmatpush2.xpose.msra.mxu0 %v1213_v24  ;;  %2859 = vmatpush2.xpose.msra.mxu1 %v1215_v25  ;;  %v737_v24 = vld [vmem:[%s5187_s22 + $0xe80] sm:$0xff]  ;;  %v739_v25 = vld [vmem:[%s5187_s22 + $0xe90] sm:$0xff] }
 0x22d   : > { %2789 = vmatprep.subr.mxu0 %v1182_v26  ;;  %2860 = vmatprep.subr.mxu1 %v1184_v27  ;;  %v706_v26 = vld [vmem:[%s5187_s22 + $0xd88] sm:$0xff]  ;;  %v708_v27 = vld [vmem:[%s5187_s22 + $0xd98] sm:$0xff] }
 0x230   : > { %2790 = vmatpush2.xpose.msra.mxu0 %v1181_v28  ;;  %2861 = vmatpush2.xpose.msra.mxu1 %v1183_v29  ;;  %v705_v28 = vld [vmem:[%s5187_s22 + $0xd80] sm:$0xff]  ;;  %v707_v29 = vld [vmem:[%s5187_s22 + $0xd90] sm:$0xff] }
 0x231   : > { %2791 = vmatprep.subr.mxu0 %v1150_v30  ;;  %2862 = vmatprep.subr.mxu1 %v1152_v31  ;;  %v674_v30 = vld [vmem:[%s5187_s22 + $0xc88] sm:$0xff]  ;;  %v676_v31 = vld [vmem:[%s5187_s22 + $0xc98] sm:$0xff] }
 0x234   : > { %2792 = vmatpush2.xpose.msra.mxu0 %v1149_v32  ;;  %2863 = vmatpush2.xpose.msra.mxu1 %v1151_v33  ;;  %v673_v32 = vld [vmem:[%s5187_s22 + $0xc80] sm:$0xff]  ;;  %v675_v33 = vld [vmem:[%s5187_s22 + $0xc90] sm:$0xff] }
 0x235   : > { %2793 = vmatprep.subr.mxu0 %v1118_v34  ;;  %2864 = vmatprep.subr.mxu1 %v1120_v35  ;;  %v642_v34 = vld [vmem:[%s5187_s22 + $0xb88] sm:$0xff]  ;;  %v644_v35 = vld [vmem:[%s5187_s22 + $0xb98] sm:$0xff] }
 0x238   : > { %2794 = vmatpush2.xpose.msra.mxu0 %v1117_v36  ;;  %2865 = vmatpush2.xpose.msra.mxu1 %v1119_v37  ;;  %v641_v36 = vld [vmem:[%s5187_s22 + $0xb80] sm:$0xff]  ;;  %v643_v37 = vld [vmem:[%s5187_s22 + $0xb90] sm:$0xff] }
 0x239   : > { %2795 = vmatprep.subr.mxu0 %v1086_v38  ;;  %2866 = vmatprep.subr.mxu1 %v1088_v39  ;;  %v610_v38 = vld [vmem:[%s5187_s22 + $0xa88] sm:$0xff]  ;;  %v612_v39 = vld [vmem:[%s5187_s22 + $0xa98] sm:$0xff] }
 0x23c   : > { %2796 = vmatpush2.xpose.msra.mxu0 %v1085_v40  ;;  %2867 = vmatpush2.xpose.msra.mxu1 %v1087_v41  ;;  %v609_v40 = vld [vmem:[%s5187_s22 + $0xa80] sm:$0xff]  ;;  %v611_v41 = vld [vmem:[%s5187_s22 + $0xa90] sm:$0xff] }
 0x23d   : > { %2797 = vmatprep.subr.mxu0 %v1054_v42  ;;  %2868 = vmatprep.subr.mxu1 %v1056_v43  ;;  %v578_v42 = vld [vmem:[%s5187_s22 + $0x988] sm:$0xff]  ;;  %v580_v43 = vld [vmem:[%s5187_s22 + $0x998] sm:$0xff] }
 0x240   : > { %2798 = vmatpush2.xpose.msra.mxu0 %v1053_v44  ;;  %2869 = vmatpush2.xpose.msra.mxu1 %v1055_v45  ;;  %v577_v44 = vld [vmem:[%s5187_s22 + $0x980] sm:$0xff]  ;;  %v579_v45 = vld [vmem:[%s5187_s22 + $0x990] sm:$0xff] }
 0x241   : > { %2799 = vmatprep.subr.mxu0 %v1022_v46  ;;  %2870 = vmatprep.subr.mxu1 %v1024_v47  ;;  %v546_v46 = vld [vmem:[%s5187_s22 + $0x888] sm:$0xff]  ;;  %v548_v47 = vld [vmem:[%s5187_s22 + $0x898] sm:$0xff] }
 0x244   : > { %2800 = vmatpush2.xpose.msra.mxu0 %v1021_v48  ;;  %2871 = vmatpush2.xpose.msra.mxu1 %v1023_v49  ;;  %v545_v48 = vld [vmem:[%s5187_s22 + $0x880] sm:$0xff]  ;;  %v547_v49 = vld [vmem:[%s5187_s22 + $0x890] sm:$0xff] }
 0x245   : > { %2801 = vmatprep.subr.mxu0 %v990_v50  ;;  %2872 = vmatprep.subr.mxu1 %v992_v51  ;;  %v514_v50 = vld [vmem:[%s5187_s22 + $0x788] sm:$0xff]  ;;  %v516_v51 = vld [vmem:[%s5187_s22 + $0x798] sm:$0xff] }
 0x248   : > { %2802 = vmatpush2.xpose.msra.mxu0 %v989_v52  ;;  %2873 = vmatpush2.xpose.msra.mxu1 %v991_v53  ;;  %v513_v52 = vld [vmem:[%s5187_s22 + $0x780] sm:$0xff]  ;;  %v515_v53 = vld [vmem:[%s5187_s22 + $0x790] sm:$0xff] }
 0x249   : > { %2803 = vmatprep.subr.mxu0 %v958_v54  ;;  %2874 = vmatprep.subr.mxu1 %v960_v55  ;;  %v482_v54 = vld [vmem:[%s5187_s22 + $0x688] sm:$0xff]  ;;  %v484_v55 = vld [vmem:[%s5187_s22 + $0x698] sm:$0xff] }
 0x24c   : > { %2804 = vmatpush2.xpose.msra.mxu0 %v957_v56  ;;  %2875 = vmatpush2.xpose.msra.mxu1 %v959_v57  ;;  %v481_v56 = vld [vmem:[%s5187_s22 + $0x680] sm:$0xff]  ;;  %v483_v57 = vld [vmem:[%s5187_s22 + $0x690] sm:$0xff] }
 0x24d   : > { %2805 = vmatprep.subr.mxu0 %v926_v58  ;;  %2876 = vmatprep.subr.mxu1 %v928_v59  ;;  %v450_v58 = vld [vmem:[%s5187_s22 + $0x588] sm:$0xff]  ;;  %v452_v59 = vld [vmem:[%s5187_s22 + $0x598] sm:$0xff] }
 0x250   : > { %2806 = vmatpush2.xpose.msra.mxu0 %v925_v60  ;;  %2877 = vmatpush2.xpose.msra.mxu1 %v927_v61  ;;  %v449_v60 = vld [vmem:[%s5187_s22 + $0x580] sm:$0xff]  ;;  %v451_v61 = vld [vmem:[%s5187_s22 + $0x590] sm:$0xff] }
 0x251   : > { %2807 = vmatprep.subr.mxu0 %v894_v62  ;;  %2878 = vmatprep.subr.mxu1 %v896_v63  ;;  %v418_v62 = vld [vmem:[%s5187_s22 + $0x488] sm:$0xff]  ;;  %v420_v63 = vld [vmem:[%s5187_s22 + $0x498] sm:$0xff] }
 0x254   : > { %2808 = vmatpush2.xpose.msra.mxu0 %v893_v0  ;;  %2879 = vmatpush2.xpose.msra.mxu1 %v895_v1  ;;  %v417_v0 = vld [vmem:[%s5187_s22 + $0x480] sm:$0xff]  ;;  %v419_v1 = vld [vmem:[%s5187_s22 + $0x490] sm:$0xff] }
 0x255   : > { %2809 = vmatprep.subr.mxu0 %v862_v2  ;;  %2880 = vmatprep.subr.mxu1 %v864_v3  ;;  %v386_v2 = vld [vmem:[%s5187_s22 + $0x388] sm:$0xff]  ;;  %v388_v3 = vld [vmem:[%s5187_s22 + $0x398] sm:$0xff] }
 0x258   : > { %2810 = vmatpush2.xpose.msra.mxu0 %v861_v4  ;;  %2881 = vmatpush2.xpose.msra.mxu1 %v863_v5  ;;  %v385_v4 = vld [vmem:[%s5187_s22 + $0x380] sm:$0xff]  ;;  %v387_v5 = vld [vmem:[%s5187_s22 + $0x390] sm:$0xff] }
 0x259   : > { %2811 = vmatprep.subr.mxu0 %v830_v6  ;;  %2882 = vmatprep.subr.mxu1 %v832_v7  ;;  %v354_v6 = vld [vmem:[%s5187_s22 + $0x288] sm:$0xff]  ;;  %v356_v7 = vld [vmem:[%s5187_s22 + $0x298] sm:$0xff] }
 0x25c   : > { %2812 = vmatpush2.xpose.msra.mxu0 %v829_v8  ;;  %2883 = vmatpush2.xpose.msra.mxu1 %v831_v9  ;;  %v353_v8 = vld [vmem:[%s5187_s22 + $0x280] sm:$0xff]  ;;  %v355_v9 = vld [vmem:[%s5187_s22 + $0x290] sm:$0xff] }
 0x25d   : > { %2813 = vmatprep.subr.mxu0 %v798_v10  ;;  %2884 = vmatprep.subr.mxu1 %v800_v11  ;;  %v322_v10 = vld [vmem:[%s5187_s22 + $0x188] sm:$0xff]  ;;  %v324_v11 = vld [vmem:[%s5187_s22 + $0x198] sm:$0xff] }
 0x260   : > { %2814 = vmatpush2.xpose.msra.mxu0 %v797_v12  ;;  %2885 = vmatpush2.xpose.msra.mxu1 %v799_v13  ;;  %v321_v12 = vld [vmem:[%s5187_s22 + $0x180] sm:$0xff]  ;;  %v323_v13 = vld [vmem:[%s5187_s22 + $0x190] sm:$0xff] }
 0x261   : > { %2893 = vmatprep.subr.mxu0 %v770_v14  ;;  %2964 = vmatprep.subr.mxu1 %v772_v15  ;;  %v290_v14 = vld [vmem:[%s5187_s22 + $0x88] sm:$0xff]  ;;  %v292_v15 = vld [vmem:[%s5187_s22 + $0x98] sm:$0xff] }
 0x263   : > { %2816 = vmatmul.mubr.f32.vlgmr.msra.gmra.mxu0 %v253_v16  ;;  %2887 = vmatmul.mubr.f32.vlgmr.msra.gmra.mxu1 %v255_v17  ;;  %v289_v16 = vld [vmem:[%s5187_s22 + $0x80] sm:$0xff]  ;;  %v291_v17 = vld [vmem:[%s5187_s22 + $0x90] sm:$0xff] }
 0x264   : > { %2894 = vmatpush1.xpose.msra.mxu0 %v769_v18  ;;  %2965 = vmatpush1.xpose.msra.mxu1 %v771_v19  ;;  %v1282_v18 = vld [vmem:[%s5187_s22 + $0x1f88] sm:$0xff]  ;;  %v1284_v19 = vld [vmem:[%s5187_s22 + $0x1f98] sm:$0xff] }
 0x265   : > { %2895 = vmatprep.subr.mxu0 %v738_v20  ;;  %2966 = vmatprep.subr.mxu1 %v740_v21  ;;  %v1281_v20 = vld [vmem:[%s5187_s22 + $0x1f80] sm:$0xff]  ;;  %v1283_v21 = vld [vmem:[%s5187_s22 + $0x1f90] sm:$0xff] }
 0x266   : > { %2957 = vmatprep.mubr.f32.mxu0 %v258_v22  ;;  %3028 = vmatprep.mubr.f32.mxu1 %v260_v23  ;;  %v1250_v22 = vld [vmem:[%s5187_s22 + $0x1e88] sm:$0xff]  ;;  %v1252_v23 = vld [vmem:[%s5187_s22 + $0x1e98] sm:$0xff] }
 0x268   : > { %2896 = vmatpush1.xpose.msra.mxu0 %v737_v24  ;;  %2967 = vmatpush1.xpose.msra.mxu1 %v739_v25  ;;  %v1249_v24 = vld [vmem:[%s5187_s22 + $0x1e80] sm:$0xff]  ;;  %v1251_v25 = vld [vmem:[%s5187_s22 + $0x1e90] sm:$0xff] }
 0x269   : > { %2897 = vmatprep.subr.mxu0 %v706_v26  ;;  %2968 = vmatprep.subr.mxu1 %v708_v27  ;;  %v1218_v26 = vld [vmem:[%s5187_s22 + $0x1d88] sm:$0xff]  ;;  %v1220_v27 = vld [vmem:[%s5187_s22 + $0x1d98] sm:$0xff] }
 0x26c   : > { %2898 = vmatpush1.xpose.msra.mxu0 %v705_v28  ;;  %2969 = vmatpush1.xpose.msra.mxu1 %v707_v29  ;;  %v1217_v28 = vld [vmem:[%s5187_s22 + $0x1d80] sm:$0xff]  ;;  %v1219_v29 = vld [vmem:[%s5187_s22 + $0x1d90] sm:$0xff] }
 0x26d   : > { %2899 = vmatprep.subr.mxu0 %v674_v30  ;;  %2970 = vmatprep.subr.mxu1 %v676_v31  ;;  %v1186_v30 = vld [vmem:[%s5187_s22 + $0x1c88] sm:$0xff]  ;;  %v1188_v31 = vld [vmem:[%s5187_s22 + $0x1c98] sm:$0xff] }
 0x270   : > { %2900 = vmatpush1.xpose.msra.mxu0 %v673_v32  ;;  %2971 = vmatpush1.xpose.msra.mxu1 %v675_v33  ;;  %v1185_v32 = vld [vmem:[%s5187_s22 + $0x1c80] sm:$0xff]  ;;  %v1187_v33 = vld [vmem:[%s5187_s22 + $0x1c90] sm:$0xff] }
 0x271   : > { %2901 = vmatprep.subr.mxu0 %v642_v34  ;;  %2972 = vmatprep.subr.mxu1 %v644_v35  ;;  %v1154_v34 = vld [vmem:[%s5187_s22 + $0x1b88] sm:$0xff]  ;;  %v1156_v35 = vld [vmem:[%s5187_s22 + $0x1b98] sm:$0xff] }
 0x274   : > { %2902 = vmatpush1.xpose.msra.mxu0 %v641_v36  ;;  %2973 = vmatpush1.xpose.msra.mxu1 %v643_v37  ;;  %v1153_v36 = vld [vmem:[%s5187_s22 + $0x1b80] sm:$0xff]  ;;  %v1155_v37 = vld [vmem:[%s5187_s22 + $0x1b90] sm:$0xff] }
 0x275   : > { %2903 = vmatprep.subr.mxu0 %v610_v38  ;;  %2974 = vmatprep.subr.mxu1 %v612_v39  ;;  %v1122_v38 = vld [vmem:[%s5187_s22 + $0x1a88] sm:$0xff]  ;;  %v1124_v39 = vld [vmem:[%s5187_s22 + $0x1a98] sm:$0xff] }
 0x278   : > { %2904 = vmatpush1.xpose.msra.mxu0 %v609_v40  ;;  %2975 = vmatpush1.xpose.msra.mxu1 %v611_v41  ;;  %v1121_v40 = vld [vmem:[%s5187_s22 + $0x1a80] sm:$0xff]  ;;  %v1123_v41 = vld [vmem:[%s5187_s22 + $0x1a90] sm:$0xff] }
 0x279   : > { %2905 = vmatprep.subr.mxu0 %v578_v42  ;;  %2976 = vmatprep.subr.mxu1 %v580_v43  ;;  %v1090_v42 = vld [vmem:[%s5187_s22 + $0x1988] sm:$0xff]  ;;  %v1092_v43 = vld [vmem:[%s5187_s22 + $0x1998] sm:$0xff] }
 0x27c   : > { %2906 = vmatpush1.xpose.msra.mxu0 %v577_v44  ;;  %2977 = vmatpush1.xpose.msra.mxu1 %v579_v45  ;;  %v1089_v44 = vld [vmem:[%s5187_s22 + $0x1980] sm:$0xff]  ;;  %v1091_v45 = vld [vmem:[%s5187_s22 + $0x1990] sm:$0xff] }
 0x27d   : > { %2907 = vmatprep.subr.mxu0 %v546_v46  ;;  %2978 = vmatprep.subr.mxu1 %v548_v47  ;;  %v1058_v46 = vld [vmem:[%s5187_s22 + $0x1888] sm:$0xff]  ;;  %v1060_v47 = vld [vmem:[%s5187_s22 + $0x1898] sm:$0xff] }
 0x280   : > { %2908 = vmatpush1.xpose.msra.mxu0 %v545_v48  ;;  %2979 = vmatpush1.xpose.msra.mxu1 %v547_v49  ;;  %v1057_v48 = vld [vmem:[%s5187_s22 + $0x1880] sm:$0xff]  ;;  %v1059_v49 = vld [vmem:[%s5187_s22 + $0x1890] sm:$0xff] }
 0x281   : > { %2909 = vmatprep.subr.mxu0 %v514_v50  ;;  %2980 = vmatprep.subr.mxu1 %v516_v51  ;;  %v1026_v50 = vld [vmem:[%s5187_s22 + $0x1788] sm:$0xff]  ;;  %v1028_v51 = vld [vmem:[%s5187_s22 + $0x1798] sm:$0xff] }
 0x284   : > { %2910 = vmatpush1.xpose.msra.mxu0 %v513_v52  ;;  %2981 = vmatpush1.xpose.msra.mxu1 %v515_v53  ;;  %v1025_v52 = vld [vmem:[%s5187_s22 + $0x1780] sm:$0xff]  ;;  %v1027_v53 = vld [vmem:[%s5187_s22 + $0x1790] sm:$0xff] }
 0x285   : > { %2911 = vmatprep.subr.mxu0 %v482_v54  ;;  %2982 = vmatprep.subr.mxu1 %v484_v55  ;;  %v994_v54 = vld [vmem:[%s5187_s22 + $0x1688] sm:$0xff]  ;;  %v996_v55 = vld [vmem:[%s5187_s22 + $0x1698] sm:$0xff] }
 0x288   : > { %2912 = vmatpush1.xpose.msra.mxu0 %v481_v56  ;;  %2983 = vmatpush1.xpose.msra.mxu1 %v483_v57  ;;  %v993_v56 = vld [vmem:[%s5187_s22 + $0x1680] sm:$0xff]  ;;  %v995_v57 = vld [vmem:[%s5187_s22 + $0x1690] sm:$0xff] }
 0x289   : > { %2913 = vmatprep.subr.mxu0 %v450_v58  ;;  %2984 = vmatprep.subr.mxu1 %v452_v59  ;;  %v962_v58 = vld [vmem:[%s5187_s22 + $0x1588] sm:$0xff]  ;;  %v964_v59 = vld [vmem:[%s5187_s22 + $0x1598] sm:$0xff] }
 0x28c   : > { %2914 = vmatpush1.xpose.msra.mxu0 %v449_v60  ;;  %2985 = vmatpush1.xpose.msra.mxu1 %v451_v61  ;;  %v961_v60 = vld [vmem:[%s5187_s22 + $0x1580] sm:$0xff]  ;;  %v963_v61 = vld [vmem:[%s5187_s22 + $0x1590] sm:$0xff] }
 0x28d   : > { %2915 = vmatprep.subr.mxu0 %v418_v62  ;;  %2986 = vmatprep.subr.mxu1 %v420_v63  ;;  %v930_v62 = vld [vmem:[%s5187_s22 + $0x1488] sm:$0xff]  ;;  %v932_v63 = vld [vmem:[%s5187_s22 + $0x1498] sm:$0xff] }
 0x290   : > { %2916 = vmatpush1.xpose.msra.mxu0 %v417_v0  ;;  %2987 = vmatpush1.xpose.msra.mxu1 %v419_v1  ;;  %v929_v0 = vld [vmem:[%s5187_s22 + $0x1480] sm:$0xff]  ;;  %v931_v1 = vld [vmem:[%s5187_s22 + $0x1490] sm:$0xff] }
 0x291   : > { %2917 = vmatprep.subr.mxu0 %v386_v2  ;;  %2988 = vmatprep.subr.mxu1 %v388_v3  ;;  %v898_v2 = vld [vmem:[%s5187_s22 + $0x1388] sm:$0xff]  ;;  %v900_v3 = vld [vmem:[%s5187_s22 + $0x1398] sm:$0xff] }
 0x294   : > { %2918 = vmatpush1.xpose.msra.mxu0 %v385_v4  ;;  %2989 = vmatpush1.xpose.msra.mxu1 %v387_v5  ;;  %v897_v4 = vld [vmem:[%s5187_s22 + $0x1380] sm:$0xff]  ;;  %v899_v5 = vld [vmem:[%s5187_s22 + $0x1390] sm:$0xff] }
 0x295   : > { %2919 = vmatprep.subr.mxu0 %v354_v6  ;;  %2990 = vmatprep.subr.mxu1 %v356_v7  ;;  %v866_v6 = vld [vmem:[%s5187_s22 + $0x1288] sm:$0xff]  ;;  %v868_v7 = vld [vmem:[%s5187_s22 + $0x1298] sm:$0xff] }
 0x298   : > { %2920 = vmatpush1.xpose.msra.mxu0 %v353_v8  ;;  %2991 = vmatpush1.xpose.msra.mxu1 %v355_v9  ;;  %v865_v8 = vld [vmem:[%s5187_s22 + $0x1280] sm:$0xff]  ;;  %v867_v9 = vld [vmem:[%s5187_s22 + $0x1290] sm:$0xff] }
 0x299   : > { %2921 = vmatprep.subr.mxu0 %v322_v10  ;;  %2992 = vmatprep.subr.mxu1 %v324_v11  ;;  %v834_v10 = vld [vmem:[%s5187_s22 + $0x1188] sm:$0xff]  ;;  %v836_v11 = vld [vmem:[%s5187_s22 + $0x1198] sm:$0xff] }
 0x29c   : > { %2922 = vmatpush1.xpose.msra.mxu0 %v321_v12  ;;  %2993 = vmatpush1.xpose.msra.mxu1 %v323_v13  ;;  %v833_v12 = vld [vmem:[%s5187_s22 + $0x1180] sm:$0xff]  ;;  %v835_v13 = vld [vmem:[%s5187_s22 + $0x1190] sm:$0xff] }
 0x29d   : > { %2923 = vmatprep.subr.mxu0 %v290_v14  ;;  %2994 = vmatprep.subr.mxu1 %v292_v15  ;;  %v802_v14 = vld [vmem:[%s5187_s22 + $0x1088] sm:$0xff]  ;;  %v804_v15 = vld [vmem:[%s5187_s22 + $0x1098] sm:$0xff] }
 0x2a0   : > { %2924 = vmatpush1.xpose.msra.mxu0 %v289_v16  ;;  %2995 = vmatpush1.xpose.msra.mxu1 %v291_v17  ;;  %v801_v16 = vld [vmem:[%s5187_s22 + $0x1080] sm:$0xff]  ;;  %v803_v17 = vld [vmem:[%s5187_s22 + $0x1090] sm:$0xff] }
 0x2a1   : > { %2925 = vmatprep.subr.mxu0 %v1282_v18  ;;  %2996 = vmatprep.subr.mxu1 %v1284_v19  ;;  %v774_v18 = vld [vmem:[%s5187_s22 + $0xfa8] sm:$0xff]  ;;  %v776_v19 = vld [vmem:[%s5187_s22 + $0xfb8] sm:$0xff] }
 0x2a4   : > { %2926 = vmatpush2.xpose.msra.mxu0 %v1281_v20  ;;  %2997 = vmatpush2.xpose.msra.mxu1 %v1283_v21  ;;  %v257_v20 = vld [vmem:[#allocation2 + $0x80] sm:$0xff]  ;;  %v259_v21 = vld [vmem:[#allocation2 + $0x90] sm:$0xff] }
 0x2a5   : > { %2927 = vmatprep.subr.mxu0 %v1250_v22  ;;  %2998 = vmatprep.subr.mxu1 %v1252_v23  ;;  %v773_v22 = vld [vmem:[%s5187_s22 + $0xfa0] sm:$0xff]  ;;  %v775_v23 = vld [vmem:[%s5187_s22 + $0xfb0] sm:$0xff] }
 0x2a8   : > { %2928 = vmatpush2.xpose.msra.mxu0 %v1249_v24  ;;  %2999 = vmatpush2.xpose.msra.mxu1 %v1251_v25  ;;  %v742_v24 = vld [vmem:[%s5187_s22 + $0xea8] sm:$0xff]  ;;  %v744_v25 = vld [vmem:[%s5187_s22 + $0xeb8] sm:$0xff] }
 0x2a9   : > { %2929 = vmatprep.subr.mxu0 %v1218_v26  ;;  %3000 = vmatprep.subr.mxu1 %v1220_v27  ;;  %v262_v26 = vld [vmem:[#allocation2 + $0xa8] sm:$0xff]  ;;  %v264_v27 = vld [vmem:[#allocation2 + $0xb8] sm:$0xff] }
 0x2ac   : > { %2930 = vmatpush2.xpose.msra.mxu0 %v1217_v28  ;;  %3001 = vmatpush2.xpose.msra.mxu1 %v1219_v29  ;;  %v741_v28 = vld [vmem:[%s5187_s22 + $0xea0] sm:$0xff]  ;;  %v743_v29 = vld [vmem:[%s5187_s22 + $0xeb0] sm:$0xff] }
 0x2ad   : > { %2931 = vmatprep.subr.mxu0 %v1186_v30  ;;  %3002 = vmatprep.subr.mxu1 %v1188_v31  ;;  %v710_v30 = vld [vmem:[%s5187_s22 + $0xda8] sm:$0xff]  ;;  %v712_v31 = vld [vmem:[%s5187_s22 + $0xdb8] sm:$0xff] }
 0x2b0   : > { %2932 = vmatpush2.xpose.msra.mxu0 %v1185_v32  ;;  %3003 = vmatpush2.xpose.msra.mxu1 %v1187_v33  ;;  %v709_v32 = vld [vmem:[%s5187_s22 + $0xda0] sm:$0xff]  ;;  %v711_v33 = vld [vmem:[%s5187_s22 + $0xdb0] sm:$0xff] }
 0x2b1   : > { %2933 = vmatprep.subr.mxu0 %v1154_v34  ;;  %3004 = vmatprep.subr.mxu1 %v1156_v35  ;;  %v678_v34 = vld [vmem:[%s5187_s22 + $0xca8] sm:$0xff]  ;;  %v680_v35 = vld [vmem:[%s5187_s22 + $0xcb8] sm:$0xff] }
 0x2b4   : > { %2934 = vmatpush2.xpose.msra.mxu0 %v1153_v36  ;;  %3005 = vmatpush2.xpose.msra.mxu1 %v1155_v37  ;;  %v677_v36 = vld [vmem:[%s5187_s22 + $0xca0] sm:$0xff]  ;;  %v679_v37 = vld [vmem:[%s5187_s22 + $0xcb0] sm:$0xff] }
 0x2b5   : > { %2935 = vmatprep.subr.mxu0 %v1122_v38  ;;  %3006 = vmatprep.subr.mxu1 %v1124_v39  ;;  %v646_v38 = vld [vmem:[%s5187_s22 + $0xba8] sm:$0xff]  ;;  %v648_v39 = vld [vmem:[%s5187_s22 + $0xbb8] sm:$0xff] }
 0x2b8   : > { %2936 = vmatpush2.xpose.msra.mxu0 %v1121_v40  ;;  %3007 = vmatpush2.xpose.msra.mxu1 %v1123_v41  ;;  %v645_v40 = vld [vmem:[%s5187_s22 + $0xba0] sm:$0xff]  ;;  %v647_v41 = vld [vmem:[%s5187_s22 + $0xbb0] sm:$0xff] }
 0x2b9   : > { %2937 = vmatprep.subr.mxu0 %v1090_v42  ;;  %3008 = vmatprep.subr.mxu1 %v1092_v43  ;;  %v614_v42 = vld [vmem:[%s5187_s22 + $0xaa8] sm:$0xff]  ;;  %v616_v43 = vld [vmem:[%s5187_s22 + $0xab8] sm:$0xff] }
 0x2bc   : > { %2938 = vmatpush2.xpose.msra.mxu0 %v1089_v44  ;;  %3009 = vmatpush2.xpose.msra.mxu1 %v1091_v45  ;;  %v613_v44 = vld [vmem:[%s5187_s22 + $0xaa0] sm:$0xff]  ;;  %v615_v45 = vld [vmem:[%s5187_s22 + $0xab0] sm:$0xff] }
 0x2bd   : > { %2939 = vmatprep.subr.mxu0 %v1058_v46  ;;  %3010 = vmatprep.subr.mxu1 %v1060_v47  ;;  %v582_v46 = vld [vmem:[%s5187_s22 + $0x9a8] sm:$0xff]  ;;  %v584_v47 = vld [vmem:[%s5187_s22 + $0x9b8] sm:$0xff] }
 0x2c0   : > { %2940 = vmatpush2.xpose.msra.mxu0 %v1057_v48  ;;  %3011 = vmatpush2.xpose.msra.mxu1 %v1059_v49  ;;  %v581_v48 = vld [vmem:[%s5187_s22 + $0x9a0] sm:$0xff]  ;;  %v583_v49 = vld [vmem:[%s5187_s22 + $0x9b0] sm:$0xff] }
 0x2c1   : > { %2941 = vmatprep.subr.mxu0 %v1026_v50  ;;  %3012 = vmatprep.subr.mxu1 %v1028_v51  ;;  %v550_v50 = vld [vmem:[%s5187_s22 + $0x8a8] sm:$0xff]  ;;  %v552_v51 = vld [vmem:[%s5187_s22 + $0x8b8] sm:$0xff] }
 0x2c4   : > { %2942 = vmatpush2.xpose.msra.mxu0 %v1025_v52  ;;  %3013 = vmatpush2.xpose.msra.mxu1 %v1027_v53  ;;  %v549_v52 = vld [vmem:[%s5187_s22 + $0x8a0] sm:$0xff]  ;;  %v551_v53 = vld [vmem:[%s5187_s22 + $0x8b0] sm:$0xff] }
 0x2c5   : > { %2943 = vmatprep.subr.mxu0 %v994_v54  ;;  %3014 = vmatprep.subr.mxu1 %v996_v55  ;;  %v518_v54 = vld [vmem:[%s5187_s22 + $0x7a8] sm:$0xff]  ;;  %v520_v55 = vld [vmem:[%s5187_s22 + $0x7b8] sm:$0xff] }
 0x2c8   : > { %2944 = vmatpush2.xpose.msra.mxu0 %v993_v56  ;;  %3015 = vmatpush2.xpose.msra.mxu1 %v995_v57  ;;  %v517_v56 = vld [vmem:[%s5187_s22 + $0x7a0] sm:$0xff]  ;;  %v519_v57 = vld [vmem:[%s5187_s22 + $0x7b0] sm:$0xff] }
 0x2c9   : > { %2945 = vmatprep.subr.mxu0 %v962_v58  ;;  %3016 = vmatprep.subr.mxu1 %v964_v59  ;;  %v486_v58 = vld [vmem:[%s5187_s22 + $0x6a8] sm:$0xff]  ;;  %v488_v59 = vld [vmem:[%s5187_s22 + $0x6b8] sm:$0xff] }
 0x2cc   : > { %2946 = vmatpush2.xpose.msra.mxu0 %v961_v60  ;;  %3017 = vmatpush2.xpose.msra.mxu1 %v963_v61  ;;  %v485_v60 = vld [vmem:[%s5187_s22 + $0x6a0] sm:$0xff]  ;;  %v487_v61 = vld [vmem:[%s5187_s22 + $0x6b0] sm:$0xff] }
 0x2cd   : > { %2947 = vmatprep.subr.mxu0 %v930_v62  ;;  %3018 = vmatprep.subr.mxu1 %v932_v63  ;;  %v454_v62 = vld [vmem:[%s5187_s22 + $0x5a8] sm:$0xff]  ;;  %v456_v63 = vld [vmem:[%s5187_s22 + $0x5b8] sm:$0xff] }
 0x2d0   : > { %2948 = vmatpush2.xpose.msra.mxu0 %v929_v0  ;;  %3019 = vmatpush2.xpose.msra.mxu1 %v931_v1  ;;  %v453_v0 = vld [vmem:[%s5187_s22 + $0x5a0] sm:$0xff]  ;;  %v455_v1 = vld [vmem:[%s5187_s22 + $0x5b0] sm:$0xff] }
 0x2d1   : > { %2949 = vmatprep.subr.mxu0 %v898_v2  ;;  %3020 = vmatprep.subr.mxu1 %v900_v3  ;;  %v422_v2 = vld [vmem:[%s5187_s22 + $0x4a8] sm:$0xff]  ;;  %v424_v3 = vld [vmem:[%s5187_s22 + $0x4b8] sm:$0xff] }
 0x2d4   : > { %2950 = vmatpush2.xpose.msra.mxu0 %v897_v4  ;;  %3021 = vmatpush2.xpose.msra.mxu1 %v899_v5  ;;  %v421_v4 = vld [vmem:[%s5187_s22 + $0x4a0] sm:$0xff]  ;;  %v423_v5 = vld [vmem:[%s5187_s22 + $0x4b0] sm:$0xff] }
 0x2d5   : > { %2951 = vmatprep.subr.mxu0 %v866_v6  ;;  %3022 = vmatprep.subr.mxu1 %v868_v7  ;;  %v390_v6 = vld [vmem:[%s5187_s22 + $0x3a8] sm:$0xff]  ;;  %v392_v7 = vld [vmem:[%s5187_s22 + $0x3b8] sm:$0xff] }
 0x2d8   : > { %2952 = vmatpush2.xpose.msra.mxu0 %v865_v8  ;;  %3023 = vmatpush2.xpose.msra.mxu1 %v867_v9  ;;  %v389_v8 = vld [vmem:[%s5187_s22 + $0x3a0] sm:$0xff]  ;;  %v391_v9 = vld [vmem:[%s5187_s22 + $0x3b0] sm:$0xff] }
 0x2d9   : > { %2953 = vmatprep.subr.mxu0 %v834_v10  ;;  %3024 = vmatprep.subr.mxu1 %v836_v11  ;;  %v358_v10 = vld [vmem:[%s5187_s22 + $0x2a8] sm:$0xff]  ;;  %v360_v11 = vld [vmem:[%s5187_s22 + $0x2b8] sm:$0xff] }
 0x2dc   : > { %2954 = vmatpush2.xpose.msra.mxu0 %v833_v12  ;;  %3025 = vmatpush2.xpose.msra.mxu1 %v835_v13  ;;  %v357_v12 = vld [vmem:[%s5187_s22 + $0x2a0] sm:$0xff]  ;;  %v359_v13 = vld [vmem:[%s5187_s22 + $0x2b0] sm:$0xff] }
 0x2dd   : > { %2955 = vmatprep.subr.mxu0 %v802_v14  ;;  %3026 = vmatprep.subr.mxu1 %v804_v15  ;;  %v326_v14 = vld [vmem:[%s5187_s22 + $0x1a8] sm:$0xff]  ;;  %v328_v15 = vld [vmem:[%s5187_s22 + $0x1b8] sm:$0xff] }
 0x2e0   : > { %2956 = vmatpush2.xpose.msra.mxu0 %v801_v16  ;;  %3027 = vmatpush2.xpose.msra.mxu1 %v803_v17  ;;  %v325_v16 = vld [vmem:[%s5187_s22 + $0x1a0] sm:$0xff]  ;;  %v327_v17 = vld [vmem:[%s5187_s22 + $0x1b0] sm:$0xff] }
 0x2e1   : > { %3035 = vmatprep.subr.mxu0 %v774_v18  ;;  %3106 = vmatprep.subr.mxu1 %v776_v19  ;;  %v294_v18 = vld [vmem:[%s5187_s22 + $0xa8] sm:$0xff]  ;;  %v296_v19 = vld [vmem:[%s5187_s22 + $0xb8] sm:$0xff] }
 0x2e3   : > { %2958 = vmatmul.mubr.f32.vlgmr.msra.gmra.mxu0 %v257_v20  ;;  %3029 = vmatmul.mubr.f32.vlgmr.msra.gmra.mxu1 %v259_v21  ;;  %v293_v20 = vld [vmem:[%s5187_s22 + $0xa0] sm:$0xff]  ;;  %v295_v21 = vld [vmem:[%s5187_s22 + $0xb0] sm:$0xff] }
 0x2e4   : > { %3036 = vmatpush1.xpose.msra.mxu0 %v773_v22  ;;  %3107 = vmatpush1.xpose.msra.mxu1 %v775_v23  ;;  %v1286_v22 = vld [vmem:[%s5187_s22 + $0x1fa8] sm:$0xff]  ;;  %v1288_v23 = vld [vmem:[%s5187_s22 + $0x1fb8] sm:$0xff] }
 0x2e5   : > { %3037 = vmatprep.subr.mxu0 %v742_v24  ;;  %3108 = vmatprep.subr.mxu1 %v744_v25  ;;  %v1285_v24 = vld [vmem:[%s5187_s22 + $0x1fa0] sm:$0xff]  ;;  %v1287_v25 = vld [vmem:[%s5187_s22 + $0x1fb0] sm:$0xff] }
 0x2e6   : > { %3099 = vmatprep.mubr.f32.mxu0 %v262_v26  ;;  %3170 = vmatprep.mubr.f32.mxu1 %v264_v27  ;;  %v1254_v26 = vld [vmem:[%s5187_s22 + $0x1ea8] sm:$0xff]  ;;  %v1256_v27 = vld [vmem:[%s5187_s22 + $0x1eb8] sm:$0xff] }
 0x2e8   : > { %3038 = vmatpush1.xpose.msra.mxu0 %v741_v28  ;;  %3109 = vmatpush1.xpose.msra.mxu1 %v743_v29  ;;  %v1253_v28 = vld [vmem:[%s5187_s22 + $0x1ea0] sm:$0xff]  ;;  %v1255_v29 = vld [vmem:[%s5187_s22 + $0x1eb0] sm:$0xff] }
 0x2e9   : > { %3039 = vmatprep.subr.mxu0 %v710_v30  ;;  %3110 = vmatprep.subr.mxu1 %v712_v31  ;;  %v1222_v30 = vld [vmem:[%s5187_s22 + $0x1da8] sm:$0xff]  ;;  %v1224_v31 = vld [vmem:[%s5187_s22 + $0x1db8] sm:$0xff] }
 0x2ec   : > { %3040 = vmatpush1.xpose.msra.mxu0 %v709_v32  ;;  %3111 = vmatpush1.xpose.msra.mxu1 %v711_v33  ;;  %v1221_v32 = vld [vmem:[%s5187_s22 + $0x1da0] sm:$0xff]  ;;  %v1223_v33 = vld [vmem:[%s5187_s22 + $0x1db0] sm:$0xff] }
 0x2ed   : > { %3041 = vmatprep.subr.mxu0 %v678_v34  ;;  %3112 = vmatprep.subr.mxu1 %v680_v35  ;;  %v1190_v34 = vld [vmem:[%s5187_s22 + $0x1ca8] sm:$0xff]  ;;  %v1192_v35 = vld [vmem:[%s5187_s22 + $0x1cb8] sm:$0xff] }
 0x2f0   : > { %3042 = vmatpush1.xpose.msra.mxu0 %v677_v36  ;;  %3113 = vmatpush1.xpose.msra.mxu1 %v679_v37  ;;  %v1189_v36 = vld [vmem:[%s5187_s22 + $0x1ca0] sm:$0xff]  ;;  %v1191_v37 = vld [vmem:[%s5187_s22 + $0x1cb0] sm:$0xff] }
 0x2f1   : > { %3043 = vmatprep.subr.mxu0 %v646_v38  ;;  %3114 = vmatprep.subr.mxu1 %v648_v39  ;;  %v1158_v38 = vld [vmem:[%s5187_s22 + $0x1ba8] sm:$0xff]  ;;  %v1160_v39 = vld [vmem:[%s5187_s22 + $0x1bb8] sm:$0xff] }
 0x2f4   : > { %3044 = vmatpush1.xpose.msra.mxu0 %v645_v40  ;;  %3115 = vmatpush1.xpose.msra.mxu1 %v647_v41  ;;  %v1157_v40 = vld [vmem:[%s5187_s22 + $0x1ba0] sm:$0xff]  ;;  %v1159_v41 = vld [vmem:[%s5187_s22 + $0x1bb0] sm:$0xff] }
 0x2f5   : > { %3045 = vmatprep.subr.mxu0 %v614_v42  ;;  %3116 = vmatprep.subr.mxu1 %v616_v43  ;;  %v1126_v42 = vld [vmem:[%s5187_s22 + $0x1aa8] sm:$0xff]  ;;  %v1128_v43 = vld [vmem:[%s5187_s22 + $0x1ab8] sm:$0xff] }
 0x2f8   : > { %3046 = vmatpush1.xpose.msra.mxu0 %v613_v44  ;;  %3117 = vmatpush1.xpose.msra.mxu1 %v615_v45  ;;  %v1125_v44 = vld [vmem:[%s5187_s22 + $0x1aa0] sm:$0xff]  ;;  %v1127_v45 = vld [vmem:[%s5187_s22 + $0x1ab0] sm:$0xff] }
 0x2f9   : > { %3047 = vmatprep.subr.mxu0 %v582_v46  ;;  %3118 = vmatprep.subr.mxu1 %v584_v47  ;;  %v1094_v46 = vld [vmem:[%s5187_s22 + $0x19a8] sm:$0xff]  ;;  %v1096_v47 = vld [vmem:[%s5187_s22 + $0x19b8] sm:$0xff] }
 0x2fc   : > { %3048 = vmatpush1.xpose.msra.mxu0 %v581_v48  ;;  %3119 = vmatpush1.xpose.msra.mxu1 %v583_v49  ;;  %v1093_v48 = vld [vmem:[%s5187_s22 + $0x19a0] sm:$0xff]  ;;  %v1095_v49 = vld [vmem:[%s5187_s22 + $0x19b0] sm:$0xff] }
 0x2fd   : > { %3049 = vmatprep.subr.mxu0 %v550_v50  ;;  %3120 = vmatprep.subr.mxu1 %v552_v51  ;;  %v1062_v50 = vld [vmem:[%s5187_s22 + $0x18a8] sm:$0xff]  ;;  %v1064_v51 = vld [vmem:[%s5187_s22 + $0x18b8] sm:$0xff] }
 0x300   : > { %3050 = vmatpush1.xpose.msra.mxu0 %v549_v52  ;;  %3121 = vmatpush1.xpose.msra.mxu1 %v551_v53  ;;  %v1061_v52 = vld [vmem:[%s5187_s22 + $0x18a0] sm:$0xff]  ;;  %v1063_v53 = vld [vmem:[%s5187_s22 + $0x18b0] sm:$0xff] }
 0x301   : > { %3051 = vmatprep.subr.mxu0 %v518_v54  ;;  %3122 = vmatprep.subr.mxu1 %v520_v55  ;;  %v1030_v54 = vld [vmem:[%s5187_s22 + $0x17a8] sm:$0xff]  ;;  %v1032_v55 = vld [vmem:[%s5187_s22 + $0x17b8] sm:$0xff] }
 0x304   : > { %3052 = vmatpush1.xpose.msra.mxu0 %v517_v56  ;;  %3123 = vmatpush1.xpose.msra.mxu1 %v519_v57  ;;  %v1029_v56 = vld [vmem:[%s5187_s22 + $0x17a0] sm:$0xff]  ;;  %v1031_v57 = vld [vmem:[%s5187_s22 + $0x17b0] sm:$0xff] }
 0x305   : > { %3053 = vmatprep.subr.mxu0 %v486_v58  ;;  %3124 = vmatprep.subr.mxu1 %v488_v59  ;;  %v998_v58 = vld [vmem:[%s5187_s22 + $0x16a8] sm:$0xff]  ;;  %v1000_v59 = vld [vmem:[%s5187_s22 + $0x16b8] sm:$0xff] }
 0x308   : > { %3054 = vmatpush1.xpose.msra.mxu0 %v485_v60  ;;  %3125 = vmatpush1.xpose.msra.mxu1 %v487_v61  ;;  %v997_v60 = vld [vmem:[%s5187_s22 + $0x16a0] sm:$0xff]  ;;  %v999_v61 = vld [vmem:[%s5187_s22 + $0x16b0] sm:$0xff] }
 0x309   : > { %3055 = vmatprep.subr.mxu0 %v454_v62  ;;  %3126 = vmatprep.subr.mxu1 %v456_v63  ;;  %v966_v62 = vld [vmem:[%s5187_s22 + $0x15a8] sm:$0xff]  ;;  %v968_v63 = vld [vmem:[%s5187_s22 + $0x15b8] sm:$0xff] }
 0x30c   : > { %3056 = vmatpush1.xpose.msra.mxu0 %v453_v0  ;;  %3127 = vmatpush1.xpose.msra.mxu1 %v455_v1  ;;  %v965_v0 = vld [vmem:[%s5187_s22 + $0x15a0] sm:$0xff]  ;;  %v967_v1 = vld [vmem:[%s5187_s22 + $0x15b0] sm:$0xff] }
 0x30d   : > { %3057 = vmatprep.subr.mxu0 %v422_v2  ;;  %3128 = vmatprep.subr.mxu1 %v424_v3  ;;  %v934_v2 = vld [vmem:[%s5187_s22 + $0x14a8] sm:$0xff]  ;;  %v936_v3 = vld [vmem:[%s5187_s22 + $0x14b8] sm:$0xff] }
 0x310   : > { %3058 = vmatpush1.xpose.msra.mxu0 %v421_v4  ;;  %3129 = vmatpush1.xpose.msra.mxu1 %v423_v5  ;;  %v933_v4 = vld [vmem:[%s5187_s22 + $0x14a0] sm:$0xff]  ;;  %v935_v5 = vld [vmem:[%s5187_s22 + $0x14b0] sm:$0xff] }
 0x311   : > { %3059 = vmatprep.subr.mxu0 %v390_v6  ;;  %3130 = vmatprep.subr.mxu1 %v392_v7  ;;  %v902_v6 = vld [vmem:[%s5187_s22 + $0x13a8] sm:$0xff]  ;;  %v904_v7 = vld [vmem:[%s5187_s22 + $0x13b8] sm:$0xff] }
 0x314   : > { %3060 = vmatpush1.xpose.msra.mxu0 %v389_v8  ;;  %3131 = vmatpush1.xpose.msra.mxu1 %v391_v9  ;;  %v901_v8 = vld [vmem:[%s5187_s22 + $0x13a0] sm:$0xff]  ;;  %v903_v9 = vld [vmem:[%s5187_s22 + $0x13b0] sm:$0xff] }
 0x315   : > { %3061 = vmatprep.subr.mxu0 %v358_v10  ;;  %3132 = vmatprep.subr.mxu1 %v360_v11  ;;  %v870_v10 = vld [vmem:[%s5187_s22 + $0x12a8] sm:$0xff]  ;;  %v872_v11 = vld [vmem:[%s5187_s22 + $0x12b8] sm:$0xff] }
 0x318   : > { %3062 = vmatpush1.xpose.msra.mxu0 %v357_v12  ;;  %3133 = vmatpush1.xpose.msra.mxu1 %v359_v13  ;;  %v869_v12 = vld [vmem:[%s5187_s22 + $0x12a0] sm:$0xff]  ;;  %v871_v13 = vld [vmem:[%s5187_s22 + $0x12b0] sm:$0xff] }
 0x319   : > { %3063 = vmatprep.subr.mxu0 %v326_v14  ;;  %3134 = vmatprep.subr.mxu1 %v328_v15  ;;  %v838_v14 = vld [vmem:[%s5187_s22 + $0x11a8] sm:$0xff]  ;;  %v840_v15 = vld [vmem:[%s5187_s22 + $0x11b8] sm:$0xff] }
 0x31c   : > { %3064 = vmatpush1.xpose.msra.mxu0 %v325_v16  ;;  %3135 = vmatpush1.xpose.msra.mxu1 %v327_v17  ;;  %v837_v16 = vld [vmem:[%s5187_s22 + $0x11a0] sm:$0xff]  ;;  %v839_v17 = vld [vmem:[%s5187_s22 + $0x11b0] sm:$0xff] }
 0x31d   : > { %3065 = vmatprep.subr.mxu0 %v294_v18  ;;  %3136 = vmatprep.subr.mxu1 %v296_v19  ;;  %v806_v18 = vld [vmem:[%s5187_s22 + $0x10a8] sm:$0xff]  ;;  %v808_v19 = vld [vmem:[%s5187_s22 + $0x10b8] sm:$0xff] }
 0x320   : > { %3066 = vmatpush1.xpose.msra.mxu0 %v293_v20  ;;  %3137 = vmatpush1.xpose.msra.mxu1 %v295_v21  ;;  %v805_v20 = vld [vmem:[%s5187_s22 + $0x10a0] sm:$0xff]  ;;  %v807_v21 = vld [vmem:[%s5187_s22 + $0x10b0] sm:$0xff] }
 0x321   : > { %3067 = vmatprep.subr.mxu0 %v1286_v22  ;;  %3138 = vmatprep.subr.mxu1 %v1288_v23  ;;  %v778_v22 = vld [vmem:[%s5187_s22 + $0xfc8] sm:$0xff]  ;;  %v780_v23 = vld [vmem:[%s5187_s22 + $0xfd8] sm:$0xff] }
 0x324   : > { %3068 = vmatpush2.xpose.msra.mxu0 %v1285_v24  ;;  %3139 = vmatpush2.xpose.msra.mxu1 %v1287_v25  ;;  %v261_v24 = vld [vmem:[#allocation2 + $0xa0] sm:$0xff]  ;;  %v263_v25 = vld [vmem:[#allocation2 + $0xb0] sm:$0xff] }
 0x325   : > { %3069 = vmatprep.subr.mxu0 %v1254_v26  ;;  %3140 = vmatprep.subr.mxu1 %v1256_v27  ;;  %v777_v26 = vld [vmem:[%s5187_s22 + $0xfc0] sm:$0xff]  ;;  %v779_v27 = vld [vmem:[%s5187_s22 + $0xfd0] sm:$0xff] }
 0x328   : > { %3070 = vmatpush2.xpose.msra.mxu0 %v1253_v28  ;;  %3141 = vmatpush2.xpose.msra.mxu1 %v1255_v29  ;;  %v746_v28 = vld [vmem:[%s5187_s22 + $0xec8] sm:$0xff]  ;;  %v748_v29 = vld [vmem:[%s5187_s22 + $0xed8] sm:$0xff] }
 0x329   : > { %3071 = vmatprep.subr.mxu0 %v1222_v30  ;;  %3142 = vmatprep.subr.mxu1 %v1224_v31  ;;  %v266_v30 = vld [vmem:[#allocation2 + $0xc8] sm:$0xff]  ;;  %v268_v31 = vld [vmem:[#allocation2 + $0xd8] sm:$0xff] }
 0x32c   : > { %3072 = vmatpush2.xpose.msra.mxu0 %v1221_v32  ;;  %3143 = vmatpush2.xpose.msra.mxu1 %v1223_v33  ;;  %v745_v32 = vld [vmem:[%s5187_s22 + $0xec0] sm:$0xff]  ;;  %v747_v33 = vld [vmem:[%s5187_s22 + $0xed0] sm:$0xff] }
 0x32d   : > { %3073 = vmatprep.subr.mxu0 %v1190_v34  ;;  %3144 = vmatprep.subr.mxu1 %v1192_v35  ;;  %v714_v34 = vld [vmem:[%s5187_s22 + $0xdc8] sm:$0xff]  ;;  %v716_v35 = vld [vmem:[%s5187_s22 + $0xdd8] sm:$0xff] }
 0x330   : > { %3074 = vmatpush2.xpose.msra.mxu0 %v1189_v36  ;;  %3145 = vmatpush2.xpose.msra.mxu1 %v1191_v37  ;;  %v713_v36 = vld [vmem:[%s5187_s22 + $0xdc0] sm:$0xff]  ;;  %v715_v37 = vld [vmem:[%s5187_s22 + $0xdd0] sm:$0xff] }
 0x331   : > { %3075 = vmatprep.subr.mxu0 %v1158_v38  ;;  %3146 = vmatprep.subr.mxu1 %v1160_v39  ;;  %v682_v38 = vld [vmem:[%s5187_s22 + $0xcc8] sm:$0xff]  ;;  %v684_v39 = vld [vmem:[%s5187_s22 + $0xcd8] sm:$0xff] }
 0x334   : > { %3076 = vmatpush2.xpose.msra.mxu0 %v1157_v40  ;;  %3147 = vmatpush2.xpose.msra.mxu1 %v1159_v41  ;;  %v681_v40 = vld [vmem:[%s5187_s22 + $0xcc0] sm:$0xff]  ;;  %v683_v41 = vld [vmem:[%s5187_s22 + $0xcd0] sm:$0xff] }
 0x335   : > { %3077 = vmatprep.subr.mxu0 %v1126_v42  ;;  %3148 = vmatprep.subr.mxu1 %v1128_v43  ;;  %v650_v42 = vld [vmem:[%s5187_s22 + $0xbc8] sm:$0xff]  ;;  %v652_v43 = vld [vmem:[%s5187_s22 + $0xbd8] sm:$0xff] }
 0x338   : > { %3078 = vmatpush2.xpose.msra.mxu0 %v1125_v44  ;;  %3149 = vmatpush2.xpose.msra.mxu1 %v1127_v45  ;;  %v649_v44 = vld [vmem:[%s5187_s22 + $0xbc0] sm:$0xff]  ;;  %v651_v45 = vld [vmem:[%s5187_s22 + $0xbd0] sm:$0xff] }
 0x339   : > { %3079 = vmatprep.subr.mxu0 %v1094_v46  ;;  %3150 = vmatprep.subr.mxu1 %v1096_v47  ;;  %v618_v46 = vld [vmem:[%s5187_s22 + $0xac8] sm:$0xff]  ;;  %v620_v47 = vld [vmem:[%s5187_s22 + $0xad8] sm:$0xff] }
 0x33c   : > { %3080 = vmatpush2.xpose.msra.mxu0 %v1093_v48  ;;  %3151 = vmatpush2.xpose.msra.mxu1 %v1095_v49  ;;  %v617_v48 = vld [vmem:[%s5187_s22 + $0xac0] sm:$0xff]  ;;  %v619_v49 = vld [vmem:[%s5187_s22 + $0xad0] sm:$0xff] }
 0x33d   : > { %3081 = vmatprep.subr.mxu0 %v1062_v50  ;;  %3152 = vmatprep.subr.mxu1 %v1064_v51  ;;  %v586_v50 = vld [vmem:[%s5187_s22 + $0x9c8] sm:$0xff]  ;;  %v588_v51 = vld [vmem:[%s5187_s22 + $0x9d8] sm:$0xff] }
 0x340   : > { %3082 = vmatpush2.xpose.msra.mxu0 %v1061_v52  ;;  %3153 = vmatpush2.xpose.msra.mxu1 %v1063_v53  ;;  %v585_v52 = vld [vmem:[%s5187_s22 + $0x9c0] sm:$0xff]  ;;  %v587_v53 = vld [vmem:[%s5187_s22 + $0x9d0] sm:$0xff] }
 0x341   : > { %3083 = vmatprep.subr.mxu0 %v1030_v54  ;;  %3154 = vmatprep.subr.mxu1 %v1032_v55  ;;  %v554_v54 = vld [vmem:[%s5187_s22 + $0x8c8] sm:$0xff]  ;;  %v556_v55 = vld [vmem:[%s5187_s22 + $0x8d8] sm:$0xff] }
 0x344   : > { %3084 = vmatpush2.xpose.msra.mxu0 %v1029_v56  ;;  %3155 = vmatpush2.xpose.msra.mxu1 %v1031_v57  ;;  %v553_v56 = vld [vmem:[%s5187_s22 + $0x8c0] sm:$0xff]  ;;  %v555_v57 = vld [vmem:[%s5187_s22 + $0x8d0] sm:$0xff] }
 0x345   : > { %3085 = vmatprep.subr.mxu0 %v998_v58  ;;  %3156 = vmatprep.subr.mxu1 %v1000_v59  ;;  %v522_v58 = vld [vmem:[%s5187_s22 + $0x7c8] sm:$0xff]  ;;  %v524_v59 = vld [vmem:[%s5187_s22 + $0x7d8] sm:$0xff] }
 0x348   : > { %3086 = vmatpush2.xpose.msra.mxu0 %v997_v60  ;;  %3157 = vmatpush2.xpose.msra.mxu1 %v999_v61  ;;  %v521_v60 = vld [vmem:[%s5187_s22 + $0x7c0] sm:$0xff]  ;;  %v523_v61 = vld [vmem:[%s5187_s22 + $0x7d0] sm:$0xff] }
 0x349   : > { %3087 = vmatprep.subr.mxu0 %v966_v62  ;;  %3158 = vmatprep.subr.mxu1 %v968_v63  ;;  %v490_v62 = vld [vmem:[%s5187_s22 + $0x6c8] sm:$0xff]  ;;  %v492_v63 = vld [vmem:[%s5187_s22 + $0x6d8] sm:$0xff] }
 0x34c   : > { %3088 = vmatpush2.xpose.msra.mxu0 %v965_v0  ;;  %3159 = vmatpush2.xpose.msra.mxu1 %v967_v1  ;;  %v489_v0 = vld [vmem:[%s5187_s22 + $0x6c0] sm:$0xff]  ;;  %v491_v1 = vld [vmem:[%s5187_s22 + $0x6d0] sm:$0xff] }
 0x34d   : > { %3089 = vmatprep.subr.mxu0 %v934_v2  ;;  %3160 = vmatprep.subr.mxu1 %v936_v3  ;;  %v458_v2 = vld [vmem:[%s5187_s22 + $0x5c8] sm:$0xff]  ;;  %v460_v3 = vld [vmem:[%s5187_s22 + $0x5d8] sm:$0xff] }
 0x350   : > { %3090 = vmatpush2.xpose.msra.mxu0 %v933_v4  ;;  %3161 = vmatpush2.xpose.msra.mxu1 %v935_v5  ;;  %v457_v4 = vld [vmem:[%s5187_s22 + $0x5c0] sm:$0xff]  ;;  %v459_v5 = vld [vmem:[%s5187_s22 + $0x5d0] sm:$0xff] }
 0x351   : > { %3091 = vmatprep.subr.mxu0 %v902_v6  ;;  %3162 = vmatprep.subr.mxu1 %v904_v7  ;;  %v426_v6 = vld [vmem:[%s5187_s22 + $0x4c8] sm:$0xff]  ;;  %v428_v7 = vld [vmem:[%s5187_s22 + $0x4d8] sm:$0xff] }
 0x354   : > { %3092 = vmatpush2.xpose.msra.mxu0 %v901_v8  ;;  %3163 = vmatpush2.xpose.msra.mxu1 %v903_v9  ;;  %v425_v8 = vld [vmem:[%s5187_s22 + $0x4c0] sm:$0xff]  ;;  %v427_v9 = vld [vmem:[%s5187_s22 + $0x4d0] sm:$0xff] }
 0x355   : > { %3093 = vmatprep.subr.mxu0 %v870_v10  ;;  %3164 = vmatprep.subr.mxu1 %v872_v11  ;;  %v394_v10 = vld [vmem:[%s5187_s22 + $0x3c8] sm:$0xff]  ;;  %v396_v11 = vld [vmem:[%s5187_s22 + $0x3d8] sm:$0xff] }
 0x358   : > { %3094 = vmatpush2.xpose.msra.mxu0 %v869_v12  ;;  %3165 = vmatpush2.xpose.msra.mxu1 %v871_v13  ;;  %v393_v12 = vld [vmem:[%s5187_s22 + $0x3c0] sm:$0xff]  ;;  %v395_v13 = vld [vmem:[%s5187_s22 + $0x3d0] sm:$0xff] }
 0x359   : > { %3095 = vmatprep.subr.mxu0 %v838_v14  ;;  %3166 = vmatprep.subr.mxu1 %v840_v15  ;;  %v362_v14 = vld [vmem:[%s5187_s22 + $0x2c8] sm:$0xff]  ;;  %v364_v15 = vld [vmem:[%s5187_s22 + $0x2d8] sm:$0xff] }
 0x35c   : > { %3096 = vmatpush2.xpose.msra.mxu0 %v837_v16  ;;  %3167 = vmatpush2.xpose.msra.mxu1 %v839_v17  ;;  %v361_v16 = vld [vmem:[%s5187_s22 + $0x2c0] sm:$0xff]  ;;  %v363_v17 = vld [vmem:[%s5187_s22 + $0x2d0] sm:$0xff] }
 0x35d   : > { %3097 = vmatprep.subr.mxu0 %v806_v18  ;;  %3168 = vmatprep.subr.mxu1 %v808_v19  ;;  %v330_v18 = vld [vmem:[%s5187_s22 + $0x1c8] sm:$0xff]  ;;  %v332_v19 = vld [vmem:[%s5187_s22 + $0x1d8] sm:$0xff] }
 0x360   : > { %3098 = vmatpush2.xpose.msra.mxu0 %v805_v20  ;;  %3169 = vmatpush2.xpose.msra.mxu1 %v807_v21  ;;  %v329_v20 = vld [vmem:[%s5187_s22 + $0x1c0] sm:$0xff]  ;;  %v331_v21 = vld [vmem:[%s5187_s22 + $0x1d0] sm:$0xff] }
 0x361   : > { %3177 = vmatprep.subr.mxu0 %v778_v22  ;;  %3248 = vmatprep.subr.mxu1 %v780_v23  ;;  %v298_v22 = vld [vmem:[%s5187_s22 + $0xc8] sm:$0xff]  ;;  %v300_v23 = vld [vmem:[%s5187_s22 + $0xd8] sm:$0xff] }
 0x363   : > { %3100 = vmatmul.mubr.f32.vlgmr.msra.gmra.mxu0 %v261_v24  ;;  %3171 = vmatmul.mubr.f32.vlgmr.msra.gmra.mxu1 %v263_v25  ;;  %v297_v24 = vld [vmem:[%s5187_s22 + $0xc0] sm:$0xff]  ;;  %v299_v25 = vld [vmem:[%s5187_s22 + $0xd0] sm:$0xff] }
 0x364   : > { %3178 = vmatpush1.xpose.msra.mxu0 %v777_v26  ;;  %3249 = vmatpush1.xpose.msra.mxu1 %v779_v27  ;;  %v1290_v26 = vld [vmem:[%s5187_s22 + $0x1fc8] sm:$0xff]  ;;  %v1292_v27 = vld [vmem:[%s5187_s22 + $0x1fd8] sm:$0xff] }
 0x365   : > { %3179 = vmatprep.subr.mxu0 %v746_v28  ;;  %3250 = vmatprep.subr.mxu1 %v748_v29  ;;  %v1289_v28 = vld [vmem:[%s5187_s22 + $0x1fc0] sm:$0xff]  ;;  %v1291_v29 = vld [vmem:[%s5187_s22 + $0x1fd0] sm:$0xff] }
 0x366   : > { %3241 = vmatprep.mubr.f32.mxu0 %v266_v30  ;;  %3312 = vmatprep.mubr.f32.mxu1 %v268_v31  ;;  %v1258_v30 = vld [vmem:[%s5187_s22 + $0x1ec8] sm:$0xff]  ;;  %v1260_v31 = vld [vmem:[%s5187_s22 + $0x1ed8] sm:$0xff] }
 0x368   : > { %3180 = vmatpush1.xpose.msra.mxu0 %v745_v32  ;;  %3251 = vmatpush1.xpose.msra.mxu1 %v747_v33  ;;  %v1257_v32 = vld [vmem:[%s5187_s22 + $0x1ec0] sm:$0xff]  ;;  %v1259_v33 = vld [vmem:[%s5187_s22 + $0x1ed0] sm:$0xff] }
 0x369   : > { %3181 = vmatprep.subr.mxu0 %v714_v34  ;;  %3252 = vmatprep.subr.mxu1 %v716_v35  ;;  %v1226_v34 = vld [vmem:[%s5187_s22 + $0x1dc8] sm:$0xff]  ;;  %v1228_v35 = vld [vmem:[%s5187_s22 + $0x1dd8] sm:$0xff] }
 0x36c   : > { %3182 = vmatpush1.xpose.msra.mxu0 %v713_v36  ;;  %3253 = vmatpush1.xpose.msra.mxu1 %v715_v37  ;;  %v1225_v36 = vld [vmem:[%s5187_s22 + $0x1dc0] sm:$0xff]  ;;  %v1227_v37 = vld [vmem:[%s5187_s22 + $0x1dd0] sm:$0xff] }
 0x36d   : > { %3183 = vmatprep.subr.mxu0 %v682_v38  ;;  %3254 = vmatprep.subr.mxu1 %v684_v39  ;;  %v1194_v38 = vld [vmem:[%s5187_s22 + $0x1cc8] sm:$0xff]  ;;  %v1196_v39 = vld [vmem:[%s5187_s22 + $0x1cd8] sm:$0xff] }
 0x370   : > { %3184 = vmatpush1.xpose.msra.mxu0 %v681_v40  ;;  %3255 = vmatpush1.xpose.msra.mxu1 %v683_v41  ;;  %v1193_v40 = vld [vmem:[%s5187_s22 + $0x1cc0] sm:$0xff]  ;;  %v1195_v41 = vld [vmem:[%s5187_s22 + $0x1cd0] sm:$0xff] }
 0x371   : > { %3185 = vmatprep.subr.mxu0 %v650_v42  ;;  %3256 = vmatprep.subr.mxu1 %v652_v43  ;;  %v1162_v42 = vld [vmem:[%s5187_s22 + $0x1bc8] sm:$0xff]  ;;  %v1164_v43 = vld [vmem:[%s5187_s22 + $0x1bd8] sm:$0xff] }
 0x374   : > { %3186 = vmatpush1.xpose.msra.mxu0 %v649_v44  ;;  %3257 = vmatpush1.xpose.msra.mxu1 %v651_v45  ;;  %v1161_v44 = vld [vmem:[%s5187_s22 + $0x1bc0] sm:$0xff]  ;;  %v1163_v45 = vld [vmem:[%s5187_s22 + $0x1bd0] sm:$0xff] }
 0x375   : > { %3187 = vmatprep.subr.mxu0 %v618_v46  ;;  %3258 = vmatprep.subr.mxu1 %v620_v47  ;;  %v1130_v46 = vld [vmem:[%s5187_s22 + $0x1ac8] sm:$0xff]  ;;  %v1132_v47 = vld [vmem:[%s5187_s22 + $0x1ad8] sm:$0xff] }
 0x378   : > { %3188 = vmatpush1.xpose.msra.mxu0 %v617_v48  ;;  %3259 = vmatpush1.xpose.msra.mxu1 %v619_v49  ;;  %v1129_v48 = vld [vmem:[%s5187_s22 + $0x1ac0] sm:$0xff]  ;;  %v1131_v49 = vld [vmem:[%s5187_s22 + $0x1ad0] sm:$0xff] }
 0x379   : > { %3189 = vmatprep.subr.mxu0 %v586_v50  ;;  %3260 = vmatprep.subr.mxu1 %v588_v51  ;;  %v1098_v50 = vld [vmem:[%s5187_s22 + $0x19c8] sm:$0xff]  ;;  %v1100_v51 = vld [vmem:[%s5187_s22 + $0x19d8] sm:$0xff] }
 0x37c   : > { %3190 = vmatpush1.xpose.msra.mxu0 %v585_v52  ;;  %3261 = vmatpush1.xpose.msra.mxu1 %v587_v53  ;;  %v1097_v52 = vld [vmem:[%s5187_s22 + $0x19c0] sm:$0xff]  ;;  %v1099_v53 = vld [vmem:[%s5187_s22 + $0x19d0] sm:$0xff] }
 0x37d   : > { %3191 = vmatprep.subr.mxu0 %v554_v54  ;;  %3262 = vmatprep.subr.mxu1 %v556_v55  ;;  %v1066_v54 = vld [vmem:[%s5187_s22 + $0x18c8] sm:$0xff]  ;;  %v1068_v55 = vld [vmem:[%s5187_s22 + $0x18d8] sm:$0xff] }
 0x380   : > { %3192 = vmatpush1.xpose.msra.mxu0 %v553_v56  ;;  %3263 = vmatpush1.xpose.msra.mxu1 %v555_v57  ;;  %v1065_v56 = vld [vmem:[%s5187_s22 + $0x18c0] sm:$0xff]  ;;  %v1067_v57 = vld [vmem:[%s5187_s22 + $0x18d0] sm:$0xff] }
 0x381   : > { %3193 = vmatprep.subr.mxu0 %v522_v58  ;;  %3264 = vmatprep.subr.mxu1 %v524_v59  ;;  %v1034_v58 = vld [vmem:[%s5187_s22 + $0x17c8] sm:$0xff]  ;;  %v1036_v59 = vld [vmem:[%s5187_s22 + $0x17d8] sm:$0xff] }
 0x384   : > { %3194 = vmatpush1.xpose.msra.mxu0 %v521_v60  ;;  %3265 = vmatpush1.xpose.msra.mxu1 %v523_v61  ;;  %v1033_v60 = vld [vmem:[%s5187_s22 + $0x17c0] sm:$0xff]  ;;  %v1035_v61 = vld [vmem:[%s5187_s22 + $0x17d0] sm:$0xff] }
 0x385   : > { %3195 = vmatprep.subr.mxu0 %v490_v62  ;;  %3266 = vmatprep.subr.mxu1 %v492_v63  ;;  %v1002_v62 = vld [vmem:[%s5187_s22 + $0x16c8] sm:$0xff]  ;;  %v1004_v63 = vld [vmem:[%s5187_s22 + $0x16d8] sm:$0xff] }
 0x388   : > { %3196 = vmatpush1.xpose.msra.mxu0 %v489_v0  ;;  %3267 = vmatpush1.xpose.msra.mxu1 %v491_v1  ;;  %v1001_v0 = vld [vmem:[%s5187_s22 + $0x16c0] sm:$0xff]  ;;  %v1003_v1 = vld [vmem:[%s5187_s22 + $0x16d0] sm:$0xff] }
 0x389   : > { %3197 = vmatprep.subr.mxu0 %v458_v2  ;;  %3268 = vmatprep.subr.mxu1 %v460_v3  ;;  %v970_v2 = vld [vmem:[%s5187_s22 + $0x15c8] sm:$0xff]  ;;  %v972_v3 = vld [vmem:[%s5187_s22 + $0x15d8] sm:$0xff] }
 0x38c   : > { %3198 = vmatpush1.xpose.msra.mxu0 %v457_v4  ;;  %3269 = vmatpush1.xpose.msra.mxu1 %v459_v5  ;;  %v969_v4 = vld [vmem:[%s5187_s22 + $0x15c0] sm:$0xff]  ;;  %v971_v5 = vld [vmem:[%s5187_s22 + $0x15d0] sm:$0xff] }
 0x38d   : > { %3199 = vmatprep.subr.mxu0 %v426_v6  ;;  %3270 = vmatprep.subr.mxu1 %v428_v7  ;;  %v938_v6 = vld [vmem:[%s5187_s22 + $0x14c8] sm:$0xff]  ;;  %v940_v7 = vld [vmem:[%s5187_s22 + $0x14d8] sm:$0xff] }
 0x390   : > { %3200 = vmatpush1.xpose.msra.mxu0 %v425_v8  ;;  %3271 = vmatpush1.xpose.msra.mxu1 %v427_v9  ;;  %v937_v8 = vld [vmem:[%s5187_s22 + $0x14c0] sm:$0xff]  ;;  %v939_v9 = vld [vmem:[%s5187_s22 + $0x14d0] sm:$0xff] }
 0x391   : > { %3201 = vmatprep.subr.mxu0 %v394_v10  ;;  %3272 = vmatprep.subr.mxu1 %v396_v11  ;;  %v906_v10 = vld [vmem:[%s5187_s22 + $0x13c8] sm:$0xff]  ;;  %v908_v11 = vld [vmem:[%s5187_s22 + $0x13d8] sm:$0xff] }
 0x394   : > { %3202 = vmatpush1.xpose.msra.mxu0 %v393_v12  ;;  %3273 = vmatpush1.xpose.msra.mxu1 %v395_v13  ;;  %v905_v12 = vld [vmem:[%s5187_s22 + $0x13c0] sm:$0xff]  ;;  %v907_v13 = vld [vmem:[%s5187_s22 + $0x13d0] sm:$0xff] }
 0x395   : > { %3203 = vmatprep.subr.mxu0 %v362_v14  ;;  %3274 = vmatprep.subr.mxu1 %v364_v15  ;;  %v874_v14 = vld [vmem:[%s5187_s22 + $0x12c8] sm:$0xff]  ;;  %v876_v15 = vld [vmem:[%s5187_s22 + $0x12d8] sm:$0xff] }
 0x398   : > { %3204 = vmatpush1.xpose.msra.mxu0 %v361_v16  ;;  %3275 = vmatpush1.xpose.msra.mxu1 %v363_v17  ;;  %v873_v16 = vld [vmem:[%s5187_s22 + $0x12c0] sm:$0xff]  ;;  %v875_v17 = vld [vmem:[%s5187_s22 + $0x12d0] sm:$0xff] }
 0x399   : > { %3205 = vmatprep.subr.mxu0 %v330_v18  ;;  %3276 = vmatprep.subr.mxu1 %v332_v19  ;;  %v842_v18 = vld [vmem:[%s5187_s22 + $0x11c8] sm:$0xff]  ;;  %v844_v19 = vld [vmem:[%s5187_s22 + $0x11d8] sm:$0xff] }
 0x39c   : > { %3206 = vmatpush1.xpose.msra.mxu0 %v329_v20  ;;  %3277 = vmatpush1.xpose.msra.mxu1 %v331_v21  ;;  %v841_v20 = vld [vmem:[%s5187_s22 + $0x11c0] sm:$0xff]  ;;  %v843_v21 = vld [vmem:[%s5187_s22 + $0x11d0] sm:$0xff] }
 0x39d   : > { %3207 = vmatprep.subr.mxu0 %v298_v22  ;;  %3278 = vmatprep.subr.mxu1 %v300_v23  ;;  %v810_v22 = vld [vmem:[%s5187_s22 + $0x10c8] sm:$0xff]  ;;  %v812_v23 = vld [vmem:[%s5187_s22 + $0x10d8] sm:$0xff] }
 0x3a0   : > { %3208 = vmatpush1.xpose.msra.mxu0 %v297_v24  ;;  %3279 = vmatpush1.xpose.msra.mxu1 %v299_v25  ;;  %v809_v24 = vld [vmem:[%s5187_s22 + $0x10c0] sm:$0xff]  ;;  %v811_v25 = vld [vmem:[%s5187_s22 + $0x10d0] sm:$0xff] }
 0x3a1   : > { %3209 = vmatprep.subr.mxu0 %v1290_v26  ;;  %3280 = vmatprep.subr.mxu1 %v1292_v27  ;;  %v782_v26 = vld [vmem:[%s5187_s22 + $0xfe8] sm:$0xff]  ;;  %v784_v27 = vld [vmem:[%s5187_s22 + $0xff8] sm:$0xff] }
 0x3a4   : > { %3210 = vmatpush2.xpose.msra.mxu0 %v1289_v28  ;;  %3281 = vmatpush2.xpose.msra.mxu1 %v1291_v29  ;;  %v265_v28 = vld [vmem:[#allocation2 + $0xc0] sm:$0xff]  ;;  %v267_v29 = vld [vmem:[#allocation2 + $0xd0] sm:$0xff] }
 0x3a5   : > { %3211 = vmatprep.subr.mxu0 %v1258_v30  ;;  %3282 = vmatprep.subr.mxu1 %v1260_v31  ;;  %v781_v30 = vld [vmem:[%s5187_s22 + $0xfe0] sm:$0xff]  ;;  %v783_v31 = vld [vmem:[%s5187_s22 + $0xff0] sm:$0xff] }
 0x3a8   : > { %3212 = vmatpush2.xpose.msra.mxu0 %v1257_v32  ;;  %3283 = vmatpush2.xpose.msra.mxu1 %v1259_v33  ;;  %v750_v32 = vld [vmem:[%s5187_s22 + $0xee8] sm:$0xff]  ;;  %v752_v33 = vld [vmem:[%s5187_s22 + $0xef8] sm:$0xff] }
 0x3a9   : > { %3213 = vmatprep.subr.mxu0 %v1226_v34  ;;  %3284 = vmatprep.subr.mxu1 %v1228_v35  ;;  %v270_v34 = vld [vmem:[#allocation2 + $0xe8] sm:$0xff]  ;;  %v272_v35 = vld [vmem:[#allocation2 + $0xf8] sm:$0xff] }
 0x3ac   : > { %3214 = vmatpush2.xpose.msra.mxu0 %v1225_v36  ;;  %3285 = vmatpush2.xpose.msra.mxu1 %v1227_v37  ;;  %v749_v36 = vld [vmem:[%s5187_s22 + $0xee0] sm:$0xff]  ;;  %v751_v37 = vld [vmem:[%s5187_s22 + $0xef0] sm:$0xff] }
 0x3ad   : > { %3215 = vmatprep.subr.mxu0 %v1194_v38  ;;  %3286 = vmatprep.subr.mxu1 %v1196_v39  ;;  %v718_v38 = vld [vmem:[%s5187_s22 + $0xde8] sm:$0xff]  ;;  %v720_v39 = vld [vmem:[%s5187_s22 + $0xdf8] sm:$0xff] }
 0x3b0   : > { %3216 = vmatpush2.xpose.msra.mxu0 %v1193_v40  ;;  %3287 = vmatpush2.xpose.msra.mxu1 %v1195_v41  ;;  %v717_v40 = vld [vmem:[%s5187_s22 + $0xde0] sm:$0xff]  ;;  %v719_v41 = vld [vmem:[%s5187_s22 + $0xdf0] sm:$0xff] }
 0x3b1   : > { %3217 = vmatprep.subr.mxu0 %v1162_v42  ;;  %3288 = vmatprep.subr.mxu1 %v1164_v43  ;;  %v686_v42 = vld [vmem:[%s5187_s22 + $0xce8] sm:$0xff]  ;;  %v688_v43 = vld [vmem:[%s5187_s22 + $0xcf8] sm:$0xff] }
 0x3b4   : > { %3218 = vmatpush2.xpose.msra.mxu0 %v1161_v44  ;;  %3289 = vmatpush2.xpose.msra.mxu1 %v1163_v45  ;;  %v685_v44 = vld [vmem:[%s5187_s22 + $0xce0] sm:$0xff]  ;;  %v687_v45 = vld [vmem:[%s5187_s22 + $0xcf0] sm:$0xff] }
 0x3b5   : > { %3219 = vmatprep.subr.mxu0 %v1130_v46  ;;  %3290 = vmatprep.subr.mxu1 %v1132_v47  ;;  %v654_v46 = vld [vmem:[%s5187_s22 + $0xbe8] sm:$0xff]  ;;  %v656_v47 = vld [vmem:[%s5187_s22 + $0xbf8] sm:$0xff] }
 0x3b8   : > { %3220 = vmatpush2.xpose.msra.mxu0 %v1129_v48  ;;  %3291 = vmatpush2.xpose.msra.mxu1 %v1131_v49  ;;  %v653_v48 = vld [vmem:[%s5187_s22 + $0xbe0] sm:$0xff]  ;;  %v655_v49 = vld [vmem:[%s5187_s22 + $0xbf0] sm:$0xff] }
 0x3b9   : > { %3221 = vmatprep.subr.mxu0 %v1098_v50  ;;  %3292 = vmatprep.subr.mxu1 %v1100_v51  ;;  %v622_v50 = vld [vmem:[%s5187_s22 + $0xae8] sm:$0xff]  ;;  %v624_v51 = vld [vmem:[%s5187_s22 + $0xaf8] sm:$0xff] }
 0x3bc   : > { %3222 = vmatpush2.xpose.msra.mxu0 %v1097_v52  ;;  %3293 = vmatpush2.xpose.msra.mxu1 %v1099_v53  ;;  %v621_v52 = vld [vmem:[%s5187_s22 + $0xae0] sm:$0xff]  ;;  %v623_v53 = vld [vmem:[%s5187_s22 + $0xaf0] sm:$0xff] }
 0x3bd   : > { %3223 = vmatprep.subr.mxu0 %v1066_v54  ;;  %3294 = vmatprep.subr.mxu1 %v1068_v55  ;;  %v590_v54 = vld [vmem:[%s5187_s22 + $0x9e8] sm:$0xff]  ;;  %v592_v55 = vld [vmem:[%s5187_s22 + $0x9f8] sm:$0xff] }
 0x3c0   : > { %3224 = vmatpush2.xpose.msra.mxu0 %v1065_v56  ;;  %3295 = vmatpush2.xpose.msra.mxu1 %v1067_v57  ;;  %v589_v56 = vld [vmem:[%s5187_s22 + $0x9e0] sm:$0xff]  ;;  %v591_v57 = vld [vmem:[%s5187_s22 + $0x9f0] sm:$0xff] }
 0x3c1   : > { %3225 = vmatprep.subr.mxu0 %v1034_v58  ;;  %3296 = vmatprep.subr.mxu1 %v1036_v59  ;;  %v558_v58 = vld [vmem:[%s5187_s22 + $0x8e8] sm:$0xff]  ;;  %v560_v59 = vld [vmem:[%s5187_s22 + $0x8f8] sm:$0xff] }
 0x3c4   : > { %3226 = vmatpush2.xpose.msra.mxu0 %v1033_v60  ;;  %3297 = vmatpush2.xpose.msra.mxu1 %v1035_v61  ;;  %v557_v60 = vld [vmem:[%s5187_s22 + $0x8e0] sm:$0xff]  ;;  %v559_v61 = vld [vmem:[%s5187_s22 + $0x8f0] sm:$0xff] }
 0x3c5   : > { %3227 = vmatprep.subr.mxu0 %v1002_v62  ;;  %3298 = vmatprep.subr.mxu1 %v1004_v63  ;;  %v526_v62 = vld [vmem:[%s5187_s22 + $0x7e8] sm:$0xff]  ;;  %v528_v63 = vld [vmem:[%s5187_s22 + $0x7f8] sm:$0xff] }
 0x3c8   : > { %3228 = vmatpush2.xpose.msra.mxu0 %v1001_v0  ;;  %3299 = vmatpush2.xpose.msra.mxu1 %v1003_v1  ;;  %v525_v0 = vld [vmem:[%s5187_s22 + $0x7e0] sm:$0xff]  ;;  %v527_v1 = vld [vmem:[%s5187_s22 + $0x7f0] sm:$0xff] }
 0x3c9   : > { %3229 = vmatprep.subr.mxu0 %v970_v2  ;;  %3300 = vmatprep.subr.mxu1 %v972_v3  ;;  %v494_v2 = vld [vmem:[%s5187_s22 + $0x6e8] sm:$0xff]  ;;  %v496_v3 = vld [vmem:[%s5187_s22 + $0x6f8] sm:$0xff] }
 0x3cc   : > { %3230 = vmatpush2.xpose.msra.mxu0 %v969_v4  ;;  %3301 = vmatpush2.xpose.msra.mxu1 %v971_v5  ;;  %v493_v4 = vld [vmem:[%s5187_s22 + $0x6e0] sm:$0xff]  ;;  %v495_v5 = vld [vmem:[%s5187_s22 + $0x6f0] sm:$0xff] }
 0x3cd   : > { %3231 = vmatprep.subr.mxu0 %v938_v6  ;;  %3302 = vmatprep.subr.mxu1 %v940_v7  ;;  %v462_v6 = vld [vmem:[%s5187_s22 + $0x5e8] sm:$0xff]  ;;  %v464_v7 = vld [vmem:[%s5187_s22 + $0x5f8] sm:$0xff] }
 0x3d0   : > { %3232 = vmatpush2.xpose.msra.mxu0 %v937_v8  ;;  %3303 = vmatpush2.xpose.msra.mxu1 %v939_v9  ;;  %v461_v8 = vld [vmem:[%s5187_s22 + $0x5e0] sm:$0xff]  ;;  %v463_v9 = vld [vmem:[%s5187_s22 + $0x5f0] sm:$0xff] }
 0x3d1   : > { %3233 = vmatprep.subr.mxu0 %v906_v10  ;;  %3304 = vmatprep.subr.mxu1 %v908_v11  ;;  %v430_v10 = vld [vmem:[%s5187_s22 + $0x4e8] sm:$0xff]  ;;  %v432_v11 = vld [vmem:[%s5187_s22 + $0x4f8] sm:$0xff] }
 0x3d4   : > { %3234 = vmatpush2.xpose.msra.mxu0 %v905_v12  ;;  %3305 = vmatpush2.xpose.msra.mxu1 %v907_v13  ;;  %v429_v12 = vld [vmem:[%s5187_s22 + $0x4e0] sm:$0xff]  ;;  %v431_v13 = vld [vmem:[%s5187_s22 + $0x4f0] sm:$0xff] }
 0x3d5   : > { %3235 = vmatprep.subr.mxu0 %v874_v14  ;;  %3306 = vmatprep.subr.mxu1 %v876_v15  ;;  %v398_v14 = vld [vmem:[%s5187_s22 + $0x3e8] sm:$0xff]  ;;  %v400_v15 = vld [vmem:[%s5187_s22 + $0x3f8] sm:$0xff] }
 0x3d8   : > { %3236 = vmatpush2.xpose.msra.mxu0 %v873_v16  ;;  %3307 = vmatpush2.xpose.msra.mxu1 %v875_v17  ;;  %v397_v16 = vld [vmem:[%s5187_s22 + $0x3e0] sm:$0xff]  ;;  %v399_v17 = vld [vmem:[%s5187_s22 + $0x3f0] sm:$0xff] }
 0x3d9   : > { %3237 = vmatprep.subr.mxu0 %v842_v18  ;;  %3308 = vmatprep.subr.mxu1 %v844_v19  ;;  %v366_v18 = vld [vmem:[%s5187_s22 + $0x2e8] sm:$0xff]  ;;  %v368_v19 = vld [vmem:[%s5187_s22 + $0x2f8] sm:$0xff] }
 0x3dc   : > { %3238 = vmatpush2.xpose.msra.mxu0 %v841_v20  ;;  %3309 = vmatpush2.xpose.msra.mxu1 %v843_v21  ;;  %v365_v20 = vld [vmem:[%s5187_s22 + $0x2e0] sm:$0xff]  ;;  %v367_v21 = vld [vmem:[%s5187_s22 + $0x2f0] sm:$0xff] }
 0x3dd   : > { %3239 = vmatprep.subr.mxu0 %v810_v22  ;;  %3310 = vmatprep.subr.mxu1 %v812_v23  ;;  %v334_v22 = vld [vmem:[%s5187_s22 + $0x1e8] sm:$0xff]  ;;  %v336_v23 = vld [vmem:[%s5187_s22 + $0x1f8] sm:$0xff] }
 0x3e0   : > { %3240 = vmatpush2.xpose.msra.mxu0 %v809_v24  ;;  %3311 = vmatpush2.xpose.msra.mxu1 %v811_v25  ;;  %v333_v24 = vld [vmem:[%s5187_s22 + $0x1e0] sm:$0xff]  ;;  %v335_v25 = vld [vmem:[%s5187_s22 + $0x1f0] sm:$0xff] }
 0x3e1   : > { %3319 = vmatprep.subr.mxu0 %v782_v26  ;;  %3390 = vmatprep.subr.mxu1 %v784_v27  ;;  %v302_v26 = vld [vmem:[%s5187_s22 + $0xe8] sm:$0xff]  ;;  %v304_v27 = vld [vmem:[%s5187_s22 + $0xf8] sm:$0xff] }
 0x3e3   : > { %3242 = vmatmul.mubr.f32.vlgmr.msra.gmra.mxu0 %v265_v28  ;;  %3313 = vmatmul.mubr.f32.vlgmr.msra.gmra.mxu1 %v267_v29  ;;  %v301_v28 = vld [vmem:[%s5187_s22 + $0xe0] sm:$0xff]  ;;  %v303_v29 = vld [vmem:[%s5187_s22 + $0xf0] sm:$0xff] }
 0x3e4   : > { %3320 = vmatpush1.xpose.msra.mxu0 %v781_v30  ;;  %3391 = vmatpush1.xpose.msra.mxu1 %v783_v31  ;;  %v1294_v30 = vld [vmem:[%s5187_s22 + $0x1fe8] sm:$0xff]  ;;  %v1296_v31 = vld [vmem:[%s5187_s22 + $0x1ff8] sm:$0xff] }
 0x3e5   : > { %3321 = vmatprep.subr.mxu0 %v750_v32  ;;  %3392 = vmatprep.subr.mxu1 %v752_v33  ;;  %v1293_v32 = vld [vmem:[%s5187_s22 + $0x1fe0] sm:$0xff]  ;;  %v1295_v33 = vld [vmem:[%s5187_s22 + $0x1ff0] sm:$0xff] }
 0x3e6   : > { %3383 = vmatprep.mubr.f32.mxu0 %v270_v34  ;;  %3454 = vmatprep.mubr.f32.mxu1 %v272_v35  ;;  %v1262_v34 = vld [vmem:[%s5187_s22 + $0x1ee8] sm:$0xff]  ;;  %v1264_v35 = vld [vmem:[%s5187_s22 + $0x1ef8] sm:$0xff] }
 0x3e8   : > { %3322 = vmatpush1.xpose.msra.mxu0 %v749_v36  ;;  %3393 = vmatpush1.xpose.msra.mxu1 %v751_v37  ;;  %v1261_v36 = vld [vmem:[%s5187_s22 + $0x1ee0] sm:$0xff]  ;;  %v1263_v37 = vld [vmem:[%s5187_s22 + $0x1ef0] sm:$0xff] }
 0x3e9   : > { %3323 = vmatprep.subr.mxu0 %v718_v38  ;;  %3394 = vmatprep.subr.mxu1 %v720_v39  ;;  %v1230_v38 = vld [vmem:[%s5187_s22 + $0x1de8] sm:$0xff]  ;;  %v1232_v39 = vld [vmem:[%s5187_s22 + $0x1df8] sm:$0xff] }
 0x3ec   : > { %3324 = vmatpush1.xpose.msra.mxu0 %v717_v40  ;;  %3395 = vmatpush1.xpose.msra.mxu1 %v719_v41  ;;  %v1229_v40 = vld [vmem:[%s5187_s22 + $0x1de0] sm:$0xff]  ;;  %v1231_v41 = vld [vmem:[%s5187_s22 + $0x1df0] sm:$0xff] }
 0x3ed   : > { %3325 = vmatprep.subr.mxu0 %v686_v42  ;;  %3396 = vmatprep.subr.mxu1 %v688_v43  ;;  %v1198_v42 = vld [vmem:[%s5187_s22 + $0x1ce8] sm:$0xff]  ;;  %v1200_v43 = vld [vmem:[%s5187_s22 + $0x1cf8] sm:$0xff] }
 0x3f0   : > { %3326 = vmatpush1.xpose.msra.mxu0 %v685_v44  ;;  %3397 = vmatpush1.xpose.msra.mxu1 %v687_v45  ;;  %v1197_v44 = vld [vmem:[%s5187_s22 + $0x1ce0] sm:$0xff]  ;;  %v1199_v45 = vld [vmem:[%s5187_s22 + $0x1cf0] sm:$0xff] }
 0x3f1   : > { %3327 = vmatprep.subr.mxu0 %v654_v46  ;;  %3398 = vmatprep.subr.mxu1 %v656_v47  ;;  %v1166_v46 = vld [vmem:[%s5187_s22 + $0x1be8] sm:$0xff]  ;;  %v1168_v47 = vld [vmem:[%s5187_s22 + $0x1bf8] sm:$0xff] }
 0x3f4   : > { %3328 = vmatpush1.xpose.msra.mxu0 %v653_v48  ;;  %3399 = vmatpush1.xpose.msra.mxu1 %v655_v49  ;;  %v1165_v48 = vld [vmem:[%s5187_s22 + $0x1be0] sm:$0xff]  ;;  %v1167_v49 = vld [vmem:[%s5187_s22 + $0x1bf0] sm:$0xff] }
 0x3f5   : > { %3329 = vmatprep.subr.mxu0 %v622_v50  ;;  %3400 = vmatprep.subr.mxu1 %v624_v51  ;;  %v1134_v50 = vld [vmem:[%s5187_s22 + $0x1ae8] sm:$0xff]  ;;  %v1136_v51 = vld [vmem:[%s5187_s22 + $0x1af8] sm:$0xff] }
 0x3f8   : > { %3330 = vmatpush1.xpose.msra.mxu0 %v621_v52  ;;  %3401 = vmatpush1.xpose.msra.mxu1 %v623_v53  ;;  %v1133_v52 = vld [vmem:[%s5187_s22 + $0x1ae0] sm:$0xff]  ;;  %v1135_v53 = vld [vmem:[%s5187_s22 + $0x1af0] sm:$0xff] }
 0x3f9   : > { %3331 = vmatprep.subr.mxu0 %v590_v54  ;;  %3402 = vmatprep.subr.mxu1 %v592_v55  ;;  %v1102_v54 = vld [vmem:[%s5187_s22 + $0x19e8] sm:$0xff]  ;;  %v1104_v55 = vld [vmem:[%s5187_s22 + $0x19f8] sm:$0xff] }
 0x3fc   : > { %3332 = vmatpush1.xpose.msra.mxu0 %v589_v56  ;;  %3403 = vmatpush1.xpose.msra.mxu1 %v591_v57  ;;  %v1101_v56 = vld [vmem:[%s5187_s22 + $0x19e0] sm:$0xff]  ;;  %v1103_v57 = vld [vmem:[%s5187_s22 + $0x19f0] sm:$0xff] }
 0x3fd   : > { %3333 = vmatprep.subr.mxu0 %v558_v58  ;;  %3404 = vmatprep.subr.mxu1 %v560_v59  ;;  %v1070_v58 = vld [vmem:[%s5187_s22 + $0x18e8] sm:$0xff]  ;;  %v1072_v59 = vld [vmem:[%s5187_s22 + $0x18f8] sm:$0xff] }
 0x400   : > { %3334 = vmatpush1.xpose.msra.mxu0 %v557_v60  ;;  %3405 = vmatpush1.xpose.msra.mxu1 %v559_v61  ;;  %v1069_v60 = vld [vmem:[%s5187_s22 + $0x18e0] sm:$0xff]  ;;  %v1071_v61 = vld [vmem:[%s5187_s22 + $0x18f0] sm:$0xff] }
 0x401   : > { %3335 = vmatprep.subr.mxu0 %v526_v62  ;;  %3406 = vmatprep.subr.mxu1 %v528_v63  ;;  %v1038_v62 = vld [vmem:[%s5187_s22 + $0x17e8] sm:$0xff]  ;;  %v1040_v63 = vld [vmem:[%s5187_s22 + $0x17f8] sm:$0xff] }
 0x404   : > { %3336 = vmatpush1.xpose.msra.mxu0 %v525_v0  ;;  %3407 = vmatpush1.xpose.msra.mxu1 %v527_v1  ;;  %v1037_v0 = vld [vmem:[%s5187_s22 + $0x17e0] sm:$0xff]  ;;  %v1039_v1 = vld [vmem:[%s5187_s22 + $0x17f0] sm:$0xff] }
 0x405   : > { %3337 = vmatprep.subr.mxu0 %v494_v2  ;;  %3408 = vmatprep.subr.mxu1 %v496_v3  ;;  %v1006_v2 = vld [vmem:[%s5187_s22 + $0x16e8] sm:$0xff]  ;;  %v1008_v3 = vld [vmem:[%s5187_s22 + $0x16f8] sm:$0xff] }
 0x408   : > { %3338 = vmatpush1.xpose.msra.mxu0 %v493_v4  ;;  %3409 = vmatpush1.xpose.msra.mxu1 %v495_v5  ;;  %v1005_v4 = vld [vmem:[%s5187_s22 + $0x16e0] sm:$0xff]  ;;  %v1007_v5 = vld [vmem:[%s5187_s22 + $0x16f0] sm:$0xff] }
 0x409   : > { %3339 = vmatprep.subr.mxu0 %v462_v6  ;;  %3410 = vmatprep.subr.mxu1 %v464_v7  ;;  %v974_v6 = vld [vmem:[%s5187_s22 + $0x15e8] sm:$0xff]  ;;  %v976_v7 = vld [vmem:[%s5187_s22 + $0x15f8] sm:$0xff] }
 0x40c   : > { %3340 = vmatpush1.xpose.msra.mxu0 %v461_v8  ;;  %3411 = vmatpush1.xpose.msra.mxu1 %v463_v9  ;;  %v973_v8 = vld [vmem:[%s5187_s22 + $0x15e0] sm:$0xff]  ;;  %v975_v9 = vld [vmem:[%s5187_s22 + $0x15f0] sm:$0xff] }
 0x40d   : > { %3341 = vmatprep.subr.mxu0 %v430_v10  ;;  %3412 = vmatprep.subr.mxu1 %v432_v11  ;;  %v942_v10 = vld [vmem:[%s5187_s22 + $0x14e8] sm:$0xff]  ;;  %v944_v11 = vld [vmem:[%s5187_s22 + $0x14f8] sm:$0xff] }
 0x410   : > { %3342 = vmatpush1.xpose.msra.mxu0 %v429_v12  ;;  %3413 = vmatpush1.xpose.msra.mxu1 %v431_v13  ;;  %v941_v12 = vld [vmem:[%s5187_s22 + $0x14e0] sm:$0xff]  ;;  %v943_v13 = vld [vmem:[%s5187_s22 + $0x14f0] sm:$0xff] }
 0x411   : > { %3343 = vmatprep.subr.mxu0 %v398_v14  ;;  %3414 = vmatprep.subr.mxu1 %v400_v15  ;;  %v910_v14 = vld [vmem:[%s5187_s22 + $0x13e8] sm:$0xff]  ;;  %v912_v15 = vld [vmem:[%s5187_s22 + $0x13f8] sm:$0xff] }
 0x414   : > { %3344 = vmatpush1.xpose.msra.mxu0 %v397_v16  ;;  %3415 = vmatpush1.xpose.msra.mxu1 %v399_v17  ;;  %v909_v16 = vld [vmem:[%s5187_s22 + $0x13e0] sm:$0xff]  ;;  %v911_v17 = vld [vmem:[%s5187_s22 + $0x13f0] sm:$0xff] }
 0x415   : > { %3345 = vmatprep.subr.mxu0 %v366_v18  ;;  %3416 = vmatprep.subr.mxu1 %v368_v19  ;;  %v878_v18 = vld [vmem:[%s5187_s22 + $0x12e8] sm:$0xff]  ;;  %v880_v19 = vld [vmem:[%s5187_s22 + $0x12f8] sm:$0xff] }
 0x418   : > { %3346 = vmatpush1.xpose.msra.mxu0 %v365_v20  ;;  %3417 = vmatpush1.xpose.msra.mxu1 %v367_v21  ;;  %v877_v20 = vld [vmem:[%s5187_s22 + $0x12e0] sm:$0xff]  ;;  %v879_v21 = vld [vmem:[%s5187_s22 + $0x12f0] sm:$0xff] }
 0x419   : > { %3347 = vmatprep.subr.mxu0 %v334_v22  ;;  %3418 = vmatprep.subr.mxu1 %v336_v23  ;;  %v846_v22 = vld [vmem:[%s5187_s22 + $0x11e8] sm:$0xff]  ;;  %v848_v23 = vld [vmem:[%s5187_s22 + $0x11f8] sm:$0xff] }
 0x41c   : > { %3348 = vmatpush1.xpose.msra.mxu0 %v333_v24  ;;  %3419 = vmatpush1.xpose.msra.mxu1 %v335_v25  ;;  %v845_v24 = vld [vmem:[%s5187_s22 + $0x11e0] sm:$0xff]  ;;  %v847_v25 = vld [vmem:[%s5187_s22 + $0x11f0] sm:$0xff] }
 0x41d   : > { %3349 = vmatprep.subr.mxu0 %v302_v26  ;;  %3420 = vmatprep.subr.mxu1 %v304_v27  ;;  %v814_v26 = vld [vmem:[%s5187_s22 + $0x10e8] sm:$0xff]  ;;  %v816_v27 = vld [vmem:[%s5187_s22 + $0x10f8] sm:$0xff] }
 0x420   : > { %3350 = vmatpush1.xpose.msra.mxu0 %v301_v28  ;;  %3421 = vmatpush1.xpose.msra.mxu1 %v303_v29  ;;  %v813_v28 = vld [vmem:[%s5187_s22 + $0x10e0] sm:$0xff]  ;;  %v815_v29 = vld [vmem:[%s5187_s22 + $0x10f0] sm:$0xff] }
 0x421   : > { %3351 = vmatprep.subr.mxu0 %v1294_v30  ;;  %3422 = vmatprep.subr.mxu1 %v1296_v31  ;;  %v1778_v30 = vld [vmem:[%s5187_s22 + $0x2f08] sm:$0xff]  ;;  %v1780_v31 = vld [vmem:[%s5187_s22 + $0x2f18] sm:$0xff] }
 0x424   : > { %3352 = vmatpush2.xpose.msra.mxu0 %v1293_v32  ;;  %3423 = vmatpush2.xpose.msra.mxu1 %v1295_v33  ;;  %v269_v32 = vld [vmem:[#allocation2 + $0xe0] sm:$0xff]  ;;  %v271_v33 = vld [vmem:[#allocation2 + $0xf0] sm:$0xff] }
 0x425   : > { %3353 = vmatprep.subr.mxu0 %v1262_v34  ;;  %3424 = vmatprep.subr.mxu1 %v1264_v35  ;;  %v1777_v34 = vld [vmem:[%s5187_s22 + $0x2f00] sm:$0xff]  ;;  %v1779_v35 = vld [vmem:[%s5187_s22 + $0x2f10] sm:$0xff] }
 0x428   : > { %3354 = vmatpush2.xpose.msra.mxu0 %v1261_v36  ;;  %3425 = vmatpush2.xpose.msra.mxu1 %v1263_v37  ;;  %v1746_v36 = vld [vmem:[%s5187_s22 + $0x2e08] sm:$0xff]  ;;  %v1748_v37 = vld [vmem:[%s5187_s22 + $0x2e18] sm:$0xff] }
 0x429   : > { %3355 = vmatprep.subr.mxu0 %v1230_v38  ;;  %3426 = vmatprep.subr.mxu1 %v1232_v39  ;;  %v1745_v38 = vld [vmem:[%s5187_s22 + $0x2e00] sm:$0xff]  ;;  %v1747_v39 = vld [vmem:[%s5187_s22 + $0x2e10] sm:$0xff] }
 0x42c   : > { %3356 = vmatpush2.xpose.msra.mxu0 %v1229_v40  ;;  %3427 = vmatpush2.xpose.msra.mxu1 %v1231_v41  ;;  %v1714_v40 = vld [vmem:[%s5187_s22 + $0x2d08] sm:$0xff]  ;;  %v1716_v41 = vld [vmem:[%s5187_s22 + $0x2d18] sm:$0xff] }
 0x42d   : > { %3357 = vmatprep.subr.mxu0 %v1198_v42  ;;  %3428 = vmatprep.subr.mxu1 %v1200_v43  ;;  %v4807_v42 = vld [vmem:[#allocation2 + $0x8] sm:$0xff]  ;;  %v4808_v43 = vld [vmem:[#allocation2 + $0x18] sm:$0xff] }
 0x430   : > { %3358 = vmatpush2.xpose.msra.mxu0 %v1197_v44  ;;  %3429 = vmatpush2.xpose.msra.mxu1 %v1199_v45  ;;  %v1713_v44 = vld [vmem:[%s5187_s22 + $0x2d00] sm:$0xff]  ;;  %v1715_v45 = vld [vmem:[%s5187_s22 + $0x2d10] sm:$0xff] }
 0x431   : > { %3359 = vmatprep.subr.mxu0 %v1166_v46  ;;  %3430 = vmatprep.subr.mxu1 %v1168_v47  ;;  %v1682_v46 = vld [vmem:[%s5187_s22 + $0x2c08] sm:$0xff]  ;;  %v1684_v47 = vld [vmem:[%s5187_s22 + $0x2c18] sm:$0xff] }
 0x434   : > { %3360 = vmatpush2.xpose.msra.mxu0 %v1165_v48  ;;  %3431 = vmatpush2.xpose.msra.mxu1 %v1167_v49  ;;  %v1681_v48 = vld [vmem:[%s5187_s22 + $0x2c00] sm:$0xff]  ;;  %v1683_v49 = vld [vmem:[%s5187_s22 + $0x2c10] sm:$0xff] }
 0x435   : > { %3361 = vmatprep.subr.mxu0 %v1134_v50  ;;  %3432 = vmatprep.subr.mxu1 %v1136_v51  ;;  %v1650_v50 = vld [vmem:[%s5187_s22 + $0x2b08] sm:$0xff]  ;;  %v1652_v51 = vld [vmem:[%s5187_s22 + $0x2b18] sm:$0xff] }
 0x438   : > { %3362 = vmatpush2.xpose.msra.mxu0 %v1133_v52  ;;  %3433 = vmatpush2.xpose.msra.mxu1 %v1135_v53  ;;  %v1649_v52 = vld [vmem:[%s5187_s22 + $0x2b00] sm:$0xff]  ;;  %v1651_v53 = vld [vmem:[%s5187_s22 + $0x2b10] sm:$0xff] }
 0x439   : > { %3363 = vmatprep.subr.mxu0 %v1102_v54  ;;  %3434 = vmatprep.subr.mxu1 %v1104_v55  ;;  %v1618_v54 = vld [vmem:[%s5187_s22 + $0x2a08] sm:$0xff]  ;;  %v1620_v55 = vld [vmem:[%s5187_s22 + $0x2a18] sm:$0xff] }
 0x43c   : > { %3364 = vmatpush2.xpose.msra.mxu0 %v1101_v56  ;;  %3435 = vmatpush2.xpose.msra.mxu1 %v1103_v57  ;;  %v1617_v56 = vld [vmem:[%s5187_s22 + $0x2a00] sm:$0xff]  ;;  %v1619_v57 = vld [vmem:[%s5187_s22 + $0x2a10] sm:$0xff] }
 0x43d   : > { %3365 = vmatprep.subr.mxu0 %v1070_v58  ;;  %3436 = vmatprep.subr.mxu1 %v1072_v59  ;;  %v1586_v58 = vld [vmem:[%s5187_s22 + $0x2908] sm:$0xff]  ;;  %v1588_v59 = vld [vmem:[%s5187_s22 + $0x2918] sm:$0xff] }
 0x440   : > { %3366 = vmatpush2.xpose.msra.mxu0 %v1069_v60  ;;  %3437 = vmatpush2.xpose.msra.mxu1 %v1071_v61  ;;  %v1585_v60 = vld [vmem:[%s5187_s22 + $0x2900] sm:$0xff]  ;;  %v1587_v61 = vld [vmem:[%s5187_s22 + $0x2910] sm:$0xff] }
 0x441   : > { %3367 = vmatprep.subr.mxu0 %v1038_v62  ;;  %3438 = vmatprep.subr.mxu1 %v1040_v63  ;;  %v1554_v62 = vld [vmem:[%s5187_s22 + $0x2808] sm:$0xff]  ;;  %v1556_v63 = vld [vmem:[%s5187_s22 + $0x2818] sm:$0xff] }
 0x444   : > { %3368 = vmatpush2.xpose.msra.mxu0 %v1037_v0  ;;  %3439 = vmatpush2.xpose.msra.mxu1 %v1039_v1  ;;  %v1553_v0 = vld [vmem:[%s5187_s22 + $0x2800] sm:$0xff]  ;;  %v1555_v1 = vld [vmem:[%s5187_s22 + $0x2810] sm:$0xff] }
 0x445   : > { %3369 = vmatprep.subr.mxu0 %v1006_v2  ;;  %3440 = vmatprep.subr.mxu1 %v1008_v3  ;;  %v1522_v2 = vld [vmem:[%s5187_s22 + $0x2708] sm:$0xff]  ;;  %v1524_v3 = vld [vmem:[%s5187_s22 + $0x2718] sm:$0xff] }
 0x448   : > { %3370 = vmatpush2.xpose.msra.mxu0 %v1005_v4  ;;  %3441 = vmatpush2.xpose.msra.mxu1 %v1007_v5  ;;  %v1521_v4 = vld [vmem:[%s5187_s22 + $0x2700] sm:$0xff]  ;;  %v1523_v5 = vld [vmem:[%s5187_s22 + $0x2710] sm:$0xff] }
 0x449   : > { %3371 = vmatprep.subr.mxu0 %v974_v6  ;;  %3442 = vmatprep.subr.mxu1 %v976_v7  ;;  %v1490_v6 = vld [vmem:[%s5187_s22 + $0x2608] sm:$0xff]  ;;  %v1492_v7 = vld [vmem:[%s5187_s22 + $0x2618] sm:$0xff] }
 0x44c   : > { %3372 = vmatpush2.xpose.msra.mxu0 %v973_v8  ;;  %3443 = vmatpush2.xpose.msra.mxu1 %v975_v9  ;;  %v1489_v8 = vld [vmem:[%s5187_s22 + $0x2600] sm:$0xff]  ;;  %v1491_v9 = vld [vmem:[%s5187_s22 + $0x2610] sm:$0xff] }
 0x44d   : > { %3373 = vmatprep.subr.mxu0 %v942_v10  ;;  %3444 = vmatprep.subr.mxu1 %v944_v11  ;;  %v1458_v10 = vld [vmem:[%s5187_s22 + $0x2508] sm:$0xff]  ;;  %v1460_v11 = vld [vmem:[%s5187_s22 + $0x2518] sm:$0xff] }
 0x450   : > { %3374 = vmatpush2.xpose.msra.mxu0 %v941_v12  ;;  %3445 = vmatpush2.xpose.msra.mxu1 %v943_v13  ;;  %v1457_v12 = vld [vmem:[%s5187_s22 + $0x2500] sm:$0xff]  ;;  %v1459_v13 = vld [vmem:[%s5187_s22 + $0x2510] sm:$0xff] }
 0x451   : > { %3375 = vmatprep.subr.mxu0 %v910_v14  ;;  %3446 = vmatprep.subr.mxu1 %v912_v15  ;;  %v1426_v14 = vld [vmem:[%s5187_s22 + $0x2408] sm:$0xff]  ;;  %v1428_v15 = vld [vmem:[%s5187_s22 + $0x2418] sm:$0xff] }
 0x454   : > { %3376 = vmatpush2.xpose.msra.mxu0 %v909_v16  ;;  %3447 = vmatpush2.xpose.msra.mxu1 %v911_v17  ;;  %v1425_v16 = vld [vmem:[%s5187_s22 + $0x2400] sm:$0xff]  ;;  %v1427_v17 = vld [vmem:[%s5187_s22 + $0x2410] sm:$0xff] }
 0x455   : > { %3377 = vmatprep.subr.mxu0 %v878_v18  ;;  %3448 = vmatprep.subr.mxu1 %v880_v19  ;;  %v1394_v18 = vld [vmem:[%s5187_s22 + $0x2308] sm:$0xff]  ;;  %v1396_v19 = vld [vmem:[%s5187_s22 + $0x2318] sm:$0xff] }
 0x458   : > { %3378 = vmatpush2.xpose.msra.mxu0 %v877_v20  ;;  %3449 = vmatpush2.xpose.msra.mxu1 %v879_v21  ;;  %v1393_v20 = vld [vmem:[%s5187_s22 + $0x2300] sm:$0xff]  ;;  %v1395_v21 = vld [vmem:[%s5187_s22 + $0x2310] sm:$0xff] }
 0x459   : > { %3379 = vmatprep.subr.mxu0 %v846_v22  ;;  %3450 = vmatprep.subr.mxu1 %v848_v23  ;;  %v1362_v22 = vld [vmem:[%s5187_s22 + $0x2208] sm:$0xff]  ;;  %v1364_v23 = vld [vmem:[%s5187_s22 + $0x2218] sm:$0xff] }
 0x45c   : > { %3380 = vmatpush2.xpose.msra.mxu0 %v845_v24  ;;  %3451 = vmatpush2.xpose.msra.mxu1 %v847_v25  ;;  %v1361_v24 = vld [vmem:[%s5187_s22 + $0x2200] sm:$0xff]  ;;  %v1363_v25 = vld [vmem:[%s5187_s22 + $0x2210] sm:$0xff] }
 0x45d   : > { %3381 = vmatprep.subr.mxu0 %v814_v26  ;;  %3452 = vmatprep.subr.mxu1 %v816_v27  ;;  %v1330_v26 = vld [vmem:[%s5187_s22 + $0x2108] sm:$0xff]  ;;  %v1332_v27 = vld [vmem:[%s5187_s22 + $0x2118] sm:$0xff] }
 0x460   : > { %3382 = vmatpush2.xpose.msra.mxu0 %v813_v28  ;;  %3453 = vmatpush2.xpose.msra.mxu1 %v815_v29  ;;  %v1329_v28 = vld [vmem:[%s5187_s22 + $0x2100] sm:$0xff]  ;;  %v1331_v29 = vld [vmem:[%s5187_s22 + $0x2110] sm:$0xff] }
 0x461   : > { %3461 = vmatprep.subr.mxu0 %v1778_v30  ;;  %3532 = vmatprep.subr.mxu1 %v1780_v31  ;;  %v1298_v30 = vld [vmem:[%s5187_s22 + $0x2008] sm:$0xff]  ;;  %v1300_v31 = vld [vmem:[%s5187_s22 + $0x2018] sm:$0xff] }
 0x463   : > { %3384 = vmatmul.mubr.f32.vlgmr.msra.gmra.mxu0 %v269_v32  ;;  %3455 = vmatmul.mubr.f32.vlgmr.msra.gmra.mxu1 %v271_v33  ;;  %v1297_v32 = vld [vmem:[%s5187_s22 + $0x2000] sm:$0xff]  ;;  %v1299_v33 = vld [vmem:[%s5187_s22 + $0x2010] sm:$0xff] }
 0x464   : > { %3462 = vmatpush1.xpose.msra.mxu0 %v1777_v34  ;;  %3533 = vmatpush1.xpose.msra.mxu1 %v1779_v35  ;;  %v2290_v34 = vld [vmem:[%s5187_s22 + $0x3f08] sm:$0xff]  ;;  %v2292_v35 = vld [vmem:[%s5187_s22 + $0x3f18] sm:$0xff] }
 0x465   : > { %3463 = vmatprep.subr.mxu0 %v1746_v36  ;;  %3534 = vmatprep.subr.mxu1 %v1748_v37  ;;  %v2289_v36 = vld [vmem:[%s5187_s22 + $0x3f00] sm:$0xff]  ;;  %v2291_v37 = vld [vmem:[%s5187_s22 + $0x3f10] sm:$0xff] }
 0x466   : > { %3525 = vmatprep.mubr.f32.mxu0 %v4807_v42  ;;  %3596 = vmatprep.mubr.f32.mxu1 %v4808_v43  ;;  %v2226_v42 = vld [vmem:[%s5187_s22 + $0x3d08] sm:$0xff]  ;;  %v2228_v43 = vld [vmem:[%s5187_s22 + $0x3d18] sm:$0xff] }
 0x468   : > { %3464 = vmatpush1.xpose.msra.mxu0 %v1745_v38  ;;  %3535 = vmatpush1.xpose.msra.mxu1 %v1747_v39  ;;  %v2258_v38 = vld [vmem:[%s5187_s22 + $0x3e08] sm:$0xff]  ;;  %v2260_v39 = vld [vmem:[%s5187_s22 + $0x3e18] sm:$0xff] }
 0x469   : > { %3465 = vmatprep.subr.mxu0 %v1714_v40  ;;  %3536 = vmatprep.subr.mxu1 %v1716_v41  ;;  %v2257_v40 = vld [vmem:[%s5187_s22 + $0x3e00] sm:$0xff]  ;;  %v2259_v41 = vld [vmem:[%s5187_s22 + $0x3e10] sm:$0xff] }
 0x46c   : > { %3466 = vmatpush1.xpose.msra.mxu0 %v1713_v44  ;;  %3537 = vmatpush1.xpose.msra.mxu1 %v1715_v45  ;;  %v2225_v44 = vld [vmem:[%s5187_s22 + $0x3d00] sm:$0xff]  ;;  %v2227_v45 = vld [vmem:[%s5187_s22 + $0x3d10] sm:$0xff] }
 0x46d   : > { %3467 = vmatprep.subr.mxu0 %v1682_v46  ;;  %3538 = vmatprep.subr.mxu1 %v1684_v47  ;;  %v2194_v46 = vld [vmem:[%s5187_s22 + $0x3c08] sm:$0xff]  ;;  %v2196_v47 = vld [vmem:[%s5187_s22 + $0x3c18] sm:$0xff] }
 0x470   : > { %3468 = vmatpush1.xpose.msra.mxu0 %v1681_v48  ;;  %3539 = vmatpush1.xpose.msra.mxu1 %v1683_v49  ;;  %v2193_v48 = vld [vmem:[%s5187_s22 + $0x3c00] sm:$0xff]  ;;  %v2195_v49 = vld [vmem:[%s5187_s22 + $0x3c10] sm:$0xff] }
 0x471   : > { %3469 = vmatprep.subr.mxu0 %v1650_v50  ;;  %3540 = vmatprep.subr.mxu1 %v1652_v51  ;;  %v2162_v50 = vld [vmem:[%s5187_s22 + $0x3b08] sm:$0xff]  ;;  %v2164_v51 = vld [vmem:[%s5187_s22 + $0x3b18] sm:$0xff] }
 0x474   : > { %3470 = vmatpush1.xpose.msra.mxu0 %v1649_v52  ;;  %3541 = vmatpush1.xpose.msra.mxu1 %v1651_v53  ;;  %v2161_v52 = vld [vmem:[%s5187_s22 + $0x3b00] sm:$0xff]  ;;  %v2163_v53 = vld [vmem:[%s5187_s22 + $0x3b10] sm:$0xff] }
 0x475   : > { %3471 = vmatprep.subr.mxu0 %v1618_v54  ;;  %3542 = vmatprep.subr.mxu1 %v1620_v55  ;;  %v2130_v54 = vld [vmem:[%s5187_s22 + $0x3a08] sm:$0xff]  ;;  %v2132_v55 = vld [vmem:[%s5187_s22 + $0x3a18] sm:$0xff] }
 0x478   : > { %3472 = vmatpush1.xpose.msra.mxu0 %v1617_v56  ;;  %3543 = vmatpush1.xpose.msra.mxu1 %v1619_v57  ;;  %v2129_v56 = vld [vmem:[%s5187_s22 + $0x3a00] sm:$0xff]  ;;  %v2131_v57 = vld [vmem:[%s5187_s22 + $0x3a10] sm:$0xff] }
 0x479   : > { %3473 = vmatprep.subr.mxu0 %v1586_v58  ;;  %3544 = vmatprep.subr.mxu1 %v1588_v59  ;;  %v2098_v58 = vld [vmem:[%s5187_s22 + $0x3908] sm:$0xff]  ;;  %v2100_v59 = vld [vmem:[%s5187_s22 + $0x3918] sm:$0xff] }
 0x47c   : > { %3474 = vmatpush1.xpose.msra.mxu0 %v1585_v60  ;;  %3545 = vmatpush1.xpose.msra.mxu1 %v1587_v61  ;;  %v2097_v60 = vld [vmem:[%s5187_s22 + $0x3900] sm:$0xff]  ;;  %v2099_v61 = vld [vmem:[%s5187_s22 + $0x3910] sm:$0xff] }
 0x47d   : > { %3475 = vmatprep.subr.mxu0 %v1554_v62  ;;  %3546 = vmatprep.subr.mxu1 %v1556_v63  ;;  %v2066_v62 = vld [vmem:[%s5187_s22 + $0x3808] sm:$0xff]  ;;  %v2068_v63 = vld [vmem:[%s5187_s22 + $0x3818] sm:$0xff] }
 0x480   : > { %3476 = vmatpush1.xpose.msra.mxu0 %v1553_v0  ;;  %3547 = vmatpush1.xpose.msra.mxu1 %v1555_v1  ;;  %v2065_v0 = vld [vmem:[%s5187_s22 + $0x3800] sm:$0xff]  ;;  %v2067_v1 = vld [vmem:[%s5187_s22 + $0x3810] sm:$0xff] }
 0x481   : > { %3477 = vmatprep.subr.mxu0 %v1522_v2  ;;  %3548 = vmatprep.subr.mxu1 %v1524_v3  ;;  %v2034_v2 = vld [vmem:[%s5187_s22 + $0x3708] sm:$0xff]  ;;  %v2036_v3 = vld [vmem:[%s5187_s22 + $0x3718] sm:$0xff] }
 0x484   : > { %3478 = vmatpush1.xpose.msra.mxu0 %v1521_v4  ;;  %3549 = vmatpush1.xpose.msra.mxu1 %v1523_v5  ;;  %v2033_v4 = vld [vmem:[%s5187_s22 + $0x3700] sm:$0xff]  ;;  %v2035_v5 = vld [vmem:[%s5187_s22 + $0x3710] sm:$0xff] }
 0x485   : > { %3479 = vmatprep.subr.mxu0 %v1490_v6  ;;  %3550 = vmatprep.subr.mxu1 %v1492_v7  ;;  %v2002_v6 = vld [vmem:[%s5187_s22 + $0x3608] sm:$0xff]  ;;  %v2004_v7 = vld [vmem:[%s5187_s22 + $0x3618] sm:$0xff] }
 0x488   : > { %3480 = vmatpush1.xpose.msra.mxu0 %v1489_v8  ;;  %3551 = vmatpush1.xpose.msra.mxu1 %v1491_v9  ;;  %v2001_v8 = vld [vmem:[%s5187_s22 + $0x3600] sm:$0xff]  ;;  %v2003_v9 = vld [vmem:[%s5187_s22 + $0x3610] sm:$0xff] }
 0x489   : > { %3481 = vmatprep.subr.mxu0 %v1458_v10  ;;  %3552 = vmatprep.subr.mxu1 %v1460_v11  ;;  %v1970_v10 = vld [vmem:[%s5187_s22 + $0x3508] sm:$0xff]  ;;  %v1972_v11 = vld [vmem:[%s5187_s22 + $0x3518] sm:$0xff] }
 0x48c   : > { %3482 = vmatpush1.xpose.msra.mxu0 %v1457_v12  ;;  %3553 = vmatpush1.xpose.msra.mxu1 %v1459_v13  ;;  %v1969_v12 = vld [vmem:[%s5187_s22 + $0x3500] sm:$0xff]  ;;  %v1971_v13 = vld [vmem:[%s5187_s22 + $0x3510] sm:$0xff] }
 0x48d   : > { %3483 = vmatprep.subr.mxu0 %v1426_v14  ;;  %3554 = vmatprep.subr.mxu1 %v1428_v15  ;;  %v1938_v14 = vld [vmem:[%s5187_s22 + $0x3408] sm:$0xff]  ;;  %v1940_v15 = vld [vmem:[%s5187_s22 + $0x3418] sm:$0xff] }
 0x490   : > { %3484 = vmatpush1.xpose.msra.mxu0 %v1425_v16  ;;  %3555 = vmatpush1.xpose.msra.mxu1 %v1427_v17  ;;  %v1937_v16 = vld [vmem:[%s5187_s22 + $0x3400] sm:$0xff]  ;;  %v1939_v17 = vld [vmem:[%s5187_s22 + $0x3410] sm:$0xff] }
 0x491   : > { %3485 = vmatprep.subr.mxu0 %v1394_v18  ;;  %3556 = vmatprep.subr.mxu1 %v1396_v19  ;;  %v1906_v18 = vld [vmem:[%s5187_s22 + $0x3308] sm:$0xff]  ;;  %v1908_v19 = vld [vmem:[%s5187_s22 + $0x3318] sm:$0xff] }
 0x494   : > { %3486 = vmatpush1.xpose.msra.mxu0 %v1393_v20  ;;  %3557 = vmatpush1.xpose.msra.mxu1 %v1395_v21  ;;  %v1905_v20 = vld [vmem:[%s5187_s22 + $0x3300] sm:$0xff]  ;;  %v1907_v21 = vld [vmem:[%s5187_s22 + $0x3310] sm:$0xff] }
 0x495   : > { %3487 = vmatprep.subr.mxu0 %v1362_v22  ;;  %3558 = vmatprep.subr.mxu1 %v1364_v23  ;;  %v1874_v22 = vld [vmem:[%s5187_s22 + $0x3208] sm:$0xff]  ;;  %v1876_v23 = vld [vmem:[%s5187_s22 + $0x3218] sm:$0xff] }
 0x498   : > { %3488 = vmatpush1.xpose.msra.mxu0 %v1361_v24  ;;  %3559 = vmatpush1.xpose.msra.mxu1 %v1363_v25  ;;  %v1873_v24 = vld [vmem:[%s5187_s22 + $0x3200] sm:$0xff]  ;;  %v1875_v25 = vld [vmem:[%s5187_s22 + $0x3210] sm:$0xff] }
 0x499   : > { %3489 = vmatprep.subr.mxu0 %v1330_v26  ;;  %3560 = vmatprep.subr.mxu1 %v1332_v27  ;;  %v1842_v26 = vld [vmem:[%s5187_s22 + $0x3108] sm:$0xff]  ;;  %v1844_v27 = vld [vmem:[%s5187_s22 + $0x3118] sm:$0xff] }
 0x49c   : > { %3490 = vmatpush1.xpose.msra.mxu0 %v1329_v28  ;;  %3561 = vmatpush1.xpose.msra.mxu1 %v1331_v29  ;;  %v1841_v28 = vld [vmem:[%s5187_s22 + $0x3100] sm:$0xff]  ;;  %v1843_v29 = vld [vmem:[%s5187_s22 + $0x3110] sm:$0xff] }
 0x49d   : > { %3491 = vmatprep.subr.mxu0 %v1298_v30  ;;  %3562 = vmatprep.subr.mxu1 %v1300_v31  ;;  %v1810_v30 = vld [vmem:[%s5187_s22 + $0x3008] sm:$0xff]  ;;  %v1812_v31 = vld [vmem:[%s5187_s22 + $0x3018] sm:$0xff] }
 0x4a0   : > { %3492 = vmatpush1.xpose.msra.mxu0 %v1297_v32  ;;  %3563 = vmatpush1.xpose.msra.mxu1 %v1299_v33  ;;  %v1809_v32 = vld [vmem:[%s5187_s22 + $0x3000] sm:$0xff]  ;;  %v1811_v33 = vld [vmem:[%s5187_s22 + $0x3010] sm:$0xff] }
 0x4a1   : > { %3493 = vmatprep.subr.mxu0 %v2290_v34  ;;  %3564 = vmatprep.subr.mxu1 %v2292_v35  ;;  %v1782_v34 = vld [vmem:[%s5187_s22 + $0x2f28] sm:$0xff]  ;;  %v1784_v35 = vld [vmem:[%s5187_s22 + $0x2f38] sm:$0xff] }
 0x4a4   : > { %3494 = vmatpush2.xpose.msra.mxu0 %v2289_v36  ;;  %3565 = vmatpush2.xpose.msra.mxu1 %v2291_v37  ;;  %v1781_v36 = vld [vmem:[%s5187_s22 + $0x2f20] sm:$0xff]  ;;  %v1783_v37 = vld [vmem:[%s5187_s22 + $0x2f30] sm:$0xff] }
 0x4a5   : > { %3495 = vmatprep.subr.mxu0 %v2258_v38  ;;  %3566 = vmatprep.subr.mxu1 %v2260_v39  ;;  %v1750_v38 = vld [vmem:[%s5187_s22 + $0x2e28] sm:$0xff]  ;;  %v1752_v39 = vld [vmem:[%s5187_s22 + $0x2e38] sm:$0xff] }
 0x4a8   : > { %3496 = vmatpush2.xpose.msra.mxu0 %v2257_v40  ;;  %3567 = vmatpush2.xpose.msra.mxu1 %v2259_v41  ;;  %v4809_v40 = vld [vmem:[#allocation2] sm:$0xff]  ;;  %v4810_v41 = vld [vmem:[#allocation2 + $0x10] sm:$0xff] }
 0x4a9   : > { %3497 = vmatprep.subr.mxu0 %v2226_v42  ;;  %3568 = vmatprep.subr.mxu1 %v2228_v43  ;;  %v1749_v42 = vld [vmem:[%s5187_s22 + $0x2e20] sm:$0xff]  ;;  %v1751_v43 = vld [vmem:[%s5187_s22 + $0x2e30] sm:$0xff] }
 0x4ac   : > { %3498 = vmatpush2.xpose.msra.mxu0 %v2225_v44  ;;  %3569 = vmatpush2.xpose.msra.mxu1 %v2227_v45  ;;  %v1718_v44 = vld [vmem:[%s5187_s22 + $0x2d28] sm:$0xff]  ;;  %v1720_v45 = vld [vmem:[%s5187_s22 + $0x2d38] sm:$0xff] }
 0x4ad   : > { %3499 = vmatprep.subr.mxu0 %v2194_v46  ;;  %3570 = vmatprep.subr.mxu1 %v2196_v47  ;;  %v4811_v46 = vld [vmem:[#allocation2 + $0x28] sm:$0xff]  ;;  %v4812_v47 = vld [vmem:[#allocation2 + $0x38] sm:$0xff] }
 0x4b0   : > { %3500 = vmatpush2.xpose.msra.mxu0 %v2193_v48  ;;  %3571 = vmatpush2.xpose.msra.mxu1 %v2195_v49  ;;  %v1717_v48 = vld [vmem:[%s5187_s22 + $0x2d20] sm:$0xff]  ;;  %v1719_v49 = vld [vmem:[%s5187_s22 + $0x2d30] sm:$0xff] }
 0x4b1   : > { %3501 = vmatprep.subr.mxu0 %v2162_v50  ;;  %3572 = vmatprep.subr.mxu1 %v2164_v51  ;;  %v1686_v50 = vld [vmem:[%s5187_s22 + $0x2c28] sm:$0xff]  ;;  %v1688_v51 = vld [vmem:[%s5187_s22 + $0x2c38] sm:$0xff] }
 0x4b4   : > { %3502 = vmatpush2.xpose.msra.mxu0 %v2161_v52  ;;  %3573 = vmatpush2.xpose.msra.mxu1 %v2163_v53  ;;  %v1685_v52 = vld [vmem:[%s5187_s22 + $0x2c20] sm:$0xff]  ;;  %v1687_v53 = vld [vmem:[%s5187_s22 + $0x2c30] sm:$0xff] }
 0x4b5   : > { %3503 = vmatprep.subr.mxu0 %v2130_v54  ;;  %3574 = vmatprep.subr.mxu1 %v2132_v55  ;;  %v1654_v54 = vld [vmem:[%s5187_s22 + $0x2b28] sm:$0xff]  ;;  %v1656_v55 = vld [vmem:[%s5187_s22 + $0x2b38] sm:$0xff] }
 0x4b8   : > { %3504 = vmatpush2.xpose.msra.mxu0 %v2129_v56  ;;  %3575 = vmatpush2.xpose.msra.mxu1 %v2131_v57  ;;  %v1653_v56 = vld [vmem:[%s5187_s22 + $0x2b20] sm:$0xff]  ;;  %v1655_v57 = vld [vmem:[%s5187_s22 + $0x2b30] sm:$0xff] }
 0x4b9   : > { %3505 = vmatprep.subr.mxu0 %v2098_v58  ;;  %3576 = vmatprep.subr.mxu1 %v2100_v59  ;;  %v1622_v58 = vld [vmem:[%s5187_s22 + $0x2a28] sm:$0xff]  ;;  %v1624_v59 = vld [vmem:[%s5187_s22 + $0x2a38] sm:$0xff] }
 0x4bc   : > { %3506 = vmatpush2.xpose.msra.mxu0 %v2097_v60  ;;  %3577 = vmatpush2.xpose.msra.mxu1 %v2099_v61  ;;  %v2391_v60 = vpop.f32.mrf.mxu0  ;;  %v1621_v61 = vld [vmem:[%s5187_s22 + $0x2a20] sm:$0xff] }
 0x4bd   : > { %3507 = vmatprep.subr.mxu0 %v2066_v62  ;;  %3578 = vmatprep.subr.mxu1 %v2068_v63  ;;  %v1623_v62 = vld [vmem:[%s5187_s22 + $0x2a30] sm:$0xff]  ;;  %v1590_v63 = vld [vmem:[%s5187_s22 + $0x2928] sm:$0xff] }
 0x4c0   : > { %3508 = vmatpush2.xpose.msra.mxu0 %v2065_v0  ;;  %3579 = vmatpush2.xpose.msra.mxu1 %v2067_v1  ;;  %v1592_v0 = vld [vmem:[%s5187_s22 + $0x2938] sm:$0xff]  ;;  %v2321_v1 = vld [vmem:[%s6374_s4] sm:$0xff] }
 0x4c1   : > { %3509 = vmatprep.subr.mxu0 %v2034_v2  ;;  %3580 = vmatprep.subr.mxu1 %v2036_v3  ;;  %v2462_v2 = vpop.f32.mrf.mxu1  ;;  %v2322_v3 = vld [vmem:[%s6374_s4 + $0x8] sm:$0xff] }
 0x4c4   : > { %3510 = vmatpush2.xpose.msra.mxu0 %v2033_v4  ;;  %3581 = vmatpush2.xpose.msra.mxu1 %v2035_v5  ;;  %v2393_v4 = vpop.f32.mrf.mxu0  ;;  %v1589_v5 = vld [vmem:[%s5187_s22 + $0x2920] sm:$0xff] }
 0x4c5   : > { %3511 = vmatprep.subr.mxu0 %v2002_v6  ;;  %3582 = vmatprep.subr.mxu1 %v2004_v7  ;;  %v1591_v6 = vld [vmem:[%s5187_s22 + $0x2930] sm:$0xff]  ;;  %v2392_v7 = vadd.f32 %v2391_v60, %v2321_v1  ;;  %v1397_v60 = vld [vmem:[%s5187_s22 + $0x2320] sm:$0xff]  ;;  %v1368_v1 = vld [vmem:[%s5187_s22 + $0x2238] sm:$0xff] }
 0x4c8   : > { %3512 = vmatpush2.xpose.msra.mxu0 %v2001_v8  ;;  %3583 = vmatpush2.xpose.msra.mxu1 %v2003_v9  ;;  %v1558_v8 = vld [vmem:[%s5187_s22 + $0x2828] sm:$0xff]  ;;  %v1560_v9 = vld [vmem:[%s5187_s22 + $0x2838] sm:$0xff] }
 0x4c9   : > { %3513 = vmatprep.subr.mxu0 %v1970_v10  ;;  %3584 = vmatprep.subr.mxu1 %v1972_v11  ;;  %v2533_v10 = vpop.f32.mrf.mxu0  ;;  %v2394_v11 = vadd.f32 %v2393_v4, %v2322_v3 }
 0x4cc   : > { %3514 = vmatpush2.xpose.msra.mxu0 %v1969_v12  ;;  %3585 = vmatpush2.xpose.msra.mxu1 %v1971_v13  ;;  %v2464_v12 = vpop.f32.mrf.mxu1  ;;  %v1557_v13 = vld [vmem:[%s5187_s22 + $0x2820] sm:$0xff] }
 0x4cd   : > { %3515 = vmatprep.subr.mxu0 %v1938_v14  ;;  %3586 = vmatprep.subr.mxu1 %v1940_v15  ;;  %v1559_v14 = vld [vmem:[%s5187_s22 + $0x2830] sm:$0xff]  ;;  %v2463_v15 = vadd.f32 %v2462_v2, %v2392_v7 }
 0x4d0   : > { %3516 = vmatpush2.xpose.msra.mxu0 %v1937_v16  ;;  %3587 = vmatpush2.xpose.msra.mxu1 %v1939_v17  ;;  %v1526_v16 = vld [vmem:[%s5187_s22 + $0x2728] sm:$0xff]  ;;  %v1528_v17 = vld [vmem:[%s5187_s22 + $0x2738] sm:$0xff] }
 0x4d1   : > { %3517 = vmatprep.subr.mxu0 %v1906_v18  ;;  %3588 = vmatprep.subr.mxu1 %v1908_v19  ;;  %v2604_v18 = vpop.f32.mrf.mxu1  ;;  %v2535_v19 = vpop.f32.mrf.mxu0 }
 0x4d4   : > { %3518 = vmatpush2.xpose.msra.mxu0 %v1905_v20  ;;  %3589 = vmatpush2.xpose.msra.mxu1 %v1907_v21  ;;  %v2465_v20 = vadd.f32 %v2464_v12, %v2394_v11  ;;  %v2534_v21 = vadd.f32 %v2533_v10, %v2463_v15  ;;  %v1333_v15 = vld [vmem:[%s5187_s22 + $0x2120] sm:$0xff] }
 0x4d5   : > { %3519 = vmatprep.subr.mxu0 %v1874_v22  ;;  %3590 = vmatprep.subr.mxu1 %v1876_v23  ;;  %v2675_v22 = vpop.f32.mrf.mxu0  ;;  %v1525_v23 = vld [vmem:[%s5187_s22 + $0x2720] sm:$0xff] }
 0x4d8   : > { %3520 = vmatpush2.xpose.msra.mxu0 %v1873_v24  ;;  %3591 = vmatpush2.xpose.msra.mxu1 %v1875_v25  ;;  %v1527_v24 = vld [vmem:[%s5187_s22 + $0x2730] sm:$0xff]  ;;  %v2536_v25 = vadd.f32 %v2535_v19, %v2465_v20  ;;  %v1304_v19 = vld [vmem:[%s5187_s22 + $0x2038] sm:$0xff] }
 0x4d9   : > { %3521 = vmatprep.subr.mxu0 %v1842_v26  ;;  %3592 = vmatprep.subr.mxu1 %v1844_v27  ;;  %v1494_v26 = vld [vmem:[%s5187_s22 + $0x2628] sm:$0xff]  ;;  %v1496_v27 = vld [vmem:[%s5187_s22 + $0x2638] sm:$0xff] }
 0x4dc   : > { %3522 = vmatpush2.xpose.msra.mxu0 %v1841_v28  ;;  %3593 = vmatpush2.xpose.msra.mxu1 %v1843_v29  ;;  %v2606_v28 = vpop.f32.mrf.mxu1  ;;  %v2605_v29 = vadd.f32 %v2604_v18, %v2534_v21  ;;  %v1302_v18 = vld [vmem:[%s5187_s22 + $0x2028] sm:$0xff] }
 0x4dd   : > { %3523 = vmatprep.subr.mxu0 %v1810_v30  ;;  %3594 = vmatprep.subr.mxu1 %v1812_v31  ;;  %v2677_v31 = vpop.f32.mrf.mxu0 }
 0x4de   : > { %v2746_v30 = vpop.f32.mrf.mxu1 }
 0x4e0   : > { %3524 = vmatpush2.xpose.msra.mxu0 %v1809_v32  ;;  %3595 = vmatpush2.xpose.msra.mxu1 %v1811_v33  ;;  %v1493_v32 = vld [vmem:[%s5187_s22 + $0x2620] sm:$0xff]  ;;  %v1495_v33 = vld [vmem:[%s5187_s22 + $0x2630] sm:$0xff] }
 0x4e1   : > { %3603 = vmatprep.subr.mxu0 %v1782_v34  ;;  %3674 = vmatprep.subr.mxu1 %v1784_v35  ;;  %v2607_v34 = vadd.f32 %v2606_v28, %v2536_v25  ;;  %v2676_v35 = vadd.f32 %v2675_v22, %v2605_v29  ;;  %v1303_v25 = vld [vmem:[%s5187_s22 + $0x2030] sm:$0xff]  ;;  %v2294_v28 = vld [vmem:[%s5187_s22 + $0x3f28] sm:$0xff]  ;;  %v2296_v29 = vld [vmem:[%s5187_s22 + $0x3f38] sm:$0xff] }
 0x4e3   : > { %3526 = vmatmul.mubr.f32.vlgmr.msra.gmra.mxu0 %v4809_v40  ;;  %3597 = vmatmul.mubr.f32.vlgmr.msra.gmra.mxu1 %v4810_v41  ;;  %v2748_v40 = vpop.f32.mrf.mxu1  ;;  %v1461_v41 = vld [vmem:[%s5187_s22 + $0x2520] sm:$0xff] }
 0x4e4   : > { %3604 = vmatpush1.xpose.msra.mxu0 %v1781_v36  ;;  %3675 = vmatpush1.xpose.msra.mxu1 %v1783_v37  ;;  %v1462_v36 = vld [vmem:[%s5187_s22 + $0x2528] sm:$0xff]  ;;  %v1464_v37 = vld [vmem:[%s5187_s22 + $0x2538] sm:$0xff] }
 0x4e5   : > { %3605 = vmatprep.subr.mxu0 %v1750_v38  ;;  %3676 = vmatprep.subr.mxu1 %v1752_v39  ;;  %v2817_v38 = vpop.f32.mrf.mxu0  ;;  %v2678_v39 = vadd.f32 %v2677_v31, %v2607_v34 }
 0x4e6   : > { %3667 = vmatprep.mubr.f32.mxu0 %v4811_v46  ;;  %3738 = vmatprep.mubr.f32.mxu1 %v4812_v47  ;;  %v2888_v46 = vpop.f32.mrf.mxu1 }
 0x4e7   : > { %v2819_v47 = vpop.f32.mrf.mxu0 }
 0x4e8   : > { %3606 = vmatpush1.xpose.msra.mxu0 %v1749_v42  ;;  %3677 = vmatpush1.xpose.msra.mxu1 %v1751_v43  ;;  %v1463_v42 = vld [vmem:[%s5187_s22 + $0x2530] sm:$0xff]  ;;  %v2747_v43 = vadd.f32 %v2746_v30, %v2676_v35  ;;  %v2262_v35 = vld [vmem:[%s5187_s22 + $0x3e28] sm:$0xff] }
 0x4e9   : > { %3607 = vmatprep.subr.mxu0 %v1718_v44  ;;  %3678 = vmatprep.subr.mxu1 %v1720_v45  ;;  %v1430_v44 = vld [vmem:[%s5187_s22 + $0x2428] sm:$0xff]  ;;  %v1432_v45 = vld [vmem:[%s5187_s22 + $0x2438] sm:$0xff] }
 0x4ec   : > { %3608 = vmatpush1.xpose.msra.mxu0 %v1717_v48  ;;  %3679 = vmatpush1.xpose.msra.mxu1 %v1719_v49  ;;  %v2749_v48 = vadd.f32 %v2748_v40, %v2678_v39  ;;  %v2818_v49 = vadd.f32 %v2817_v38, %v2747_v43  ;;  %v2261_v43 = vld [vmem:[%s5187_s22 + $0x3e20] sm:$0xff] }
 0x4ed   : > { %3609 = vmatprep.subr.mxu0 %v1686_v50  ;;  %3680 = vmatprep.subr.mxu1 %v1688_v51  ;;  %v2959_v50 = vpop.f32.mrf.mxu0  ;;  %v1429_v51 = vld [vmem:[%s5187_s22 + $0x2420] sm:$0xff] }
 0x4f0   : > { %3610 = vmatpush1.xpose.msra.mxu0 %v1685_v52  ;;  %3681 = vmatpush1.xpose.msra.mxu1 %v1687_v53  ;;  %v1431_v52 = vld [vmem:[%s5187_s22 + $0x2430] sm:$0xff]  ;;  %v2820_v53 = vadd.f32 %v2819_v47, %v2749_v48  ;;  %v2230_v47 = vld [vmem:[%s5187_s22 + $0x3d28] sm:$0xff]  ;;  %v2232_v48 = vld [vmem:[%s5187_s22 + $0x3d38] sm:$0xff] }
 0x4f1   : > { %3611 = vmatprep.subr.mxu0 %v1654_v54  ;;  %3682 = vmatprep.subr.mxu1 %v1656_v55  ;;  %v1398_v54 = vld [vmem:[%s5187_s22 + $0x2328] sm:$0xff]  ;;  %v1400_v55 = vld [vmem:[%s5187_s22 + $0x2338] sm:$0xff] }
 0x4f4   : > { %3612 = vmatpush1.xpose.msra.mxu0 %v1653_v56  ;;  %3683 = vmatpush1.xpose.msra.mxu1 %v1655_v57  ;;  %v2890_v56 = vpop.f32.mrf.mxu1  ;;  %v2889_v57 = vadd.f32 %v2888_v46, %v2818_v49 }
 0x4f5   : > { %3613 = vmatprep.subr.mxu0 %v1622_v58  ;;  %3684 = vmatprep.subr.mxu1 %v1624_v59  ;;  %v2961_v59 = vpop.f32.mrf.mxu0 }
 0x4f6   : > { %v3030_v58 = vpop.f32.mrf.mxu1 }
 0x4f7   : > { %v3101_v2 = vpop.f32.mrf.mxu0 }
 0x4f8   : > { %3614 = vmatpush1.xpose.msra.mxu0 %v1621_v61  ;;  %3685 = vmatpush1.xpose.msra.mxu1 %v1623_v62  ;;  %v1399_v61 = vld [vmem:[%s5187_s22 + $0x2330] sm:$0xff]  ;;  %v2891_v62 = vadd.f32 %v2890_v56, %v2820_v53  ;;  %v3032_v4 = vpop.f32.mrf.mxu1  ;;  %v2200_v53 = vld [vmem:[%s5187_s22 + $0x3c38] sm:$0xff]  ;;  %v2166_v56 = vld [vmem:[%s5187_s22 + $0x3b28] sm:$0xff] }
 0x4f9   : > { %3615 = vmatprep.subr.mxu0 %v1590_v63  ;;  %3686 = vmatprep.subr.mxu1 %v1592_v0  ;;  %v2960_v63 = vadd.f32 %v2959_v50, %v2889_v57  ;;  %v1366_v0 = vld [vmem:[%s5187_s22 + $0x2228] sm:$0xff]  ;;  %v3103_v11 = vpop.f32.mrf.mxu0  ;;  %v2229_v50 = vld [vmem:[%s5187_s22 + $0x3d20] sm:$0xff]  ;;  %v2168_v57 = vld [vmem:[%s5187_s22 + $0x3b38] sm:$0xff] }
 0x4fa   : > { %v2962_v3 = vadd.f32 %v2961_v59, %v2891_v62  ;;  %v3172_v10 = vpop.f32.mrf.mxu1  ;;  %v2167_v59 = vld [vmem:[%s5187_s22 + $0x3b30] sm:$0xff]  ;;  %v2133_v62 = vld [vmem:[%s5187_s22 + $0x3a20] sm:$0xff] }
 0x4fb   : > { %v3031_v7 = vadd.f32 %v3030_v58, %v2960_v63  ;;  %v2165_v58 = vld [vmem:[%s5187_s22 + $0x3b20] sm:$0xff]  ;;  %v2135_v63 = vld [vmem:[%s5187_s22 + $0x3a30] sm:$0xff] }
 0x4fc   : > { %3616 = vmatpush1.xpose.msra.mxu0 %v1589_v5  ;;  %3687 = vmatpush1.xpose.msra.mxu1 %v1591_v6  ;;  %v1365_v5 = vld [vmem:[%s5187_s22 + $0x2220] sm:$0xff]  ;;  %v1367_v6 = vld [vmem:[%s5187_s22 + $0x2230] sm:$0xff]  ;;  %v3033_v12 = vadd.f32 %v3032_v4, %v2962_v3  ;;  %v3174_v20 = vpop.f32.mrf.mxu1  ;;  %v2070_v4 = vld [vmem:[%s5187_s22 + $0x3828] sm:$0xff] }
 0x4fd   : > { %3617 = vmatprep.subr.mxu0 %v1558_v8  ;;  %3688 = vmatprep.subr.mxu1 %v1560_v9  ;;  %v1334_v8 = vld [vmem:[%s5187_s22 + $0x2128] sm:$0xff]  ;;  %v1336_v9 = vld [vmem:[%s5187_s22 + $0x2138] sm:$0xff]  ;;  %v2103_v3 = vld [vmem:[%s5187_s22 + $0x3930] sm:$0xff] }
 0x4fe   : > { %v3314_v22 = vpop.f32.mrf.mxu1 }
 0x500   : > { %3618 = vmatpush1.xpose.msra.mxu0 %v1557_v13  ;;  %3689 = vmatpush1.xpose.msra.mxu1 %v1559_v14  ;;  %v3102_v13 = vadd.f32 %v3101_v2, %v3031_v7  ;;  %v3243_v14 = vpop.f32.mrf.mxu0  ;;  %v3316_v31 = vpop.f32.mrf.mxu1  ;;  %v2101_v2 = vld [vmem:[%s5187_s22 + $0x3920] sm:$0xff]  ;;  %v2071_v7 = vld [vmem:[%s5187_s22 + $0x3830] sm:$0xff] }
 0x501   : > { %3619 = vmatprep.subr.mxu0 %v1526_v16  ;;  %3690 = vmatprep.subr.mxu1 %v1528_v17  ;;  %v1335_v16 = vld [vmem:[%s5187_s22 + $0x2130] sm:$0xff]  ;;  %v3104_v17 = vadd.f32 %v3103_v11, %v3033_v12  ;;  %v2006_v12 = vld [vmem:[%s5187_s22 + $0x3628] sm:$0xff] }
 0x502   : > { %v3173_v21 = vadd.f32 %v3172_v10, %v3102_v13  ;;  %v2037_v10 = vld [vmem:[%s5187_s22 + $0x3720] sm:$0xff]  ;;  %v2039_v11 = vld [vmem:[%s5187_s22 + $0x3730] sm:$0xff]  ;;  %v2008_v13 = vld [vmem:[%s5187_s22 + $0x3638] sm:$0xff] }
 0x504   : > { %3620 = vmatpush1.xpose.msra.mxu0 %v1525_v23  ;;  %3691 = vmatpush1.xpose.msra.mxu1 %v1527_v24  ;;  %v3245_v23 = vpop.f32.mrf.mxu0  ;;  %v1301_v24 = vld [vmem:[%s5187_s22 + $0x2020] sm:$0xff] }
 0x505   : > { %3621 = vmatprep.subr.mxu0 %v1494_v26  ;;  %3692 = vmatprep.subr.mxu1 %v1496_v27  ;;  %v3175_v26 = vadd.f32 %v3174_v20, %v3104_v17  ;;  %v3244_v27 = vadd.f32 %v3243_v14, %v3173_v21  ;;  %v2005_v14 = vld [vmem:[%s5187_s22 + $0x3620] sm:$0xff]  ;;  %v1976_v17 = vld [vmem:[%s5187_s22 + $0x3538] sm:$0xff]  ;;  %v1942_v20 = vld [vmem:[%s5187_s22 + $0x3428] sm:$0xff] }
 0x506   : > { %v1944_v21 = vld [vmem:[%s5187_s22 + $0x3438] sm:$0xff] }
 0x507   : > { %v3246_v30 = vadd.f32 %v3245_v23, %v3175_v26  ;;  %v3315_v34 = vadd.f32 %v3314_v22, %v3244_v27  ;;  %v1941_v22 = vld [vmem:[%s5187_s22 + $0x3420] sm:$0xff]  ;;  %v1943_v23 = vld [vmem:[%s5187_s22 + $0x3430] sm:$0xff] }
 0x508   : > { %3622 = vmatpush1.xpose.msra.mxu0 %v1493_v32  ;;  %3693 = vmatpush1.xpose.msra.mxu1 %v1495_v33  ;;  %v2293_v32 = vld [vmem:[%s5187_s22 + $0x3f20] sm:$0xff]  ;;  %v2295_v33 = vld [vmem:[%s5187_s22 + $0x3f30] sm:$0xff] }
 0x509   : > { %3623 = vmatprep.subr.mxu0 %v1462_v36  ;;  %3694 = vmatprep.subr.mxu1 %v1464_v37  ;;  %v2264_v36 = vld [vmem:[%s5187_s22 + $0x3e38] sm:$0xff]  ;;  %v3317_v39 = vadd.f32 %v3316_v31, %v3246_v30  ;;  %v1909_v26 = vld [vmem:[%s5187_s22 + $0x3320] sm:$0xff]  ;;  %v1911_v27 = vld [vmem:[%s5187_s22 + $0x3330] sm:$0xff] }
 0x50a   : > { %v1877_v30 = vld [vmem:[%s5187_s22 + $0x3220] sm:$0xff]  ;;  %v1879_v31 = vld [vmem:[%s5187_s22 + $0x3230] sm:$0xff] }
 0x50c   : > { %3624 = vmatpush1.xpose.msra.mxu0 %v1461_v41  ;;  %3695 = vmatpush1.xpose.msra.mxu1 %v1463_v42 }
 0x50d   : > { %3625 = vmatprep.subr.mxu0 %v1430_v44  ;;  %3696 = vmatprep.subr.mxu1 %v1432_v45  ;;  %v2263_v44 = vld [vmem:[%s5187_s22 + $0x3e30] sm:$0xff] }
 0x510   : > { %3626 = vmatpush1.xpose.msra.mxu0 %v1429_v51  ;;  %3697 = vmatpush1.xpose.msra.mxu1 %v1431_v52  ;;  %v2231_v51 = vld [vmem:[%s5187_s22 + $0x3d30] sm:$0xff]  ;;  %v2198_v52 = vld [vmem:[%s5187_s22 + $0x3c28] sm:$0xff] }
 0x511   : > { %3627 = vmatprep.subr.mxu0 %v1398_v54  ;;  %3698 = vmatprep.subr.mxu1 %v1400_v55  ;;  %v2197_v54 = vld [vmem:[%s5187_s22 + $0x3c20] sm:$0xff]  ;;  %v2199_v55 = vld [vmem:[%s5187_s22 + $0x3c30] sm:$0xff] }
 0x514   : > { %3628 = vmatpush1.xpose.msra.mxu0 %v1397_v60  ;;  %3699 = vmatpush1.xpose.msra.mxu1 %v1399_v61  ;;  %v2134_v60 = vld [vmem:[%s5187_s22 + $0x3a28] sm:$0xff]  ;;  %v2136_v61 = vld [vmem:[%s5187_s22 + $0x3a38] sm:$0xff] }
 0x515   : > { %3629 = vmatprep.subr.mxu0 %v1366_v0  ;;  %3700 = vmatprep.subr.mxu1 %v1368_v1  ;;  %v2102_v0 = vld [vmem:[%s5187_s22 + $0x3928] sm:$0xff]  ;;  %v2104_v1 = vld [vmem:[%s5187_s22 + $0x3938] sm:$0xff] }
 0x518   : > { %3630 = vmatpush1.xpose.msra.mxu0 %v1365_v5  ;;  %3701 = vmatpush1.xpose.msra.mxu1 %v1367_v6  ;;  %v2072_v5 = vld [vmem:[%s5187_s22 + $0x3838] sm:$0xff]  ;;  %v2069_v6 = vld [vmem:[%s5187_s22 + $0x3820] sm:$0xff] }
 0x519   : > { %3631 = vmatprep.subr.mxu0 %v1334_v8  ;;  %3702 = vmatprep.subr.mxu1 %v1336_v9  ;;  %v2038_v8 = vld [vmem:[%s5187_s22 + $0x3728] sm:$0xff]  ;;  %v2040_v9 = vld [vmem:[%s5187_s22 + $0x3738] sm:$0xff] }
 0x51c   : > { %3632 = vmatpush1.xpose.msra.mxu0 %v1333_v15  ;;  %3703 = vmatpush1.xpose.msra.mxu1 %v1335_v16  ;;  %v2007_v15 = vld [vmem:[%s5187_s22 + $0x3630] sm:$0xff]  ;;  %v1974_v16 = vld [vmem:[%s5187_s22 + $0x3528] sm:$0xff] }
 0x51d   : > { %3633 = vmatprep.subr.mxu0 %v1302_v18  ;;  %3704 = vmatprep.subr.mxu1 %v1304_v19  ;;  %v1973_v18 = vld [vmem:[%s5187_s22 + $0x3520] sm:$0xff]  ;;  %v1975_v19 = vld [vmem:[%s5187_s22 + $0x3530] sm:$0xff] }
 0x520   : > { %3634 = vmatpush1.xpose.msra.mxu0 %v1301_v24  ;;  %3705 = vmatpush1.xpose.msra.mxu1 %v1303_v25  ;;  %v1910_v24 = vld [vmem:[%s5187_s22 + $0x3328] sm:$0xff]  ;;  %v1912_v25 = vld [vmem:[%s5187_s22 + $0x3338] sm:$0xff] }
 0x521   : > { %3635 = vmatprep.subr.mxu0 %v2294_v28  ;;  %3706 = vmatprep.subr.mxu1 %v2296_v29  ;;  %v1878_v28 = vld [vmem:[%s5187_s22 + $0x3228] sm:$0xff]  ;;  %v1880_v29 = vld [vmem:[%s5187_s22 + $0x3238] sm:$0xff] }
 0x523   : > { %v3385_v37 = vpop.f32.mrf.mxu0  ;;  %v3456_v38 = vpop.f32.mrf.mxu1 }
 0x524   : > { %v3386_v40 = vadd.f32 %v3385_v37, %v3315_v34  ;;  %3636 = vmatpush2.xpose.msra.mxu0 %v2293_v32  ;;  %3707 = vmatpush2.xpose.msra.mxu1 %v2295_v33  ;;  %v1846_v32 = vld [vmem:[%s5187_s22 + $0x3128] sm:$0xff]  ;;  %v1848_v33 = vld [vmem:[%s5187_s22 + $0x3138] sm:$0xff]  ;;  %v1845_v34 = vld [vmem:[%s5187_s22 + $0x3120] sm:$0xff] }
 0x525   : > { %v3387_v41 = vpop.f32.mrf.mxu0  ;;  %v3458_v42 = vpop.f32.mrf.mxu1  ;;  %3637 = vmatprep.subr.mxu0 %v2262_v35  ;;  %3708 = vmatprep.subr.mxu1 %v2264_v36  ;;  %v1847_v35 = vld [vmem:[%s5187_s22 + $0x3130] sm:$0xff]  ;;  %v1814_v36 = vld [vmem:[%s5187_s22 + $0x3028] sm:$0xff]  ;;  %v1816_v37 = vld [vmem:[%s5187_s22 + $0x3038] sm:$0xff] }
 0x526   : > { %v3457_v45 = vadd.f32 %v3456_v38, %v3386_v40  ;;  %v3388_v46 = vadd.f32 %v3387_v41, %v3317_v39  ;;  %v1813_v38 = vld [vmem:[%s5187_s22 + $0x3020] sm:$0xff]  ;;  %v1815_v39 = vld [vmem:[%s5187_s22 + $0x3030] sm:$0xff]  ;;  %v1786_v40 = vld [vmem:[%s5187_s22 + $0x2f48] sm:$0xff] }
 0x527   : > { %v1788_v41 = vld [vmem:[%s5187_s22 + $0x2f58] sm:$0xff] }
 0x528   : > { %4597 = vst [vmem:[%s6428_s6] sm:$0xff] %v3457_v45  ;;  %v3459_v49 = vadd.f32 %v3458_v42, %v3388_v46  ;;  %3638 = vmatpush2.xpose.msra.mxu0 %v2261_v43  ;;  %3709 = vmatpush2.xpose.msra.mxu1 %v2263_v44  ;;  %v1785_v42 = vld [vmem:[%s5187_s22 + $0x2f40] sm:$0xff]  ;;  %v1787_v43 = vld [vmem:[%s5187_s22 + $0x2f50] sm:$0xff]  ;;  %v1754_v44 = vld [vmem:[%s5187_s22 + $0x2e48] sm:$0xff] }
 0x529   : > { %3639 = vmatprep.subr.mxu0 %v2230_v47  ;;  %3710 = vmatprep.subr.mxu1 %v2232_v48  ;;  %v1756_v45 = vld [vmem:[%s5187_s22 + $0x2e58] sm:$0xff]  ;;  %v4813_v46 = vld [vmem:[#allocation2 + $0x20] sm:$0xff]  ;;  %v4814_v47 = vld [vmem:[#allocation2 + $0x30] sm:$0xff] }
 0x52a   : > { %4598 = vst [vmem:[%s6428_s6 + $0x8] sm:$0xff] %v3459_v49  ;;  %v1753_v48 = vld [vmem:[%s5187_s22 + $0x2e40] sm:$0xff]  ;;  %v1755_v49 = vld [vmem:[%s5187_s22 + $0x2e50] sm:$0xff] }
 0x52c   : > { %3640 = vmatpush2.xpose.msra.mxu0 %v2229_v50  ;;  %3711 = vmatpush2.xpose.msra.mxu1 %v2231_v51  ;;  %v1722_v50 = vld [vmem:[%s5187_s22 + $0x2d48] sm:$0xff]  ;;  %v1724_v51 = vld [vmem:[%s5187_s22 + $0x2d58] sm:$0xff] }
 0x52d   : > { %3641 = vmatprep.subr.mxu0 %v2198_v52  ;;  %3712 = vmatprep.subr.mxu1 %v2200_v53  ;;  %v4815_v52 = vld [vmem:[#allocation2 + $0x48] sm:$0xff]  ;;  %v4816_v53 = vld [vmem:[#allocation2 + $0x58] sm:$0xff] }
 0x530   : > { %3642 = vmatpush2.xpose.msra.mxu0 %v2197_v54  ;;  %3713 = vmatpush2.xpose.msra.mxu1 %v2199_v55  ;;  %v1721_v54 = vld [vmem:[%s5187_s22 + $0x2d40] sm:$0xff]  ;;  %v1723_v55 = vld [vmem:[%s5187_s22 + $0x2d50] sm:$0xff] }
 0x531   : > { %3643 = vmatprep.subr.mxu0 %v2166_v56  ;;  %3714 = vmatprep.subr.mxu1 %v2168_v57  ;;  %v1690_v56 = vld [vmem:[%s5187_s22 + $0x2c48] sm:$0xff]  ;;  %v1692_v57 = vld [vmem:[%s5187_s22 + $0x2c58] sm:$0xff] }
 0x534   : > { %3644 = vmatpush2.xpose.msra.mxu0 %v2165_v58  ;;  %3715 = vmatpush2.xpose.msra.mxu1 %v2167_v59  ;;  %v1689_v58 = vld [vmem:[%s5187_s22 + $0x2c40] sm:$0xff]  ;;  %v1691_v59 = vld [vmem:[%s5187_s22 + $0x2c50] sm:$0xff] }
 0x535   : > { %3645 = vmatprep.subr.mxu0 %v2134_v60  ;;  %3716 = vmatprep.subr.mxu1 %v2136_v61  ;;  %v1658_v60 = vld [vmem:[%s5187_s22 + $0x2b48] sm:$0xff]  ;;  %v1660_v61 = vld [vmem:[%s5187_s22 + $0x2b58] sm:$0xff] }
 0x538   : > { %3646 = vmatpush2.xpose.msra.mxu0 %v2133_v62  ;;  %3717 = vmatpush2.xpose.msra.mxu1 %v2135_v63  ;;  %v1657_v62 = vld [vmem:[%s5187_s22 + $0x2b40] sm:$0xff]  ;;  %v1659_v63 = vld [vmem:[%s5187_s22 + $0x2b50] sm:$0xff] }
 0x539   : > { %3647 = vmatprep.subr.mxu0 %v2102_v0  ;;  %3718 = vmatprep.subr.mxu1 %v2104_v1  ;;  %v1626_v0 = vld [vmem:[%s5187_s22 + $0x2a48] sm:$0xff]  ;;  %v1628_v1 = vld [vmem:[%s5187_s22 + $0x2a58] sm:$0xff] }
 0x53c   : > { %3648 = vmatpush2.xpose.msra.mxu0 %v2101_v2  ;;  %3719 = vmatpush2.xpose.msra.mxu1 %v2103_v3  ;;  %v1625_v2 = vld [vmem:[%s5187_s22 + $0x2a40] sm:$0xff]  ;;  %v1627_v3 = vld [vmem:[%s5187_s22 + $0x2a50] sm:$0xff] }
 0x53d   : > { %3649 = vmatprep.subr.mxu0 %v2070_v4  ;;  %3720 = vmatprep.subr.mxu1 %v2072_v5  ;;  %v1594_v4 = vld [vmem:[%s5187_s22 + $0x2948] sm:$0xff]  ;;  %v1596_v5 = vld [vmem:[%s5187_s22 + $0x2958] sm:$0xff] }
 0x540   : > { %3650 = vmatpush2.xpose.msra.mxu0 %v2069_v6  ;;  %3721 = vmatpush2.xpose.msra.mxu1 %v2071_v7  ;;  %v1593_v6 = vld [vmem:[%s5187_s22 + $0x2940] sm:$0xff]  ;;  %v1595_v7 = vld [vmem:[%s5187_s22 + $0x2950] sm:$0xff] }
 0x541   : > { %3651 = vmatprep.subr.mxu0 %v2038_v8  ;;  %3722 = vmatprep.subr.mxu1 %v2040_v9  ;;  %v1562_v8 = vld [vmem:[%s5187_s22 + $0x2848] sm:$0xff]  ;;  %v1564_v9 = vld [vmem:[%s5187_s22 + $0x2858] sm:$0xff] }
 0x544   : > { %3652 = vmatpush2.xpose.msra.mxu0 %v2037_v10  ;;  %3723 = vmatpush2.xpose.msra.mxu1 %v2039_v11  ;;  %v1561_v10 = vld [vmem:[%s5187_s22 + $0x2840] sm:$0xff]  ;;  %v1563_v11 = vld [vmem:[%s5187_s22 + $0x2850] sm:$0xff] }
 0x545   : > { %3653 = vmatprep.subr.mxu0 %v2006_v12  ;;  %3724 = vmatprep.subr.mxu1 %v2008_v13  ;;  %v1530_v12 = vld [vmem:[%s5187_s22 + $0x2748] sm:$0xff]  ;;  %v1532_v13 = vld [vmem:[%s5187_s22 + $0x2758] sm:$0xff] }
 0x548   : > { %3654 = vmatpush2.xpose.msra.mxu0 %v2005_v14  ;;  %3725 = vmatpush2.xpose.msra.mxu1 %v2007_v15  ;;  %v1529_v14 = vld [vmem:[%s5187_s22 + $0x2740] sm:$0xff]  ;;  %v1531_v15 = vld [vmem:[%s5187_s22 + $0x2750] sm:$0xff] }
 0x549   : > { %3655 = vmatprep.subr.mxu0 %v1974_v16  ;;  %3726 = vmatprep.subr.mxu1 %v1976_v17  ;;  %v1498_v16 = vld [vmem:[%s5187_s22 + $0x2648] sm:$0xff]  ;;  %v1500_v17 = vld [vmem:[%s5187_s22 + $0x2658] sm:$0xff] }
 0x54c   : > { %3656 = vmatpush2.xpose.msra.mxu0 %v1973_v18  ;;  %3727 = vmatpush2.xpose.msra.mxu1 %v1975_v19  ;;  %v1497_v18 = vld [vmem:[%s5187_s22 + $0x2640] sm:$0xff]  ;;  %v1499_v19 = vld [vmem:[%s5187_s22 + $0x2650] sm:$0xff] }
 0x54d   : > { %3657 = vmatprep.subr.mxu0 %v1942_v20  ;;  %3728 = vmatprep.subr.mxu1 %v1944_v21  ;;  %v1466_v20 = vld [vmem:[%s5187_s22 + $0x2548] sm:$0xff]  ;;  %v1468_v21 = vld [vmem:[%s5187_s22 + $0x2558] sm:$0xff] }
 0x550   : > { %3658 = vmatpush2.xpose.msra.mxu0 %v1941_v22  ;;  %3729 = vmatpush2.xpose.msra.mxu1 %v1943_v23  ;;  %v1465_v22 = vld [vmem:[%s5187_s22 + $0x2540] sm:$0xff]  ;;  %v1467_v23 = vld [vmem:[%s5187_s22 + $0x2550] sm:$0xff] }
 0x551   : > { %3659 = vmatprep.subr.mxu0 %v1910_v24  ;;  %3730 = vmatprep.subr.mxu1 %v1912_v25  ;;  %v1434_v24 = vld [vmem:[%s5187_s22 + $0x2448] sm:$0xff]  ;;  %v1436_v25 = vld [vmem:[%s5187_s22 + $0x2458] sm:$0xff] }
 0x554   : > { %3660 = vmatpush2.xpose.msra.mxu0 %v1909_v26  ;;  %3731 = vmatpush2.xpose.msra.mxu1 %v1911_v27  ;;  %v1433_v26 = vld [vmem:[%s5187_s22 + $0x2440] sm:$0xff]  ;;  %v1435_v27 = vld [vmem:[%s5187_s22 + $0x2450] sm:$0xff] }
 0x555   : > { %3661 = vmatprep.subr.mxu0 %v1878_v28  ;;  %3732 = vmatprep.subr.mxu1 %v1880_v29  ;;  %v1402_v28 = vld [vmem:[%s5187_s22 + $0x2348] sm:$0xff]  ;;  %v1404_v29 = vld [vmem:[%s5187_s22 + $0x2358] sm:$0xff] }
 0x558   : > { %3662 = vmatpush2.xpose.msra.mxu0 %v1877_v30  ;;  %3733 = vmatpush2.xpose.msra.mxu1 %v1879_v31  ;;  %v1401_v30 = vld [vmem:[%s5187_s22 + $0x2340] sm:$0xff]  ;;  %v1403_v31 = vld [vmem:[%s5187_s22 + $0x2350] sm:$0xff] }
 0x559   : > { %3663 = vmatprep.subr.mxu0 %v1846_v32  ;;  %3734 = vmatprep.subr.mxu1 %v1848_v33  ;;  %v1370_v32 = vld [vmem:[%s5187_s22 + $0x2248] sm:$0xff]  ;;  %v1372_v33 = vld [vmem:[%s5187_s22 + $0x2258] sm:$0xff] }
 0x55c   : > { %3664 = vmatpush2.xpose.msra.mxu0 %v1845_v34  ;;  %3735 = vmatpush2.xpose.msra.mxu1 %v1847_v35  ;;  %v1369_v34 = vld [vmem:[%s5187_s22 + $0x2240] sm:$0xff]  ;;  %v1371_v35 = vld [vmem:[%s5187_s22 + $0x2250] sm:$0xff] }
 0x55d   : > { %3665 = vmatprep.subr.mxu0 %v1814_v36  ;;  %3736 = vmatprep.subr.mxu1 %v1816_v37  ;;  %v1338_v36 = vld [vmem:[%s5187_s22 + $0x2148] sm:$0xff]  ;;  %v1340_v37 = vld [vmem:[%s5187_s22 + $0x2158] sm:$0xff] }
 0x560   : > { %3666 = vmatpush2.xpose.msra.mxu0 %v1813_v38  ;;  %3737 = vmatpush2.xpose.msra.mxu1 %v1815_v39  ;;  %v1337_v38 = vld [vmem:[%s5187_s22 + $0x2140] sm:$0xff]  ;;  %v1339_v39 = vld [vmem:[%s5187_s22 + $0x2150] sm:$0xff] }
 0x561   : > { %3745 = vmatprep.subr.mxu0 %v1786_v40  ;;  %3816 = vmatprep.subr.mxu1 %v1788_v41  ;;  %v1306_v40 = vld [vmem:[%s5187_s22 + $0x2048] sm:$0xff]  ;;  %v1308_v41 = vld [vmem:[%s5187_s22 + $0x2058] sm:$0xff] }
 0x563   : > { %3668 = vmatmul.mubr.f32.vlgmr.msra.gmra.mxu0 %v4813_v46  ;;  %3739 = vmatmul.mubr.f32.vlgmr.msra.gmra.mxu1 %v4814_v47  ;;  %v2297_v46 = vld [vmem:[%s5187_s22 + $0x3f40] sm:$0xff]  ;;  %v2299_v47 = vld [vmem:[%s5187_s22 + $0x3f50] sm:$0xff] }
 0x564   : > { %3746 = vmatpush1.xpose.msra.mxu0 %v1785_v42  ;;  %3817 = vmatpush1.xpose.msra.mxu1 %v1787_v43  ;;  %v1305_v42 = vld [vmem:[%s5187_s22 + $0x2040] sm:$0xff]  ;;  %v1307_v43 = vld [vmem:[%s5187_s22 + $0x2050] sm:$0xff] }
 0x565   : > { %3747 = vmatprep.subr.mxu0 %v1754_v44  ;;  %3818 = vmatprep.subr.mxu1 %v1756_v45  ;;  %v2298_v44 = vld [vmem:[%s5187_s22 + $0x3f48] sm:$0xff]  ;;  %v2300_v45 = vld [vmem:[%s5187_s22 + $0x3f58] sm:$0xff] }
 0x566   : > { %3809 = vmatprep.mubr.f32.mxu0 %v4815_v52  ;;  %3880 = vmatprep.mubr.f32.mxu1 %v4816_v53  ;;  %v2234_v52 = vld [vmem:[%s5187_s22 + $0x3d48] sm:$0xff]  ;;  %v2236_v53 = vld [vmem:[%s5187_s22 + $0x3d58] sm:$0xff] }
 0x568   : > { %3748 = vmatpush1.xpose.msra.mxu0 %v1753_v48  ;;  %3819 = vmatpush1.xpose.msra.mxu1 %v1755_v49  ;;  %v2266_v48 = vld [vmem:[%s5187_s22 + $0x3e48] sm:$0xff]  ;;  %v2268_v49 = vld [vmem:[%s5187_s22 + $0x3e58] sm:$0xff] }
 0x569   : > { %3749 = vmatprep.subr.mxu0 %v1722_v50  ;;  %3820 = vmatprep.subr.mxu1 %v1724_v51  ;;  %v2265_v50 = vld [vmem:[%s5187_s22 + $0x3e40] sm:$0xff]  ;;  %v2267_v51 = vld [vmem:[%s5187_s22 + $0x3e50] sm:$0xff] }
 0x56c   : > { %3750 = vmatpush1.xpose.msra.mxu0 %v1721_v54  ;;  %3821 = vmatpush1.xpose.msra.mxu1 %v1723_v55  ;;  %v2233_v54 = vld [vmem:[%s5187_s22 + $0x3d40] sm:$0xff]  ;;  %v2235_v55 = vld [vmem:[%s5187_s22 + $0x3d50] sm:$0xff] }
 0x56d   : > { %3751 = vmatprep.subr.mxu0 %v1690_v56  ;;  %3822 = vmatprep.subr.mxu1 %v1692_v57  ;;  %v2202_v56 = vld [vmem:[%s5187_s22 + $0x3c48] sm:$0xff]  ;;  %v2204_v57 = vld [vmem:[%s5187_s22 + $0x3c58] sm:$0xff] }
 0x570   : > { %3752 = vmatpush1.xpose.msra.mxu0 %v1689_v58  ;;  %3823 = vmatpush1.xpose.msra.mxu1 %v1691_v59  ;;  %v2201_v58 = vld [vmem:[%s5187_s22 + $0x3c40] sm:$0xff]  ;;  %v2203_v59 = vld [vmem:[%s5187_s22 + $0x3c50] sm:$0xff] }
 0x571   : > { %3753 = vmatprep.subr.mxu0 %v1658_v60  ;;  %3824 = vmatprep.subr.mxu1 %v1660_v61  ;;  %v2170_v60 = vld [vmem:[%s5187_s22 + $0x3b48] sm:$0xff]  ;;  %v2172_v61 = vld [vmem:[%s5187_s22 + $0x3b58] sm:$0xff] }
 0x574   : > { %3754 = vmatpush1.xpose.msra.mxu0 %v1657_v62  ;;  %3825 = vmatpush1.xpose.msra.mxu1 %v1659_v63  ;;  %v2169_v62 = vld [vmem:[%s5187_s22 + $0x3b40] sm:$0xff]  ;;  %v2171_v63 = vld [vmem:[%s5187_s22 + $0x3b50] sm:$0xff] }
 0x575   : > { %3755 = vmatprep.subr.mxu0 %v1626_v0  ;;  %3826 = vmatprep.subr.mxu1 %v1628_v1  ;;  %v2138_v0 = vld [vmem:[%s5187_s22 + $0x3a48] sm:$0xff]  ;;  %v2140_v1 = vld [vmem:[%s5187_s22 + $0x3a58] sm:$0xff] }
 0x578   : > { %3756 = vmatpush1.xpose.msra.mxu0 %v1625_v2  ;;  %3827 = vmatpush1.xpose.msra.mxu1 %v1627_v3  ;;  %v2137_v2 = vld [vmem:[%s5187_s22 + $0x3a40] sm:$0xff]  ;;  %v2139_v3 = vld [vmem:[%s5187_s22 + $0x3a50] sm:$0xff] }
 0x579   : > { %3757 = vmatprep.subr.mxu0 %v1594_v4  ;;  %3828 = vmatprep.subr.mxu1 %v1596_v5  ;;  %v2106_v4 = vld [vmem:[%s5187_s22 + $0x3948] sm:$0xff]  ;;  %v2108_v5 = vld [vmem:[%s5187_s22 + $0x3958] sm:$0xff] }
 0x57c   : > { %3758 = vmatpush1.xpose.msra.mxu0 %v1593_v6  ;;  %3829 = vmatpush1.xpose.msra.mxu1 %v1595_v7  ;;  %v2105_v6 = vld [vmem:[%s5187_s22 + $0x3940] sm:$0xff]  ;;  %v2107_v7 = vld [vmem:[%s5187_s22 + $0x3950] sm:$0xff] }
 0x57d   : > { %3759 = vmatprep.subr.mxu0 %v1562_v8  ;;  %3830 = vmatprep.subr.mxu1 %v1564_v9  ;;  %v2074_v8 = vld [vmem:[%s5187_s22 + $0x3848] sm:$0xff]  ;;  %v2076_v9 = vld [vmem:[%s5187_s22 + $0x3858] sm:$0xff] }
 0x580   : > { %3760 = vmatpush1.xpose.msra.mxu0 %v1561_v10  ;;  %3831 = vmatpush1.xpose.msra.mxu1 %v1563_v11  ;;  %v2073_v10 = vld [vmem:[%s5187_s22 + $0x3840] sm:$0xff]  ;;  %v2075_v11 = vld [vmem:[%s5187_s22 + $0x3850] sm:$0xff] }
 0x581   : > { %3761 = vmatprep.subr.mxu0 %v1530_v12  ;;  %3832 = vmatprep.subr.mxu1 %v1532_v13  ;;  %v2042_v12 = vld [vmem:[%s5187_s22 + $0x3748] sm:$0xff]  ;;  %v2044_v13 = vld [vmem:[%s5187_s22 + $0x3758] sm:$0xff] }
 0x584   : > { %3762 = vmatpush1.xpose.msra.mxu0 %v1529_v14  ;;  %3833 = vmatpush1.xpose.msra.mxu1 %v1531_v15  ;;  %v2041_v14 = vld [vmem:[%s5187_s22 + $0x3740] sm:$0xff]  ;;  %v2043_v15 = vld [vmem:[%s5187_s22 + $0x3750] sm:$0xff] }
 0x585   : > { %3763 = vmatprep.subr.mxu0 %v1498_v16  ;;  %3834 = vmatprep.subr.mxu1 %v1500_v17  ;;  %v2010_v16 = vld [vmem:[%s5187_s22 + $0x3648] sm:$0xff]  ;;  %v2012_v17 = vld [vmem:[%s5187_s22 + $0x3658] sm:$0xff] }
 0x588   : > { %3764 = vmatpush1.xpose.msra.mxu0 %v1497_v18  ;;  %3835 = vmatpush1.xpose.msra.mxu1 %v1499_v19  ;;  %v2009_v18 = vld [vmem:[%s5187_s22 + $0x3640] sm:$0xff]  ;;  %v2011_v19 = vld [vmem:[%s5187_s22 + $0x3650] sm:$0xff] }
 0x589   : > { %3765 = vmatprep.subr.mxu0 %v1466_v20  ;;  %3836 = vmatprep.subr.mxu1 %v1468_v21  ;;  %v1978_v20 = vld [vmem:[%s5187_s22 + $0x3548] sm:$0xff]  ;;  %v1980_v21 = vld [vmem:[%s5187_s22 + $0x3558] sm:$0xff] }
 0x58c   : > { %3766 = vmatpush1.xpose.msra.mxu0 %v1465_v22  ;;  %3837 = vmatpush1.xpose.msra.mxu1 %v1467_v23  ;;  %v1977_v22 = vld [vmem:[%s5187_s22 + $0x3540] sm:$0xff]  ;;  %v1979_v23 = vld [vmem:[%s5187_s22 + $0x3550] sm:$0xff] }
 0x58d   : > { %3767 = vmatprep.subr.mxu0 %v1434_v24  ;;  %3838 = vmatprep.subr.mxu1 %v1436_v25  ;;  %v1946_v24 = vld [vmem:[%s5187_s22 + $0x3448] sm:$0xff]  ;;  %v1948_v25 = vld [vmem:[%s5187_s22 + $0x3458] sm:$0xff] }
 0x590   : > { %3768 = vmatpush1.xpose.msra.mxu0 %v1433_v26  ;;  %3839 = vmatpush1.xpose.msra.mxu1 %v1435_v27  ;;  %v1945_v26 = vld [vmem:[%s5187_s22 + $0x3440] sm:$0xff]  ;;  %v1947_v27 = vld [vmem:[%s5187_s22 + $0x3450] sm:$0xff] }
 0x591   : > { %3769 = vmatprep.subr.mxu0 %v1402_v28  ;;  %3840 = vmatprep.subr.mxu1 %v1404_v29  ;;  %v1914_v28 = vld [vmem:[%s5187_s22 + $0x3348] sm:$0xff]  ;;  %v1916_v29 = vld [vmem:[%s5187_s22 + $0x3358] sm:$0xff] }
 0x594   : > { %3770 = vmatpush1.xpose.msra.mxu0 %v1401_v30  ;;  %3841 = vmatpush1.xpose.msra.mxu1 %v1403_v31  ;;  %v1913_v30 = vld [vmem:[%s5187_s22 + $0x3340] sm:$0xff]  ;;  %v1915_v31 = vld [vmem:[%s5187_s22 + $0x3350] sm:$0xff] }
 0x595   : > { %3771 = vmatprep.subr.mxu0 %v1370_v32  ;;  %3842 = vmatprep.subr.mxu1 %v1372_v33  ;;  %v1882_v32 = vld [vmem:[%s5187_s22 + $0x3248] sm:$0xff]  ;;  %v1884_v33 = vld [vmem:[%s5187_s22 + $0x3258] sm:$0xff] }
 0x598   : > { %3772 = vmatpush1.xpose.msra.mxu0 %v1369_v34  ;;  %3843 = vmatpush1.xpose.msra.mxu1 %v1371_v35  ;;  %v1881_v34 = vld [vmem:[%s5187_s22 + $0x3240] sm:$0xff]  ;;  %v1883_v35 = vld [vmem:[%s5187_s22 + $0x3250] sm:$0xff] }
 0x599   : > { %3773 = vmatprep.subr.mxu0 %v1338_v36  ;;  %3844 = vmatprep.subr.mxu1 %v1340_v37  ;;  %v1850_v36 = vld [vmem:[%s5187_s22 + $0x3148] sm:$0xff]  ;;  %v1852_v37 = vld [vmem:[%s5187_s22 + $0x3158] sm:$0xff] }
 0x59c   : > { %3774 = vmatpush1.xpose.msra.mxu0 %v1337_v38  ;;  %3845 = vmatpush1.xpose.msra.mxu1 %v1339_v39  ;;  %v1849_v38 = vld [vmem:[%s5187_s22 + $0x3140] sm:$0xff]  ;;  %v1851_v39 = vld [vmem:[%s5187_s22 + $0x3150] sm:$0xff] }
 0x59d   : > { %3775 = vmatprep.subr.mxu0 %v1306_v40  ;;  %3846 = vmatprep.subr.mxu1 %v1308_v41  ;;  %v1818_v40 = vld [vmem:[%s5187_s22 + $0x3048] sm:$0xff]  ;;  %v1820_v41 = vld [vmem:[%s5187_s22 + $0x3058] sm:$0xff] }
 0x5a0   : > { %3776 = vmatpush1.xpose.msra.mxu0 %v1305_v42  ;;  %3847 = vmatpush1.xpose.msra.mxu1 %v1307_v43  ;;  %v1817_v42 = vld [vmem:[%s5187_s22 + $0x3040] sm:$0xff]  ;;  %v1819_v43 = vld [vmem:[%s5187_s22 + $0x3050] sm:$0xff] }
 0x5a1   : > { %3777 = vmatprep.subr.mxu0 %v2298_v44  ;;  %3848 = vmatprep.subr.mxu1 %v2300_v45  ;;  %v1790_v44 = vld [vmem:[%s5187_s22 + $0x2f68] sm:$0xff]  ;;  %v1792_v45 = vld [vmem:[%s5187_s22 + $0x2f78] sm:$0xff] }
 0x5a4   : > { %3778 = vmatpush2.xpose.msra.mxu0 %v2297_v46  ;;  %3849 = vmatpush2.xpose.msra.mxu1 %v2299_v47  ;;  %v1789_v46 = vld [vmem:[%s5187_s22 + $0x2f60] sm:$0xff]  ;;  %v1791_v47 = vld [vmem:[%s5187_s22 + $0x2f70] sm:$0xff] }
 0x5a5   : > { %3779 = vmatprep.subr.mxu0 %v2266_v48  ;;  %3850 = vmatprep.subr.mxu1 %v2268_v49  ;;  %v1758_v48 = vld [vmem:[%s5187_s22 + $0x2e68] sm:$0xff]  ;;  %v1760_v49 = vld [vmem:[%s5187_s22 + $0x2e78] sm:$0xff] }
 0x5a8   : > { %3780 = vmatpush2.xpose.msra.mxu0 %v2265_v50  ;;  %3851 = vmatpush2.xpose.msra.mxu1 %v2267_v51  ;;  %v4817_v50 = vld [vmem:[#allocation2 + $0x40] sm:$0xff]  ;;  %v4818_v51 = vld [vmem:[#allocation2 + $0x50] sm:$0xff] }
 0x5a9   : > { %3781 = vmatprep.subr.mxu0 %v2234_v52  ;;  %3852 = vmatprep.subr.mxu1 %v2236_v53  ;;  %v1757_v52 = vld [vmem:[%s5187_s22 + $0x2e60] sm:$0xff]  ;;  %v1759_v53 = vld [vmem:[%s5187_s22 + $0x2e70] sm:$0xff] }
 0x5ac   : > { %3782 = vmatpush2.xpose.msra.mxu0 %v2233_v54  ;;  %3853 = vmatpush2.xpose.msra.mxu1 %v2235_v55  ;;  %v1726_v54 = vld [vmem:[%s5187_s22 + $0x2d68] sm:$0xff]  ;;  %v1728_v55 = vld [vmem:[%s5187_s22 + $0x2d78] sm:$0xff] }
 0x5ad   : > { %3783 = vmatprep.subr.mxu0 %v2202_v56  ;;  %3854 = vmatprep.subr.mxu1 %v2204_v57  ;;  %v4819_v56 = vld [vmem:[#allocation2 + $0x68] sm:$0xff]  ;;  %v4820_v57 = vld [vmem:[#allocation2 + $0x78] sm:$0xff] }
 0x5b0   : > { %3784 = vmatpush2.xpose.msra.mxu0 %v2201_v58  ;;  %3855 = vmatpush2.xpose.msra.mxu1 %v2203_v59  ;;  %v1725_v58 = vld [vmem:[%s5187_s22 + $0x2d60] sm:$0xff]  ;;  %v1727_v59 = vld [vmem:[%s5187_s22 + $0x2d70] sm:$0xff] }
 0x5b1   : > { %3785 = vmatprep.subr.mxu0 %v2170_v60  ;;  %3856 = vmatprep.subr.mxu1 %v2172_v61  ;;  %v1694_v60 = vld [vmem:[%s5187_s22 + $0x2c68] sm:$0xff]  ;;  %v1696_v61 = vld [vmem:[%s5187_s22 + $0x2c78] sm:$0xff] }
 0x5b4   : > { %3786 = vmatpush2.xpose.msra.mxu0 %v2169_v62  ;;  %3857 = vmatpush2.xpose.msra.mxu1 %v2171_v63  ;;  %v1693_v62 = vld [vmem:[%s5187_s22 + $0x2c60] sm:$0xff]  ;;  %v1695_v63 = vld [vmem:[%s5187_s22 + $0x2c70] sm:$0xff] }
 0x5b5   : > { %3787 = vmatprep.subr.mxu0 %v2138_v0  ;;  %3858 = vmatprep.subr.mxu1 %v2140_v1  ;;  %v1662_v0 = vld [vmem:[%s5187_s22 + $0x2b68] sm:$0xff]  ;;  %v1664_v1 = vld [vmem:[%s5187_s22 + $0x2b78] sm:$0xff] }
 0x5b8   : > { %3788 = vmatpush2.xpose.msra.mxu0 %v2137_v2  ;;  %3859 = vmatpush2.xpose.msra.mxu1 %v2139_v3  ;;  %v1661_v2 = vld [vmem:[%s5187_s22 + $0x2b60] sm:$0xff]  ;;  %v1663_v3 = vld [vmem:[%s5187_s22 + $0x2b70] sm:$0xff] }
 0x5b9   : > { %3789 = vmatprep.subr.mxu0 %v2106_v4  ;;  %3860 = vmatprep.subr.mxu1 %v2108_v5  ;;  %v1630_v4 = vld [vmem:[%s5187_s22 + $0x2a68] sm:$0xff]  ;;  %v1632_v5 = vld [vmem:[%s5187_s22 + $0x2a78] sm:$0xff] }
 0x5bc   : > { %3790 = vmatpush2.xpose.msra.mxu0 %v2105_v6  ;;  %3861 = vmatpush2.xpose.msra.mxu1 %v2107_v7  ;;  %v1629_v6 = vld [vmem:[%s5187_s22 + $0x2a60] sm:$0xff]  ;;  %v1631_v7 = vld [vmem:[%s5187_s22 + $0x2a70] sm:$0xff] }
 0x5bd   : > { %3791 = vmatprep.subr.mxu0 %v2074_v8  ;;  %3862 = vmatprep.subr.mxu1 %v2076_v9  ;;  %v1598_v8 = vld [vmem:[%s5187_s22 + $0x2968] sm:$0xff]  ;;  %v1600_v9 = vld [vmem:[%s5187_s22 + $0x2978] sm:$0xff] }
 0x5c0   : > { %3792 = vmatpush2.xpose.msra.mxu0 %v2073_v10  ;;  %3863 = vmatpush2.xpose.msra.mxu1 %v2075_v11  ;;  %v1597_v10 = vld [vmem:[%s5187_s22 + $0x2960] sm:$0xff]  ;;  %v1599_v11 = vld [vmem:[%s5187_s22 + $0x2970] sm:$0xff] }
 0x5c1   : > { %3793 = vmatprep.subr.mxu0 %v2042_v12  ;;  %3864 = vmatprep.subr.mxu1 %v2044_v13  ;;  %v1566_v12 = vld [vmem:[%s5187_s22 + $0x2868] sm:$0xff]  ;;  %v1568_v13 = vld [vmem:[%s5187_s22 + $0x2878] sm:$0xff] }
 0x5c4   : > { %3794 = vmatpush2.xpose.msra.mxu0 %v2041_v14  ;;  %3865 = vmatpush2.xpose.msra.mxu1 %v2043_v15  ;;  %v1565_v14 = vld [vmem:[%s5187_s22 + $0x2860] sm:$0xff]  ;;  %v1567_v15 = vld [vmem:[%s5187_s22 + $0x2870] sm:$0xff] }
 0x5c5   : > { %3795 = vmatprep.subr.mxu0 %v2010_v16  ;;  %3866 = vmatprep.subr.mxu1 %v2012_v17  ;;  %v1534_v16 = vld [vmem:[%s5187_s22 + $0x2768] sm:$0xff]  ;;  %v1536_v17 = vld [vmem:[%s5187_s22 + $0x2778] sm:$0xff] }
 0x5c8   : > { %3796 = vmatpush2.xpose.msra.mxu0 %v2009_v18  ;;  %3867 = vmatpush2.xpose.msra.mxu1 %v2011_v19  ;;  %v1533_v18 = vld [vmem:[%s5187_s22 + $0x2760] sm:$0xff]  ;;  %v1535_v19 = vld [vmem:[%s5187_s22 + $0x2770] sm:$0xff] }
 0x5c9   : > { %3797 = vmatprep.subr.mxu0 %v1978_v20  ;;  %3868 = vmatprep.subr.mxu1 %v1980_v21  ;;  %v1502_v20 = vld [vmem:[%s5187_s22 + $0x2668] sm:$0xff]  ;;  %v1504_v21 = vld [vmem:[%s5187_s22 + $0x2678] sm:$0xff] }
 0x5cc   : > { %3798 = vmatpush2.xpose.msra.mxu0 %v1977_v22  ;;  %3869 = vmatpush2.xpose.msra.mxu1 %v1979_v23  ;;  %v1501_v22 = vld [vmem:[%s5187_s22 + $0x2660] sm:$0xff]  ;;  %v1503_v23 = vld [vmem:[%s5187_s22 + $0x2670] sm:$0xff] }
 0x5cd   : > { %3799 = vmatprep.subr.mxu0 %v1946_v24  ;;  %3870 = vmatprep.subr.mxu1 %v1948_v25  ;;  %v1470_v24 = vld [vmem:[%s5187_s22 + $0x2568] sm:$0xff]  ;;  %v1472_v25 = vld [vmem:[%s5187_s22 + $0x2578] sm:$0xff] }
 0x5d0   : > { %3800 = vmatpush2.xpose.msra.mxu0 %v1945_v26  ;;  %3871 = vmatpush2.xpose.msra.mxu1 %v1947_v27  ;;  %v1469_v26 = vld [vmem:[%s5187_s22 + $0x2560] sm:$0xff]  ;;  %v1471_v27 = vld [vmem:[%s5187_s22 + $0x2570] sm:$0xff] }
 0x5d1   : > { %3801 = vmatprep.subr.mxu0 %v1914_v28  ;;  %3872 = vmatprep.subr.mxu1 %v1916_v29  ;;  %v1438_v28 = vld [vmem:[%s5187_s22 + $0x2468] sm:$0xff]  ;;  %v1440_v29 = vld [vmem:[%s5187_s22 + $0x2478] sm:$0xff] }
 0x5d4   : > { %3802 = vmatpush2.xpose.msra.mxu0 %v1913_v30  ;;  %3873 = vmatpush2.xpose.msra.mxu1 %v1915_v31  ;;  %v1437_v30 = vld [vmem:[%s5187_s22 + $0x2460] sm:$0xff]  ;;  %v1439_v31 = vld [vmem:[%s5187_s22 + $0x2470] sm:$0xff] }
 0x5d5   : > { %3803 = vmatprep.subr.mxu0 %v1882_v32  ;;  %3874 = vmatprep.subr.mxu1 %v1884_v33  ;;  %v1406_v32 = vld [vmem:[%s5187_s22 + $0x2368] sm:$0xff]  ;;  %v1408_v33 = vld [vmem:[%s5187_s22 + $0x2378] sm:$0xff] }
 0x5d8   : > { %3804 = vmatpush2.xpose.msra.mxu0 %v1881_v34  ;;  %3875 = vmatpush2.xpose.msra.mxu1 %v1883_v35  ;;  %v1405_v34 = vld [vmem:[%s5187_s22 + $0x2360] sm:$0xff]  ;;  %v1407_v35 = vld [vmem:[%s5187_s22 + $0x2370] sm:$0xff] }
 0x5d9   : > { %3805 = vmatprep.subr.mxu0 %v1850_v36  ;;  %3876 = vmatprep.subr.mxu1 %v1852_v37  ;;  %v1374_v36 = vld [vmem:[%s5187_s22 + $0x2268] sm:$0xff]  ;;  %v1376_v37 = vld [vmem:[%s5187_s22 + $0x2278] sm:$0xff] }
 0x5dc   : > { %3806 = vmatpush2.xpose.msra.mxu0 %v1849_v38  ;;  %3877 = vmatpush2.xpose.msra.mxu1 %v1851_v39  ;;  %v1373_v38 = vld [vmem:[%s5187_s22 + $0x2260] sm:$0xff]  ;;  %v1375_v39 = vld [vmem:[%s5187_s22 + $0x2270] sm:$0xff] }
 0x5dd   : > { %3807 = vmatprep.subr.mxu0 %v1818_v40  ;;  %3878 = vmatprep.subr.mxu1 %v1820_v41  ;;  %v1342_v40 = vld [vmem:[%s5187_s22 + $0x2168] sm:$0xff]  ;;  %v1344_v41 = vld [vmem:[%s5187_s22 + $0x2178] sm:$0xff] }
 0x5e0   : > { %3808 = vmatpush2.xpose.msra.mxu0 %v1817_v42  ;;  %3879 = vmatpush2.xpose.msra.mxu1 %v1819_v43  ;;  %v1341_v42 = vld [vmem:[%s5187_s22 + $0x2160] sm:$0xff]  ;;  %v1343_v43 = vld [vmem:[%s5187_s22 + $0x2170] sm:$0xff] }
 0x5e1   : > { %3887 = vmatprep.subr.mxu0 %v1790_v44  ;;  %3958 = vmatprep.subr.mxu1 %v1792_v45  ;;  %v1310_v44 = vld [vmem:[%s5187_s22 + $0x2068] sm:$0xff]  ;;  %v1312_v45 = vld [vmem:[%s5187_s22 + $0x2078] sm:$0xff] }
 0x5e3   : > { %3810 = vmatmul.mubr.f32.vlgmr.msra.gmra.mxu0 %v4817_v50  ;;  %3881 = vmatmul.mubr.f32.vlgmr.msra.gmra.mxu1 %v4818_v51  ;;  %v2301_v50 = vld [vmem:[%s5187_s22 + $0x3f60] sm:$0xff]  ;;  %v2303_v51 = vld [vmem:[%s5187_s22 + $0x3f70] sm:$0xff] }
 0x5e4   : > { %3888 = vmatpush1.xpose.msra.mxu0 %v1789_v46  ;;  %3959 = vmatpush1.xpose.msra.mxu1 %v1791_v47  ;;  %v1309_v46 = vld [vmem:[%s5187_s22 + $0x2060] sm:$0xff]  ;;  %v1311_v47 = vld [vmem:[%s5187_s22 + $0x2070] sm:$0xff] }
 0x5e5   : > { %3889 = vmatprep.subr.mxu0 %v1758_v48  ;;  %3960 = vmatprep.subr.mxu1 %v1760_v49  ;;  %v2302_v48 = vld [vmem:[%s5187_s22 + $0x3f68] sm:$0xff]  ;;  %v2304_v49 = vld [vmem:[%s5187_s22 + $0x3f78] sm:$0xff] }
 0x5e6   : > { %3951 = vmatprep.mubr.f32.mxu0 %v4819_v56  ;;  %4022 = vmatprep.mubr.f32.mxu1 %v4820_v57  ;;  %v2238_v56 = vld [vmem:[%s5187_s22 + $0x3d68] sm:$0xff]  ;;  %v2240_v57 = vld [vmem:[%s5187_s22 + $0x3d78] sm:$0xff] }
 0x5e8   : > { %3890 = vmatpush1.xpose.msra.mxu0 %v1757_v52  ;;  %3961 = vmatpush1.xpose.msra.mxu1 %v1759_v53  ;;  %v2270_v52 = vld [vmem:[%s5187_s22 + $0x3e68] sm:$0xff]  ;;  %v2272_v53 = vld [vmem:[%s5187_s22 + $0x3e78] sm:$0xff] }
 0x5e9   : > { %3891 = vmatprep.subr.mxu0 %v1726_v54  ;;  %3962 = vmatprep.subr.mxu1 %v1728_v55  ;;  %v2269_v54 = vld [vmem:[%s5187_s22 + $0x3e60] sm:$0xff]  ;;  %v2271_v55 = vld [vmem:[%s5187_s22 + $0x3e70] sm:$0xff] }
 0x5ec   : > { %3892 = vmatpush1.xpose.msra.mxu0 %v1725_v58  ;;  %3963 = vmatpush1.xpose.msra.mxu1 %v1727_v59  ;;  %v2237_v58 = vld [vmem:[%s5187_s22 + $0x3d60] sm:$0xff]  ;;  %v2239_v59 = vld [vmem:[%s5187_s22 + $0x3d70] sm:$0xff] }
 0x5ed   : > { %3893 = vmatprep.subr.mxu0 %v1694_v60  ;;  %3964 = vmatprep.subr.mxu1 %v1696_v61  ;;  %v2206_v60 = vld [vmem:[%s5187_s22 + $0x3c68] sm:$0xff]  ;;  %v2208_v61 = vld [vmem:[%s5187_s22 + $0x3c78] sm:$0xff] }
 0x5f0   : > { %3894 = vmatpush1.xpose.msra.mxu0 %v1693_v62  ;;  %3965 = vmatpush1.xpose.msra.mxu1 %v1695_v63  ;;  %v2205_v62 = vld [vmem:[%s5187_s22 + $0x3c60] sm:$0xff]  ;;  %v2207_v63 = vld [vmem:[%s5187_s22 + $0x3c70] sm:$0xff] }
 0x5f1   : > { %3895 = vmatprep.subr.mxu0 %v1662_v0  ;;  %3966 = vmatprep.subr.mxu1 %v1664_v1  ;;  %v2174_v0 = vld [vmem:[%s5187_s22 + $0x3b68] sm:$0xff]  ;;  %v2176_v1 = vld [vmem:[%s5187_s22 + $0x3b78] sm:$0xff] }
 0x5f4   : > { %3896 = vmatpush1.xpose.msra.mxu0 %v1661_v2  ;;  %3967 = vmatpush1.xpose.msra.mxu1 %v1663_v3  ;;  %v2173_v2 = vld [vmem:[%s5187_s22 + $0x3b60] sm:$0xff]  ;;  %v2175_v3 = vld [vmem:[%s5187_s22 + $0x3b70] sm:$0xff] }
 0x5f5   : > { %3897 = vmatprep.subr.mxu0 %v1630_v4  ;;  %3968 = vmatprep.subr.mxu1 %v1632_v5  ;;  %v2142_v4 = vld [vmem:[%s5187_s22 + $0x3a68] sm:$0xff]  ;;  %v2144_v5 = vld [vmem:[%s5187_s22 + $0x3a78] sm:$0xff] }
 0x5f8   : > { %3898 = vmatpush1.xpose.msra.mxu0 %v1629_v6  ;;  %3969 = vmatpush1.xpose.msra.mxu1 %v1631_v7  ;;  %v2141_v6 = vld [vmem:[%s5187_s22 + $0x3a60] sm:$0xff]  ;;  %v2143_v7 = vld [vmem:[%s5187_s22 + $0x3a70] sm:$0xff] }
 0x5f9   : > { %3899 = vmatprep.subr.mxu0 %v1598_v8  ;;  %3970 = vmatprep.subr.mxu1 %v1600_v9  ;;  %v2110_v8 = vld [vmem:[%s5187_s22 + $0x3968] sm:$0xff]  ;;  %v2112_v9 = vld [vmem:[%s5187_s22 + $0x3978] sm:$0xff] }
 0x5fc   : > { %3900 = vmatpush1.xpose.msra.mxu0 %v1597_v10  ;;  %3971 = vmatpush1.xpose.msra.mxu1 %v1599_v11  ;;  %v2109_v10 = vld [vmem:[%s5187_s22 + $0x3960] sm:$0xff]  ;;  %v2111_v11 = vld [vmem:[%s5187_s22 + $0x3970] sm:$0xff] }
 0x5fd   : > { %3901 = vmatprep.subr.mxu0 %v1566_v12  ;;  %3972 = vmatprep.subr.mxu1 %v1568_v13  ;;  %v2078_v12 = vld [vmem:[%s5187_s22 + $0x3868] sm:$0xff]  ;;  %v2080_v13 = vld [vmem:[%s5187_s22 + $0x3878] sm:$0xff] }
 0x600   : > { %3902 = vmatpush1.xpose.msra.mxu0 %v1565_v14  ;;  %3973 = vmatpush1.xpose.msra.mxu1 %v1567_v15  ;;  %v2077_v14 = vld [vmem:[%s5187_s22 + $0x3860] sm:$0xff]  ;;  %v2079_v15 = vld [vmem:[%s5187_s22 + $0x3870] sm:$0xff] }
 0x601   : > { %3903 = vmatprep.subr.mxu0 %v1534_v16  ;;  %3974 = vmatprep.subr.mxu1 %v1536_v17  ;;  %v2046_v16 = vld [vmem:[%s5187_s22 + $0x3768] sm:$0xff]  ;;  %v2048_v17 = vld [vmem:[%s5187_s22 + $0x3778] sm:$0xff] }
 0x604   : > { %3904 = vmatpush1.xpose.msra.mxu0 %v1533_v18  ;;  %3975 = vmatpush1.xpose.msra.mxu1 %v1535_v19  ;;  %v2045_v18 = vld [vmem:[%s5187_s22 + $0x3760] sm:$0xff]  ;;  %v2047_v19 = vld [vmem:[%s5187_s22 + $0x3770] sm:$0xff] }
 0x605   : > { %3905 = vmatprep.subr.mxu0 %v1502_v20  ;;  %3976 = vmatprep.subr.mxu1 %v1504_v21  ;;  %v2014_v20 = vld [vmem:[%s5187_s22 + $0x3668] sm:$0xff]  ;;  %v2016_v21 = vld [vmem:[%s5187_s22 + $0x3678] sm:$0xff] }
 0x608   : > { %3906 = vmatpush1.xpose.msra.mxu0 %v1501_v22  ;;  %3977 = vmatpush1.xpose.msra.mxu1 %v1503_v23  ;;  %v2013_v22 = vld [vmem:[%s5187_s22 + $0x3660] sm:$0xff]  ;;  %v2015_v23 = vld [vmem:[%s5187_s22 + $0x3670] sm:$0xff] }
 0x609   : > { %3907 = vmatprep.subr.mxu0 %v1470_v24  ;;  %3978 = vmatprep.subr.mxu1 %v1472_v25  ;;  %v1982_v24 = vld [vmem:[%s5187_s22 + $0x3568] sm:$0xff]  ;;  %v1984_v25 = vld [vmem:[%s5187_s22 + $0x3578] sm:$0xff] }
 0x60c   : > { %3908 = vmatpush1.xpose.msra.mxu0 %v1469_v26  ;;  %3979 = vmatpush1.xpose.msra.mxu1 %v1471_v27  ;;  %v1981_v26 = vld [vmem:[%s5187_s22 + $0x3560] sm:$0xff]  ;;  %v1983_v27 = vld [vmem:[%s5187_s22 + $0x3570] sm:$0xff] }
 0x60d   : > { %3909 = vmatprep.subr.mxu0 %v1438_v28  ;;  %3980 = vmatprep.subr.mxu1 %v1440_v29  ;;  %v1950_v28 = vld [vmem:[%s5187_s22 + $0x3468] sm:$0xff]  ;;  %v1952_v29 = vld [vmem:[%s5187_s22 + $0x3478] sm:$0xff] }
 0x610   : > { %3910 = vmatpush1.xpose.msra.mxu0 %v1437_v30  ;;  %3981 = vmatpush1.xpose.msra.mxu1 %v1439_v31  ;;  %v1949_v30 = vld [vmem:[%s5187_s22 + $0x3460] sm:$0xff]  ;;  %v1951_v31 = vld [vmem:[%s5187_s22 + $0x3470] sm:$0xff] }
 0x611   : > { %3911 = vmatprep.subr.mxu0 %v1406_v32  ;;  %3982 = vmatprep.subr.mxu1 %v1408_v33  ;;  %v1918_v32 = vld [vmem:[%s5187_s22 + $0x3368] sm:$0xff]  ;;  %v1920_v33 = vld [vmem:[%s5187_s22 + $0x3378] sm:$0xff] }
 0x614   : > { %3912 = vmatpush1.xpose.msra.mxu0 %v1405_v34  ;;  %3983 = vmatpush1.xpose.msra.mxu1 %v1407_v35  ;;  %v1917_v34 = vld [vmem:[%s5187_s22 + $0x3360] sm:$0xff]  ;;  %v1919_v35 = vld [vmem:[%s5187_s22 + $0x3370] sm:$0xff] }
 0x615   : > { %3913 = vmatprep.subr.mxu0 %v1374_v36  ;;  %3984 = vmatprep.subr.mxu1 %v1376_v37  ;;  %v1886_v36 = vld [vmem:[%s5187_s22 + $0x3268] sm:$0xff]  ;;  %v1888_v37 = vld [vmem:[%s5187_s22 + $0x3278] sm:$0xff] }
 0x618   : > { %3914 = vmatpush1.xpose.msra.mxu0 %v1373_v38  ;;  %3985 = vmatpush1.xpose.msra.mxu1 %v1375_v39  ;;  %v1885_v38 = vld [vmem:[%s5187_s22 + $0x3260] sm:$0xff]  ;;  %v1887_v39 = vld [vmem:[%s5187_s22 + $0x3270] sm:$0xff] }
 0x619   : > { %3915 = vmatprep.subr.mxu0 %v1342_v40  ;;  %3986 = vmatprep.subr.mxu1 %v1344_v41  ;;  %v1854_v40 = vld [vmem:[%s5187_s22 + $0x3168] sm:$0xff]  ;;  %v1856_v41 = vld [vmem:[%s5187_s22 + $0x3178] sm:$0xff] }
 0x61c   : > { %3916 = vmatpush1.xpose.msra.mxu0 %v1341_v42  ;;  %3987 = vmatpush1.xpose.msra.mxu1 %v1343_v43  ;;  %v1853_v42 = vld [vmem:[%s5187_s22 + $0x3160] sm:$0xff]  ;;  %v1855_v43 = vld [vmem:[%s5187_s22 + $0x3170] sm:$0xff] }
 0x61d   : > { %3917 = vmatprep.subr.mxu0 %v1310_v44  ;;  %3988 = vmatprep.subr.mxu1 %v1312_v45  ;;  %v1822_v44 = vld [vmem:[%s5187_s22 + $0x3068] sm:$0xff]  ;;  %v1824_v45 = vld [vmem:[%s5187_s22 + $0x3078] sm:$0xff] }
 0x620   : > { %3918 = vmatpush1.xpose.msra.mxu0 %v1309_v46  ;;  %3989 = vmatpush1.xpose.msra.mxu1 %v1311_v47  ;;  %v1821_v46 = vld [vmem:[%s5187_s22 + $0x3060] sm:$0xff]  ;;  %v1823_v47 = vld [vmem:[%s5187_s22 + $0x3070] sm:$0xff] }
 0x621   : > { %3919 = vmatprep.subr.mxu0 %v2302_v48  ;;  %3990 = vmatprep.subr.mxu1 %v2304_v49  ;;  %v1794_v48 = vld [vmem:[%s5187_s22 + $0x2f88] sm:$0xff]  ;;  %v1796_v49 = vld [vmem:[%s5187_s22 + $0x2f98] sm:$0xff] }
 0x624   : > { %3920 = vmatpush2.xpose.msra.mxu0 %v2301_v50  ;;  %3991 = vmatpush2.xpose.msra.mxu1 %v2303_v51  ;;  %v1793_v50 = vld [vmem:[%s5187_s22 + $0x2f80] sm:$0xff]  ;;  %v1795_v51 = vld [vmem:[%s5187_s22 + $0x2f90] sm:$0xff] }
 0x625   : > { %3921 = vmatprep.subr.mxu0 %v2270_v52  ;;  %3992 = vmatprep.subr.mxu1 %v2272_v53  ;;  %v1762_v52 = vld [vmem:[%s5187_s22 + $0x2e88] sm:$0xff]  ;;  %v1764_v53 = vld [vmem:[%s5187_s22 + $0x2e98] sm:$0xff] }
 0x628   : > { %3922 = vmatpush2.xpose.msra.mxu0 %v2269_v54  ;;  %3993 = vmatpush2.xpose.msra.mxu1 %v2271_v55  ;;  %v4821_v54 = vld [vmem:[#allocation2 + $0x60] sm:$0xff]  ;;  %v4822_v55 = vld [vmem:[#allocation2 + $0x70] sm:$0xff] }
 0x629   : > { %3923 = vmatprep.subr.mxu0 %v2238_v56  ;;  %3994 = vmatprep.subr.mxu1 %v2240_v57  ;;  %v1761_v56 = vld [vmem:[%s5187_s22 + $0x2e80] sm:$0xff]  ;;  %v1763_v57 = vld [vmem:[%s5187_s22 + $0x2e90] sm:$0xff] }
 0x62c   : > { %3924 = vmatpush2.xpose.msra.mxu0 %v2237_v58  ;;  %3995 = vmatpush2.xpose.msra.mxu1 %v2239_v59  ;;  %v1730_v58 = vld [vmem:[%s5187_s22 + $0x2d88] sm:$0xff]  ;;  %v1732_v59 = vld [vmem:[%s5187_s22 + $0x2d98] sm:$0xff] }
 0x62d   : > { %3925 = vmatprep.subr.mxu0 %v2206_v60  ;;  %3996 = vmatprep.subr.mxu1 %v2208_v61  ;;  %v4823_v60 = vld [vmem:[#allocation2 + $0x88] sm:$0xff]  ;;  %v4824_v61 = vld [vmem:[#allocation2 + $0x98] sm:$0xff] }
 0x630   : > { %3926 = vmatpush2.xpose.msra.mxu0 %v2205_v62  ;;  %3997 = vmatpush2.xpose.msra.mxu1 %v2207_v63  ;;  %v1729_v62 = vld [vmem:[%s5187_s22 + $0x2d80] sm:$0xff]  ;;  %v1731_v63 = vld [vmem:[%s5187_s22 + $0x2d90] sm:$0xff] }
 0x631   : > { %3927 = vmatprep.subr.mxu0 %v2174_v0  ;;  %3998 = vmatprep.subr.mxu1 %v2176_v1  ;;  %v1698_v0 = vld [vmem:[%s5187_s22 + $0x2c88] sm:$0xff]  ;;  %v1700_v1 = vld [vmem:[%s5187_s22 + $0x2c98] sm:$0xff] }
 0x634   : > { %3928 = vmatpush2.xpose.msra.mxu0 %v2173_v2  ;;  %3999 = vmatpush2.xpose.msra.mxu1 %v2175_v3  ;;  %v1697_v2 = vld [vmem:[%s5187_s22 + $0x2c80] sm:$0xff]  ;;  %v1699_v3 = vld [vmem:[%s5187_s22 + $0x2c90] sm:$0xff] }
 0x635   : > { %3929 = vmatprep.subr.mxu0 %v2142_v4  ;;  %4000 = vmatprep.subr.mxu1 %v2144_v5  ;;  %v1666_v4 = vld [vmem:[%s5187_s22 + $0x2b88] sm:$0xff]  ;;  %v1668_v5 = vld [vmem:[%s5187_s22 + $0x2b98] sm:$0xff] }
 0x638   : > { %3930 = vmatpush2.xpose.msra.mxu0 %v2141_v6  ;;  %4001 = vmatpush2.xpose.msra.mxu1 %v2143_v7  ;;  %v1665_v6 = vld [vmem:[%s5187_s22 + $0x2b80] sm:$0xff]  ;;  %v1667_v7 = vld [vmem:[%s5187_s22 + $0x2b90] sm:$0xff] }
 0x639   : > { %3931 = vmatprep.subr.mxu0 %v2110_v8  ;;  %4002 = vmatprep.subr.mxu1 %v2112_v9  ;;  %v1634_v8 = vld [vmem:[%s5187_s22 + $0x2a88] sm:$0xff]  ;;  %v1636_v9 = vld [vmem:[%s5187_s22 + $0x2a98] sm:$0xff] }
 0x63c   : > { %3932 = vmatpush2.xpose.msra.mxu0 %v2109_v10  ;;  %4003 = vmatpush2.xpose.msra.mxu1 %v2111_v11  ;;  %v1633_v10 = vld [vmem:[%s5187_s22 + $0x2a80] sm:$0xff]  ;;  %v1635_v11 = vld [vmem:[%s5187_s22 + $0x2a90] sm:$0xff] }
 0x63d   : > { %3933 = vmatprep.subr.mxu0 %v2078_v12  ;;  %4004 = vmatprep.subr.mxu1 %v2080_v13  ;;  %v1602_v12 = vld [vmem:[%s5187_s22 + $0x2988] sm:$0xff]  ;;  %v1604_v13 = vld [vmem:[%s5187_s22 + $0x2998] sm:$0xff] }
 0x640   : > { %3934 = vmatpush2.xpose.msra.mxu0 %v2077_v14  ;;  %4005 = vmatpush2.xpose.msra.mxu1 %v2079_v15  ;;  %v1601_v14 = vld [vmem:[%s5187_s22 + $0x2980] sm:$0xff]  ;;  %v1603_v15 = vld [vmem:[%s5187_s22 + $0x2990] sm:$0xff] }
 0x641   : > { %3935 = vmatprep.subr.mxu0 %v2046_v16  ;;  %4006 = vmatprep.subr.mxu1 %v2048_v17  ;;  %v1570_v16 = vld [vmem:[%s5187_s22 + $0x2888] sm:$0xff]  ;;  %v1572_v17 = vld [vmem:[%s5187_s22 + $0x2898] sm:$0xff] }
 0x644   : > { %3936 = vmatpush2.xpose.msra.mxu0 %v2045_v18  ;;  %4007 = vmatpush2.xpose.msra.mxu1 %v2047_v19  ;;  %v1569_v18 = vld [vmem:[%s5187_s22 + $0x2880] sm:$0xff]  ;;  %v1571_v19 = vld [vmem:[%s5187_s22 + $0x2890] sm:$0xff] }
 0x645   : > { %3937 = vmatprep.subr.mxu0 %v2014_v20  ;;  %4008 = vmatprep.subr.mxu1 %v2016_v21  ;;  %v1538_v20 = vld [vmem:[%s5187_s22 + $0x2788] sm:$0xff]  ;;  %v1540_v21 = vld [vmem:[%s5187_s22 + $0x2798] sm:$0xff] }
 0x648   : > { %3938 = vmatpush2.xpose.msra.mxu0 %v2013_v22  ;;  %4009 = vmatpush2.xpose.msra.mxu1 %v2015_v23  ;;  %v1537_v22 = vld [vmem:[%s5187_s22 + $0x2780] sm:$0xff]  ;;  %v1539_v23 = vld [vmem:[%s5187_s22 + $0x2790] sm:$0xff] }
 0x649   : > { %3939 = vmatprep.subr.mxu0 %v1982_v24  ;;  %4010 = vmatprep.subr.mxu1 %v1984_v25  ;;  %v1506_v24 = vld [vmem:[%s5187_s22 + $0x2688] sm:$0xff]  ;;  %v1508_v25 = vld [vmem:[%s5187_s22 + $0x2698] sm:$0xff] }
 0x64c   : > { %3940 = vmatpush2.xpose.msra.mxu0 %v1981_v26  ;;  %4011 = vmatpush2.xpose.msra.mxu1 %v1983_v27  ;;  %v1505_v26 = vld [vmem:[%s5187_s22 + $0x2680] sm:$0xff]  ;;  %v1507_v27 = vld [vmem:[%s5187_s22 + $0x2690] sm:$0xff] }
 0x64d   : > { %3941 = vmatprep.subr.mxu0 %v1950_v28  ;;  %4012 = vmatprep.subr.mxu1 %v1952_v29  ;;  %v1474_v28 = vld [vmem:[%s5187_s22 + $0x2588] sm:$0xff]  ;;  %v1476_v29 = vld [vmem:[%s5187_s22 + $0x2598] sm:$0xff] }
 0x650   : > { %3942 = vmatpush2.xpose.msra.mxu0 %v1949_v30  ;;  %4013 = vmatpush2.xpose.msra.mxu1 %v1951_v31  ;;  %v1473_v30 = vld [vmem:[%s5187_s22 + $0x2580] sm:$0xff]  ;;  %v1475_v31 = vld [vmem:[%s5187_s22 + $0x2590] sm:$0xff] }
 0x651   : > { %3943 = vmatprep.subr.mxu0 %v1918_v32  ;;  %4014 = vmatprep.subr.mxu1 %v1920_v33  ;;  %v1442_v32 = vld [vmem:[%s5187_s22 + $0x2488] sm:$0xff]  ;;  %v1444_v33 = vld [vmem:[%s5187_s22 + $0x2498] sm:$0xff] }
 0x654   : > { %3944 = vmatpush2.xpose.msra.mxu0 %v1917_v34  ;;  %4015 = vmatpush2.xpose.msra.mxu1 %v1919_v35  ;;  %v1441_v34 = vld [vmem:[%s5187_s22 + $0x2480] sm:$0xff]  ;;  %v1443_v35 = vld [vmem:[%s5187_s22 + $0x2490] sm:$0xff] }
 0x655   : > { %3945 = vmatprep.subr.mxu0 %v1886_v36  ;;  %4016 = vmatprep.subr.mxu1 %v1888_v37  ;;  %v1410_v36 = vld [vmem:[%s5187_s22 + $0x2388] sm:$0xff]  ;;  %v1412_v37 = vld [vmem:[%s5187_s22 + $0x2398] sm:$0xff] }
 0x658   : > { %3946 = vmatpush2.xpose.msra.mxu0 %v1885_v38  ;;  %4017 = vmatpush2.xpose.msra.mxu1 %v1887_v39  ;;  %v1409_v38 = vld [vmem:[%s5187_s22 + $0x2380] sm:$0xff]  ;;  %v1411_v39 = vld [vmem:[%s5187_s22 + $0x2390] sm:$0xff] }
 0x659   : > { %3947 = vmatprep.subr.mxu0 %v1854_v40  ;;  %4018 = vmatprep.subr.mxu1 %v1856_v41  ;;  %v1378_v40 = vld [vmem:[%s5187_s22 + $0x2288] sm:$0xff]  ;;  %v1380_v41 = vld [vmem:[%s5187_s22 + $0x2298] sm:$0xff] }
 0x65c   : > { %3948 = vmatpush2.xpose.msra.mxu0 %v1853_v42  ;;  %4019 = vmatpush2.xpose.msra.mxu1 %v1855_v43  ;;  %v1377_v42 = vld [vmem:[%s5187_s22 + $0x2280] sm:$0xff]  ;;  %v1379_v43 = vld [vmem:[%s5187_s22 + $0x2290] sm:$0xff] }
 0x65d   : > { %3949 = vmatprep.subr.mxu0 %v1822_v44  ;;  %4020 = vmatprep.subr.mxu1 %v1824_v45  ;;  %v1346_v44 = vld [vmem:[%s5187_s22 + $0x2188] sm:$0xff]  ;;  %v1348_v45 = vld [vmem:[%s5187_s22 + $0x2198] sm:$0xff] }
 0x660   : > { %3950 = vmatpush2.xpose.msra.mxu0 %v1821_v46  ;;  %4021 = vmatpush2.xpose.msra.mxu1 %v1823_v47  ;;  %v1345_v46 = vld [vmem:[%s5187_s22 + $0x2180] sm:$0xff]  ;;  %v1347_v47 = vld [vmem:[%s5187_s22 + $0x2190] sm:$0xff] }
 0x661   : > { %4029 = vmatprep.subr.mxu0 %v1794_v48  ;;  %4100 = vmatprep.subr.mxu1 %v1796_v49  ;;  %v1314_v48 = vld [vmem:[%s5187_s22 + $0x2088] sm:$0xff]  ;;  %v1316_v49 = vld [vmem:[%s5187_s22 + $0x2098] sm:$0xff] }
 0x663   : > { %3952 = vmatmul.mubr.f32.vlgmr.msra.gmra.mxu0 %v4821_v54  ;;  %4023 = vmatmul.mubr.f32.vlgmr.msra.gmra.mxu1 %v4822_v55  ;;  %v2305_v54 = vld [vmem:[%s5187_s22 + $0x3f80] sm:$0xff]  ;;  %v2307_v55 = vld [vmem:[%s5187_s22 + $0x3f90] sm:$0xff] }
 0x664   : > { %4030 = vmatpush1.xpose.msra.mxu0 %v1793_v50  ;;  %4101 = vmatpush1.xpose.msra.mxu1 %v1795_v51  ;;  %v1313_v50 = vld [vmem:[%s5187_s22 + $0x2080] sm:$0xff]  ;;  %v1315_v51 = vld [vmem:[%s5187_s22 + $0x2090] sm:$0xff] }
 0x665   : > { %4031 = vmatprep.subr.mxu0 %v1762_v52  ;;  %4102 = vmatprep.subr.mxu1 %v1764_v53  ;;  %v2306_v52 = vld [vmem:[%s5187_s22 + $0x3f88] sm:$0xff]  ;;  %v2308_v53 = vld [vmem:[%s5187_s22 + $0x3f98] sm:$0xff] }
 0x666   : > { %4093 = vmatprep.mubr.f32.mxu0 %v4823_v60  ;;  %4164 = vmatprep.mubr.f32.mxu1 %v4824_v61  ;;  %v2242_v60 = vld [vmem:[%s5187_s22 + $0x3d88] sm:$0xff]  ;;  %v2244_v61 = vld [vmem:[%s5187_s22 + $0x3d98] sm:$0xff] }
 0x668   : > { %4032 = vmatpush1.xpose.msra.mxu0 %v1761_v56  ;;  %4103 = vmatpush1.xpose.msra.mxu1 %v1763_v57  ;;  %v2274_v56 = vld [vmem:[%s5187_s22 + $0x3e88] sm:$0xff]  ;;  %v2276_v57 = vld [vmem:[%s5187_s22 + $0x3e98] sm:$0xff] }
 0x669   : > { %4033 = vmatprep.subr.mxu0 %v1730_v58  ;;  %4104 = vmatprep.subr.mxu1 %v1732_v59  ;;  %v2273_v58 = vld [vmem:[%s5187_s22 + $0x3e80] sm:$0xff]  ;;  %v2275_v59 = vld [vmem:[%s5187_s22 + $0x3e90] sm:$0xff] }
 0x66c   : > { %4034 = vmatpush1.xpose.msra.mxu0 %v1729_v62  ;;  %4105 = vmatpush1.xpose.msra.mxu1 %v1731_v63  ;;  %v2241_v62 = vld [vmem:[%s5187_s22 + $0x3d80] sm:$0xff]  ;;  %v2243_v63 = vld [vmem:[%s5187_s22 + $0x3d90] sm:$0xff] }
 0x66d   : > { %4035 = vmatprep.subr.mxu0 %v1698_v0  ;;  %4106 = vmatprep.subr.mxu1 %v1700_v1  ;;  %v2210_v0 = vld [vmem:[%s5187_s22 + $0x3c88] sm:$0xff]  ;;  %v2212_v1 = vld [vmem:[%s5187_s22 + $0x3c98] sm:$0xff] }
 0x670   : > { %4036 = vmatpush1.xpose.msra.mxu0 %v1697_v2  ;;  %4107 = vmatpush1.xpose.msra.mxu1 %v1699_v3  ;;  %v2209_v2 = vld [vmem:[%s5187_s22 + $0x3c80] sm:$0xff]  ;;  %v2211_v3 = vld [vmem:[%s5187_s22 + $0x3c90] sm:$0xff] }
 0x671   : > { %4037 = vmatprep.subr.mxu0 %v1666_v4  ;;  %4108 = vmatprep.subr.mxu1 %v1668_v5  ;;  %v2178_v4 = vld [vmem:[%s5187_s22 + $0x3b88] sm:$0xff]  ;;  %v2180_v5 = vld [vmem:[%s5187_s22 + $0x3b98] sm:$0xff] }
 0x674   : > { %4038 = vmatpush1.xpose.msra.mxu0 %v1665_v6  ;;  %4109 = vmatpush1.xpose.msra.mxu1 %v1667_v7  ;;  %v2177_v6 = vld [vmem:[%s5187_s22 + $0x3b80] sm:$0xff]  ;;  %v2179_v7 = vld [vmem:[%s5187_s22 + $0x3b90] sm:$0xff] }
 0x675   : > { %4039 = vmatprep.subr.mxu0 %v1634_v8  ;;  %4110 = vmatprep.subr.mxu1 %v1636_v9  ;;  %v2146_v8 = vld [vmem:[%s5187_s22 + $0x3a88] sm:$0xff]  ;;  %v2148_v9 = vld [vmem:[%s5187_s22 + $0x3a98] sm:$0xff] }
 0x678   : > { %4040 = vmatpush1.xpose.msra.mxu0 %v1633_v10  ;;  %4111 = vmatpush1.xpose.msra.mxu1 %v1635_v11  ;;  %v2145_v10 = vld [vmem:[%s5187_s22 + $0x3a80] sm:$0xff]  ;;  %v2147_v11 = vld [vmem:[%s5187_s22 + $0x3a90] sm:$0xff] }
 0x679   : > { %4041 = vmatprep.subr.mxu0 %v1602_v12  ;;  %4112 = vmatprep.subr.mxu1 %v1604_v13  ;;  %v2114_v12 = vld [vmem:[%s5187_s22 + $0x3988] sm:$0xff]  ;;  %v2116_v13 = vld [vmem:[%s5187_s22 + $0x3998] sm:$0xff] }
 0x67c   : > { %4042 = vmatpush1.xpose.msra.mxu0 %v1601_v14  ;;  %4113 = vmatpush1.xpose.msra.mxu1 %v1603_v15  ;;  %v2113_v14 = vld [vmem:[%s5187_s22 + $0x3980] sm:$0xff]  ;;  %v2115_v15 = vld [vmem:[%s5187_s22 + $0x3990] sm:$0xff] }
 0x67d   : > { %4043 = vmatprep.subr.mxu0 %v1570_v16  ;;  %4114 = vmatprep.subr.mxu1 %v1572_v17  ;;  %v2082_v16 = vld [vmem:[%s5187_s22 + $0x3888] sm:$0xff]  ;;  %v2084_v17 = vld [vmem:[%s5187_s22 + $0x3898] sm:$0xff] }
 0x680   : > { %4044 = vmatpush1.xpose.msra.mxu0 %v1569_v18  ;;  %4115 = vmatpush1.xpose.msra.mxu1 %v1571_v19  ;;  %v2081_v18 = vld [vmem:[%s5187_s22 + $0x3880] sm:$0xff]  ;;  %v2083_v19 = vld [vmem:[%s5187_s22 + $0x3890] sm:$0xff] }
 0x681   : > { %4045 = vmatprep.subr.mxu0 %v1538_v20  ;;  %4116 = vmatprep.subr.mxu1 %v1540_v21  ;;  %v2050_v20 = vld [vmem:[%s5187_s22 + $0x3788] sm:$0xff]  ;;  %v2052_v21 = vld [vmem:[%s5187_s22 + $0x3798] sm:$0xff] }
 0x684   : > { %4046 = vmatpush1.xpose.msra.mxu0 %v1537_v22  ;;  %4117 = vmatpush1.xpose.msra.mxu1 %v1539_v23  ;;  %v2049_v22 = vld [vmem:[%s5187_s22 + $0x3780] sm:$0xff]  ;;  %v2051_v23 = vld [vmem:[%s5187_s22 + $0x3790] sm:$0xff] }
 0x685   : > { %4047 = vmatprep.subr.mxu0 %v1506_v24  ;;  %4118 = vmatprep.subr.mxu1 %v1508_v25  ;;  %v2018_v24 = vld [vmem:[%s5187_s22 + $0x3688] sm:$0xff]  ;;  %v2020_v25 = vld [vmem:[%s5187_s22 + $0x3698] sm:$0xff] }
 0x688   : > { %4048 = vmatpush1.xpose.msra.mxu0 %v1505_v26  ;;  %4119 = vmatpush1.xpose.msra.mxu1 %v1507_v27  ;;  %v2017_v26 = vld [vmem:[%s5187_s22 + $0x3680] sm:$0xff]  ;;  %v2019_v27 = vld [vmem:[%s5187_s22 + $0x3690] sm:$0xff] }
 0x689   : > { %4049 = vmatprep.subr.mxu0 %v1474_v28  ;;  %4120 = vmatprep.subr.mxu1 %v1476_v29  ;;  %v1986_v28 = vld [vmem:[%s5187_s22 + $0x3588] sm:$0xff]  ;;  %v1988_v29 = vld [vmem:[%s5187_s22 + $0x3598] sm:$0xff] }
 0x68c   : > { %4050 = vmatpush1.xpose.msra.mxu0 %v1473_v30  ;;  %4121 = vmatpush1.xpose.msra.mxu1 %v1475_v31  ;;  %v1985_v30 = vld [vmem:[%s5187_s22 + $0x3580] sm:$0xff]  ;;  %v1987_v31 = vld [vmem:[%s5187_s22 + $0x3590] sm:$0xff] }
 0x68d   : > { %4051 = vmatprep.subr.mxu0 %v1442_v32  ;;  %4122 = vmatprep.subr.mxu1 %v1444_v33  ;;  %v1954_v32 = vld [vmem:[%s5187_s22 + $0x3488] sm:$0xff]  ;;  %v1956_v33 = vld [vmem:[%s5187_s22 + $0x3498] sm:$0xff] }
 0x690   : > { %4052 = vmatpush1.xpose.msra.mxu0 %v1441_v34  ;;  %4123 = vmatpush1.xpose.msra.mxu1 %v1443_v35  ;;  %v1953_v34 = vld [vmem:[%s5187_s22 + $0x3480] sm:$0xff]  ;;  %v1955_v35 = vld [vmem:[%s5187_s22 + $0x3490] sm:$0xff] }
 0x691   : > { %4053 = vmatprep.subr.mxu0 %v1410_v36  ;;  %4124 = vmatprep.subr.mxu1 %v1412_v37  ;;  %v1922_v36 = vld [vmem:[%s5187_s22 + $0x3388] sm:$0xff]  ;;  %v1924_v37 = vld [vmem:[%s5187_s22 + $0x3398] sm:$0xff] }
 0x694   : > { %4054 = vmatpush1.xpose.msra.mxu0 %v1409_v38  ;;  %4125 = vmatpush1.xpose.msra.mxu1 %v1411_v39  ;;  %v1921_v38 = vld [vmem:[%s5187_s22 + $0x3380] sm:$0xff]  ;;  %v1923_v39 = vld [vmem:[%s5187_s22 + $0x3390] sm:$0xff] }
 0x695   : > { %4055 = vmatprep.subr.mxu0 %v1378_v40  ;;  %4126 = vmatprep.subr.mxu1 %v1380_v41  ;;  %v1890_v40 = vld [vmem:[%s5187_s22 + $0x3288] sm:$0xff]  ;;  %v1892_v41 = vld [vmem:[%s5187_s22 + $0x3298] sm:$0xff] }
 0x698   : > { %4056 = vmatpush1.xpose.msra.mxu0 %v1377_v42  ;;  %4127 = vmatpush1.xpose.msra.mxu1 %v1379_v43  ;;  %v1889_v42 = vld [vmem:[%s5187_s22 + $0x3280] sm:$0xff]  ;;  %v1891_v43 = vld [vmem:[%s5187_s22 + $0x3290] sm:$0xff] }
 0x699   : > { %4057 = vmatprep.subr.mxu0 %v1346_v44  ;;  %4128 = vmatprep.subr.mxu1 %v1348_v45  ;;  %v1858_v44 = vld [vmem:[%s5187_s22 + $0x3188] sm:$0xff]  ;;  %v1860_v45 = vld [vmem:[%s5187_s22 + $0x3198] sm:$0xff] }
 0x69c   : > { %4058 = vmatpush1.xpose.msra.mxu0 %v1345_v46  ;;  %4129 = vmatpush1.xpose.msra.mxu1 %v1347_v47  ;;  %v1857_v46 = vld [vmem:[%s5187_s22 + $0x3180] sm:$0xff]  ;;  %v1859_v47 = vld [vmem:[%s5187_s22 + $0x3190] sm:$0xff] }
 0x69d   : > { %4059 = vmatprep.subr.mxu0 %v1314_v48  ;;  %4130 = vmatprep.subr.mxu1 %v1316_v49  ;;  %v1826_v48 = vld [vmem:[%s5187_s22 + $0x3088] sm:$0xff]  ;;  %v1828_v49 = vld [vmem:[%s5187_s22 + $0x3098] sm:$0xff] }
 0x6a0   : > { %4060 = vmatpush1.xpose.msra.mxu0 %v1313_v50  ;;  %4131 = vmatpush1.xpose.msra.mxu1 %v1315_v51  ;;  %v1825_v50 = vld [vmem:[%s5187_s22 + $0x3080] sm:$0xff]  ;;  %v1827_v51 = vld [vmem:[%s5187_s22 + $0x3090] sm:$0xff] }
 0x6a1   : > { %4061 = vmatprep.subr.mxu0 %v2306_v52  ;;  %4132 = vmatprep.subr.mxu1 %v2308_v53  ;;  %v1798_v52 = vld [vmem:[%s5187_s22 + $0x2fa8] sm:$0xff]  ;;  %v1800_v53 = vld [vmem:[%s5187_s22 + $0x2fb8] sm:$0xff] }
 0x6a4   : > { %4062 = vmatpush2.xpose.msra.mxu0 %v2305_v54  ;;  %4133 = vmatpush2.xpose.msra.mxu1 %v2307_v55  ;;  %v1797_v54 = vld [vmem:[%s5187_s22 + $0x2fa0] sm:$0xff]  ;;  %v1799_v55 = vld [vmem:[%s5187_s22 + $0x2fb0] sm:$0xff] }
 0x6a5   : > { %4063 = vmatprep.subr.mxu0 %v2274_v56  ;;  %4134 = vmatprep.subr.mxu1 %v2276_v57  ;;  %v1766_v56 = vld [vmem:[%s5187_s22 + $0x2ea8] sm:$0xff]  ;;  %v1768_v57 = vld [vmem:[%s5187_s22 + $0x2eb8] sm:$0xff] }
 0x6a8   : > { %4064 = vmatpush2.xpose.msra.mxu0 %v2273_v58  ;;  %4135 = vmatpush2.xpose.msra.mxu1 %v2275_v59  ;;  %v4825_v58 = vld [vmem:[#allocation2 + $0x80] sm:$0xff]  ;;  %v4826_v59 = vld [vmem:[#allocation2 + $0x90] sm:$0xff] }
 0x6a9   : > { %4065 = vmatprep.subr.mxu0 %v2242_v60  ;;  %4136 = vmatprep.subr.mxu1 %v2244_v61  ;;  %v1765_v60 = vld [vmem:[%s5187_s22 + $0x2ea0] sm:$0xff]  ;;  %v1767_v61 = vld [vmem:[%s5187_s22 + $0x2eb0] sm:$0xff] }
 0x6ac   : > { %4066 = vmatpush2.xpose.msra.mxu0 %v2241_v62  ;;  %4137 = vmatpush2.xpose.msra.mxu1 %v2243_v63  ;;  %v1734_v62 = vld [vmem:[%s5187_s22 + $0x2da8] sm:$0xff]  ;;  %v1736_v63 = vld [vmem:[%s5187_s22 + $0x2db8] sm:$0xff] }
 0x6ad   : > { %4067 = vmatprep.subr.mxu0 %v2210_v0  ;;  %4138 = vmatprep.subr.mxu1 %v2212_v1  ;;  %v4827_v0 = vld [vmem:[#allocation2 + $0xa8] sm:$0xff]  ;;  %v4828_v1 = vld [vmem:[#allocation2 + $0xb8] sm:$0xff] }
 0x6b0   : > { %4068 = vmatpush2.xpose.msra.mxu0 %v2209_v2  ;;  %4139 = vmatpush2.xpose.msra.mxu1 %v2211_v3  ;;  %v1733_v2 = vld [vmem:[%s5187_s22 + $0x2da0] sm:$0xff]  ;;  %v1735_v3 = vld [vmem:[%s5187_s22 + $0x2db0] sm:$0xff] }
 0x6b1   : > { %4069 = vmatprep.subr.mxu0 %v2178_v4  ;;  %4140 = vmatprep.subr.mxu1 %v2180_v5  ;;  %v1702_v4 = vld [vmem:[%s5187_s22 + $0x2ca8] sm:$0xff]  ;;  %v1704_v5 = vld [vmem:[%s5187_s22 + $0x2cb8] sm:$0xff] }
 0x6b4   : > { %4070 = vmatpush2.xpose.msra.mxu0 %v2177_v6  ;;  %4141 = vmatpush2.xpose.msra.mxu1 %v2179_v7  ;;  %v1701_v6 = vld [vmem:[%s5187_s22 + $0x2ca0] sm:$0xff]  ;;  %v1703_v7 = vld [vmem:[%s5187_s22 + $0x2cb0] sm:$0xff] }
 0x6b5   : > { %4071 = vmatprep.subr.mxu0 %v2146_v8  ;;  %4142 = vmatprep.subr.mxu1 %v2148_v9  ;;  %v1670_v8 = vld [vmem:[%s5187_s22 + $0x2ba8] sm:$0xff]  ;;  %v1672_v9 = vld [vmem:[%s5187_s22 + $0x2bb8] sm:$0xff] }
 0x6b8   : > { %4072 = vmatpush2.xpose.msra.mxu0 %v2145_v10  ;;  %4143 = vmatpush2.xpose.msra.mxu1 %v2147_v11  ;;  %v1669_v10 = vld [vmem:[%s5187_s22 + $0x2ba0] sm:$0xff]  ;;  %v1671_v11 = vld [vmem:[%s5187_s22 + $0x2bb0] sm:$0xff] }
 0x6b9   : > { %4073 = vmatprep.subr.mxu0 %v2114_v12  ;;  %4144 = vmatprep.subr.mxu1 %v2116_v13  ;;  %v1638_v12 = vld [vmem:[%s5187_s22 + $0x2aa8] sm:$0xff]  ;;  %v1640_v13 = vld [vmem:[%s5187_s22 + $0x2ab8] sm:$0xff] }
 0x6bc   : > { %4074 = vmatpush2.xpose.msra.mxu0 %v2113_v14  ;;  %4145 = vmatpush2.xpose.msra.mxu1 %v2115_v15  ;;  %v1637_v14 = vld [vmem:[%s5187_s22 + $0x2aa0] sm:$0xff]  ;;  %v1639_v15 = vld [vmem:[%s5187_s22 + $0x2ab0] sm:$0xff] }
 0x6bd   : > { %4075 = vmatprep.subr.mxu0 %v2082_v16  ;;  %4146 = vmatprep.subr.mxu1 %v2084_v17  ;;  %v1606_v16 = vld [vmem:[%s5187_s22 + $0x29a8] sm:$0xff]  ;;  %v1608_v17 = vld [vmem:[%s5187_s22 + $0x29b8] sm:$0xff] }
 0x6c0   : > { %4076 = vmatpush2.xpose.msra.mxu0 %v2081_v18  ;;  %4147 = vmatpush2.xpose.msra.mxu1 %v2083_v19  ;;  %v1605_v18 = vld [vmem:[%s5187_s22 + $0x29a0] sm:$0xff]  ;;  %v1607_v19 = vld [vmem:[%s5187_s22 + $0x29b0] sm:$0xff] }
 0x6c1   : > { %4077 = vmatprep.subr.mxu0 %v2050_v20  ;;  %4148 = vmatprep.subr.mxu1 %v2052_v21  ;;  %v1574_v20 = vld [vmem:[%s5187_s22 + $0x28a8] sm:$0xff]  ;;  %v1576_v21 = vld [vmem:[%s5187_s22 + $0x28b8] sm:$0xff] }
 0x6c4   : > { %4078 = vmatpush2.xpose.msra.mxu0 %v2049_v22  ;;  %4149 = vmatpush2.xpose.msra.mxu1 %v2051_v23  ;;  %v1573_v22 = vld [vmem:[%s5187_s22 + $0x28a0] sm:$0xff]  ;;  %v1575_v23 = vld [vmem:[%s5187_s22 + $0x28b0] sm:$0xff] }
 0x6c5   : > { %4079 = vmatprep.subr.mxu0 %v2018_v24  ;;  %4150 = vmatprep.subr.mxu1 %v2020_v25  ;;  %v1542_v24 = vld [vmem:[%s5187_s22 + $0x27a8] sm:$0xff]  ;;  %v1544_v25 = vld [vmem:[%s5187_s22 + $0x27b8] sm:$0xff] }
 0x6c8   : > { %4080 = vmatpush2.xpose.msra.mxu0 %v2017_v26  ;;  %4151 = vmatpush2.xpose.msra.mxu1 %v2019_v27  ;;  %v1541_v26 = vld [vmem:[%s5187_s22 + $0x27a0] sm:$0xff]  ;;  %v1543_v27 = vld [vmem:[%s5187_s22 + $0x27b0] sm:$0xff] }
 0x6c9   : > { %4081 = vmatprep.subr.mxu0 %v1986_v28  ;;  %4152 = vmatprep.subr.mxu1 %v1988_v29  ;;  %v1510_v28 = vld [vmem:[%s5187_s22 + $0x26a8] sm:$0xff]  ;;  %v1512_v29 = vld [vmem:[%s5187_s22 + $0x26b8] sm:$0xff] }
 0x6cc   : > { %4082 = vmatpush2.xpose.msra.mxu0 %v1985_v30  ;;  %4153 = vmatpush2.xpose.msra.mxu1 %v1987_v31  ;;  %v1509_v30 = vld [vmem:[%s5187_s22 + $0x26a0] sm:$0xff]  ;;  %v1511_v31 = vld [vmem:[%s5187_s22 + $0x26b0] sm:$0xff] }
 0x6cd   : > { %4083 = vmatprep.subr.mxu0 %v1954_v32  ;;  %4154 = vmatprep.subr.mxu1 %v1956_v33  ;;  %v1478_v32 = vld [vmem:[%s5187_s22 + $0x25a8] sm:$0xff]  ;;  %v1480_v33 = vld [vmem:[%s5187_s22 + $0x25b8] sm:$0xff] }
 0x6d0   : > { %4084 = vmatpush2.xpose.msra.mxu0 %v1953_v34  ;;  %4155 = vmatpush2.xpose.msra.mxu1 %v1955_v35  ;;  %v1477_v34 = vld [vmem:[%s5187_s22 + $0x25a0] sm:$0xff]  ;;  %v1479_v35 = vld [vmem:[%s5187_s22 + $0x25b0] sm:$0xff] }
 0x6d1   : > { %4085 = vmatprep.subr.mxu0 %v1922_v36  ;;  %4156 = vmatprep.subr.mxu1 %v1924_v37  ;;  %v1446_v36 = vld [vmem:[%s5187_s22 + $0x24a8] sm:$0xff]  ;;  %v1448_v37 = vld [vmem:[%s5187_s22 + $0x24b8] sm:$0xff] }
 0x6d4   : > { %4086 = vmatpush2.xpose.msra.mxu0 %v1921_v38  ;;  %4157 = vmatpush2.xpose.msra.mxu1 %v1923_v39  ;;  %v1445_v38 = vld [vmem:[%s5187_s22 + $0x24a0] sm:$0xff]  ;;  %v1447_v39 = vld [vmem:[%s5187_s22 + $0x24b0] sm:$0xff] }
 0x6d5   : > { %4087 = vmatprep.subr.mxu0 %v1890_v40  ;;  %4158 = vmatprep.subr.mxu1 %v1892_v41  ;;  %v1414_v40 = vld [vmem:[%s5187_s22 + $0x23a8] sm:$0xff]  ;;  %v1416_v41 = vld [vmem:[%s5187_s22 + $0x23b8] sm:$0xff] }
 0x6d8   : > { %4088 = vmatpush2.xpose.msra.mxu0 %v1889_v42  ;;  %4159 = vmatpush2.xpose.msra.mxu1 %v1891_v43  ;;  %v1413_v42 = vld [vmem:[%s5187_s22 + $0x23a0] sm:$0xff]  ;;  %v1415_v43 = vld [vmem:[%s5187_s22 + $0x23b0] sm:$0xff] }
 0x6d9   : > { %4089 = vmatprep.subr.mxu0 %v1858_v44  ;;  %4160 = vmatprep.subr.mxu1 %v1860_v45  ;;  %v1382_v44 = vld [vmem:[%s5187_s22 + $0x22a8] sm:$0xff]  ;;  %v1384_v45 = vld [vmem:[%s5187_s22 + $0x22b8] sm:$0xff] }
 0x6dc   : > { %4090 = vmatpush2.xpose.msra.mxu0 %v1857_v46  ;;  %4161 = vmatpush2.xpose.msra.mxu1 %v1859_v47  ;;  %v1381_v46 = vld [vmem:[%s5187_s22 + $0x22a0] sm:$0xff]  ;;  %v1383_v47 = vld [vmem:[%s5187_s22 + $0x22b0] sm:$0xff] }
 0x6dd   : > { %4091 = vmatprep.subr.mxu0 %v1826_v48  ;;  %4162 = vmatprep.subr.mxu1 %v1828_v49  ;;  %v1350_v48 = vld [vmem:[%s5187_s22 + $0x21a8] sm:$0xff]  ;;  %v1352_v49 = vld [vmem:[%s5187_s22 + $0x21b8] sm:$0xff] }
 0x6e0   : > { %4092 = vmatpush2.xpose.msra.mxu0 %v1825_v50  ;;  %4163 = vmatpush2.xpose.msra.mxu1 %v1827_v51  ;;  %v1349_v50 = vld [vmem:[%s5187_s22 + $0x21a0] sm:$0xff]  ;;  %v1351_v51 = vld [vmem:[%s5187_s22 + $0x21b0] sm:$0xff] }
 0x6e1   : > { %4171 = vmatprep.subr.mxu0 %v1798_v52  ;;  %4242 = vmatprep.subr.mxu1 %v1800_v53  ;;  %v1318_v52 = vld [vmem:[%s5187_s22 + $0x20a8] sm:$0xff]  ;;  %v1320_v53 = vld [vmem:[%s5187_s22 + $0x20b8] sm:$0xff] }
 0x6e3   : > { %4094 = vmatmul.mubr.f32.vlgmr.msra.gmra.mxu0 %v4825_v58  ;;  %4165 = vmatmul.mubr.f32.vlgmr.msra.gmra.mxu1 %v4826_v59  ;;  %v2309_v58 = vld [vmem:[%s5187_s22 + $0x3fa0] sm:$0xff]  ;;  %v2311_v59 = vld [vmem:[%s5187_s22 + $0x3fb0] sm:$0xff] }
 0x6e4   : > { %4172 = vmatpush1.xpose.msra.mxu0 %v1797_v54  ;;  %4243 = vmatpush1.xpose.msra.mxu1 %v1799_v55  ;;  %v1317_v54 = vld [vmem:[%s5187_s22 + $0x20a0] sm:$0xff]  ;;  %v1319_v55 = vld [vmem:[%s5187_s22 + $0x20b0] sm:$0xff] }
 0x6e5   : > { %4173 = vmatprep.subr.mxu0 %v1766_v56  ;;  %4244 = vmatprep.subr.mxu1 %v1768_v57  ;;  %v2310_v56 = vld [vmem:[%s5187_s22 + $0x3fa8] sm:$0xff]  ;;  %v2312_v57 = vld [vmem:[%s5187_s22 + $0x3fb8] sm:$0xff] }
 0x6e6   : > { %4235 = vmatprep.mubr.f32.mxu0 %v4827_v0  ;;  %4306 = vmatprep.mubr.f32.mxu1 %v4828_v1  ;;  %v2246_v0 = vld [vmem:[%s5187_s22 + $0x3da8] sm:$0xff]  ;;  %v2248_v1 = vld [vmem:[%s5187_s22 + $0x3db8] sm:$0xff] }
 0x6e8   : > { %4174 = vmatpush1.xpose.msra.mxu0 %v1765_v60  ;;  %4245 = vmatpush1.xpose.msra.mxu1 %v1767_v61  ;;  %v2278_v60 = vld [vmem:[%s5187_s22 + $0x3ea8] sm:$0xff]  ;;  %v2280_v61 = vld [vmem:[%s5187_s22 + $0x3eb8] sm:$0xff] }
 0x6e9   : > { %4175 = vmatprep.subr.mxu0 %v1734_v62  ;;  %4246 = vmatprep.subr.mxu1 %v1736_v63  ;;  %v2277_v62 = vld [vmem:[%s5187_s22 + $0x3ea0] sm:$0xff]  ;;  %v2279_v63 = vld [vmem:[%s5187_s22 + $0x3eb0] sm:$0xff] }
 0x6ec   : > { %4176 = vmatpush1.xpose.msra.mxu0 %v1733_v2  ;;  %4247 = vmatpush1.xpose.msra.mxu1 %v1735_v3  ;;  %v2245_v2 = vld [vmem:[%s5187_s22 + $0x3da0] sm:$0xff]  ;;  %v2247_v3 = vld [vmem:[%s5187_s22 + $0x3db0] sm:$0xff] }
 0x6ed   : > { %4177 = vmatprep.subr.mxu0 %v1702_v4  ;;  %4248 = vmatprep.subr.mxu1 %v1704_v5  ;;  %v2214_v4 = vld [vmem:[%s5187_s22 + $0x3ca8] sm:$0xff]  ;;  %v2216_v5 = vld [vmem:[%s5187_s22 + $0x3cb8] sm:$0xff] }
 0x6f0   : > { %4178 = vmatpush1.xpose.msra.mxu0 %v1701_v6  ;;  %4249 = vmatpush1.xpose.msra.mxu1 %v1703_v7  ;;  %v2213_v6 = vld [vmem:[%s5187_s22 + $0x3ca0] sm:$0xff]  ;;  %v2215_v7 = vld [vmem:[%s5187_s22 + $0x3cb0] sm:$0xff] }
 0x6f1   : > { %4179 = vmatprep.subr.mxu0 %v1670_v8  ;;  %4250 = vmatprep.subr.mxu1 %v1672_v9  ;;  %v2182_v8 = vld [vmem:[%s5187_s22 + $0x3ba8] sm:$0xff]  ;;  %v2184_v9 = vld [vmem:[%s5187_s22 + $0x3bb8] sm:$0xff] }
 0x6f4   : > { %4180 = vmatpush1.xpose.msra.mxu0 %v1669_v10  ;;  %4251 = vmatpush1.xpose.msra.mxu1 %v1671_v11  ;;  %v2181_v10 = vld [vmem:[%s5187_s22 + $0x3ba0] sm:$0xff]  ;;  %v2183_v11 = vld [vmem:[%s5187_s22 + $0x3bb0] sm:$0xff] }
 0x6f5   : > { %4181 = vmatprep.subr.mxu0 %v1638_v12  ;;  %4252 = vmatprep.subr.mxu1 %v1640_v13  ;;  %v2150_v12 = vld [vmem:[%s5187_s22 + $0x3aa8] sm:$0xff]  ;;  %v2152_v13 = vld [vmem:[%s5187_s22 + $0x3ab8] sm:$0xff] }
 0x6f8   : > { %4182 = vmatpush1.xpose.msra.mxu0 %v1637_v14  ;;  %4253 = vmatpush1.xpose.msra.mxu1 %v1639_v15  ;;  %v2149_v14 = vld [vmem:[%s5187_s22 + $0x3aa0] sm:$0xff]  ;;  %v2151_v15 = vld [vmem:[%s5187_s22 + $0x3ab0] sm:$0xff] }
 0x6f9   : > { %4183 = vmatprep.subr.mxu0 %v1606_v16  ;;  %4254 = vmatprep.subr.mxu1 %v1608_v17  ;;  %v2118_v16 = vld [vmem:[%s5187_s22 + $0x39a8] sm:$0xff]  ;;  %v2120_v17 = vld [vmem:[%s5187_s22 + $0x39b8] sm:$0xff] }
 0x6fc   : > { %4184 = vmatpush1.xpose.msra.mxu0 %v1605_v18  ;;  %4255 = vmatpush1.xpose.msra.mxu1 %v1607_v19  ;;  %v2117_v18 = vld [vmem:[%s5187_s22 + $0x39a0] sm:$0xff]  ;;  %v2119_v19 = vld [vmem:[%s5187_s22 + $0x39b0] sm:$0xff] }
 0x6fd   : > { %4185 = vmatprep.subr.mxu0 %v1574_v20  ;;  %4256 = vmatprep.subr.mxu1 %v1576_v21  ;;  %v2086_v20 = vld [vmem:[%s5187_s22 + $0x38a8] sm:$0xff]  ;;  %v2088_v21 = vld [vmem:[%s5187_s22 + $0x38b8] sm:$0xff] }
 0x700   : > { %4186 = vmatpush1.xpose.msra.mxu0 %v1573_v22  ;;  %4257 = vmatpush1.xpose.msra.mxu1 %v1575_v23  ;;  %v2085_v22 = vld [vmem:[%s5187_s22 + $0x38a0] sm:$0xff]  ;;  %v2087_v23 = vld [vmem:[%s5187_s22 + $0x38b0] sm:$0xff] }
 0x701   : > { %4187 = vmatprep.subr.mxu0 %v1542_v24  ;;  %4258 = vmatprep.subr.mxu1 %v1544_v25  ;;  %v2054_v24 = vld [vmem:[%s5187_s22 + $0x37a8] sm:$0xff]  ;;  %v2056_v25 = vld [vmem:[%s5187_s22 + $0x37b8] sm:$0xff] }
 0x704   : > { %4188 = vmatpush1.xpose.msra.mxu0 %v1541_v26  ;;  %4259 = vmatpush1.xpose.msra.mxu1 %v1543_v27  ;;  %v2053_v26 = vld [vmem:[%s5187_s22 + $0x37a0] sm:$0xff]  ;;  %v2055_v27 = vld [vmem:[%s5187_s22 + $0x37b0] sm:$0xff] }
 0x705   : > { %4189 = vmatprep.subr.mxu0 %v1510_v28  ;;  %4260 = vmatprep.subr.mxu1 %v1512_v29  ;;  %v2022_v28 = vld [vmem:[%s5187_s22 + $0x36a8] sm:$0xff]  ;;  %v2024_v29 = vld [vmem:[%s5187_s22 + $0x36b8] sm:$0xff] }
 0x708   : > { %4190 = vmatpush1.xpose.msra.mxu0 %v1509_v30  ;;  %4261 = vmatpush1.xpose.msra.mxu1 %v1511_v31  ;;  %v2021_v30 = vld [vmem:[%s5187_s22 + $0x36a0] sm:$0xff]  ;;  %v2023_v31 = vld [vmem:[%s5187_s22 + $0x36b0] sm:$0xff] }
 0x709   : > { %4191 = vmatprep.subr.mxu0 %v1478_v32  ;;  %4262 = vmatprep.subr.mxu1 %v1480_v33  ;;  %v1990_v32 = vld [vmem:[%s5187_s22 + $0x35a8] sm:$0xff]  ;;  %v1992_v33 = vld [vmem:[%s5187_s22 + $0x35b8] sm:$0xff] }
 0x70c   : > { %4192 = vmatpush1.xpose.msra.mxu0 %v1477_v34  ;;  %4263 = vmatpush1.xpose.msra.mxu1 %v1479_v35  ;;  %v1989_v34 = vld [vmem:[%s5187_s22 + $0x35a0] sm:$0xff]  ;;  %v1991_v35 = vld [vmem:[%s5187_s22 + $0x35b0] sm:$0xff] }
 0x70d   : > { %4193 = vmatprep.subr.mxu0 %v1446_v36  ;;  %4264 = vmatprep.subr.mxu1 %v1448_v37  ;;  %v1958_v36 = vld [vmem:[%s5187_s22 + $0x34a8] sm:$0xff]  ;;  %v1960_v37 = vld [vmem:[%s5187_s22 + $0x34b8] sm:$0xff] }
 0x710   : > { %4194 = vmatpush1.xpose.msra.mxu0 %v1445_v38  ;;  %4265 = vmatpush1.xpose.msra.mxu1 %v1447_v39  ;;  %v1957_v38 = vld [vmem:[%s5187_s22 + $0x34a0] sm:$0xff]  ;;  %v1959_v39 = vld [vmem:[%s5187_s22 + $0x34b0] sm:$0xff] }
 0x711   : > { %4195 = vmatprep.subr.mxu0 %v1414_v40  ;;  %4266 = vmatprep.subr.mxu1 %v1416_v41  ;;  %v1926_v40 = vld [vmem:[%s5187_s22 + $0x33a8] sm:$0xff]  ;;  %v1928_v41 = vld [vmem:[%s5187_s22 + $0x33b8] sm:$0xff] }
 0x714   : > { %4196 = vmatpush1.xpose.msra.mxu0 %v1413_v42  ;;  %4267 = vmatpush1.xpose.msra.mxu1 %v1415_v43  ;;  %v1925_v42 = vld [vmem:[%s5187_s22 + $0x33a0] sm:$0xff]  ;;  %v1927_v43 = vld [vmem:[%s5187_s22 + $0x33b0] sm:$0xff] }
 0x715   : > { %4197 = vmatprep.subr.mxu0 %v1382_v44  ;;  %4268 = vmatprep.subr.mxu1 %v1384_v45  ;;  %v1894_v44 = vld [vmem:[%s5187_s22 + $0x32a8] sm:$0xff]  ;;  %v1896_v45 = vld [vmem:[%s5187_s22 + $0x32b8] sm:$0xff] }
 0x718   : > { %4198 = vmatpush1.xpose.msra.mxu0 %v1381_v46  ;;  %4269 = vmatpush1.xpose.msra.mxu1 %v1383_v47  ;;  %v1893_v46 = vld [vmem:[%s5187_s22 + $0x32a0] sm:$0xff]  ;;  %v1895_v47 = vld [vmem:[%s5187_s22 + $0x32b0] sm:$0xff] }
 0x719   : > { %4199 = vmatprep.subr.mxu0 %v1350_v48  ;;  %4270 = vmatprep.subr.mxu1 %v1352_v49  ;;  %v1862_v48 = vld [vmem:[%s5187_s22 + $0x31a8] sm:$0xff]  ;;  %v1864_v49 = vld [vmem:[%s5187_s22 + $0x31b8] sm:$0xff] }
 0x71c   : > { %4200 = vmatpush1.xpose.msra.mxu0 %v1349_v50  ;;  %4271 = vmatpush1.xpose.msra.mxu1 %v1351_v51  ;;  %v1861_v50 = vld [vmem:[%s5187_s22 + $0x31a0] sm:$0xff]  ;;  %v1863_v51 = vld [vmem:[%s5187_s22 + $0x31b0] sm:$0xff] }
 0x71d   : > { %4201 = vmatprep.subr.mxu0 %v1318_v52  ;;  %4272 = vmatprep.subr.mxu1 %v1320_v53  ;;  %v1830_v52 = vld [vmem:[%s5187_s22 + $0x30a8] sm:$0xff]  ;;  %v1832_v53 = vld [vmem:[%s5187_s22 + $0x30b8] sm:$0xff] }
 0x720   : > { %4202 = vmatpush1.xpose.msra.mxu0 %v1317_v54  ;;  %4273 = vmatpush1.xpose.msra.mxu1 %v1319_v55  ;;  %v1829_v54 = vld [vmem:[%s5187_s22 + $0x30a0] sm:$0xff]  ;;  %v1831_v55 = vld [vmem:[%s5187_s22 + $0x30b0] sm:$0xff] }
 0x721   : > { %4203 = vmatprep.subr.mxu0 %v2310_v56  ;;  %4274 = vmatprep.subr.mxu1 %v2312_v57  ;;  %v1802_v56 = vld [vmem:[%s5187_s22 + $0x2fc8] sm:$0xff]  ;;  %v1804_v57 = vld [vmem:[%s5187_s22 + $0x2fd8] sm:$0xff] }
 0x724   : > { %4204 = vmatpush2.xpose.msra.mxu0 %v2309_v58  ;;  %4275 = vmatpush2.xpose.msra.mxu1 %v2311_v59  ;;  %v1801_v58 = vld [vmem:[%s5187_s22 + $0x2fc0] sm:$0xff]  ;;  %v1803_v59 = vld [vmem:[%s5187_s22 + $0x2fd0] sm:$0xff] }
 0x725   : > { %4205 = vmatprep.subr.mxu0 %v2278_v60  ;;  %4276 = vmatprep.subr.mxu1 %v2280_v61  ;;  %v1770_v60 = vld [vmem:[%s5187_s22 + $0x2ec8] sm:$0xff]  ;;  %v1772_v61 = vld [vmem:[%s5187_s22 + $0x2ed8] sm:$0xff] }
 0x728   : > { %4206 = vmatpush2.xpose.msra.mxu0 %v2277_v62  ;;  %4277 = vmatpush2.xpose.msra.mxu1 %v2279_v63  ;;  %v4829_v62 = vld [vmem:[#allocation2 + $0xa0] sm:$0xff]  ;;  %v4830_v63 = vld [vmem:[#allocation2 + $0xb0] sm:$0xff] }
 0x729   : > { %4207 = vmatprep.subr.mxu0 %v2246_v0  ;;  %4278 = vmatprep.subr.mxu1 %v2248_v1  ;;  %v1769_v0 = vld [vmem:[%s5187_s22 + $0x2ec0] sm:$0xff]  ;;  %v1771_v1 = vld [vmem:[%s5187_s22 + $0x2ed0] sm:$0xff] }
 0x72c   : > { %4208 = vmatpush2.xpose.msra.mxu0 %v2245_v2  ;;  %4279 = vmatpush2.xpose.msra.mxu1 %v2247_v3  ;;  %v1738_v2 = vld [vmem:[%s5187_s22 + $0x2dc8] sm:$0xff]  ;;  %v1740_v3 = vld [vmem:[%s5187_s22 + $0x2dd8] sm:$0xff] }
 0x72d   : > { %4209 = vmatprep.subr.mxu0 %v2214_v4  ;;  %4280 = vmatprep.subr.mxu1 %v2216_v5  ;;  %v4831_v4 = vld [vmem:[#allocation2 + $0xc8] sm:$0xff]  ;;  %v4832_v5 = vld [vmem:[#allocation2 + $0xd8] sm:$0xff] }
 0x730   : > { %4210 = vmatpush2.xpose.msra.mxu0 %v2213_v6  ;;  %4281 = vmatpush2.xpose.msra.mxu1 %v2215_v7  ;;  %v1737_v6 = vld [vmem:[%s5187_s22 + $0x2dc0] sm:$0xff]  ;;  %v1739_v7 = vld [vmem:[%s5187_s22 + $0x2dd0] sm:$0xff] }
 0x731   : > { %4211 = vmatprep.subr.mxu0 %v2182_v8  ;;  %4282 = vmatprep.subr.mxu1 %v2184_v9  ;;  %v1706_v8 = vld [vmem:[%s5187_s22 + $0x2cc8] sm:$0xff]  ;;  %v1708_v9 = vld [vmem:[%s5187_s22 + $0x2cd8] sm:$0xff] }
 0x734   : > { %4212 = vmatpush2.xpose.msra.mxu0 %v2181_v10  ;;  %4283 = vmatpush2.xpose.msra.mxu1 %v2183_v11  ;;  %v1705_v10 = vld [vmem:[%s5187_s22 + $0x2cc0] sm:$0xff]  ;;  %v1707_v11 = vld [vmem:[%s5187_s22 + $0x2cd0] sm:$0xff] }
 0x735   : > { %4213 = vmatprep.subr.mxu0 %v2150_v12  ;;  %4284 = vmatprep.subr.mxu1 %v2152_v13  ;;  %v1674_v12 = vld [vmem:[%s5187_s22 + $0x2bc8] sm:$0xff]  ;;  %v1676_v13 = vld [vmem:[%s5187_s22 + $0x2bd8] sm:$0xff] }
 0x738   : > { %4214 = vmatpush2.xpose.msra.mxu0 %v2149_v14  ;;  %4285 = vmatpush2.xpose.msra.mxu1 %v2151_v15  ;;  %v1673_v14 = vld [vmem:[%s5187_s22 + $0x2bc0] sm:$0xff]  ;;  %v1675_v15 = vld [vmem:[%s5187_s22 + $0x2bd0] sm:$0xff] }
 0x739   : > { %4215 = vmatprep.subr.mxu0 %v2118_v16  ;;  %4286 = vmatprep.subr.mxu1 %v2120_v17  ;;  %v1642_v16 = vld [vmem:[%s5187_s22 + $0x2ac8] sm:$0xff]  ;;  %v1644_v17 = vld [vmem:[%s5187_s22 + $0x2ad8] sm:$0xff] }
 0x73c   : > { %4216 = vmatpush2.xpose.msra.mxu0 %v2117_v18  ;;  %4287 = vmatpush2.xpose.msra.mxu1 %v2119_v19  ;;  %v1641_v18 = vld [vmem:[%s5187_s22 + $0x2ac0] sm:$0xff]  ;;  %v1643_v19 = vld [vmem:[%s5187_s22 + $0x2ad0] sm:$0xff] }
 0x73d   : > { %4217 = vmatprep.subr.mxu0 %v2086_v20  ;;  %4288 = vmatprep.subr.mxu1 %v2088_v21  ;;  %v1610_v20 = vld [vmem:[%s5187_s22 + $0x29c8] sm:$0xff]  ;;  %v1612_v21 = vld [vmem:[%s5187_s22 + $0x29d8] sm:$0xff] }
 0x740   : > { %4218 = vmatpush2.xpose.msra.mxu0 %v2085_v22  ;;  %4289 = vmatpush2.xpose.msra.mxu1 %v2087_v23  ;;  %v1609_v22 = vld [vmem:[%s5187_s22 + $0x29c0] sm:$0xff]  ;;  %v1611_v23 = vld [vmem:[%s5187_s22 + $0x29d0] sm:$0xff] }
 0x741   : > { %4219 = vmatprep.subr.mxu0 %v2054_v24  ;;  %4290 = vmatprep.subr.mxu1 %v2056_v25  ;;  %v1578_v24 = vld [vmem:[%s5187_s22 + $0x28c8] sm:$0xff]  ;;  %v1580_v25 = vld [vmem:[%s5187_s22 + $0x28d8] sm:$0xff] }
 0x744   : > { %4220 = vmatpush2.xpose.msra.mxu0 %v2053_v26  ;;  %4291 = vmatpush2.xpose.msra.mxu1 %v2055_v27  ;;  %v1577_v26 = vld [vmem:[%s5187_s22 + $0x28c0] sm:$0xff]  ;;  %v1579_v27 = vld [vmem:[%s5187_s22 + $0x28d0] sm:$0xff] }
 0x745   : > { %4221 = vmatprep.subr.mxu0 %v2022_v28  ;;  %4292 = vmatprep.subr.mxu1 %v2024_v29  ;;  %v1546_v28 = vld [vmem:[%s5187_s22 + $0x27c8] sm:$0xff]  ;;  %v1548_v29 = vld [vmem:[%s5187_s22 + $0x27d8] sm:$0xff] }
 0x748   : > { %4222 = vmatpush2.xpose.msra.mxu0 %v2021_v30  ;;  %4293 = vmatpush2.xpose.msra.mxu1 %v2023_v31  ;;  %v1545_v30 = vld [vmem:[%s5187_s22 + $0x27c0] sm:$0xff]  ;;  %v1547_v31 = vld [vmem:[%s5187_s22 + $0x27d0] sm:$0xff] }
 0x749   : > { %4223 = vmatprep.subr.mxu0 %v1990_v32  ;;  %4294 = vmatprep.subr.mxu1 %v1992_v33  ;;  %v1514_v32 = vld [vmem:[%s5187_s22 + $0x26c8] sm:$0xff]  ;;  %v1516_v33 = vld [vmem:[%s5187_s22 + $0x26d8] sm:$0xff] }
 0x74c   : > { %4224 = vmatpush2.xpose.msra.mxu0 %v1989_v34  ;;  %4295 = vmatpush2.xpose.msra.mxu1 %v1991_v35  ;;  %v1513_v34 = vld [vmem:[%s5187_s22 + $0x26c0] sm:$0xff]  ;;  %v1515_v35 = vld [vmem:[%s5187_s22 + $0x26d0] sm:$0xff] }
 0x74d   : > { %4225 = vmatprep.subr.mxu0 %v1958_v36  ;;  %4296 = vmatprep.subr.mxu1 %v1960_v37  ;;  %v1482_v36 = vld [vmem:[%s5187_s22 + $0x25c8] sm:$0xff]  ;;  %v1484_v37 = vld [vmem:[%s5187_s22 + $0x25d8] sm:$0xff] }
 0x750   : > { %4226 = vmatpush2.xpose.msra.mxu0 %v1957_v38  ;;  %4297 = vmatpush2.xpose.msra.mxu1 %v1959_v39  ;;  %v1481_v38 = vld [vmem:[%s5187_s22 + $0x25c0] sm:$0xff]  ;;  %v1483_v39 = vld [vmem:[%s5187_s22 + $0x25d0] sm:$0xff] }
 0x751   : > { %4227 = vmatprep.subr.mxu0 %v1926_v40  ;;  %4298 = vmatprep.subr.mxu1 %v1928_v41  ;;  %v1450_v40 = vld [vmem:[%s5187_s22 + $0x24c8] sm:$0xff]  ;;  %v1452_v41 = vld [vmem:[%s5187_s22 + $0x24d8] sm:$0xff] }
 0x754   : > { %4228 = vmatpush2.xpose.msra.mxu0 %v1925_v42  ;;  %4299 = vmatpush2.xpose.msra.mxu1 %v1927_v43  ;;  %v1449_v42 = vld [vmem:[%s5187_s22 + $0x24c0] sm:$0xff]  ;;  %v1451_v43 = vld [vmem:[%s5187_s22 + $0x24d0] sm:$0xff] }
 0x755   : > { %4229 = vmatprep.subr.mxu0 %v1894_v44  ;;  %4300 = vmatprep.subr.mxu1 %v1896_v45  ;;  %v1418_v44 = vld [vmem:[%s5187_s22 + $0x23c8] sm:$0xff]  ;;  %v1420_v45 = vld [vmem:[%s5187_s22 + $0x23d8] sm:$0xff] }
 0x758   : > { %4230 = vmatpush2.xpose.msra.mxu0 %v1893_v46  ;;  %4301 = vmatpush2.xpose.msra.mxu1 %v1895_v47  ;;  %v1417_v46 = vld [vmem:[%s5187_s22 + $0x23c0] sm:$0xff]  ;;  %v1419_v47 = vld [vmem:[%s5187_s22 + $0x23d0] sm:$0xff] }
 0x759   : > { %4231 = vmatprep.subr.mxu0 %v1862_v48  ;;  %4302 = vmatprep.subr.mxu1 %v1864_v49  ;;  %v1386_v48 = vld [vmem:[%s5187_s22 + $0x22c8] sm:$0xff]  ;;  %v1388_v49 = vld [vmem:[%s5187_s22 + $0x22d8] sm:$0xff] }
 0x75c   : > { %4232 = vmatpush2.xpose.msra.mxu0 %v1861_v50  ;;  %4303 = vmatpush2.xpose.msra.mxu1 %v1863_v51  ;;  %v1385_v50 = vld [vmem:[%s5187_s22 + $0x22c0] sm:$0xff]  ;;  %v1387_v51 = vld [vmem:[%s5187_s22 + $0x22d0] sm:$0xff] }
 0x75d   : > { %4233 = vmatprep.subr.mxu0 %v1830_v52  ;;  %4304 = vmatprep.subr.mxu1 %v1832_v53  ;;  %v1354_v52 = vld [vmem:[%s5187_s22 + $0x21c8] sm:$0xff]  ;;  %v1356_v53 = vld [vmem:[%s5187_s22 + $0x21d8] sm:$0xff] }
 0x760   : > { %4234 = vmatpush2.xpose.msra.mxu0 %v1829_v54  ;;  %4305 = vmatpush2.xpose.msra.mxu1 %v1831_v55  ;;  %v1353_v54 = vld [vmem:[%s5187_s22 + $0x21c0] sm:$0xff]  ;;  %v1355_v55 = vld [vmem:[%s5187_s22 + $0x21d0] sm:$0xff] }
 0x761   : > { %4313 = vmatprep.subr.mxu0 %v1802_v56  ;;  %4384 = vmatprep.subr.mxu1 %v1804_v57  ;;  %v1322_v56 = vld [vmem:[%s5187_s22 + $0x20c8] sm:$0xff]  ;;  %v1324_v57 = vld [vmem:[%s5187_s22 + $0x20d8] sm:$0xff] }
 0x763   : > { %4236 = vmatmul.mubr.f32.vlgmr.msra.gmra.mxu0 %v4829_v62  ;;  %4307 = vmatmul.mubr.f32.vlgmr.msra.gmra.mxu1 %v4830_v63  ;;  %v2313_v62 = vld [vmem:[%s5187_s22 + $0x3fc0] sm:$0xff]  ;;  %v2315_v63 = vld [vmem:[%s5187_s22 + $0x3fd0] sm:$0xff] }
 0x764   : > { %4314 = vmatpush1.xpose.msra.mxu0 %v1801_v58  ;;  %4385 = vmatpush1.xpose.msra.mxu1 %v1803_v59  ;;  %v1321_v58 = vld [vmem:[%s5187_s22 + $0x20c0] sm:$0xff]  ;;  %v1323_v59 = vld [vmem:[%s5187_s22 + $0x20d0] sm:$0xff] }
 0x765   : > { %4315 = vmatprep.subr.mxu0 %v1770_v60  ;;  %4386 = vmatprep.subr.mxu1 %v1772_v61  ;;  %v2314_v60 = vld [vmem:[%s5187_s22 + $0x3fc8] sm:$0xff]  ;;  %v2316_v61 = vld [vmem:[%s5187_s22 + $0x3fd8] sm:$0xff] }
 0x766   : > { %4377 = vmatprep.mubr.f32.mxu0 %v4831_v4  ;;  %4448 = vmatprep.mubr.f32.mxu1 %v4832_v5  ;;  %v2250_v4 = vld [vmem:[%s5187_s22 + $0x3dc8] sm:$0xff]  ;;  %v2252_v5 = vld [vmem:[%s5187_s22 + $0x3dd8] sm:$0xff] }
 0x768   : > { %4316 = vmatpush1.xpose.msra.mxu0 %v1769_v0  ;;  %4387 = vmatpush1.xpose.msra.mxu1 %v1771_v1  ;;  %v2282_v0 = vld [vmem:[%s5187_s22 + $0x3ec8] sm:$0xff]  ;;  %v2284_v1 = vld [vmem:[%s5187_s22 + $0x3ed8] sm:$0xff] }
 0x769   : > { %4317 = vmatprep.subr.mxu0 %v1738_v2  ;;  %4388 = vmatprep.subr.mxu1 %v1740_v3  ;;  %v2281_v2 = vld [vmem:[%s5187_s22 + $0x3ec0] sm:$0xff]  ;;  %v2283_v3 = vld [vmem:[%s5187_s22 + $0x3ed0] sm:$0xff] }
 0x76c   : > { %4318 = vmatpush1.xpose.msra.mxu0 %v1737_v6  ;;  %4389 = vmatpush1.xpose.msra.mxu1 %v1739_v7  ;;  %v2249_v6 = vld [vmem:[%s5187_s22 + $0x3dc0] sm:$0xff]  ;;  %v2251_v7 = vld [vmem:[%s5187_s22 + $0x3dd0] sm:$0xff] }
 0x76d   : > { %4319 = vmatprep.subr.mxu0 %v1706_v8  ;;  %4390 = vmatprep.subr.mxu1 %v1708_v9  ;;  %v2218_v8 = vld [vmem:[%s5187_s22 + $0x3cc8] sm:$0xff]  ;;  %v2220_v9 = vld [vmem:[%s5187_s22 + $0x3cd8] sm:$0xff] }
 0x770   : > { %4320 = vmatpush1.xpose.msra.mxu0 %v1705_v10  ;;  %4391 = vmatpush1.xpose.msra.mxu1 %v1707_v11  ;;  %v2217_v10 = vld [vmem:[%s5187_s22 + $0x3cc0] sm:$0xff]  ;;  %v2219_v11 = vld [vmem:[%s5187_s22 + $0x3cd0] sm:$0xff] }
 0x771   : > { %4321 = vmatprep.subr.mxu0 %v1674_v12  ;;  %4392 = vmatprep.subr.mxu1 %v1676_v13  ;;  %v2186_v12 = vld [vmem:[%s5187_s22 + $0x3bc8] sm:$0xff]  ;;  %v2188_v13 = vld [vmem:[%s5187_s22 + $0x3bd8] sm:$0xff] }
 0x774   : > { %4322 = vmatpush1.xpose.msra.mxu0 %v1673_v14  ;;  %4393 = vmatpush1.xpose.msra.mxu1 %v1675_v15  ;;  %v2185_v14 = vld [vmem:[%s5187_s22 + $0x3bc0] sm:$0xff]  ;;  %v2187_v15 = vld [vmem:[%s5187_s22 + $0x3bd0] sm:$0xff] }
 0x775   : > { %4323 = vmatprep.subr.mxu0 %v1642_v16  ;;  %4394 = vmatprep.subr.mxu1 %v1644_v17  ;;  %v2154_v16 = vld [vmem:[%s5187_s22 + $0x3ac8] sm:$0xff]  ;;  %v2156_v17 = vld [vmem:[%s5187_s22 + $0x3ad8] sm:$0xff] }
 0x778   : > { %4324 = vmatpush1.xpose.msra.mxu0 %v1641_v18  ;;  %4395 = vmatpush1.xpose.msra.mxu1 %v1643_v19  ;;  %v2153_v18 = vld [vmem:[%s5187_s22 + $0x3ac0] sm:$0xff]  ;;  %v2155_v19 = vld [vmem:[%s5187_s22 + $0x3ad0] sm:$0xff] }
 0x779   : > { %4325 = vmatprep.subr.mxu0 %v1610_v20  ;;  %4396 = vmatprep.subr.mxu1 %v1612_v21  ;;  %v2122_v20 = vld [vmem:[%s5187_s22 + $0x39c8] sm:$0xff]  ;;  %v2124_v21 = vld [vmem:[%s5187_s22 + $0x39d8] sm:$0xff] }
 0x77c   : > { %4326 = vmatpush1.xpose.msra.mxu0 %v1609_v22  ;;  %4397 = vmatpush1.xpose.msra.mxu1 %v1611_v23  ;;  %v2121_v22 = vld [vmem:[%s5187_s22 + $0x39c0] sm:$0xff]  ;;  %v2123_v23 = vld [vmem:[%s5187_s22 + $0x39d0] sm:$0xff] }
 0x77d   : > { %4327 = vmatprep.subr.mxu0 %v1578_v24  ;;  %4398 = vmatprep.subr.mxu1 %v1580_v25  ;;  %v2090_v24 = vld [vmem:[%s5187_s22 + $0x38c8] sm:$0xff]  ;;  %v2092_v25 = vld [vmem:[%s5187_s22 + $0x38d8] sm:$0xff] }
 0x780   : > { %4328 = vmatpush1.xpose.msra.mxu0 %v1577_v26  ;;  %4399 = vmatpush1.xpose.msra.mxu1 %v1579_v27  ;;  %v2089_v26 = vld [vmem:[%s5187_s22 + $0x38c0] sm:$0xff]  ;;  %v2091_v27 = vld [vmem:[%s5187_s22 + $0x38d0] sm:$0xff] }
 0x781   : > { %4329 = vmatprep.subr.mxu0 %v1546_v28  ;;  %4400 = vmatprep.subr.mxu1 %v1548_v29  ;;  %v2058_v28 = vld [vmem:[%s5187_s22 + $0x37c8] sm:$0xff]  ;;  %v2060_v29 = vld [vmem:[%s5187_s22 + $0x37d8] sm:$0xff] }
 0x784   : > { %4330 = vmatpush1.xpose.msra.mxu0 %v1545_v30  ;;  %4401 = vmatpush1.xpose.msra.mxu1 %v1547_v31  ;;  %v2057_v30 = vld [vmem:[%s5187_s22 + $0x37c0] sm:$0xff]  ;;  %v2059_v31 = vld [vmem:[%s5187_s22 + $0x37d0] sm:$0xff] }
 0x785   : > { %4331 = vmatprep.subr.mxu0 %v1514_v32  ;;  %4402 = vmatprep.subr.mxu1 %v1516_v33  ;;  %v2026_v32 = vld [vmem:[%s5187_s22 + $0x36c8] sm:$0xff]  ;;  %v2028_v33 = vld [vmem:[%s5187_s22 + $0x36d8] sm:$0xff] }
 0x788   : > { %4332 = vmatpush1.xpose.msra.mxu0 %v1513_v34  ;;  %4403 = vmatpush1.xpose.msra.mxu1 %v1515_v35  ;;  %v2025_v34 = vld [vmem:[%s5187_s22 + $0x36c0] sm:$0xff]  ;;  %v2027_v35 = vld [vmem:[%s5187_s22 + $0x36d0] sm:$0xff] }
 0x789   : > { %4333 = vmatprep.subr.mxu0 %v1482_v36  ;;  %4404 = vmatprep.subr.mxu1 %v1484_v37  ;;  %v1994_v36 = vld [vmem:[%s5187_s22 + $0x35c8] sm:$0xff]  ;;  %v1996_v37 = vld [vmem:[%s5187_s22 + $0x35d8] sm:$0xff] }
 0x78c   : > { %4334 = vmatpush1.xpose.msra.mxu0 %v1481_v38  ;;  %4405 = vmatpush1.xpose.msra.mxu1 %v1483_v39  ;;  %v1993_v38 = vld [vmem:[%s5187_s22 + $0x35c0] sm:$0xff]  ;;  %v1995_v39 = vld [vmem:[%s5187_s22 + $0x35d0] sm:$0xff] }
 0x78d   : > { %4335 = vmatprep.subr.mxu0 %v1450_v40  ;;  %4406 = vmatprep.subr.mxu1 %v1452_v41  ;;  %v1962_v40 = vld [vmem:[%s5187_s22 + $0x34c8] sm:$0xff]  ;;  %v1964_v41 = vld [vmem:[%s5187_s22 + $0x34d8] sm:$0xff] }
 0x790   : > { %4336 = vmatpush1.xpose.msra.mxu0 %v1449_v42  ;;  %4407 = vmatpush1.xpose.msra.mxu1 %v1451_v43  ;;  %v1961_v42 = vld [vmem:[%s5187_s22 + $0x34c0] sm:$0xff]  ;;  %v1963_v43 = vld [vmem:[%s5187_s22 + $0x34d0] sm:$0xff] }
 0x791   : > { %4337 = vmatprep.subr.mxu0 %v1418_v44  ;;  %4408 = vmatprep.subr.mxu1 %v1420_v45  ;;  %v1930_v44 = vld [vmem:[%s5187_s22 + $0x33c8] sm:$0xff]  ;;  %v1932_v45 = vld [vmem:[%s5187_s22 + $0x33d8] sm:$0xff] }
 0x794   : > { %4338 = vmatpush1.xpose.msra.mxu0 %v1417_v46  ;;  %4409 = vmatpush1.xpose.msra.mxu1 %v1419_v47  ;;  %v1929_v46 = vld [vmem:[%s5187_s22 + $0x33c0] sm:$0xff]  ;;  %v1931_v47 = vld [vmem:[%s5187_s22 + $0x33d0] sm:$0xff] }
 0x795   : > { %4339 = vmatprep.subr.mxu0 %v1386_v48  ;;  %4410 = vmatprep.subr.mxu1 %v1388_v49  ;;  %v1898_v48 = vld [vmem:[%s5187_s22 + $0x32c8] sm:$0xff]  ;;  %v1900_v49 = vld [vmem:[%s5187_s22 + $0x32d8] sm:$0xff] }
 0x798   : > { %4340 = vmatpush1.xpose.msra.mxu0 %v1385_v50  ;;  %4411 = vmatpush1.xpose.msra.mxu1 %v1387_v51  ;;  %v1897_v50 = vld [vmem:[%s5187_s22 + $0x32c0] sm:$0xff]  ;;  %v1899_v51 = vld [vmem:[%s5187_s22 + $0x32d0] sm:$0xff] }
 0x799   : > { %4341 = vmatprep.subr.mxu0 %v1354_v52  ;;  %4412 = vmatprep.subr.mxu1 %v1356_v53  ;;  %v1866_v52 = vld [vmem:[%s5187_s22 + $0x31c8] sm:$0xff]  ;;  %v1868_v53 = vld [vmem:[%s5187_s22 + $0x31d8] sm:$0xff] }
 0x79c   : > { %4342 = vmatpush1.xpose.msra.mxu0 %v1353_v54  ;;  %4413 = vmatpush1.xpose.msra.mxu1 %v1355_v55  ;;  %v1865_v54 = vld [vmem:[%s5187_s22 + $0x31c0] sm:$0xff]  ;;  %v1867_v55 = vld [vmem:[%s5187_s22 + $0x31d0] sm:$0xff] }
 0x79d   : > { %4343 = vmatprep.subr.mxu0 %v1322_v56  ;;  %4414 = vmatprep.subr.mxu1 %v1324_v57  ;;  %v1834_v56 = vld [vmem:[%s5187_s22 + $0x30c8] sm:$0xff]  ;;  %v1836_v57 = vld [vmem:[%s5187_s22 + $0x30d8] sm:$0xff] }
 0x7a0   : > { %4344 = vmatpush1.xpose.msra.mxu0 %v1321_v58  ;;  %4415 = vmatpush1.xpose.msra.mxu1 %v1323_v59  ;;  %v1833_v58 = vld [vmem:[%s5187_s22 + $0x30c0] sm:$0xff]  ;;  %v1835_v59 = vld [vmem:[%s5187_s22 + $0x30d0] sm:$0xff] }
 0x7a1   : > { %4345 = vmatprep.subr.mxu0 %v2314_v60  ;;  %4416 = vmatprep.subr.mxu1 %v2316_v61  ;;  %v1806_v60 = vld [vmem:[%s5187_s22 + $0x2fe8] sm:$0xff]  ;;  %v1808_v61 = vld [vmem:[%s5187_s22 + $0x2ff8] sm:$0xff] }
 0x7a4   : > { %4346 = vmatpush2.xpose.msra.mxu0 %v2313_v62  ;;  %4417 = vmatpush2.xpose.msra.mxu1 %v2315_v63  ;;  %v1805_v62 = vld [vmem:[%s5187_s22 + $0x2fe0] sm:$0xff]  ;;  %v1807_v63 = vld [vmem:[%s5187_s22 + $0x2ff0] sm:$0xff] }
 0x7a5   : > { %4347 = vmatprep.subr.mxu0 %v2282_v0  ;;  %4418 = vmatprep.subr.mxu1 %v2284_v1  ;;  %v1774_v0 = vld [vmem:[%s5187_s22 + $0x2ee8] sm:$0xff]  ;;  %v1776_v1 = vld [vmem:[%s5187_s22 + $0x2ef8] sm:$0xff] }
 0x7a8   : > { %4348 = vmatpush2.xpose.msra.mxu0 %v2281_v2  ;;  %4419 = vmatpush2.xpose.msra.mxu1 %v2283_v3  ;;  %v4833_v2 = vld [vmem:[#allocation2 + $0xc0] sm:$0xff]  ;;  %v4834_v3 = vld [vmem:[#allocation2 + $0xd0] sm:$0xff] }
 0x7a9   : > { %4349 = vmatprep.subr.mxu0 %v2250_v4  ;;  %4420 = vmatprep.subr.mxu1 %v2252_v5  ;;  %v1773_v4 = vld [vmem:[%s5187_s22 + $0x2ee0] sm:$0xff]  ;;  %v1775_v5 = vld [vmem:[%s5187_s22 + $0x2ef0] sm:$0xff] }
 0x7ac   : > { %4350 = vmatpush2.xpose.msra.mxu0 %v2249_v6  ;;  %4421 = vmatpush2.xpose.msra.mxu1 %v2251_v7  ;;  %v1742_v6 = vld [vmem:[%s5187_s22 + $0x2de8] sm:$0xff]  ;;  %v1744_v7 = vld [vmem:[%s5187_s22 + $0x2df8] sm:$0xff] }
 0x7ad   : > { %4351 = vmatprep.subr.mxu0 %v2218_v8  ;;  %4422 = vmatprep.subr.mxu1 %v2220_v9  ;;  %v4835_v8 = vld [vmem:[#allocation2 + $0xe8] sm:$0xff]  ;;  %v4836_v9 = vld [vmem:[#allocation2 + $0xf8] sm:$0xff] }
 0x7b0   : > { %4352 = vmatpush2.xpose.msra.mxu0 %v2217_v10  ;;  %4423 = vmatpush2.xpose.msra.mxu1 %v2219_v11  ;;  %v1741_v10 = vld [vmem:[%s5187_s22 + $0x2de0] sm:$0xff]  ;;  %v1743_v11 = vld [vmem:[%s5187_s22 + $0x2df0] sm:$0xff] }
 0x7b1   : > { %4353 = vmatprep.subr.mxu0 %v2186_v12  ;;  %4424 = vmatprep.subr.mxu1 %v2188_v13  ;;  %v1710_v12 = vld [vmem:[%s5187_s22 + $0x2ce8] sm:$0xff]  ;;  %v1712_v13 = vld [vmem:[%s5187_s22 + $0x2cf8] sm:$0xff] }
 0x7b4   : > { %4354 = vmatpush2.xpose.msra.mxu0 %v2185_v14  ;;  %4425 = vmatpush2.xpose.msra.mxu1 %v2187_v15  ;;  %v1709_v14 = vld [vmem:[%s5187_s22 + $0x2ce0] sm:$0xff]  ;;  %v1711_v15 = vld [vmem:[%s5187_s22 + $0x2cf0] sm:$0xff] }
 0x7b5   : > { %4355 = vmatprep.subr.mxu0 %v2154_v16  ;;  %4426 = vmatprep.subr.mxu1 %v2156_v17  ;;  %v1678_v16 = vld [vmem:[%s5187_s22 + $0x2be8] sm:$0xff]  ;;  %v1680_v17 = vld [vmem:[%s5187_s22 + $0x2bf8] sm:$0xff] }
 0x7b8   : > { %4356 = vmatpush2.xpose.msra.mxu0 %v2153_v18  ;;  %4427 = vmatpush2.xpose.msra.mxu1 %v2155_v19  ;;  %v1677_v18 = vld [vmem:[%s5187_s22 + $0x2be0] sm:$0xff]  ;;  %v1679_v19 = vld [vmem:[%s5187_s22 + $0x2bf0] sm:$0xff] }
 0x7b9   : > { %4357 = vmatprep.subr.mxu0 %v2122_v20  ;;  %4428 = vmatprep.subr.mxu1 %v2124_v21  ;;  %v1646_v20 = vld [vmem:[%s5187_s22 + $0x2ae8] sm:$0xff]  ;;  %v1648_v21 = vld [vmem:[%s5187_s22 + $0x2af8] sm:$0xff] }
 0x7bc   : > { %4358 = vmatpush2.xpose.msra.mxu0 %v2121_v22  ;;  %4429 = vmatpush2.xpose.msra.mxu1 %v2123_v23  ;;  %v1645_v22 = vld [vmem:[%s5187_s22 + $0x2ae0] sm:$0xff]  ;;  %v1647_v23 = vld [vmem:[%s5187_s22 + $0x2af0] sm:$0xff] }
 0x7bd   : > { %4359 = vmatprep.subr.mxu0 %v2090_v24  ;;  %4430 = vmatprep.subr.mxu1 %v2092_v25  ;;  %v1614_v24 = vld [vmem:[%s5187_s22 + $0x29e8] sm:$0xff]  ;;  %v1616_v25 = vld [vmem:[%s5187_s22 + $0x29f8] sm:$0xff] }
 0x7c0   : > { %4360 = vmatpush2.xpose.msra.mxu0 %v2089_v26  ;;  %4431 = vmatpush2.xpose.msra.mxu1 %v2091_v27  ;;  %v1613_v26 = vld [vmem:[%s5187_s22 + $0x29e0] sm:$0xff]  ;;  %v1615_v27 = vld [vmem:[%s5187_s22 + $0x29f0] sm:$0xff] }
 0x7c1   : > { %4361 = vmatprep.subr.mxu0 %v2058_v28  ;;  %4432 = vmatprep.subr.mxu1 %v2060_v29  ;;  %v1582_v28 = vld [vmem:[%s5187_s22 + $0x28e8] sm:$0xff]  ;;  %v1584_v29 = vld [vmem:[%s5187_s22 + $0x28f8] sm:$0xff] }
 0x7c4   : > { %4362 = vmatpush2.xpose.msra.mxu0 %v2057_v30  ;;  %4433 = vmatpush2.xpose.msra.mxu1 %v2059_v31  ;;  %v1581_v30 = vld [vmem:[%s5187_s22 + $0x28e0] sm:$0xff]  ;;  %v1583_v31 = vld [vmem:[%s5187_s22 + $0x28f0] sm:$0xff] }
 0x7c5   : > { %4363 = vmatprep.subr.mxu0 %v2026_v32  ;;  %4434 = vmatprep.subr.mxu1 %v2028_v33  ;;  %v1550_v32 = vld [vmem:[%s5187_s22 + $0x27e8] sm:$0xff]  ;;  %v1552_v33 = vld [vmem:[%s5187_s22 + $0x27f8] sm:$0xff] }
 0x7c8   : > { %4364 = vmatpush2.xpose.msra.mxu0 %v2025_v34  ;;  %4435 = vmatpush2.xpose.msra.mxu1 %v2027_v35  ;;  %v1549_v34 = vld [vmem:[%s5187_s22 + $0x27e0] sm:$0xff]  ;;  %v1551_v35 = vld [vmem:[%s5187_s22 + $0x27f0] sm:$0xff] }
 0x7c9   : > { %4365 = vmatprep.subr.mxu0 %v1994_v36  ;;  %4436 = vmatprep.subr.mxu1 %v1996_v37  ;;  %v1518_v36 = vld [vmem:[%s5187_s22 + $0x26e8] sm:$0xff]  ;;  %v1520_v37 = vld [vmem:[%s5187_s22 + $0x26f8] sm:$0xff] }
 0x7cc   : > { %4366 = vmatpush2.xpose.msra.mxu0 %v1993_v38  ;;  %4437 = vmatpush2.xpose.msra.mxu1 %v1995_v39  ;;  %v1517_v38 = vld [vmem:[%s5187_s22 + $0x26e0] sm:$0xff]  ;;  %v1519_v39 = vld [vmem:[%s5187_s22 + $0x26f0] sm:$0xff] }
 0x7cd   : > { %4367 = vmatprep.subr.mxu0 %v1962_v40  ;;  %4438 = vmatprep.subr.mxu1 %v1964_v41  ;;  %v1486_v40 = vld [vmem:[%s5187_s22 + $0x25e8] sm:$0xff]  ;;  %v1488_v41 = vld [vmem:[%s5187_s22 + $0x25f8] sm:$0xff] }
 0x7d0   : > { %4368 = vmatpush2.xpose.msra.mxu0 %v1961_v42  ;;  %4439 = vmatpush2.xpose.msra.mxu1 %v1963_v43  ;;  %v1485_v42 = vld [vmem:[%s5187_s22 + $0x25e0] sm:$0xff]  ;;  %v1487_v43 = vld [vmem:[%s5187_s22 + $0x25f0] sm:$0xff] }
 0x7d1   : > { %4369 = vmatprep.subr.mxu0 %v1930_v44  ;;  %4440 = vmatprep.subr.mxu1 %v1932_v45  ;;  %v1454_v44 = vld [vmem:[%s5187_s22 + $0x24e8] sm:$0xff]  ;;  %v1456_v45 = vld [vmem:[%s5187_s22 + $0x24f8] sm:$0xff] }
 0x7d4   : > { %4370 = vmatpush2.xpose.msra.mxu0 %v1929_v46  ;;  %4441 = vmatpush2.xpose.msra.mxu1 %v1931_v47  ;;  %v1453_v46 = vld [vmem:[%s5187_s22 + $0x24e0] sm:$0xff]  ;;  %v1455_v47 = vld [vmem:[%s5187_s22 + $0x24f0] sm:$0xff] }
 0x7d5   : > { %4371 = vmatprep.subr.mxu0 %v1898_v48  ;;  %4442 = vmatprep.subr.mxu1 %v1900_v49  ;;  %v1422_v48 = vld [vmem:[%s5187_s22 + $0x23e8] sm:$0xff]  ;;  %v1424_v49 = vld [vmem:[%s5187_s22 + $0x23f8] sm:$0xff] }
 0x7d8   : > { %4372 = vmatpush2.xpose.msra.mxu0 %v1897_v50  ;;  %4443 = vmatpush2.xpose.msra.mxu1 %v1899_v51  ;;  %v1421_v50 = vld [vmem:[%s5187_s22 + $0x23e0] sm:$0xff]  ;;  %v1423_v51 = vld [vmem:[%s5187_s22 + $0x23f0] sm:$0xff] }
 0x7d9   : > { %4373 = vmatprep.subr.mxu0 %v1866_v52  ;;  %4444 = vmatprep.subr.mxu1 %v1868_v53  ;;  %v1390_v52 = vld [vmem:[%s5187_s22 + $0x22e8] sm:$0xff]  ;;  %v1392_v53 = vld [vmem:[%s5187_s22 + $0x22f8] sm:$0xff] }
 0x7dc   : > { %4374 = vmatpush2.xpose.msra.mxu0 %v1865_v54  ;;  %4445 = vmatpush2.xpose.msra.mxu1 %v1867_v55  ;;  %v1389_v54 = vld [vmem:[%s5187_s22 + $0x22e0] sm:$0xff]  ;;  %v1391_v55 = vld [vmem:[%s5187_s22 + $0x22f0] sm:$0xff] }
 0x7dd   : > { %4375 = vmatprep.subr.mxu0 %v1834_v56  ;;  %4446 = vmatprep.subr.mxu1 %v1836_v57  ;;  %v1358_v56 = vld [vmem:[%s5187_s22 + $0x21e8] sm:$0xff]  ;;  %v1360_v57 = vld [vmem:[%s5187_s22 + $0x21f8] sm:$0xff] }
 0x7e0   : > { %4376 = vmatpush2.xpose.msra.mxu0 %v1833_v58  ;;  %4447 = vmatpush2.xpose.msra.mxu1 %v1835_v59  ;;  %v1357_v58 = vld [vmem:[%s5187_s22 + $0x21e0] sm:$0xff]  ;;  %v1359_v59 = vld [vmem:[%s5187_s22 + $0x21f0] sm:$0xff] }
 0x7e1   : > { %4455 = vmatprep.subr.mxu0 %v1806_v60  ;;  %4526 = vmatprep.subr.mxu1 %v1808_v61  ;;  %v1326_v60 = vld [vmem:[%s5187_s22 + $0x20e8] sm:$0xff]  ;;  %v1328_v61 = vld [vmem:[%s5187_s22 + $0x20f8] sm:$0xff] }
 0x7e3   : > { %4378 = vmatmul.mubr.f32.vlgmr.msra.gmra.mxu0 %v4833_v2  ;;  %4449 = vmatmul.mubr.f32.vlgmr.msra.gmra.mxu1 %v4834_v3  ;;  %v2317_v2 = vld [vmem:[%s5187_s22 + $0x3fe0] sm:$0xff]  ;;  %v2319_v3 = vld [vmem:[%s5187_s22 + $0x3ff0] sm:$0xff] }
 0x7e4   : > { %4456 = vmatpush1.xpose.msra.mxu0 %v1805_v62  ;;  %4527 = vmatpush1.xpose.msra.mxu1 %v1807_v63  ;;  %v1325_v62 = vld [vmem:[%s5187_s22 + $0x20e0] sm:$0xff]  ;;  %v1327_v63 = vld [vmem:[%s5187_s22 + $0x20f0] sm:$0xff] }
 0x7e5   : > { %4457 = vmatprep.subr.mxu0 %v1774_v0  ;;  %4528 = vmatprep.subr.mxu1 %v1776_v1  ;;  %v2318_v0 = vld [vmem:[%s5187_s22 + $0x3fe8] sm:$0xff]  ;;  %v2320_v1 = vld [vmem:[%s5187_s22 + $0x3ff8] sm:$0xff] }
 0x7e6   : > { %4519 = vmatprep.mubr.f32.mxu0 %v4835_v8  ;;  %4590 = vmatprep.mubr.f32.mxu1 %v4836_v9  ;;  %v2254_v8 = vld [vmem:[%s5187_s22 + $0x3de8] sm:$0xff]  ;;  %v2256_v9 = vld [vmem:[%s5187_s22 + $0x3df8] sm:$0xff] }
 0x7e8   : > { %4458 = vmatpush1.xpose.msra.mxu0 %v1773_v4  ;;  %4529 = vmatpush1.xpose.msra.mxu1 %v1775_v5  ;;  %v2286_v4 = vld [vmem:[%s5187_s22 + $0x3ee8] sm:$0xff]  ;;  %v2288_v5 = vld [vmem:[%s5187_s22 + $0x3ef8] sm:$0xff] }
 0x7e9   : > { %4459 = vmatprep.subr.mxu0 %v1742_v6  ;;  %4530 = vmatprep.subr.mxu1 %v1744_v7  ;;  %v2285_v6 = vld [vmem:[%s5187_s22 + $0x3ee0] sm:$0xff]  ;;  %v2287_v7 = vld [vmem:[%s5187_s22 + $0x3ef0] sm:$0xff] }
 0x7ec   : > { %4460 = vmatpush1.xpose.msra.mxu0 %v1741_v10  ;;  %4531 = vmatpush1.xpose.msra.mxu1 %v1743_v11  ;;  %v2253_v10 = vld [vmem:[%s5187_s22 + $0x3de0] sm:$0xff]  ;;  %v2255_v11 = vld [vmem:[%s5187_s22 + $0x3df0] sm:$0xff] }
 0x7ed   : > { %4461 = vmatprep.subr.mxu0 %v1710_v12  ;;  %4532 = vmatprep.subr.mxu1 %v1712_v13  ;;  %v2222_v12 = vld [vmem:[%s5187_s22 + $0x3ce8] sm:$0xff]  ;;  %v2224_v13 = vld [vmem:[%s5187_s22 + $0x3cf8] sm:$0xff] }
 0x7f0   : > { %4462 = vmatpush1.xpose.msra.mxu0 %v1709_v14  ;;  %4533 = vmatpush1.xpose.msra.mxu1 %v1711_v15  ;;  %v2221_v14 = vld [vmem:[%s5187_s22 + $0x3ce0] sm:$0xff]  ;;  %v2223_v15 = vld [vmem:[%s5187_s22 + $0x3cf0] sm:$0xff] }
 0x7f1   : > { %4463 = vmatprep.subr.mxu0 %v1678_v16  ;;  %4534 = vmatprep.subr.mxu1 %v1680_v17  ;;  %v2190_v16 = vld [vmem:[%s5187_s22 + $0x3be8] sm:$0xff]  ;;  %v2192_v17 = vld [vmem:[%s5187_s22 + $0x3bf8] sm:$0xff] }
 0x7f4   : > { %4464 = vmatpush1.xpose.msra.mxu0 %v1677_v18  ;;  %4535 = vmatpush1.xpose.msra.mxu1 %v1679_v19  ;;  %v2189_v18 = vld [vmem:[%s5187_s22 + $0x3be0] sm:$0xff]  ;;  %v2191_v19 = vld [vmem:[%s5187_s22 + $0x3bf0] sm:$0xff] }
 0x7f5   : > { %4465 = vmatprep.subr.mxu0 %v1646_v20  ;;  %4536 = vmatprep.subr.mxu1 %v1648_v21  ;;  %v2158_v20 = vld [vmem:[%s5187_s22 + $0x3ae8] sm:$0xff]  ;;  %v2160_v21 = vld [vmem:[%s5187_s22 + $0x3af8] sm:$0xff] }
 0x7f8   : > { %4466 = vmatpush1.xpose.msra.mxu0 %v1645_v22  ;;  %4537 = vmatpush1.xpose.msra.mxu1 %v1647_v23  ;;  %v2157_v22 = vld [vmem:[%s5187_s22 + $0x3ae0] sm:$0xff]  ;;  %v2159_v23 = vld [vmem:[%s5187_s22 + $0x3af0] sm:$0xff] }
 0x7f9   : > { %4467 = vmatprep.subr.mxu0 %v1614_v24  ;;  %4538 = vmatprep.subr.mxu1 %v1616_v25  ;;  %v2126_v24 = vld [vmem:[%s5187_s22 + $0x39e8] sm:$0xff]  ;;  %v2128_v25 = vld [vmem:[%s5187_s22 + $0x39f8] sm:$0xff] }
 0x7fc   : > { %4468 = vmatpush1.xpose.msra.mxu0 %v1613_v26  ;;  %4539 = vmatpush1.xpose.msra.mxu1 %v1615_v27  ;;  %v2125_v26 = vld [vmem:[%s5187_s22 + $0x39e0] sm:$0xff]  ;;  %v2127_v27 = vld [vmem:[%s5187_s22 + $0x39f0] sm:$0xff] }
 0x7fd   : > { %4469 = vmatprep.subr.mxu0 %v1582_v28  ;;  %4540 = vmatprep.subr.mxu1 %v1584_v29  ;;  %v2094_v28 = vld [vmem:[%s5187_s22 + $0x38e8] sm:$0xff]  ;;  %v2096_v29 = vld [vmem:[%s5187_s22 + $0x38f8] sm:$0xff] }
 0x800   : > { %4470 = vmatpush1.xpose.msra.mxu0 %v1581_v30  ;;  %4541 = vmatpush1.xpose.msra.mxu1 %v1583_v31  ;;  %v2093_v30 = vld [vmem:[%s5187_s22 + $0x38e0] sm:$0xff]  ;;  %v2095_v31 = vld [vmem:[%s5187_s22 + $0x38f0] sm:$0xff] }
 0x801   : > { %4471 = vmatprep.subr.mxu0 %v1550_v32  ;;  %4542 = vmatprep.subr.mxu1 %v1552_v33  ;;  %v2062_v32 = vld [vmem:[%s5187_s22 + $0x37e8] sm:$0xff]  ;;  %v2064_v33 = vld [vmem:[%s5187_s22 + $0x37f8] sm:$0xff] }
 0x804   : > { %4472 = vmatpush1.xpose.msra.mxu0 %v1549_v34  ;;  %4543 = vmatpush1.xpose.msra.mxu1 %v1551_v35  ;;  %v2061_v34 = vld [vmem:[%s5187_s22 + $0x37e0] sm:$0xff]  ;;  %v2063_v35 = vld [vmem:[%s5187_s22 + $0x37f0] sm:$0xff] }
 0x805   : > { %4473 = vmatprep.subr.mxu0 %v1518_v36  ;;  %4544 = vmatprep.subr.mxu1 %v1520_v37  ;;  %v2030_v36 = vld [vmem:[%s5187_s22 + $0x36e8] sm:$0xff]  ;;  %v2032_v37 = vld [vmem:[%s5187_s22 + $0x36f8] sm:$0xff] }
 0x808   : > { %4474 = vmatpush1.xpose.msra.mxu0 %v1517_v38  ;;  %4545 = vmatpush1.xpose.msra.mxu1 %v1519_v39  ;;  %v2029_v38 = vld [vmem:[%s5187_s22 + $0x36e0] sm:$0xff]  ;;  %v2031_v39 = vld [vmem:[%s5187_s22 + $0x36f0] sm:$0xff] }
 0x809   : > { %4475 = vmatprep.subr.mxu0 %v1486_v40  ;;  %4546 = vmatprep.subr.mxu1 %v1488_v41  ;;  %v1998_v40 = vld [vmem:[%s5187_s22 + $0x35e8] sm:$0xff]  ;;  %v2000_v41 = vld [vmem:[%s5187_s22 + $0x35f8] sm:$0xff] }
 0x80c   : > { %4476 = vmatpush1.xpose.msra.mxu0 %v1485_v42  ;;  %4547 = vmatpush1.xpose.msra.mxu1 %v1487_v43  ;;  %v1997_v42 = vld [vmem:[%s5187_s22 + $0x35e0] sm:$0xff]  ;;  %v1999_v43 = vld [vmem:[%s5187_s22 + $0x35f0] sm:$0xff] }
 0x80d   : > { %4477 = vmatprep.subr.mxu0 %v1454_v44  ;;  %4548 = vmatprep.subr.mxu1 %v1456_v45  ;;  %v1966_v44 = vld [vmem:[%s5187_s22 + $0x34e8] sm:$0xff]  ;;  %v1968_v45 = vld [vmem:[%s5187_s22 + $0x34f8] sm:$0xff] }
 0x810   : > { %4478 = vmatpush1.xpose.msra.mxu0 %v1453_v46  ;;  %4549 = vmatpush1.xpose.msra.mxu1 %v1455_v47  ;;  %v1965_v46 = vld [vmem:[%s5187_s22 + $0x34e0] sm:$0xff]  ;;  %v1967_v47 = vld [vmem:[%s5187_s22 + $0x34f0] sm:$0xff] }
 0x811   : > { %4479 = vmatprep.subr.mxu0 %v1422_v48  ;;  %4550 = vmatprep.subr.mxu1 %v1424_v49  ;;  %v1934_v48 = vld [vmem:[%s5187_s22 + $0x33e8] sm:$0xff]  ;;  %v1936_v49 = vld [vmem:[%s5187_s22 + $0x33f8] sm:$0xff] }
 0x814   : > { %4480 = vmatpush1.xpose.msra.mxu0 %v1421_v50  ;;  %4551 = vmatpush1.xpose.msra.mxu1 %v1423_v51  ;;  %v1933_v50 = vld [vmem:[%s5187_s22 + $0x33e0] sm:$0xff]  ;;  %v1935_v51 = vld [vmem:[%s5187_s22 + $0x33f0] sm:$0xff] }
 0x815   : > { %4481 = vmatprep.subr.mxu0 %v1390_v52  ;;  %4552 = vmatprep.subr.mxu1 %v1392_v53  ;;  %v1902_v52 = vld [vmem:[%s5187_s22 + $0x32e8] sm:$0xff]  ;;  %v1904_v53 = vld [vmem:[%s5187_s22 + $0x32f8] sm:$0xff] }
 0x818   : > { %4482 = vmatpush1.xpose.msra.mxu0 %v1389_v54  ;;  %4553 = vmatpush1.xpose.msra.mxu1 %v1391_v55  ;;  %v1901_v54 = vld [vmem:[%s5187_s22 + $0x32e0] sm:$0xff]  ;;  %v1903_v55 = vld [vmem:[%s5187_s22 + $0x32f0] sm:$0xff] }
 0x819   : > { %4483 = vmatprep.subr.mxu0 %v1358_v56  ;;  %4554 = vmatprep.subr.mxu1 %v1360_v57  ;;  %v1870_v56 = vld [vmem:[%s5187_s22 + $0x31e8] sm:$0xff]  ;;  %v1872_v57 = vld [vmem:[%s5187_s22 + $0x31f8] sm:$0xff] }
 0x81c   : > { %4484 = vmatpush1.xpose.msra.mxu0 %v1357_v58  ;;  %4555 = vmatpush1.xpose.msra.mxu1 %v1359_v59  ;;  %v1869_v58 = vld [vmem:[%s5187_s22 + $0x31e0] sm:$0xff]  ;;  %v1871_v59 = vld [vmem:[%s5187_s22 + $0x31f0] sm:$0xff] }
 0x81d   : > { %4485 = vmatprep.subr.mxu0 %v1326_v60  ;;  %4556 = vmatprep.subr.mxu1 %v1328_v61  ;;  %v1838_v60 = vld [vmem:[%s5187_s22 + $0x30e8] sm:$0xff]  ;;  %v1840_v61 = vld [vmem:[%s5187_s22 + $0x30f8] sm:$0xff] }
 0x820   : > { %4486 = vmatpush1.xpose.msra.mxu0 %v1325_v62  ;;  %4557 = vmatpush1.xpose.msra.mxu1 %v1327_v63  ;;  %v1837_v62 = vld [vmem:[%s5187_s22 + $0x30e0] sm:$0xff]  ;;  %v1839_v63 = vld [vmem:[%s5187_s22 + $0x30f0] sm:$0xff] }
 0x821   : > { %4487 = vmatprep.subr.mxu0 %v2318_v0  ;;  %4558 = vmatprep.subr.mxu1 %v2320_v1  ;;  %v4837_v0 = vld [vmem:[#allocation2 + $0xe0] sm:$0xff]  ;;  %v4838_v1 = vld [vmem:[#allocation2 + $0xf0] sm:$0xff] }
 0x824   : > { %4488 = vmatpush2.xpose.msra.mxu0 %v2317_v2  ;;  %4559 = vmatpush2.xpose.msra.mxu1 %v2319_v3  ;;  %v3527_v2 = vpop.f32.mrf.mxu0  ;;  %v2323_v3 = vld [vmem:[%s6374_s4 + $0x10] sm:$0xff] }
 0x825   : > { %4489 = vmatprep.subr.mxu0 %v2286_v4  ;;  %4560 = vmatprep.subr.mxu1 %v2288_v5  ;;  %v3598_v4 = vpop.f32.mrf.mxu1  ;;  %v2324_v5 = vld [vmem:[%s6374_s4 + $0x18] sm:$0xff] }
 0x828   : > { %4490 = vmatpush2.xpose.msra.mxu0 %v2285_v6  ;;  %4561 = vmatpush2.xpose.msra.mxu1 %v2287_v7  ;;  %v3529_v6 = vpop.f32.mrf.mxu0  ;;  %v3528_v7 = vadd.f32 %v3527_v2, %v2323_v3 }
 0x829   : > { %4491 = vmatprep.subr.mxu0 %v2254_v8  ;;  %4562 = vmatprep.subr.mxu1 %v2256_v9  ;;  %v3530_v9 = vadd.f32 %v3529_v6, %v2324_v5 }
 0x82a   : > { %v3669_v8 = vpop.f32.mrf.mxu0 }
 0x82c   : > { %4492 = vmatpush2.xpose.msra.mxu0 %v2253_v10  ;;  %4563 = vmatpush2.xpose.msra.mxu1 %v2255_v11  ;;  %v3600_v10 = vpop.f32.mrf.mxu1  ;;  %v3599_v11 = vadd.f32 %v3598_v4, %v3528_v7 }
 0x82d   : > { %4493 = vmatprep.subr.mxu0 %v2222_v12  ;;  %4564 = vmatprep.subr.mxu1 %v2224_v13  ;;  %v3671_v13 = vpop.f32.mrf.mxu0 }
 0x82e   : > { %v3740_v12 = vpop.f32.mrf.mxu1 }
 0x830   : > { %4494 = vmatpush2.xpose.msra.mxu0 %v2221_v14  ;;  %4565 = vmatpush2.xpose.msra.mxu1 %v2223_v15  ;;  %v3601_v14 = vadd.f32 %v3600_v10, %v3530_v9  ;;  %v3670_v15 = vadd.f32 %v3669_v8, %v3599_v11 }
 0x831   : > { %4495 = vmatprep.subr.mxu0 %v2190_v16  ;;  %4566 = vmatprep.subr.mxu1 %v2192_v17  ;;  %v3811_v16 = vpop.f32.mrf.mxu0 }
 0x832   : > { %v3672_v17 = vadd.f32 %v3671_v13, %v3601_v14 }
 0x834   : > { %4496 = vmatpush2.xpose.msra.mxu0 %v2189_v18  ;;  %4567 = vmatpush2.xpose.msra.mxu1 %v2191_v19  ;;  %v3742_v18 = vpop.f32.mrf.mxu1  ;;  %v3741_v19 = vadd.f32 %v3740_v12, %v3670_v15 }
 0x835   : > { %4497 = vmatprep.subr.mxu0 %v2158_v20  ;;  %4568 = vmatprep.subr.mxu1 %v2160_v21  ;;  %v3813_v21 = vpop.f32.mrf.mxu0 }
 0x836   : > { %v3882_v20 = vpop.f32.mrf.mxu1 }
 0x838   : > { %4498 = vmatpush2.xpose.msra.mxu0 %v2157_v22  ;;  %4569 = vmatpush2.xpose.msra.mxu1 %v2159_v23  ;;  %v3743_v22 = vadd.f32 %v3742_v18, %v3672_v17  ;;  %v3812_v23 = vadd.f32 %v3811_v16, %v3741_v19 }
 0x839   : > { %4499 = vmatprep.subr.mxu0 %v2126_v24  ;;  %4570 = vmatprep.subr.mxu1 %v2128_v25  ;;  %v3953_v24 = vpop.f32.mrf.mxu0 }
 0x83a   : > { %v3814_v25 = vadd.f32 %v3813_v21, %v3743_v22 }
 0x83c   : > { %4500 = vmatpush2.xpose.msra.mxu0 %v2125_v26  ;;  %4571 = vmatpush2.xpose.msra.mxu1 %v2127_v27  ;;  %v3884_v26 = vpop.f32.mrf.mxu1  ;;  %v3883_v27 = vadd.f32 %v3882_v20, %v3812_v23 }
 0x83d   : > { %4501 = vmatprep.subr.mxu0 %v2094_v28  ;;  %4572 = vmatprep.subr.mxu1 %v2096_v29  ;;  %v3955_v29 = vpop.f32.mrf.mxu0 }
 0x83e   : > { %v4024_v28 = vpop.f32.mrf.mxu1 }
 0x840   : > { %4502 = vmatpush2.xpose.msra.mxu0 %v2093_v30  ;;  %4573 = vmatpush2.xpose.msra.mxu1 %v2095_v31  ;;  %v3885_v30 = vadd.f32 %v3884_v26, %v3814_v25  ;;  %v3954_v31 = vadd.f32 %v3953_v24, %v3883_v27 }
 0x841   : > { %4503 = vmatprep.subr.mxu0 %v2062_v32  ;;  %4574 = vmatprep.subr.mxu1 %v2064_v33  ;;  %v4095_v32 = vpop.f32.mrf.mxu0 }
 0x842   : > { %v3956_v33 = vadd.f32 %v3955_v29, %v3885_v30 }
 0x844   : > { %4504 = vmatpush2.xpose.msra.mxu0 %v2061_v34  ;;  %4575 = vmatpush2.xpose.msra.mxu1 %v2063_v35  ;;  %v4026_v34 = vpop.f32.mrf.mxu1  ;;  %v4025_v35 = vadd.f32 %v4024_v28, %v3954_v31 }
 0x845   : > { %4505 = vmatprep.subr.mxu0 %v2030_v36  ;;  %4576 = vmatprep.subr.mxu1 %v2032_v37  ;;  %v4097_v37 = vpop.f32.mrf.mxu0 }
 0x846   : > { %v4166_v36 = vpop.f32.mrf.mxu1 }
 0x848   : > { %4506 = vmatpush2.xpose.msra.mxu0 %v2029_v38  ;;  %4577 = vmatpush2.xpose.msra.mxu1 %v2031_v39  ;;  %v4027_v38 = vadd.f32 %v4026_v34, %v3956_v33  ;;  %v4096_v39 = vadd.f32 %v4095_v32, %v4025_v35 }
 0x849   : > { %4507 = vmatprep.subr.mxu0 %v1998_v40  ;;  %4578 = vmatprep.subr.mxu1 %v2000_v41  ;;  %v4237_v40 = vpop.f32.mrf.mxu0 }
 0x84a   : > { %v4098_v41 = vadd.f32 %v4097_v37, %v4027_v38 }
 0x84c   : > { %4508 = vmatpush2.xpose.msra.mxu0 %v1997_v42  ;;  %4579 = vmatpush2.xpose.msra.mxu1 %v1999_v43  ;;  %v4168_v42 = vpop.f32.mrf.mxu1  ;;  %v4167_v43 = vadd.f32 %v4166_v36, %v4096_v39 }
 0x84d   : > { %4509 = vmatprep.subr.mxu0 %v1966_v44  ;;  %4580 = vmatprep.subr.mxu1 %v1968_v45  ;;  %v4239_v45 = vpop.f32.mrf.mxu0 }
 0x84e   : > { %v4308_v44 = vpop.f32.mrf.mxu1 }
 0x850   : > { %4510 = vmatpush2.xpose.msra.mxu0 %v1965_v46  ;;  %4581 = vmatpush2.xpose.msra.mxu1 %v1967_v47  ;;  %v4169_v46 = vadd.f32 %v4168_v42, %v4098_v41  ;;  %v4238_v47 = vadd.f32 %v4237_v40, %v4167_v43 }
 0x851   : > { %4511 = vmatprep.subr.mxu0 %v1934_v48  ;;  %4582 = vmatprep.subr.mxu1 %v1936_v49 }
 0x852   : > { %v4240_v49 = vadd.f32 %v4239_v45, %v4169_v46 }
 0x854   : > { %4512 = vmatpush2.xpose.msra.mxu0 %v1933_v50  ;;  %4583 = vmatpush2.xpose.msra.mxu1 %v1935_v51  ;;  %v4310_v50 = vpop.f32.mrf.mxu1  ;;  %v4309_v51 = vadd.f32 %v4308_v44, %v4238_v47 }
 0x855   : > { %4513 = vmatprep.subr.mxu0 %v1902_v52  ;;  %4584 = vmatprep.subr.mxu1 %v1904_v53 }
 0x858   : > { %4514 = vmatpush2.xpose.msra.mxu0 %v1901_v54  ;;  %4585 = vmatpush2.xpose.msra.mxu1 %v1903_v55  ;;  %v4311_v54 = vadd.f32 %v4310_v50, %v4240_v49 }
 0x859   : > { %4515 = vmatprep.subr.mxu0 %v1870_v56  ;;  %4586 = vmatprep.subr.mxu1 %v1872_v57 }
 0x85c   : > { %4516 = vmatpush2.xpose.msra.mxu0 %v1869_v58  ;;  %4587 = vmatpush2.xpose.msra.mxu1 %v1871_v59 }
 0x85d   : > { %4517 = vmatprep.subr.mxu0 %v1838_v60  ;;  %4588 = vmatprep.subr.mxu1 %v1840_v61 }
 0x860   : > { %4518 = vmatpush2.xpose.msra.mxu0 %v1837_v62  ;;  %4589 = vmatpush2.xpose.msra.mxu1 %v1839_v63 }
 0x863   : > { %4520 = vmatmul.mubr.f32.vlgmr.msra.gmra.mxu0 %v4837_v0  ;;  %4591 = vmatmul.mubr.f32.vlgmr.msra.gmra.mxu1 %v4838_v1 }
 0x8a3   : > { %v4379_v48 = vpop.f32.mrf.mxu0  ;;  %v4450_v52 = vpop.f32.mrf.mxu1 }
 0x8a4   : > { %v4380_v55 = vadd.f32 %v4379_v48, %v4309_v51 }
 0x8a5   : > { %v4381_v53 = vpop.f32.mrf.mxu0  ;;  %v4452_v57 = vpop.f32.mrf.mxu1 }
 0x8a6   : > { %v4382_v56 = vadd.f32 %v4381_v53, %v4311_v54  ;;  %v4451_v58 = vadd.f32 %v4450_v52, %v4380_v55 }
 0x8a8   : > { %v4453_v61 = vadd.f32 %v4452_v57, %v4382_v56 }
 0x923   : > { %v4521_v59 = vpop.f32.mrf.mxu0  ;;  %v4592_v60 = vpop.f32.mrf.mxu1 }
 0x924   : > { %v4522_v62 = vadd.f32 %v4521_v59, %v4451_v58 }
 0x925   : > { %v4523_v63 = vpop.f32.mrf.mxu0  ;;  %v4594_v2 = vpop.f32.mrf.mxu1 }
 0x926   : > { %v4593_v0 = vadd.f32 %v4592_v60, %v4522_v62  ;;  %v4524_v1 = vadd.f32 %v4523_v63, %v4453_v61 }
 0x928   : > { %4599 = vst [vmem:[%s6428_s6 + $0x10] sm:$0xff] %v4593_v0  ;;  %v4595_v3 = vadd.f32 %v4594_v2, %v4524_v1 }
 0x92a   : > { %4600 = vst [vmem:[%s6428_s6 + $0x18] sm:$0xff] %v4595_v3 }
 0x92b   : > { %4934 = shalt.err (!%p4931_p1)
}
 0x92c   : > { %s4935_s20 = scalar_lea.hbm %s4614_s8, 512  ;;  %s4939_s11 = scalar_lea.hbm %s7296_s3, 4096 }
 0x92d   : > { %p4936_p8 = scmp.ne.s32.totalorder %s4614_s8, %s4935_s20  ;;  %p4940_p6 = scmp.lt.s32.totalorder %s4614_s8, %s7296_s3 }
 0x92e   : > { %p4941_p0 = scmp.lt.s32.totalorder %s4939_s11, %s4935_s20 }
 0x92f   : > { %p4937_p10 = pnand %p4936_p8, %p7313_p7 }
 0x930   : > { %p4942_p9 = por %p4941_p0, %p4940_p6 }
 0x931   : > { %p4938_p5 = pneg %p4937_p10 }
 0x933   : > { %p4943_p12 = pnand %p4942_p9, %p4938_p5 }
 0x935   : > { %4946 = shalt.err (!%p4943_p12)
}
 0x936   : > { %4751 = dma.vmem_to_hbm [thread:$0]  (%p7313_p7), %s4617_s5, 512, %s4614_s8, %s4602_s9  }
 0x937 PF: > { %p4771_p11 = scmp.ge.s32.totalorder %s4989_s15, 2  ;;  %s4628_s25 = sand.u32 1, %s4977_s12  }
 0x938   : > { %p7314_p3 = scmp.ne.s32.totalorder %s7305_s27, 0  ;;  %s4629_s4 = scalar_lea.sflag [#allocation4], %s4628_s25 }
 0x93a   : > { %p4765_p4 = pnand %p4771_p11, %p7314_p3 }
 0x93c   : > { %p4766_p13 = pneg %p4765_p4 }
 0x93e   : > { %4972 = dma.done.wait (%p4766_p13), %s4629_s4, 512  }
 0x93f   : > { %4974 = vsyncadd (%p4766_p13), %s4629_s4, 4294966784  ;;  %p17_p2 = scmp.ge.s32.totalorder %s5038_s16, 10   ;;  %s7315_s12 = smov %s4981_s13 }
 0x940   : > { %s7316_s13 = smov %s4985_s14  ;;  %s7317_s14 = smov %s5048_s19 }
 0x941   : > { %s7318_s15 = smov %s5038_s16  ;;  %19 = sbr.rel (!%p17_p2) target bundleno = 6 (0x6), region = 93 }
 0x946   :  { %4634 = vsyncpa [#allocation3], 1 }
 0x947   :  { %4636 = vsyncpa [#allocation3 + $0x1], 1 }
 0x948   :  { %4637 = vsyncpa [#allocation6], 1 }
 0x949   :  { %4639 = vsyncpa [#allocation6 + $0x1], 1 }
 0x94a   :  { %4640 = vsyncpa [#allocation4], 1 }
 0x94b   :  { %4642 = vsyncpa [#allocation4 + $0x1], 1 }

</bundles_post_ra>
